<compile_context>
chip_gen: v7x
topology: tpu7x:2x2x1
jax: 0.10.0
libtpu: 0.0.40
codegen_flags: <defaults>
</compile_context>

<pallas_src>
import functools

import jax
import jax.numpy as jnp
from jax.experimental import pallas as pl
from jax.experimental.pallas import tpu as pltpu


LANES = 128  # pad output channels to this many lanes for dense stores


def _pick_tile(n, cap=2048):
    """Largest multiple of 16 that divides n and is <= cap; else the full dim."""
    start = min(cap, n)
    start -= start % 16
    for t in range(start, 15, -16):
        if n % t == 0:
            return t
    return n


# ----------------------------------------------------------------------------
# Fused kernel (BN layers): im2col-A @ weight, y in bf16, per-tile BN stats.
# Stats are written per grid tile (no resident accumulator, no pl.when init),
# so the single M grid axis is "parallel" and can be sharded across v7x cores.
# ----------------------------------------------------------------------------
def _mm_stats_kernel(a_ref, b_ref, y_ref, stat_ref):
    y = jnp.dot(a_ref[...], b_ref[...], preferred_element_type=jnp.float32)
    s = jnp.sum(y, axis=0, keepdims=True)          # per-channel sum   (1, Cp)
    sq = jnp.sum(y * y, axis=0, keepdims=True)     # per-channel sum^2 (1, Cp)
    pad = jnp.zeros((6, y.shape[1]), jnp.float32)  # pad to a full 8-sublane row
    stat_ref[...] = jnp.concatenate([s, sq, pad], axis=0)[None, :, :]
    y_ref[...] = y.astype(y_ref.dtype)


def pallas_matmul_stats(a, b, out_dtype=jnp.bfloat16):
    """A (M,K) bf16 @ B (K,128) bf16 -> y (M,128) bf16, stats (T,8,128) f32."""
    M, K = a.shape
    _, Cp = b.shape
    tm = _pick_tile(M)
    T = M // tm
    return pl.pallas_call(
        _mm_stats_kernel,
        out_shape=(jax.ShapeDtypeStruct((M, Cp), out_dtype),
                   jax.ShapeDtypeStruct((T, 8, Cp), jnp.float32)),
        grid_spec=pltpu.PrefetchScalarGridSpec(
            num_scalar_prefetch=0,
            grid=(T,),
            in_specs=[pl.BlockSpec((tm, K), lambda i: (i, 0)),
                      pl.BlockSpec((K, Cp), lambda i: (0, 0))],
            out_specs=(pl.BlockSpec((tm, Cp), lambda i: (i, 0)),
                       pl.BlockSpec((1, 8, Cp), lambda i: (i, 0, 0)))),
        compiler_params=pltpu.CompilerParams(
            dimension_semantics=("parallel",)),
    )(a, b)


# ----------------------------------------------------------------------------
# Fused kernel (last layer): matmul + tanh, no stats, f32 output.
# ----------------------------------------------------------------------------
def _mm_tanh_kernel(a_ref, b_ref, y_ref):
    y = jnp.dot(a_ref[...], b_ref[...], preferred_element_type=jnp.float32)
    y_ref[...] = jnp.tanh(y).astype(y_ref.dtype)


def pallas_matmul_tanh(a, b, out_dtype=jnp.float32):
    M, K = a.shape
    _, Cp = b.shape
    tm = _pick_tile(M)
    return pl.pallas_call(
        _mm_tanh_kernel,
        out_shape=jax.ShapeDtypeStruct((M, Cp), out_dtype),
        grid_spec=pltpu.PrefetchScalarGridSpec(
            num_scalar_prefetch=0,
            grid=(M // tm,),
            in_specs=[pl.BlockSpec((tm, K), lambda i: (i, 0)),
                      pl.BlockSpec((K, Cp), lambda i: (0, 0))],
            out_specs=pl.BlockSpec((tm, Cp), lambda i: (i, 0))),
        compiler_params=pltpu.CompilerParams(
            dimension_semantics=("parallel",)),
    )(a, b)


# ----------------------------------------------------------------------------
# Fused BatchNorm (batch stats -> scale/shift) + ReLU, bf16 in / bf16 out,
# all math in f32.  The tiny (T, 8, 128) partial-stat block is resident and
# reduced in-kernel, so no scalar XLA glue is needed between the two calls.
# ----------------------------------------------------------------------------
def _bn_relu_kernel(y_ref, stat_ref, gamma_ref, beta_ref, o_ref, *, inv_m, eps):
    st = jnp.sum(stat_ref[...], axis=0)                   # (8, Cp): row0=sum, row1=sum^2
    mean = st[0:1, :] * inv_m
    # TODO(synk): E[y^2]-E[y]^2 in f32 can cancel for large activations;
    # acceptable here (post-conv activations are small), clamp guards negatives.
    var = jnp.maximum(st[1:2, :] * inv_m - mean * mean, 0.0)
    scale = gamma_ref[...] * jax.lax.rsqrt(var + eps)
    shift = beta_ref[...] - mean * scale
    v = y_ref[...].astype(jnp.float32) * scale + shift     # f32 VPU math
    o_ref[...] = jnp.maximum(v, 0.0).astype(o_ref.dtype)


def pallas_bn_relu(y, stats, gamma, beta, inv_m, eps, out_dtype=jnp.bfloat16):
    M, Cp = y.shape
    T = stats.shape[0]
    tm = _pick_tile(M)
    kernel = functools.partial(_bn_relu_kernel, inv_m=inv_m, eps=eps)
    return pl.pallas_call(
        kernel,
        out_shape=jax.ShapeDtypeStruct((M, Cp), out_dtype),
        grid_spec=pltpu.PrefetchScalarGridSpec(
            num_scalar_prefetch=0,
            grid=(M // tm,),
            in_specs=[pl.BlockSpec((tm, Cp), lambda i: (i, 0)),
                      pl.BlockSpec((T, 8, Cp), lambda i: (0, 0, 0)),
                      pl.BlockSpec((1, Cp), lambda i: (0, 0)),
                      pl.BlockSpec((1, Cp), lambda i: (0, 0))],
            out_specs=pl.BlockSpec((tm, Cp), lambda i: (i, 0))),
        compiler_params=pltpu.CompilerParams(
            dimension_semantics=("parallel",)),
    )(y, stats, gamma, beta)


# ----------------------------------------------------------------------------
# ConvTranspose2d lowering glue (XLA): zero-dilate + pad + im2col, bf16.
# ----------------------------------------------------------------------------
def conv_transpose_im2col(x_nhwc, kh, kw, stride, padding):
    """x_nhwc: (N, H, W, Cin) -> im2col A (N*Ho*Wo, kh*kw*Cin) bf16."""
    N, H, W, Cin = x_nhwc.shape
    Hd = (H - 1) * stride + 1
    Wd = (W - 1) * stride + 1
    ph = kh - 1 - padding
    pw = kw - 1 - padding
    Ho = (H - 1) * stride - 2 * padding + kh
    Wo = (W - 1) * stride - 2 * padding + kw

    xd = jnp.zeros((N, Hd + 2 * ph, Wd + 2 * pw, Cin), x_nhwc.dtype)
    xd = xd.at[:, ph:ph + Hd:stride, pw:pw + Wd:stride, :].set(x_nhwc)

    # TODO(synk): move this im2col (kh*kw = 16x data blow-up) into the matmul
    # kernel via a VMEM-resident dilated input + in-kernel shifted windows;
    # kept in XLA glue for robustness (tensors here are tiny).
    cols = []
    for i in range(kh):
        for j in range(kw):
            cols.append(xd[:, i:i + Ho, j:j + Wo, :])
    a = jnp.stack(cols, axis=3).reshape(N * Ho * Wo, kh * kw * Cin)
    return a.astype(jnp.bfloat16), (N, Ho, Wo)


def conv_weight_matrix(w, cp=LANES):
    """(Cin, Cout, kH, kW) PyTorch layout -> lane-padded (kH*kW*Cin, cp) bf16."""
    Cin, Cout, kH, kW = w.shape
    wf = w[:, :, ::-1, ::-1]                               # spatial flip
    wm = jnp.transpose(wf, (2, 3, 0, 1)).reshape(kH * kW * Cin, Cout)
    wm = jnp.pad(wm, ((0, 0), (0, cp - Cout)))
    return wm.astype(jnp.bfloat16)


# ----------------------------------------------------------------------------
# Generator: parameters + forward
# ----------------------------------------------------------------------------
def init_generator_params(key, z_dim, img_channels, embed_size):
    specs = [
        (embed_size, z_dim * 8, 1, 0),
        (z_dim * 8, z_dim * 4, 2, 1),
        (z_dim * 4, z_dim * 2, 2, 1),
        (z_dim * 2, z_dim, 2, 1),
        (z_dim, img_channels, 2, 1),
    ]
    n_layers = len(specs)
    params = []
    for li, (cin, cout, s, p) in enumerate(specs):
        key, kw, kg, kb = jax.random.split(key, 4)
        w = 0.05 * jax.random.normal(kw, (cin, cout, 4, 4), jnp.float32)
        layer = dict(
            # weight pre-laid-out for the MXU once, at init time
            wm=conv_weight_matrix(w),
            cout=cout, kh=4, kw=4, stride=s, padding=p,
        )
        if li < n_layers - 1:
            gamma = 1.0 + 0.1 * jax.random.normal(kg, (cout,), jnp.float32)
            beta = 0.1 * jax.random.normal(kb, (cout,), jnp.float32)
            layer["gamma_p"] = jnp.pad(gamma, (0, LANES - cout)).reshape(1, LANES)
            layer["beta_p"] = jnp.pad(beta, (0, LANES - cout)).reshape(1, LANES)
        params.append(layer)
    return params


def generator_forward(params, label_nchw, eps=1e-5):
    # NCHW (PyTorch) -> NHWC (kernel layout)
    x = jnp.transpose(label_nchw.astype(jnp.float32), (0, 2, 3, 1))
    n_layers = len(params)
    for li, p in enumerate(params):
        a, (N, Ho, Wo) = conv_transpose_im2col(x, p["kh"], p["kw"],
                                               p["stride"], p["padding"])
        cout = p["cout"]
        if li == n_layers - 1:
            # Final layer: matmul + tanh fused, no BN stats.
            y = pallas_matmul_tanh(a, p["wm"], out_dtype=jnp.float32)
        else:
            # BatchNorm2d (training mode): batch statistics over (N, H, W),
            # biased variance; stats accumulated in-kernel from the f32 MXU
            # accumulator, BN affine + ReLU fused into one second call.
            # TODO(synk): BN running-mean/var buffer updates (training-mode
            # side effect) are not reproduced.
            yb, stats = pallas_matmul_stats(a, p["wm"], out_dtype=jnp.bfloat16)
            y = pallas_bn_relu(yb, stats, p["gamma_p"], p["beta_p"],
                               inv_m=1.0 / a.shape[0], eps=eps,
                               out_dtype=jnp.bfloat16)
        # drop lane padding, restore NHWC for the next layer / final output
        x = y[:, :cout].reshape(N, Ho, Wo, cout)
    # NHWC -> NCHW
    return jnp.transpose(x.astype(jnp.float32), (0, 3, 1, 2))


if __name__ == "__main__":
    z_dim, img_channels, embed_size, img_size = 8, 3, 16, 64
    key = jax.random.PRNGKey(0)
    kp, kx = jax.random.split(key)

    params = init_generator_params(kp, z_dim, img_channels, embed_size)
    # DCGAN-style generator expects (N, embed_size, 1, 1) input.
    label = jax.random.normal(kx, (2, embed_size, 1, 1), jnp.float32)

    out = jax.jit(lambda x: generator_forward(params, x))(label)
    out = jax.block_until_ready(out)

    assert out.shape == (2, img_channels, img_size, img_size), out.shape
    assert bool(jnp.all(jnp.isfinite(out)))
    assert bool(jnp.all(jnp.abs(out) <= 1.0 + 1e-6))   # tanh output range
    print("KERNEL_OK")
</pallas_src>

<mosaic_0001>
module attributes {stable_mosaic.version = 11 : i64} {
  func.func @_mm_stats_kernel(%arg0: i32, %arg1: memref<32x256xbf16, #tpu.memory_space<vmem>>, %arg2: memref<256x128xbf16, #tpu.memory_space<vmem>>, %arg3: memref<32x128xbf16, #tpu.memory_space<vmem>>, %arg4: memref<1x8x128xf32, #tpu.memory_space<vmem>>) attributes {dimension_semantics = [#tpu.dimension_semantics<parallel>], iteration_bounds = array<i64: 1>, scalar_prefetch = 0 : i64, scratch_operands = 0 : i64, tpu.core_type = #tpu.core_type<tc>, window_params = [{transform_indices = @transform_0, window_bounds = array<i64: 32, 256>}, {pipeline_mode = #tpu.pipeline_mode<synchronous>, transform_indices = @transform_1, window_bounds = array<i64: 256, 128>}, {transform_indices = @transform_2, window_bounds = array<i64: 32, 128>}, {transform_indices = @transform_3, window_bounds = array<i64: 1, 8, 128>}]} {
    %c0 = arith.constant 0 : index
    %c0_0 = arith.constant 0 : index
    %0 = vector.load %arg1[%c0, %c0_0] : memref<32x256xbf16, #tpu.memory_space<vmem>>, vector<32x256xbf16>
    %c0_1 = arith.constant 0 : index
    %c0_2 = arith.constant 0 : index
    %1 = vector.load %arg2[%c0_1, %c0_2] : memref<256x128xbf16, #tpu.memory_space<vmem>>, vector<256x128xbf16>
    %cst = arith.constant dense<0.000000e+00> : vector<32x128xf32>
    %2 = tpu.matmul %0, %1, %cst {dimension_numbers = #tpu.dot_dimension_numbers<[1], [0], [0], [1], [0, 0, 1, 1], [], []>} : vector<32x256xbf16>, vector<256x128xbf16>, vector<32x128xf32> -> vector<32x128xf32>
    %cst_3 = arith.constant dense<0.000000e+00> : vector<128xf32>
    %3 = vector.multi_reduction <add>, %2, %cst_3 [0] : vector<32x128xf32> to vector<128xf32>
    %4 = vector.shape_cast %3 : vector<128xf32> to vector<1x128xf32>
    %5 = arith.mulf %2, %2 : vector<32x128xf32>
    %cst_4 = arith.constant dense<0.000000e+00> : vector<128xf32>
    %6 = vector.multi_reduction <add>, %5, %cst_4 [0] : vector<32x128xf32> to vector<128xf32>
    %7 = vector.shape_cast %6 : vector<128xf32> to vector<1x128xf32>
    %cst_5 = arith.constant 0.000000e+00 : f32
    %8 = vector.broadcast %cst_5 : f32 to vector<6x128xf32>
    %9 = tpu.concatenate %4, %7, %8 in 0 : vector<1x128xf32>, vector<1x128xf32>, vector<6x128xf32> -> vector<8x128xf32>
    %10 = vector.shape_cast %9 : vector<8x128xf32> to vector<1x8x128xf32>
    %c0_6 = arith.constant 0 : index
    %c0_7 = arith.constant 0 : index
    %c0_8 = arith.constant 0 : index
    %11 = vector.load %arg4[%c0_6, %c0_7, %c0_8] : memref<1x8x128xf32, #tpu.memory_space<vmem>>, vector<1x8x128xf32>
    tpu.vector_store %arg4[%c0_6, %c0_7, %c0_8], %10 {strides = array<i32>} : memref<1x8x128xf32, #tpu.memory_space<vmem>>, vector<1x8x128xf32>,
    %12 = arith.truncf %2 : vector<32x128xf32> to vector<32x128xbf16>
    %c0_9 = arith.constant 0 : index
    %c0_10 = arith.constant 0 : index
    %13 = vector.load %arg3[%c0_9, %c0_10] : memref<32x128xbf16, #tpu.memory_space<vmem>>, vector<32x128xbf16>
    tpu.vector_store %arg3[%c0_9, %c0_10], %12 {strides = array<i32>} : memref<32x128xbf16, #tpu.memory_space<vmem>>, vector<32x128xbf16>,
    return
  }
  func.func @transform_0(%arg0: i32) -> (i32, i32) {
    %c0_i32 = arith.constant 0 : i32
    %c0_i32_0 = arith.constant 0 : i32
    return %arg0, %c0_i32 : i32, i32
  }
  func.func @transform_1(%arg0: i32) -> (i32, i32) {
    %c0_i32 = arith.constant 0 : i32
    %c0_i32_0 = arith.constant 0 : i32
    %c0_i32_1 = arith.constant 0 : i32
    return %c0_i32, %c0_i32_0 : i32, i32
  }
  func.func @transform_2(%arg0: i32) -> (i32, i32) {
    %c0_i32 = arith.constant 0 : i32
    %c0_i32_0 = arith.constant 0 : i32
    return %arg0, %c0_i32 : i32, i32
  }
  func.func @transform_3(%arg0: i32) -> (i32, i32, i32) {
    %c0_i32 = arith.constant 0 : i32
    %c0_i32_0 = arith.constant 0 : i32
    %c0_i32_1 = arith.constant 0 : i32
    return %arg0, %c0_i32, %c0_i32_0 : i32, i32, i32
  }
}

module attributes {stable_mosaic.version = 11 : i64} {
  func.func @_bn_relu_kernel(%arg0: i32, %arg1: memref<32x128xbf16, #tpu.memory_space<vmem>>, %arg2: memref<1x8x128xf32, #tpu.memory_space<vmem>>, %arg3: memref<1x128xf32, #tpu.memory_space<vmem>>, %arg4: memref<1x128xf32, #tpu.memory_space<vmem>>, %arg5: memref<32x128xbf16, #tpu.memory_space<vmem>>) attributes {dimension_semantics = [#tpu.dimension_semantics<parallel>], iteration_bounds = array<i64: 1>, scalar_prefetch = 0 : i64, scratch_operands = 0 : i64, tpu.core_type = #tpu.core_type<tc>, window_params = [{transform_indices = @transform_0, window_bounds = array<i64: 32, 128>}, {pipeline_mode = #tpu.pipeline_mode<synchronous>, transform_indices = @transform_1, window_bounds = array<i64: 1, 8, 128>}, {pipeline_mode = #tpu.pipeline_mode<synchronous>, transform_indices = @transform_2, window_bounds = array<i64: 1, 128>}, {pipeline_mode = #tpu.pipeline_mode<synchronous>, transform_indices = @transform_3, window_bounds = array<i64: 1, 128>}, {transform_indices = @transform_4, window_bounds = array<i64: 32, 128>}]} {
    %c0 = arith.constant 0 : index
    %c0_0 = arith.constant 0 : index
    %c0_1 = arith.constant 0 : index
    %0 = vector.load %arg2[%c0, %c0_0, %c0_1] : memref<1x8x128xf32, #tpu.memory_space<vmem>>, vector<1x8x128xf32>
    %cst = arith.constant dense<0.000000e+00> : vector<8x128xf32>
    %1 = vector.multi_reduction <add>, %0, %cst [0] : vector<1x8x128xf32> to vector<8x128xf32>
    %2 = vector.extract_strided_slice %1 {offsets = [0, 0], sizes = [1, 128], strides = [1, 1]} : vector<8x128xf32> to vector<1x128xf32>
    %cst_2 = arith.constant 3.125000e-02 : f32
    %3 = vector.broadcast %cst_2 : f32 to vector<1x128xf32>
    %4 = arith.mulf %2, %3 : vector<1x128xf32>
    %5 = vector.extract_strided_slice %1 {offsets = [1, 0], sizes = [1, 128], strides = [1, 1]} : vector<8x128xf32> to vector<1x128xf32>
    %cst_3 = arith.constant 3.125000e-02 : f32
    %6 = vector.broadcast %cst_3 : f32 to vector<1x128xf32>
    %7 = arith.mulf %5, %6 : vector<1x128xf32>
    %8 = arith.mulf %4, %4 : vector<1x128xf32>
    %9 = arith.subf %7, %8 : vector<1x128xf32>
    %cst_4 = arith.constant 0.000000e+00 : f32
    %10 = vector.broadcast %cst_4 : f32 to vector<1x128xf32>
    %11 = arith.maximumf %9, %10 : vector<1x128xf32>
    %c0_5 = arith.constant 0 : index
    %c0_6 = arith.constant 0 : index
    %12 = vector.load %arg3[%c0_5, %c0_6] : memref<1x128xf32, #tpu.memory_space<vmem>>, vector<1x128xf32>
    %cst_7 = arith.constant 9.99999974E-6 : f32
    %13 = vector.broadcast %cst_7 : f32 to vector<1x128xf32>
    %14 = arith.addf %11, %13 : vector<1x128xf32>
    %15 = math.rsqrt %14 : vector<1x128xf32>
    %16 = arith.mulf %12, %15 : vector<1x128xf32>
    %c0_8 = arith.constant 0 : index
    %c0_9 = arith.constant 0 : index
    %17 = vector.load %arg4[%c0_8, %c0_9] : memref<1x128xf32, #tpu.memory_space<vmem>>, vector<1x128xf32>
    %18 = arith.mulf %4, %16 : vector<1x128xf32>
    %19 = arith.subf %17, %18 : vector<1x128xf32>
    %c0_10 = arith.constant 0 : index
    %c0_11 = arith.constant 0 : index
    %20 = vector.load %arg1[%c0_10, %c0_11] : memref<32x128xbf16, #tpu.memory_space<vmem>>, vector<32x128xbf16>
    %21 = arith.extf %20 : vector<32x128xbf16> to vector<32x128xf32>
    %22 = vector.broadcast %16 : vector<1x128xf32> to vector<32x128xf32>
    %23 = arith.mulf %21, %22 : vector<32x128xf32>
    %24 = vector.broadcast %19 : vector<1x128xf32> to vector<32x128xf32>
    %25 = arith.addf %23, %24 : vector<32x128xf32>
    %cst_12 = arith.constant 0.000000e+00 : f32
    %26 = vector.broadcast %cst_12 : f32 to vector<32x128xf32>
    %27 = arith.maximumf %25, %26 : vector<32x128xf32>
    %28 = arith.truncf %27 : vector<32x128xf32> to vector<32x128xbf16>
    %c0_13 = arith.constant 0 : index
    %c0_14 = arith.constant 0 : index
    %29 = vector.load %arg5[%c0_13, %c0_14] : memref<32x128xbf16, #tpu.memory_space<vmem>>, vector<32x128xbf16>
    tpu.vector_store %arg5[%c0_13, %c0_14], %28 {strides = array<i32>} : memref<32x128xbf16, #tpu.memory_space<vmem>>, vector<32x128xbf16>,
    return
  }
  func.func @transform_0(%arg0: i32) -> (i32, i32) {
    %c0_i32 = arith.constant 0 : i32
    %c0_i32_0 = arith.constant 0 : i32
    return %arg0, %c0_i32 : i32, i32
  }
  func.func @transform_1(%arg0: i32) -> (i32, i32, i32) {
    %c0_i32 = arith.constant 0 : i32
    %c0_i32_0 = arith.constant 0 : i32
    %c0_i32_1 = arith.constant 0 : i32
    %c0_i32_2 = arith.constant 0 : i32
    return %c0_i32, %c0_i32_0, %c0_i32_1 : i32, i32, i32
  }
  func.func @transform_2(%arg0: i32) -> (i32, i32) {
    %c0_i32 = arith.constant 0 : i32
    %c0_i32_0 = arith.constant 0 : i32
    %c0_i32_1 = arith.constant 0 : i32
    return %c0_i32, %c0_i32_0 : i32, i32
  }
  func.func @transform_3(%arg0: i32) -> (i32, i32) {
    %c0_i32 = arith.constant 0 : i32
    %c0_i32_0 = arith.constant 0 : i32
    %c0_i32_1 = arith.constant 0 : i32
    return %c0_i32, %c0_i32_0 : i32, i32
  }
  func.func @transform_4(%arg0: i32) -> (i32, i32) {
    %c0_i32 = arith.constant 0 : i32
    %c0_i32_0 = arith.constant 0 : i32
    return %arg0, %c0_i32 : i32, i32
  }
}

module attributes {stable_mosaic.version = 11 : i64} {
  func.func @_bn_relu_kernel(%arg0: i32, %arg1: memref<128x128xbf16, #tpu.memory_space<vmem>>, %arg2: memref<1x8x128xf32, #tpu.memory_space<vmem>>, %arg3: memref<1x128xf32, #tpu.memory_space<vmem>>, %arg4: memref<1x128xf32, #tpu.memory_space<vmem>>, %arg5: memref<128x128xbf16, #tpu.memory_space<vmem>>) attributes {dimension_semantics = [#tpu.dimension_semantics<parallel>], iteration_bounds = array<i64: 1>, scalar_prefetch = 0 : i64, scratch_operands = 0 : i64, tpu.core_type = #tpu.core_type<tc>, window_params = [{transform_indices = @transform_0, window_bounds = array<i64: 128, 128>}, {pipeline_mode = #tpu.pipeline_mode<synchronous>, transform_indices = @transform_1, window_bounds = array<i64: 1, 8, 128>}, {pipeline_mode = #tpu.pipeline_mode<synchronous>, transform_indices = @transform_2, window_bounds = array<i64: 1, 128>}, {pipeline_mode = #tpu.pipeline_mode<synchronous>, transform_indices = @transform_3, window_bounds = array<i64: 1, 128>}, {transform_indices = @transform_4, window_bounds = array<i64: 128, 128>}]} {
    %c0 = arith.constant 0 : index
    %c0_0 = arith.constant 0 : index
    %c0_1 = arith.constant 0 : index
    %0 = vector.load %arg2[%c0, %c0_0, %c0_1] : memref<1x8x128xf32, #tpu.memory_space<vmem>>, vector<1x8x128xf32>
    %cst = arith.constant dense<0.000000e+00> : vector<8x128xf32>
    %1 = vector.multi_reduction <add>, %0, %cst [0] : vector<1x8x128xf32> to vector<8x128xf32>
    %2 = vector.extract_strided_slice %1 {offsets = [0, 0], sizes = [1, 128], strides = [1, 1]} : vector<8x128xf32> to vector<1x128xf32>
    %cst_2 = arith.constant 7.812500e-03 : f32
    %3 = vector.broadcast %cst_2 : f32 to vector<1x128xf32>
    %4 = arith.mulf %2, %3 : vector<1x128xf32>
    %5 = vector.extract_strided_slice %1 {offsets = [1, 0], sizes = [1, 128], strides = [1, 1]} : vector<8x128xf32> to vector<1x128xf32>
    %cst_3 = arith.constant 7.812500e-03 : f32
    %6 = vector.broadcast %cst_3 : f32 to vector<1x128xf32>
    %7 = arith.mulf %5, %6 : vector<1x128xf32>
    %8 = arith.mulf %4, %4 : vector<1x128xf32>
    %9 = arith.subf %7, %8 : vector<1x128xf32>
    %cst_4 = arith.constant 0.000000e+00 : f32
    %10 = vector.broadcast %cst_4 : f32 to vector<1x128xf32>
    %11 = arith.maximumf %9, %10 : vector<1x128xf32>
    %c0_5 = arith.constant 0 : index
    %c0_6 = arith.constant 0 : index
    %12 = vector.load %arg3[%c0_5, %c0_6] : memref<1x128xf32, #tpu.memory_space<vmem>>, vector<1x128xf32>
    %cst_7 = arith.constant 9.99999974E-6 : f32
    %13 = vector.broadcast %cst_7 : f32 to vector<1x128xf32>
    %14 = arith.addf %11, %13 : vector<1x128xf32>
    %15 = math.rsqrt %14 : vector<1x128xf32>
    %16 = arith.mulf %12, %15 : vector<1x128xf32>
    %c0_8 = arith.constant 0 : index
    %c0_9 = arith.constant 0 : index
    %17 = vector.load %arg4[%c0_8, %c0_9] : memref<1x128xf32, #tpu.memory_space<vmem>>, vector<1x128xf32>
    %18 = arith.mulf %4, %16 : vector<1x128xf32>
    %19 = arith.subf %17, %18 : vector<1x128xf32>
    %c0_10 = arith.constant 0 : index
    %c0_11 = arith.constant 0 : index
    %20 = vector.load %arg1[%c0_10, %c0_11] : memref<128x128xbf16, #tpu.memory_space<vmem>>, vector<128x128xbf16>
    %21 = arith.extf %20 : vector<128x128xbf16> to vector<128x128xf32>
    %22 = vector.broadcast %16 : vector<1x128xf32> to vector<128x128xf32>
    %23 = arith.mulf %21, %22 : vector<128x128xf32>
    %24 = vector.broadcast %19 : vector<1x128xf32> to vector<128x128xf32>
    %25 = arith.addf %23, %24 : vector<128x128xf32>
    %cst_12 = arith.constant 0.000000e+00 : f32
    %26 = vector.broadcast %cst_12 : f32 to vector<128x128xf32>
    %27 = arith.maximumf %25, %26 : vector<128x128xf32>
    %28 = arith.truncf %27 : vector<128x128xf32> to vector<128x128xbf16>
    %c0_13 = arith.constant 0 : index
    %c0_14 = arith.constant 0 : index
    %29 = vector.load %arg5[%c0_13, %c0_14] : memref<128x128xbf16, #tpu.memory_space<vmem>>, vector<128x128xbf16>
    tpu.vector_store %arg5[%c0_13, %c0_14], %28 {strides = array<i32>} : memref<128x128xbf16, #tpu.memory_space<vmem>>, vector<128x128xbf16>,
    return
  }
  func.func @transform_0(%arg0: i32) -> (i32, i32) {
    %c0_i32 = arith.constant 0 : i32
    %c0_i32_0 = arith.constant 0 : i32
    return %arg0, %c0_i32 : i32, i32
  }
  func.func @transform_1(%arg0: i32) -> (i32, i32, i32) {
    %c0_i32 = arith.constant 0 : i32
    %c0_i32_0 = arith.constant 0 : i32
    %c0_i32_1 = arith.constant 0 : i32
    %c0_i32_2 = arith.constant 0 : i32
    return %c0_i32, %c0_i32_0, %c0_i32_1 : i32, i32, i32
  }
  func.func @transform_2(%arg0: i32) -> (i32, i32) {
    %c0_i32 = arith.constant 0 : i32
    %c0_i32_0 = arith.constant 0 : i32
    %c0_i32_1 = arith.constant 0 : i32
    return %c0_i32, %c0_i32_0 : i32, i32
  }
  func.func @transform_3(%arg0: i32) -> (i32, i32) {
    %c0_i32 = arith.constant 0 : i32
    %c0_i32_0 = arith.constant 0 : i32
    %c0_i32_1 = arith.constant 0 : i32
    return %c0_i32, %c0_i32_0 : i32, i32
  }
  func.func @transform_4(%arg0: i32) -> (i32, i32) {
    %c0_i32 = arith.constant 0 : i32
    %c0_i32_0 = arith.constant 0 : i32
    return %arg0, %c0_i32 : i32, i32
  }
}

module attributes {stable_mosaic.version = 11 : i64} {
  func.func @_mm_stats_kernel(%arg0: i32, %arg1: memref<128x1024xbf16, #tpu.memory_space<vmem>>, %arg2: memref<1024x128xbf16, #tpu.memory_space<vmem>>, %arg3: memref<128x128xbf16, #tpu.memory_space<vmem>>, %arg4: memref<1x8x128xf32, #tpu.memory_space<vmem>>) attributes {dimension_semantics = [#tpu.dimension_semantics<parallel>], iteration_bounds = array<i64: 1>, scalar_prefetch = 0 : i64, scratch_operands = 0 : i64, tpu.core_type = #tpu.core_type<tc>, window_params = [{transform_indices = @transform_0, window_bounds = array<i64: 128, 1024>}, {pipeline_mode = #tpu.pipeline_mode<synchronous>, transform_indices = @transform_1, window_bounds = array<i64: 1024, 128>}, {transform_indices = @transform_2, window_bounds = array<i64: 128, 128>}, {transform_indices = @transform_3, window_bounds = array<i64: 1, 8, 128>}]} {
    %c0 = arith.constant 0 : index
    %c0_0 = arith.constant 0 : index
    %0 = vector.load %arg1[%c0, %c0_0] : memref<128x1024xbf16, #tpu.memory_space<vmem>>, vector<128x1024xbf16>
    %c0_1 = arith.constant 0 : index
    %c0_2 = arith.constant 0 : index
    %1 = vector.load %arg2[%c0_1, %c0_2] : memref<1024x128xbf16, #tpu.memory_space<vmem>>, vector<1024x128xbf16>
    %cst = arith.constant dense<0.000000e+00> : vector<128x128xf32>
    %2 = tpu.matmul %0, %1, %cst {dimension_numbers = #tpu.dot_dimension_numbers<[1], [0], [0], [1], [0, 0, 1, 1], [], []>} : vector<128x1024xbf16>, vector<1024x128xbf16>, vector<128x128xf32> -> vector<128x128xf32>
    %cst_3 = arith.constant dense<0.000000e+00> : vector<128xf32>
    %3 = vector.multi_reduction <add>, %2, %cst_3 [0] : vector<128x128xf32> to vector<128xf32>
    %4 = vector.shape_cast %3 : vector<128xf32> to vector<1x128xf32>
    %5 = arith.mulf %2, %2 : vector<128x128xf32>
    %cst_4 = arith.constant dense<0.000000e+00> : vector<128xf32>
    %6 = vector.multi_reduction <add>, %5, %cst_4 [0] : vector<128x128xf32> to vector<128xf32>
    %7 = vector.shape_cast %6 : vector<128xf32> to vector<1x128xf32>
    %cst_5 = arith.constant 0.000000e+00 : f32
    %8 = vector.broadcast %cst_5 : f32 to vector<6x128xf32>
    %9 = tpu.concatenate %4, %7, %8 in 0 : vector<1x128xf32>, vector<1x128xf32>, vector<6x128xf32> -> vector<8x128xf32>
    %10 = vector.shape_cast %9 : vector<8x128xf32> to vector<1x8x128xf32>
    %c0_6 = arith.constant 0 : index
    %c0_7 = arith.constant 0 : index
    %c0_8 = arith.constant 0 : index
    %11 = vector.load %arg4[%c0_6, %c0_7, %c0_8] : memref<1x8x128xf32, #tpu.memory_space<vmem>>, vector<1x8x128xf32>
    tpu.vector_store %arg4[%c0_6, %c0_7, %c0_8], %10 {strides = array<i32>} : memref<1x8x128xf32, #tpu.memory_space<vmem>>, vector<1x8x128xf32>,
    %12 = arith.truncf %2 : vector<128x128xf32> to vector<128x128xbf16>
    %c0_9 = arith.constant 0 : index
    %c0_10 = arith.constant 0 : index
    %13 = vector.load %arg3[%c0_9, %c0_10] : memref<128x128xbf16, #tpu.memory_space<vmem>>, vector<128x128xbf16>
    tpu.vector_store %arg3[%c0_9, %c0_10], %12 {strides = array<i32>} : memref<128x128xbf16, #tpu.memory_space<vmem>>, vector<128x128xbf16>,
    return
  }
  func.func @transform_0(%arg0: i32) -> (i32, i32) {
    %c0_i32 = arith.constant 0 : i32
    %c0_i32_0 = arith.constant 0 : i32
    return %arg0, %c0_i32 : i32, i32
  }
  func.func @transform_1(%arg0: i32) -> (i32, i32) {
    %c0_i32 = arith.constant 0 : i32
    %c0_i32_0 = arith.constant 0 : i32
    %c0_i32_1 = arith.constant 0 : i32
    return %c0_i32, %c0_i32_0 : i32, i32
  }
  func.func @transform_2(%arg0: i32) -> (i32, i32) {
    %c0_i32 = arith.constant 0 : i32
    %c0_i32_0 = arith.constant 0 : i32
    return %arg0, %c0_i32 : i32, i32
  }
  func.func @transform_3(%arg0: i32) -> (i32, i32, i32) {
    %c0_i32 = arith.constant 0 : i32
    %c0_i32_0 = arith.constant 0 : i32
    %c0_i32_1 = arith.constant 0 : i32
    return %arg0, %c0_i32, %c0_i32_0 : i32, i32, i32
  }
}

module attributes {stable_mosaic.version = 11 : i64} {
  func.func @_bn_relu_kernel(%arg0: i32, %arg1: memref<512x128xbf16, #tpu.memory_space<vmem>>, %arg2: memref<1x8x128xf32, #tpu.memory_space<vmem>>, %arg3: memref<1x128xf32, #tpu.memory_space<vmem>>, %arg4: memref<1x128xf32, #tpu.memory_space<vmem>>, %arg5: memref<512x128xbf16, #tpu.memory_space<vmem>>) attributes {dimension_semantics = [#tpu.dimension_semantics<parallel>], iteration_bounds = array<i64: 1>, scalar_prefetch = 0 : i64, scratch_operands = 0 : i64, tpu.core_type = #tpu.core_type<tc>, window_params = [{transform_indices = @transform_0, window_bounds = array<i64: 512, 128>}, {pipeline_mode = #tpu.pipeline_mode<synchronous>, transform_indices = @transform_1, window_bounds = array<i64: 1, 8, 128>}, {pipeline_mode = #tpu.pipeline_mode<synchronous>, transform_indices = @transform_2, window_bounds = array<i64: 1, 128>}, {pipeline_mode = #tpu.pipeline_mode<synchronous>, transform_indices = @transform_3, window_bounds = array<i64: 1, 128>}, {transform_indices = @transform_4, window_bounds = array<i64: 512, 128>}]} {
    %c0 = arith.constant 0 : index
    %c0_0 = arith.constant 0 : index
    %c0_1 = arith.constant 0 : index
    %0 = vector.load %arg2[%c0, %c0_0, %c0_1] : memref<1x8x128xf32, #tpu.memory_space<vmem>>, vector<1x8x128xf32>
    %cst = arith.constant dense<0.000000e+00> : vector<8x128xf32>
    %1 = vector.multi_reduction <add>, %0, %cst [0] : vector<1x8x128xf32> to vector<8x128xf32>
    %2 = vector.extract_strided_slice %1 {offsets = [0, 0], sizes = [1, 128], strides = [1, 1]} : vector<8x128xf32> to vector<1x128xf32>
    %cst_2 = arith.constant 0.001953125 : f32
    %3 = vector.broadcast %cst_2 : f32 to vector<1x128xf32>
    %4 = arith.mulf %2, %3 : vector<1x128xf32>
    %5 = vector.extract_strided_slice %1 {offsets = [1, 0], sizes = [1, 128], strides = [1, 1]} : vector<8x128xf32> to vector<1x128xf32>
    %cst_3 = arith.constant 0.001953125 : f32
    %6 = vector.broadcast %cst_3 : f32 to vector<1x128xf32>
    %7 = arith.mulf %5, %6 : vector<1x128xf32>
    %8 = arith.mulf %4, %4 : vector<1x128xf32>
    %9 = arith.subf %7, %8 : vector<1x128xf32>
    %cst_4 = arith.constant 0.000000e+00 : f32
    %10 = vector.broadcast %cst_4 : f32 to vector<1x128xf32>
    %11 = arith.maximumf %9, %10 : vector<1x128xf32>
    %c0_5 = arith.constant 0 : index
    %c0_6 = arith.constant 0 : index
    %12 = vector.load %arg3[%c0_5, %c0_6] : memref<1x128xf32, #tpu.memory_space<vmem>>, vector<1x128xf32>
    %cst_7 = arith.constant 9.99999974E-6 : f32
    %13 = vector.broadcast %cst_7 : f32 to vector<1x128xf32>
    %14 = arith.addf %11, %13 : vector<1x128xf32>
    %15 = math.rsqrt %14 : vector<1x128xf32>
    %16 = arith.mulf %12, %15 : vector<1x128xf32>
    %c0_8 = arith.constant 0 : index
    %c0_9 = arith.constant 0 : index
    %17 = vector.load %arg4[%c0_8, %c0_9] : memref<1x128xf32, #tpu.memory_space<vmem>>, vector<1x128xf32>
    %18 = arith.mulf %4, %16 : vector<1x128xf32>
    %19 = arith.subf %17, %18 : vector<1x128xf32>
    %c0_10 = arith.constant 0 : index
    %c0_11 = arith.constant 0 : index
    %20 = vector.load %arg1[%c0_10, %c0_11] : memref<512x128xbf16, #tpu.memory_space<vmem>>, vector<512x128xbf16>
    %21 = arith.extf %20 : vector<512x128xbf16> to vector<512x128xf32>
    %22 = vector.broadcast %16 : vector<1x128xf32> to vector<512x128xf32>
    %23 = arith.mulf %21, %22 : vector<512x128xf32>
    %24 = vector.broadcast %19 : vector<1x128xf32> to vector<512x128xf32>
    %25 = arith.addf %23, %24 : vector<512x128xf32>
    %cst_12 = arith.constant 0.000000e+00 : f32
    %26 = vector.broadcast %cst_12 : f32 to vector<512x128xf32>
    %27 = arith.maximumf %25, %26 : vector<512x128xf32>
    %28 = arith.truncf %27 : vector<512x128xf32> to vector<512x128xbf16>
    %c0_13 = arith.constant 0 : index
    %c0_14 = arith.constant 0 : index
    %29 = vector.load %arg5[%c0_13, %c0_14] : memref<512x128xbf16, #tpu.memory_space<vmem>>, vector<512x128xbf16>
    tpu.vector_store %arg5[%c0_13, %c0_14], %28 {strides = array<i32>} : memref<512x128xbf16, #tpu.memory_space<vmem>>, vector<512x128xbf16>,
    return
  }
  func.func @transform_0(%arg0: i32) -> (i32, i32) {
    %c0_i32 = arith.constant 0 : i32
    %c0_i32_0 = arith.constant 0 : i32
    return %arg0, %c0_i32 : i32, i32
  }
  func.func @transform_1(%arg0: i32) -> (i32, i32, i32) {
    %c0_i32 = arith.constant 0 : i32
    %c0_i32_0 = arith.constant 0 : i32
    %c0_i32_1 = arith.constant 0 : i32
    %c0_i32_2 = arith.constant 0 : i32
    return %c0_i32, %c0_i32_0, %c0_i32_1 : i32, i32, i32
  }
  func.func @transform_2(%arg0: i32) -> (i32, i32) {
    %c0_i32 = arith.constant 0 : i32
    %c0_i32_0 = arith.constant 0 : i32
    %c0_i32_1 = arith.constant 0 : i32
    return %c0_i32, %c0_i32_0 : i32, i32
  }
  func.func @transform_3(%arg0: i32) -> (i32, i32) {
    %c0_i32 = arith.constant 0 : i32
    %c0_i32_0 = arith.constant 0 : i32
    %c0_i32_1 = arith.constant 0 : i32
    return %c0_i32, %c0_i32_0 : i32, i32
  }
  func.func @transform_4(%arg0: i32) -> (i32, i32) {
    %c0_i32 = arith.constant 0 : i32
    %c0_i32_0 = arith.constant 0 : i32
    return %arg0, %c0_i32 : i32, i32
  }
}

module attributes {stable_mosaic.version = 11 : i64} {
  func.func @_mm_stats_kernel(%arg0: i32, %arg1: memref<512x512xbf16, #tpu.memory_space<vmem>>, %arg2: memref<512x128xbf16, #tpu.memory_space<vmem>>, %arg3: memref<512x128xbf16, #tpu.memory_space<vmem>>, %arg4: memref<1x8x128xf32, #tpu.memory_space<vmem>>) attributes {dimension_semantics = [#tpu.dimension_semantics<parallel>], iteration_bounds = array<i64: 1>, scalar_prefetch = 0 : i64, scratch_operands = 0 : i64, tpu.core_type = #tpu.core_type<tc>, window_params = [{transform_indices = @transform_0, window_bounds = array<i64: 512, 512>}, {pipeline_mode = #tpu.pipeline_mode<synchronous>, transform_indices = @transform_1, window_bounds = array<i64: 512, 128>}, {transform_indices = @transform_2, window_bounds = array<i64: 512, 128>}, {transform_indices = @transform_3, window_bounds = array<i64: 1, 8, 128>}]} {
    %c0 = arith.constant 0 : index
    %c0_0 = arith.constant 0 : index
    %0 = vector.load %arg1[%c0, %c0_0] : memref<512x512xbf16, #tpu.memory_space<vmem>>, vector<512x512xbf16>
    %c0_1 = arith.constant 0 : index
    %c0_2 = arith.constant 0 : index
    %1 = vector.load %arg2[%c0_1, %c0_2] : memref<512x128xbf16, #tpu.memory_space<vmem>>, vector<512x128xbf16>
    %cst = arith.constant dense<0.000000e+00> : vector<512x128xf32>
    %2 = tpu.matmul %0, %1, %cst {dimension_numbers = #tpu.dot_dimension_numbers<[1], [0], [0], [1], [0, 0, 1, 1], [], []>} : vector<512x512xbf16>, vector<512x128xbf16>, vector<512x128xf32> -> vector<512x128xf32>
    %cst_3 = arith.constant dense<0.000000e+00> : vector<128xf32>
    %3 = vector.multi_reduction <add>, %2, %cst_3 [0] : vector<512x128xf32> to vector<128xf32>
    %4 = vector.shape_cast %3 : vector<128xf32> to vector<1x128xf32>
    %5 = arith.mulf %2, %2 : vector<512x128xf32>
    %cst_4 = arith.constant dense<0.000000e+00> : vector<128xf32>
    %6 = vector.multi_reduction <add>, %5, %cst_4 [0] : vector<512x128xf32> to vector<128xf32>
    %7 = vector.shape_cast %6 : vector<128xf32> to vector<1x128xf32>
    %cst_5 = arith.constant 0.000000e+00 : f32
    %8 = vector.broadcast %cst_5 : f32 to vector<6x128xf32>
    %9 = tpu.concatenate %4, %7, %8 in 0 : vector<1x128xf32>, vector<1x128xf32>, vector<6x128xf32> -> vector<8x128xf32>
    %10 = vector.shape_cast %9 : vector<8x128xf32> to vector<1x8x128xf32>
    %c0_6 = arith.constant 0 : index
    %c0_7 = arith.constant 0 : index
    %c0_8 = arith.constant 0 : index
    %11 = vector.load %arg4[%c0_6, %c0_7, %c0_8] : memref<1x8x128xf32, #tpu.memory_space<vmem>>, vector<1x8x128xf32>
    tpu.vector_store %arg4[%c0_6, %c0_7, %c0_8], %10 {strides = array<i32>} : memref<1x8x128xf32, #tpu.memory_space<vmem>>, vector<1x8x128xf32>,
    %12 = arith.truncf %2 : vector<512x128xf32> to vector<512x128xbf16>
    %c0_9 = arith.constant 0 : index
    %c0_10 = arith.constant 0 : index
    %13 = vector.load %arg3[%c0_9, %c0_10] : memref<512x128xbf16, #tpu.memory_space<vmem>>, vector<512x128xbf16>
    tpu.vector_store %arg3[%c0_9, %c0_10], %12 {strides = array<i32>} : memref<512x128xbf16, #tpu.memory_space<vmem>>, vector<512x128xbf16>,
    return
  }
  func.func @transform_0(%arg0: i32) -> (i32, i32) {
    %c0_i32 = arith.constant 0 : i32
    %c0_i32_0 = arith.constant 0 : i32
    return %arg0, %c0_i32 : i32, i32
  }
  func.func @transform_1(%arg0: i32) -> (i32, i32) {
    %c0_i32 = arith.constant 0 : i32
    %c0_i32_0 = arith.constant 0 : i32
    %c0_i32_1 = arith.constant 0 : i32
    return %c0_i32, %c0_i32_0 : i32, i32
  }
  func.func @transform_2(%arg0: i32) -> (i32, i32) {
    %c0_i32 = arith.constant 0 : i32
    %c0_i32_0 = arith.constant 0 : i32
    return %arg0, %c0_i32 : i32, i32
  }
  func.func @transform_3(%arg0: i32) -> (i32, i32, i32) {
    %c0_i32 = arith.constant 0 : i32
    %c0_i32_0 = arith.constant 0 : i32
    %c0_i32_1 = arith.constant 0 : i32
    return %arg0, %c0_i32, %c0_i32_0 : i32, i32, i32
  }
}

module attributes {stable_mosaic.version = 11 : i64} {
  func.func @_mm_stats_kernel(%arg0: i32, %arg1: memref<2048x256xbf16, #tpu.memory_space<vmem>>, %arg2: memref<256x128xbf16, #tpu.memory_space<vmem>>, %arg3: memref<2048x128xbf16, #tpu.memory_space<vmem>>, %arg4: memref<1x8x128xf32, #tpu.memory_space<vmem>>) attributes {dimension_semantics = [#tpu.dimension_semantics<parallel>], iteration_bounds = array<i64: 1>, scalar_prefetch = 0 : i64, scratch_operands = 0 : i64, tpu.core_type = #tpu.core_type<tc>, window_params = [{transform_indices = @transform_0, window_bounds = array<i64: 2048, 256>}, {pipeline_mode = #tpu.pipeline_mode<synchronous>, transform_indices = @transform_1, window_bounds = array<i64: 256, 128>}, {transform_indices = @transform_2, window_bounds = array<i64: 2048, 128>}, {transform_indices = @transform_3, window_bounds = array<i64: 1, 8, 128>}]} {
    %c0 = arith.constant 0 : index
    %c0_0 = arith.constant 0 : index
    %0 = vector.load %arg1[%c0, %c0_0] : memref<2048x256xbf16, #tpu.memory_space<vmem>>, vector<2048x256xbf16>
    %c0_1 = arith.constant 0 : index
    %c0_2 = arith.constant 0 : index
    %1 = vector.load %arg2[%c0_1, %c0_2] : memref<256x128xbf16, #tpu.memory_space<vmem>>, vector<256x128xbf16>
    %cst = arith.constant dense<0.000000e+00> : vector<2048x128xf32>
    %2 = tpu.matmul %0, %1, %cst {dimension_numbers = #tpu.dot_dimension_numbers<[1], [0], [0], [1], [0, 0, 1, 1], [], []>} : vector<2048x256xbf16>, vector<256x128xbf16>, vector<2048x128xf32> -> vector<2048x128xf32>
    %cst_3 = arith.constant dense<0.000000e+00> : vector<128xf32>
    %3 = vector.multi_reduction <add>, %2, %cst_3 [0] : vector<2048x128xf32> to vector<128xf32>
    %4 = vector.shape_cast %3 : vector<128xf32> to vector<1x128xf32>
    %5 = arith.mulf %2, %2 : vector<2048x128xf32>
    %cst_4 = arith.constant dense<0.000000e+00> : vector<128xf32>
    %6 = vector.multi_reduction <add>, %5, %cst_4 [0] : vector<2048x128xf32> to vector<128xf32>
    %7 = vector.shape_cast %6 : vector<128xf32> to vector<1x128xf32>
    %cst_5 = arith.constant 0.000000e+00 : f32
    %8 = vector.broadcast %cst_5 : f32 to vector<6x128xf32>
    %9 = tpu.concatenate %4, %7, %8 in 0 : vector<1x128xf32>, vector<1x128xf32>, vector<6x128xf32> -> vector<8x128xf32>
    %10 = vector.shape_cast %9 : vector<8x128xf32> to vector<1x8x128xf32>
    %c0_6 = arith.constant 0 : index
    %c0_7 = arith.constant 0 : index
    %c0_8 = arith.constant 0 : index
    %11 = vector.load %arg4[%c0_6, %c0_7, %c0_8] : memref<1x8x128xf32, #tpu.memory_space<vmem>>, vector<1x8x128xf32>
    tpu.vector_store %arg4[%c0_6, %c0_7, %c0_8], %10 {strides = array<i32>} : memref<1x8x128xf32, #tpu.memory_space<vmem>>, vector<1x8x128xf32>,
    %12 = arith.truncf %2 : vector<2048x128xf32> to vector<2048x128xbf16>
    %c0_9 = arith.constant 0 : index
    %c0_10 = arith.constant 0 : index
    %13 = vector.load %arg3[%c0_9, %c0_10] : memref<2048x128xbf16, #tpu.memory_space<vmem>>, vector<2048x128xbf16>
    tpu.vector_store %arg3[%c0_9, %c0_10], %12 {strides = array<i32>} : memref<2048x128xbf16, #tpu.memory_space<vmem>>, vector<2048x128xbf16>,
    return
  }
  func.func @transform_0(%arg0: i32) -> (i32, i32) {
    %c0_i32 = arith.constant 0 : i32
    %c0_i32_0 = arith.constant 0 : i32
    return %arg0, %c0_i32 : i32, i32
  }
  func.func @transform_1(%arg0: i32) -> (i32, i32) {
    %c0_i32 = arith.constant 0 : i32
    %c0_i32_0 = arith.constant 0 : i32
    %c0_i32_1 = arith.constant 0 : i32
    return %c0_i32, %c0_i32_0 : i32, i32
  }
  func.func @transform_2(%arg0: i32) -> (i32, i32) {
    %c0_i32 = arith.constant 0 : i32
    %c0_i32_0 = arith.constant 0 : i32
    return %arg0, %c0_i32 : i32, i32
  }
  func.func @transform_3(%arg0: i32) -> (i32, i32, i32) {
    %c0_i32 = arith.constant 0 : i32
    %c0_i32_0 = arith.constant 0 : i32
    %c0_i32_1 = arith.constant 0 : i32
    return %arg0, %c0_i32, %c0_i32_0 : i32, i32, i32
  }
}

module attributes {stable_mosaic.version = 11 : i64} {
  func.func @_bn_relu_kernel(%arg0: i32, %arg1: memref<2048x128xbf16, #tpu.memory_space<vmem>>, %arg2: memref<1x8x128xf32, #tpu.memory_space<vmem>>, %arg3: memref<1x128xf32, #tpu.memory_space<vmem>>, %arg4: memref<1x128xf32, #tpu.memory_space<vmem>>, %arg5: memref<2048x128xbf16, #tpu.memory_space<vmem>>) attributes {dimension_semantics = [#tpu.dimension_semantics<parallel>], iteration_bounds = array<i64: 1>, scalar_prefetch = 0 : i64, scratch_operands = 0 : i64, tpu.core_type = #tpu.core_type<tc>, window_params = [{transform_indices = @transform_0, window_bounds = array<i64: 2048, 128>}, {pipeline_mode = #tpu.pipeline_mode<synchronous>, transform_indices = @transform_1, window_bounds = array<i64: 1, 8, 128>}, {pipeline_mode = #tpu.pipeline_mode<synchronous>, transform_indices = @transform_2, window_bounds = array<i64: 1, 128>}, {pipeline_mode = #tpu.pipeline_mode<synchronous>, transform_indices = @transform_3, window_bounds = array<i64: 1, 128>}, {transform_indices = @transform_4, window_bounds = array<i64: 2048, 128>}]} {
    %c0 = arith.constant 0 : index
    %c0_0 = arith.constant 0 : index
    %c0_1 = arith.constant 0 : index
    %0 = vector.load %arg2[%c0, %c0_0, %c0_1] : memref<1x8x128xf32, #tpu.memory_space<vmem>>, vector<1x8x128xf32>
    %cst = arith.constant dense<0.000000e+00> : vector<8x128xf32>
    %1 = vector.multi_reduction <add>, %0, %cst [0] : vector<1x8x128xf32> to vector<8x128xf32>
    %2 = vector.extract_strided_slice %1 {offsets = [0, 0], sizes = [1, 128], strides = [1, 1]} : vector<8x128xf32> to vector<1x128xf32>
    %cst_2 = arith.constant 4.8828125E-4 : f32
    %3 = vector.broadcast %cst_2 : f32 to vector<1x128xf32>
    %4 = arith.mulf %2, %3 : vector<1x128xf32>
    %5 = vector.extract_strided_slice %1 {offsets = [1, 0], sizes = [1, 128], strides = [1, 1]} : vector<8x128xf32> to vector<1x128xf32>
    %cst_3 = arith.constant 4.8828125E-4 : f32
    %6 = vector.broadcast %cst_3 : f32 to vector<1x128xf32>
    %7 = arith.mulf %5, %6 : vector<1x128xf32>
    %8 = arith.mulf %4, %4 : vector<1x128xf32>
    %9 = arith.subf %7, %8 : vector<1x128xf32>
    %cst_4 = arith.constant 0.000000e+00 : f32
    %10 = vector.broadcast %cst_4 : f32 to vector<1x128xf32>
    %11 = arith.maximumf %9, %10 : vector<1x128xf32>
    %c0_5 = arith.constant 0 : index
    %c0_6 = arith.constant 0 : index
    %12 = vector.load %arg3[%c0_5, %c0_6] : memref<1x128xf32, #tpu.memory_space<vmem>>, vector<1x128xf32>
    %cst_7 = arith.constant 9.99999974E-6 : f32
    %13 = vector.broadcast %cst_7 : f32 to vector<1x128xf32>
    %14 = arith.addf %11, %13 : vector<1x128xf32>
    %15 = math.rsqrt %14 : vector<1x128xf32>
    %16 = arith.mulf %12, %15 : vector<1x128xf32>
    %c0_8 = arith.constant 0 : index
    %c0_9 = arith.constant 0 : index
    %17 = vector.load %arg4[%c0_8, %c0_9] : memref<1x128xf32, #tpu.memory_space<vmem>>, vector<1x128xf32>
    %18 = arith.mulf %4, %16 : vector<1x128xf32>
    %19 = arith.subf %17, %18 : vector<1x128xf32>
    %c0_10 = arith.constant 0 : index
    %c0_11 = arith.constant 0 : index
    %20 = vector.load %arg1[%c0_10, %c0_11] : memref<2048x128xbf16, #tpu.memory_space<vmem>>, vector<2048x128xbf16>
    %21 = arith.extf %20 : vector<2048x128xbf16> to vector<2048x128xf32>
    %22 = vector.broadcast %16 : vector<1x128xf32> to vector<2048x128xf32>
    %23 = arith.mulf %21, %22 : vector<2048x128xf32>
    %24 = vector.broadcast %19 : vector<1x128xf32> to vector<2048x128xf32>
    %25 = arith.addf %23, %24 : vector<2048x128xf32>
    %cst_12 = arith.constant 0.000000e+00 : f32
    %26 = vector.broadcast %cst_12 : f32 to vector<2048x128xf32>
    %27 = arith.maximumf %25, %26 : vector<2048x128xf32>
    %28 = arith.truncf %27 : vector<2048x128xf32> to vector<2048x128xbf16>
    %c0_13 = arith.constant 0 : index
    %c0_14 = arith.constant 0 : index
    %29 = vector.load %arg5[%c0_13, %c0_14] : memref<2048x128xbf16, #tpu.memory_space<vmem>>, vector<2048x128xbf16>
    tpu.vector_store %arg5[%c0_13, %c0_14], %28 {strides = array<i32>} : memref<2048x128xbf16, #tpu.memory_space<vmem>>, vector<2048x128xbf16>,
    return
  }
  func.func @transform_0(%arg0: i32) -> (i32, i32) {
    %c0_i32 = arith.constant 0 : i32
    %c0_i32_0 = arith.constant 0 : i32
    return %arg0, %c0_i32 : i32, i32
  }
  func.func @transform_1(%arg0: i32) -> (i32, i32, i32) {
    %c0_i32 = arith.constant 0 : i32
    %c0_i32_0 = arith.constant 0 : i32
    %c0_i32_1 = arith.constant 0 : i32
    %c0_i32_2 = arith.constant 0 : i32
    return %c0_i32, %c0_i32_0, %c0_i32_1 : i32, i32, i32
  }
  func.func @transform_2(%arg0: i32) -> (i32, i32) {
    %c0_i32 = arith.constant 0 : i32
    %c0_i32_0 = arith.constant 0 : i32
    %c0_i32_1 = arith.constant 0 : i32
    return %c0_i32, %c0_i32_0 : i32, i32
  }
  func.func @transform_3(%arg0: i32) -> (i32, i32) {
    %c0_i32 = arith.constant 0 : i32
    %c0_i32_0 = arith.constant 0 : i32
    %c0_i32_1 = arith.constant 0 : i32
    return %c0_i32, %c0_i32_0 : i32, i32
  }
  func.func @transform_4(%arg0: i32) -> (i32, i32) {
    %c0_i32 = arith.constant 0 : i32
    %c0_i32_0 = arith.constant 0 : i32
    return %arg0, %c0_i32 : i32, i32
  }
}

module attributes {stable_mosaic.version = 11 : i64} {
  func.func @_mm_tanh_kernel(%arg0: i32, %arg1: memref<2048x128xbf16, #tpu.memory_space<vmem>>, %arg2: memref<128x128xbf16, #tpu.memory_space<vmem>>, %arg3: memref<2048x128xf32, #tpu.memory_space<vmem>>) attributes {dimension_semantics = [#tpu.dimension_semantics<parallel>], iteration_bounds = array<i64: 4>, scalar_prefetch = 0 : i64, scratch_operands = 0 : i64, tpu.core_type = #tpu.core_type<tc>, window_params = [{transform_indices = @transform_0, window_bounds = array<i64: 2048, 128>}, {pipeline_mode = #tpu.pipeline_mode<synchronous>, transform_indices = @transform_1, window_bounds = array<i64: 128, 128>}, {transform_indices = @transform_2, window_bounds = array<i64: 2048, 128>}]} {
    %c0 = arith.constant 0 : index
    %c0_0 = arith.constant 0 : index
    %0 = vector.load %arg1[%c0, %c0_0] : memref<2048x128xbf16, #tpu.memory_space<vmem>>, vector<2048x128xbf16>
    %c0_1 = arith.constant 0 : index
    %c0_2 = arith.constant 0 : index
    %1 = vector.load %arg2[%c0_1, %c0_2] : memref<128x128xbf16, #tpu.memory_space<vmem>>, vector<128x128xbf16>
    %cst = arith.constant dense<0.000000e+00> : vector<2048x128xf32>
    %2 = tpu.matmul %0, %1, %cst {dimension_numbers = #tpu.dot_dimension_numbers<[1], [0], [0], [1], [0, 0, 1, 1], [], []>} : vector<2048x128xbf16>, vector<128x128xbf16>, vector<2048x128xf32> -> vector<2048x128xf32>
    %3 = math.tanh %2 : vector<2048x128xf32>
    %c0_3 = arith.constant 0 : index
    %c0_4 = arith.constant 0 : index
    %4 = vector.load %arg3[%c0_3, %c0_4] : memref<2048x128xf32, #tpu.memory_space<vmem>>, vector<2048x128xf32>
    tpu.vector_store %arg3[%c0_3, %c0_4], %3 {strides = array<i32>} : memref<2048x128xf32, #tpu.memory_space<vmem>>, vector<2048x128xf32>,
    return
  }
  func.func @transform_0(%arg0: i32) -> (i32, i32) {
    %c0_i32 = arith.constant 0 : i32
    %c0_i32_0 = arith.constant 0 : i32
    return %arg0, %c0_i32 : i32, i32
  }
  func.func @transform_1(%arg0: i32) -> (i32, i32) {
    %c0_i32 = arith.constant 0 : i32
    %c0_i32_0 = arith.constant 0 : i32
    %c0_i32_1 = arith.constant 0 : i32
    return %c0_i32, %c0_i32_0 : i32, i32
  }
  func.func @transform_2(%arg0: i32) -> (i32, i32) {
    %c0_i32 = arith.constant 0 : i32
    %c0_i32_0 = arith.constant 0 : i32
    return %arg0, %c0_i32 : i32, i32
  }
}

</mosaic_0001>

<bundles_post_ra>
// kernel: _lambda_.9
= control target key start
LH: loop header
LB: loop body
LE: loop exit
PB: predicated region body
PF: predicated region fallthrough
CT: control target
= control target key end

     0   :  { %9 = vsyncpa [#allocation3], 0  ;;  %s417_s12 = smov [#allocation2]   ;;  %s473_s0 = inlined_call_operand.vmem [shape: bf16[32,256], index: 0, kind: input, shape index: {}]   ;;  %s474_s1 = inlined_call_operand.hbm [shape: bf16[256,128], index: 1, kind: input, shape index: {}]   ;;  %s475_s2 = inlined_call_operand.vmem [shape: bf16[32,128], index: 2, kind: output, shape index: {0}]   ;;  %s476_s3 = inlined_call_operand.vmem [shape: f32[1,8,128], index: 3, kind: output, shape index: {1}]  }
   0x1   :  { %s17_s13 = sshll.u32 %s417_s12, 4  ;;  %s393_s16 = scalar_lea.hbm %s474_s1, 2048  ;;  %s18_s13 = int_to_ptr.vmem [resolvable:$true] %s17_s13 }
   0x2   :  { %p394_p0 = scmp.ne.s32.totalorder %s474_s1, %s393_s16  ;;  %p397_p1 = scmp.lt.u32.totalorder %s393_s16, %s474_s1 }
   0x4   :  { %p399_p2 = pnand %p397_p1, %p394_p0 }
   0x6   :  { %402 = shalt.err (!%p399_p2)
}
   0x7   :  { %s403_s21 = scalar_lea.vmem %s18_s13, 2048  ;;  %p408_p4 = scmp.lt.s32.totalorder %s18_s13, %s18_s13 }
   0x8   :  { %p404_p3 = scmp.ne.s32.totalorder %s18_s13, %s403_s21  ;;  %p409_p5 = scmp.lt.s32.totalorder %s403_s21, %s403_s21 }
   0xa   :  { %p410_p6 = por %p409_p5, %p408_p4 }
   0xc   :  { %p411_p7 = pnand %p410_p6, %p404_p3 }
   0xe   :  { %414 = shalt.err (!%p411_p7)
}
   0xf   :  { %s418_s22 = smov 64   ;;  %s419_s23 = smov 4  }
  0x10   :  { %23 = dma.hbm_to_vmem [thread:$0]  %s474_s1, 2048, %s18_s13, [#allocation3], %s418_s22, %s418_s22, %s419_s23  }
  0x11   :  { %415 = dma.done.wait [#allocation3], 2048  }
  0x12   :  { %416 = vsyncadd [#allocation3], 4294965248  ;;  %v371_v0 = vld [vmem:[#allocation2 + $0x40] sm:$0xff]   ;;  %v373_v2 = vld [vmem:[#allocation2 + $0x48] sm:$0xff]   ;;  %vm251_vm0 = vcmask 1040384   ;;  %vm253_vm1 = vcmask 1041408  }
  0x13   :  { %v372_v1 = vld [vmem:[#allocation2] sm:$0xff]   ;;  %324 = vmatprep.subr.bf16.mxu0 %v371_v0  ;;  %352 = vmatprep.subr.bf16.mxu1 %v371_v0  ;;  %v374_v3 = vld [vmem:[#allocation2 + $0x8] sm:$0xff]   ;;  %v375_v4 = vld [vmem:[#allocation2 + $0x50] sm:$0xff]  }
  0x14   :  { %325 = vmatpush3.bf16.msra.mxu0 %v372_v1  ;;  %360 = vmatpush3.bf16.msra.mxu1 %v372_v1  ;;  %v376_v5 = vld [vmem:[#allocation2 + $0x10] sm:$0xff]   ;;  %v377_v6 = vld [vmem:[#allocation2 + $0x58] sm:$0xff]   ;;  %v379_v8 = vld [vmem:[#allocation2 + $0x60] sm:$0xff]  }
  0x15   :  { %326 = vmatprep.subr.bf16.mxu0 %v373_v2  ;;  %353 = vmatprep.subr.bf16.mxu1 %v373_v2  ;;  %v378_v7 = vld [vmem:[#allocation2 + $0x18] sm:$0xff]   ;;  %v380_v9 = vld [vmem:[#allocation2 + $0x20] sm:$0xff]   ;;  %v381_v10 = vld [vmem:[#allocation2 + $0x68] sm:$0xff]  }
  0x16   :  { %v389_v11 = vld [vmem:[%s473_s0 + $0x4] ss:$8 sps:$4 sm:$0xff]   ;;  %v392_v12 = vld [vmem:[%s473_s0 + $0x14] ss:$8 sps:$4 sm:$0xff]   ;;  %v387_v18 = vld [vmem:[%s473_s0] ss:$8 sps:$4 sm:$0xff]  }
  0x17   :  { %v382_v13 = vld [vmem:[#allocation2 + $0x28] sm:$0xff]   ;;  %v383_v14 = vld [vmem:[#allocation2 + $0x70] sm:$0xff]   ;;  %212 = vmatprep.mubr.bf16.mxu0 %v389_v11  ;;  %220 = vmatprep.mubr.bf16.mxu1 %v392_v12  ;;  %v385_v16 = vld [vmem:[#allocation2 + $0x78] sm:$0xff]  }
  0x18   :  { %327 = vmatpush3.bf16.msra.mxu0 %v374_v3  ;;  %361 = vmatpush3.bf16.msra.mxu1 %v374_v3  ;;  %v384_v15 = vld [vmem:[#allocation2 + $0x30] sm:$0xff]   ;;  %v386_v17 = vld [vmem:[#allocation2 + $0x38] sm:$0xff]  }
  0x19   :  { %328 = vmatprep.subr.bf16.mxu0 %v375_v4  ;;  %354 = vmatprep.subr.bf16.mxu1 %v375_v4  ;;  %v390_v19 = vld [vmem:[%s473_s0 + $0x10] ss:$8 sps:$4 sm:$0xff]  }
  0x1c   :  { %329 = vmatpush3.bf16.msra.mxu0 %v376_v5  ;;  %362 = vmatpush3.bf16.msra.mxu1 %v376_v5 }
  0x1d   :  { %330 = vmatprep.subr.bf16.mxu0 %v377_v6  ;;  %355 = vmatprep.subr.bf16.mxu1 %v377_v6 }
  0x20   :  { %331 = vmatpush3.bf16.msra.mxu0 %v378_v7  ;;  %363 = vmatpush3.bf16.msra.mxu1 %v378_v7 }
  0x21   :  { %332 = vmatprep.subr.bf16.mxu0 %v379_v8  ;;  %356 = vmatprep.subr.bf16.mxu1 %v379_v8 }
  0x24   :  { %333 = vmatpush3.bf16.msra.mxu0 %v380_v9  ;;  %364 = vmatpush3.bf16.msra.mxu1 %v380_v9 }
  0x25   :  { %334 = vmatprep.subr.bf16.mxu0 %v381_v10  ;;  %357 = vmatprep.subr.bf16.mxu1 %v381_v10 }
  0x28   :  { %335 = vmatpush3.bf16.msra.mxu0 %v382_v13  ;;  %365 = vmatpush3.bf16.msra.mxu1 %v382_v13 }
  0x29   :  { %336 = vmatprep.subr.bf16.mxu0 %v383_v14  ;;  %358 = vmatprep.subr.bf16.mxu1 %v383_v14 }
  0x2c   :  { %337 = vmatpush3.bf16.msra.mxu0 %v384_v15  ;;  %366 = vmatpush3.bf16.msra.mxu1 %v384_v15 }
  0x2d   :  { %338 = vmatprep.subr.bf16.mxu0 %v385_v16  ;;  %359 = vmatprep.subr.bf16.mxu1 %v385_v16 }
  0x30   :  { %339 = vmatpush3.bf16.msra.mxu0 %v386_v17  ;;  %367 = vmatpush3.bf16.msra.mxu1 %v386_v17 }
  0x33   :  { %213 = vmatmul.mubr.bf16.vlgmr.msra.gmra.mrb[0].mxu0 %v387_v18  ;;  %221 = vmatmul.mubr.bf16.vlgmr.msra.gmra.mrb[0].mxu1 %v390_v19 }
 0x106   :  { %v340_v20 = vpop.f32.mrb[0].mxu0  ;;  %v346_v21 = vpop.f32.mrb[0].mxu1 }
 0x107   :  { %v341_v22 = vpop.f32.mrb[1].mxu0  ;;  %v347_v23 = vpop.f32.mrb[1].mxu1 }
 0x108   :  { %v342_v24 = vadd.f32 %v341_v22, %v340_v20  ;;  %v343_v25 = vpop.f32.mrb[2].mxu0  ;;  %v348_v26 = vadd.f32 %v347_v23, %v346_v21  ;;  %v349_v27 = vpop.f32.mrb[2].mxu1 }
 0x109   :  { %v344_v28 = vpop.f32.mrb[3].mxu0  ;;  %v350_v29 = vpop.f32.mrb[3].mxu1 }
 0x10a   :  { %v345_v30 = vadd.f32 %v344_v28, %v343_v25  ;;  %v351_v31 = vadd.f32 %v350_v29, %v349_v27  ;;  %v238_v32 = vmul.f32 %v342_v24, %v342_v24  ;;  %v240_v33 = vmul.f32 %v348_v26, %v348_v26 }
 0x10c   :  { %v229_v34 = vadd.f32 %v345_v30, %v342_v24  ;;  %v239_v35 = vmul.f32 %v345_v30, %v345_v30  ;;  %v316_v36 = vpack.c.bf16 %v345_v30, %v342_v24  ;;  %v321_v37 = vpack.c.bf16 %v351_v31, %v348_v26 }
 0x10d   :  { %v241_v41 = vmul.f32 %v351_v31, %v351_v31 }
 0x10e   :  { %v242_v38 = vadd.f32 %v239_v35, %v238_v32  ;;  %317 = vst [vmem:[%s475_s2] sm:$0xff] %v316_v36   ;;  %v230_v39 = vadd.f32 %v348_v26, %v229_v34  ;;  %323 = vst [vmem:[%s475_s2 + $0x8] sm:$0xff] %v321_v37  }
 0x110   :  { %v231_v40 = vadd.f32 %v351_v31, %v230_v39  ;;  %v243_v42 = vadd.f32 %v242_v38, %v240_v33 }
 0x112   :  { %v232_v43 = vrot.slane %v231_v40, 4  ;;  %v244_v44 = vadd.f32 %v243_v42, %v241_v41 }
 0x114   :  { %v233_v45 = vadd.f32 %v232_v43, %v231_v40  ;;  %v245_v46 = vrot.slane %v244_v44, 4 }
 0x116   :  { %v234_v47 = vrot.slane %v233_v45, 2  ;;  %v246_v48 = vadd.f32 %v245_v46, %v244_v44 }
 0x118   :  { %v235_v49 = vadd.f32 %v234_v47, %v233_v45  ;;  %v247_v50 = vrot.slane %v246_v48, 2 }
 0x11a   :  { %v236_v51 = vrot.slane %v235_v49, 1  ;;  %v248_v52 = vadd.f32 %v247_v50, %v246_v48 }
 0x11c   :  { %v249_v53 = vrot.slane %v248_v52, 1  ;;  %v237_v54 = vadd.f32 %v236_v51, %v235_v49 }
 0x11e   :  { %v250_v55 = vadd.f32 %v249_v53, %v248_v52 }
 0x120   :  { %v252_v56 = vsel %vm251_vm0, %v237_v54, %v250_v55 }
 0x121   :  { %v254_v57 = vsel %vm253_vm1, %v252_v56, 0.0 }
 0x122   :  { %255 = vst [vmem:[%s476_s3] sm:$0xff] %v254_v57 }
 0x123   :  { %284 = vsyncpa [#allocation3], 1 }

// kernel: _lambda_.10
= control target key start
LH: loop header
LB: loop body
LE: loop exit
PB: predicated region body
PF: predicated region fallthrough
CT: control target
= control target key end

     0   :  { %9 = vsyncpa [#allocation3], 0  ;;  %s280_s0 = inlined_call_operand.vmem [shape: bf16[32,128], index: 0, kind: input, shape index: {}]   ;;  %s281_s1 = inlined_call_operand.vmem [shape: f32[1,8,128], index: 1, kind: input, shape index: {}]   ;;  %s282_s2 = inlined_call_operand.hbm [shape: f32[1,128], index: 2, kind: input, shape index: {}]   ;;  %s283_s3 = inlined_call_operand.hbm [shape: f32[1,128], index: 3, kind: input, shape index: {}]   ;;  %s284_s4 = inlined_call_operand.vmem [shape: bf16[32,128], index: 4, kind: output, shape index: {}]  }
   0x1   :  { %10 = vsyncpa [#allocation5], 0  ;;  %s213_s15 = smov [#allocation2]   ;;  %s214_s17 = smov [#allocation4]  }
   0x2   :  { %s21_s16 = sshll.u32 %s213_s15, 4  ;;  %s31_s18 = sshll.u32 %s214_s17, 4  ;;  %s22_s16 = int_to_ptr.vmem [resolvable:$true] %s21_s16  ;;  %s32_s18 = int_to_ptr.vmem [resolvable:$true] %s31_s18 }
   0x3   :  { %s165_s21 = scalar_lea.hbm %s282_s2, 16 }
   0x4   :  { %p166_p0 = scmp.ne.s32.totalorder %s282_s2, %s165_s21  ;;  %p169_p1 = scmp.lt.u32.totalorder %s165_s21, %s282_s2 }
   0x6   :  { %p171_p2 = pnand %p169_p1, %p166_p0 }
   0x8   :  { %174 = shalt.err (!%p171_p2)
}
   0x9   :  { %s175_s26 = scalar_lea.vmem %s22_s16, 16  ;;  %s179_s27 = scalar_lea.vmem %s22_s16, 32 }
   0xa   :  { %p176_p3 = scmp.ne.s32.totalorder %s22_s16, %s175_s26  ;;  %p180_p4 = scmp.lt.s32.totalorder %s22_s16, %s22_s16 }
   0xb   :  { %p181_p5 = scmp.lt.s32.totalorder %s179_s27, %s175_s26 }
   0xd   :  { %p182_p6 = por %p181_p5, %p180_p4 }
   0xf   :  { %p183_p7 = pnand %p182_p6, %p176_p3 }
  0x11   :  { %186 = shalt.err (!%p183_p7)
}
  0x12   :  { %24 = dma.hbm_to_vmem [thread:$0]  %s282_s2, 16, %s22_s16, [#allocation3]  }
  0x13   :  { %s187_s6 = scalar_lea.hbm %s283_s3, 16 }
  0x14   :  { %p188_p8 = scmp.ne.s32.totalorder %s283_s3, %s187_s6  ;;  %p191_p9 = scmp.lt.u32.totalorder %s187_s6, %s283_s3 }
  0x16   :  { %p193_p10 = pnand %p191_p9, %p188_p8 }
  0x18   :  { %196 = shalt.err (!%p193_p10)
}
  0x19   :  { %s197_s11 = scalar_lea.vmem %s32_s18, 16  ;;  %s201_s12 = scalar_lea.vmem %s32_s18, 32 }
  0x1a   :  { %p198_p11 = scmp.ne.s32.totalorder %s32_s18, %s197_s11  ;;  %p202_p12 = scmp.lt.s32.totalorder %s32_s18, %s32_s18 }
  0x1b   :  { %p203_p13 = scmp.lt.s32.totalorder %s201_s12, %s197_s11 }
  0x1d   :  { %p204_p0 = por %p203_p13, %p202_p12 }
  0x1f   :  { %p205_p1 = pnand %p204_p0, %p198_p11 }
  0x21   :  { %208 = shalt.err (!%p205_p1)
}
  0x22   :  { %34 = dma.hbm_to_vmem [thread:$0]  %s283_s3, 16, %s32_s18, [#allocation5]  }
  0x23   :  { %209 = dma.done.wait [#allocation3], 16  }
  0x24   :  { %210 = vsyncadd [#allocation3], 4294967280 }
  0x25   :  { %211 = dma.done.wait [#allocation5], 16  }
  0x26   :  { %212 = vsyncadd [#allocation5], 4294967280  ;;  %v41_v0 = vld [vmem:[%s281_s1] sm:$0xff]  ;;  %v215_v7 = vmov 1966171168   ;;  %v57_v9 = vlaneseq  ;;  %v158_v18 = vld [vmem:[%s280_s0 + $0x8] sm:$0xff]  }
  0x27   :  { %v43_v1 = vmul.f32 0.03125, %v41_v0  ;;  %v55_v8 = vunpack.c.l.s4 %v215_v7  ;;  %v50_v16 = vld [vmem:[#allocation2] sm:$0x1]  ;;  %v146_v24 = vunpack.c.l.bf16 %v158_v18  ;;  %v71_v25 = vld [vmem:[#allocation4] sm:$0x1]  ;;  %v147_v26 = vunpack.c.h.bf16 %v158_v18 }
  0x28   :  { %v58_v11 = vshrl.u32 %v57_v9, 7  ;;  %v141_v17 = vld [vmem:[%s280_s0] sm:$0xff]  }
  0x29   :  { %v44_v2 = vmul.f32 %v43_v1, %v43_v1  ;;  %v56_v10 = vunpack.c.0.s8 %v55_v8  ;;  %v142_v22 = vunpack.c.l.bf16 %v141_v17  ;;  %v143_v23 = vunpack.c.h.bf16 %v141_v17 }
  0x2a   :  { %v85_v20 = vsub.s32 0, %v58_v11 }
  0x2b   :  { %v46_v3 = vrot.slane %v44_v2, 7  ;;  %v59_v12 = vsub.s32 %v56_v10, %v58_v11 }
  0x2d   :  { %v48_v4 = vsub.f32 %v43_v1, %v46_v3 }
  0x2f   :  { %v49_v5 = vmax.f32 %v48_v4, 0.0 }
  0x31   :  { %v51_v6 = vadd.f32 1e-05, %v49_v5 }
  0x33   :  { %163 = vrsqrt.f32 %v51_v6 }
  0x3d   :  { %v164_v13 = vpop.eup %163 }
  0x3e   :  { %v60_v14 = vrot.slane %v164_v13, %v59_v12 }
  0x40   :  { %v61_v15 = vcombine.high %v60_v14, %v60_v14 }
  0x42   :  { %v68_v19 = vrot.slane %v61_v15, %v59_v12 }
  0x44   :  { %v70_v21 = vmul.f32 %v68_v19, %v50_v16 }
  0x46   :  { %v72_v27 = vmul.f32 %v70_v21, %v43_v1  ;;  %v86_v28 = vrot.slane %v70_v21, %v85_v20 }
  0x48   :  { %v73_v29 = vsub.f32 %v71_v25, %v72_v27  ;;  %v88_v30 = vmul.f32 %v142_v22, %v86_v28  ;;  %v89_v31 = vmul.f32 %v143_v23, %v86_v28  ;;  %v90_v32 = vmul.f32 %v146_v24, %v86_v28 }
  0x49   :  { %v91_v33 = vmul.f32 %v147_v26, %v86_v28 }
  0x4a   :  { %v96_v34 = vrot.slane %v73_v29, %v85_v20 }
  0x4c   :  { %v98_v35 = vadd.f32 %v96_v34, %v88_v30  ;;  %v99_v36 = vadd.f32 %v96_v34, %v89_v31  ;;  %v100_v37 = vadd.f32 %v96_v34, %v90_v32  ;;  %v101_v38 = vadd.f32 %v96_v34, %v91_v33 }
  0x4e   :  { %v102_v39 = vmax.f32 %v98_v35, 0.0  ;;  %v103_v40 = vmax.f32 %v99_v36, 0.0  ;;  %v104_v41 = vmax.f32 %v100_v37, 0.0  ;;  %v105_v42 = vmax.f32 %v101_v38, 0.0 }
  0x50   :  { %v151_v43 = vpack.c.bf16 %v103_v40, %v102_v39  ;;  %v156_v44 = vpack.c.bf16 %v105_v42, %v104_v41 }
  0x52   :  { %152 = vst [vmem:[%s284_s4] sm:$0xff] %v151_v43   ;;  %159 = vst [vmem:[%s284_s4 + $0x8] sm:$0xff] %v156_v44  }
  0x53   :  { %130 = vsyncpa [#allocation3], 1 }
  0x54   :  { %131 = vsyncpa [#allocation5], 1 }

// kernel: _lambda_.12
= control target key start
LH: loop header
LB: loop body
LE: loop exit
PB: predicated region body
PF: predicated region fallthrough
CT: control target
= control target key end

     0   :  { %v347_v7 = vmov 1966171168   ;;  %v33_v9 = vlaneseq  ;;  %s434_s1 = inlined_call_operand.vmem [shape: f32[1,8,128], index: 1, kind: input, shape index: {}]   ;;  %s435_s0 = inlined_call_operand.vmem [shape: bf16[128,128], index: 0, kind: input, shape index: {}]   ;;  %s436_s2 = inlined_call_operand.vmem [shape: f32[1,128], index: 2, kind: input, shape index: {}]   ;;  %s437_s3 = inlined_call_operand.vmem [shape: f32[1,128], index: 3, kind: input, shape index: {}]   ;;  %s438_s4 = inlined_call_operand.vmem [shape: bf16[128,128], index: 4, kind: output, shape index: {}]  }
   0x1   :  { %v17_v0 = vld [vmem:[%s434_s1] sm:$0xff]  ;;  %v31_v8 = vunpack.c.l.s4 %v347_v7  ;;  %v330_v17 = vld [vmem:[%s435_s0 + $0x8] sm:$0xff]   ;;  %v331_v19 = vld [vmem:[%s435_s0 + $0x10] sm:$0xff]  }
   0x2   :  { %v19_v1 = vmul.f32 0.0078125, %v17_v0  ;;  %v34_v11 = vshrl.u32 %v33_v9, 7  ;;  %v259_v16 = vld [vmem:[%s435_s0] sm:$0xff]   ;;  %v332_v22 = vld [vmem:[%s435_s0 + $0x18] sm:$0xff]   ;;  %v264_v26 = vunpack.c.l.bf16 %v330_v17  ;;  %v334_v27 = vld [vmem:[%s435_s0 + $0x28] sm:$0xff]   ;;  %v265_v29 = vunpack.c.h.bf16 %v330_v17 }
   0x3   :  { %v32_v10 = vunpack.c.0.s8 %v31_v8  ;;  %v26_v18 = vld [vmem:[%s436_s2] sm:$0x1]  ;;  %v260_v24 = vunpack.c.l.bf16 %v259_v16  ;;  %v261_v25 = vunpack.c.h.bf16 %v259_v16  ;;  %v268_v30 = vunpack.c.l.bf16 %v331_v19  ;;  %v335_v32 = vld [vmem:[%s435_s0 + $0x30] sm:$0xff]   ;;  %v403_v33 = vld [vmem:[%s435_s0 + $0x38] sm:$0xff]  }
   0x4   :  { %v20_v2 = vmul.f32 %v19_v1, %v19_v1  ;;  %v85_v21 = vsub.s32 0, %v34_v11  ;;  %v333_v23 = vld [vmem:[%s435_s0 + $0x20] sm:$0xff]   ;;  %v269_v31 = vunpack.c.h.bf16 %v331_v19  ;;  %v272_v35 = vunpack.c.l.bf16 %v332_v22 }
   0x5   :  { %v35_v12 = vsub.s32 %v32_v10, %v34_v11  ;;  %v47_v34 = vld [vmem:[%s437_s3] sm:$0x1]  ;;  %v273_v36 = vunpack.c.h.bf16 %v332_v22  ;;  %v276_v37 = vunpack.c.l.bf16 %v333_v23  ;;  %v277_v38 = vunpack.c.h.bf16 %v333_v23 }
   0x6   :  { %v22_v3 = vrot.slane %v20_v2, 7  ;;  %v280_v41 = vunpack.c.l.bf16 %v334_v27  ;;  %v281_v42 = vunpack.c.h.bf16 %v334_v27  ;;  %v284_v43 = vunpack.c.l.bf16 %v335_v32 }
   0x7   :  { %v285_v44 = vunpack.c.h.bf16 %v335_v32  ;;  %v288_v45 = vunpack.c.l.bf16 %v403_v33  ;;  %v289_v46 = vunpack.c.h.bf16 %v403_v33 }
   0x8   :  { %v24_v4 = vsub.f32 %v19_v1, %v22_v3 }
   0xa   :  { %v25_v5 = vmax.f32 %v24_v4, 0.0 }
   0xc   :  { %v27_v6 = vadd.f32 1e-05, %v25_v5 }
   0xe   :  { %345 = vrsqrt.f32 %v27_v6 }
  0x18   :  { %v346_v13 = vpop.eup %345 }
  0x19   :  { %v36_v14 = vrot.slane %v346_v13, %v35_v12 }
  0x1b   :  { %v37_v15 = vcombine.high %v36_v14, %v36_v14 }
  0x1d   :  { %v44_v20 = vrot.slane %v37_v15, %v35_v12 }
  0x1f   :  { %v46_v28 = vmul.f32 %v44_v20, %v26_v18 }
  0x21   :  { %v48_v39 = vmul.f32 %v46_v28, %v19_v1  ;;  %v86_v40 = vrot.slane %v46_v28, %v85_v21 }
  0x23   :  { %v49_v47 = vsub.f32 %v47_v34, %v48_v39  ;;  %v88_v48 = vmul.f32 %v260_v24, %v86_v40  ;;  %v89_v49 = vmul.f32 %v261_v25, %v86_v40  ;;  %v90_v50 = vmul.f32 %v264_v26, %v86_v40 }
  0x24   :  { %v91_v51 = vmul.f32 %v265_v29, %v86_v40  ;;  %v92_v52 = vmul.f32 %v268_v30, %v86_v40  ;;  %v93_v53 = vmul.f32 %v269_v31, %v86_v40  ;;  %v94_v54 = vmul.f32 %v272_v35, %v86_v40 }
  0x25   :  { %v108_v55 = vrot.slane %v49_v47, %v85_v21  ;;  %v95_v56 = vmul.f32 %v273_v36, %v86_v40  ;;  %v96_v57 = vmul.f32 %v276_v37, %v86_v40  ;;  %v97_v58 = vmul.f32 %v277_v38, %v86_v40 }
  0x26   :  { %v98_v59 = vmul.f32 %v280_v41, %v86_v40  ;;  %v99_v60 = vmul.f32 %v281_v42, %v86_v40  ;;  %v100_v61 = vmul.f32 %v284_v43, %v86_v40  ;;  %v101_v62 = vmul.f32 %v285_v44, %v86_v40 }
  0x27   :  { %v110_v63 = vadd.f32 %v108_v55, %v88_v48  ;;  %v111_v0 = vadd.f32 %v108_v55, %v89_v49  ;;  %v112_v1 = vadd.f32 %v108_v55, %v90_v50  ;;  %v113_v2 = vadd.f32 %v108_v55, %v91_v51 }
  0x28   :  { %v114_v3 = vadd.f32 %v108_v55, %v92_v52  ;;  %v115_v4 = vadd.f32 %v108_v55, %v93_v53  ;;  %v116_v5 = vadd.f32 %v108_v55, %v94_v54  ;;  %v117_v6 = vadd.f32 %v108_v55, %v95_v56 }
  0x29   :  { %v126_v7 = vmax.f32 %v110_v63, 0.0  ;;  %v127_v8 = vmax.f32 %v111_v0, 0.0  ;;  %v128_v9 = vmax.f32 %v112_v1, 0.0  ;;  %v129_v10 = vmax.f32 %v113_v2, 0.0 }
  0x2a   :  { %v130_v11 = vmax.f32 %v114_v3, 0.0  ;;  %v131_v12 = vmax.f32 %v115_v4, 0.0  ;;  %v132_v13 = vmax.f32 %v116_v5, 0.0  ;;  %v133_v14 = vmax.f32 %v117_v6, 0.0 }
  0x2b   :  { %v293_v15 = vpack.c.bf16 %v127_v8, %v126_v7  ;;  %v298_v16 = vpack.c.bf16 %v129_v10, %v128_v9  ;;  %v118_v17 = vadd.f32 %v108_v55, %v96_v57  ;;  %v119_v18 = vadd.f32 %v108_v55, %v97_v58 }
  0x2c   :  { %v303_v19 = vpack.c.bf16 %v131_v12, %v130_v11  ;;  %v308_v20 = vpack.c.bf16 %v133_v14, %v132_v13  ;;  %v120_v21 = vadd.f32 %v108_v55, %v98_v59  ;;  %v121_v22 = vadd.f32 %v108_v55, %v99_v60 }
  0x2d   :  { %294 = vst [vmem:[%s438_s4] sm:$0xff] %v293_v15   ;;  %337 = vst [vmem:[%s438_s4 + $0x8] sm:$0xff] %v298_v16   ;;  %v134_v23 = vmax.f32 %v118_v17, 0.0  ;;  %v135_v24 = vmax.f32 %v119_v18, 0.0  ;;  %v122_v25 = vadd.f32 %v108_v55, %v100_v61  ;;  %v123_v26 = vadd.f32 %v108_v55, %v101_v62 }
  0x2e   :  { %338 = vst [vmem:[%s438_s4 + $0x10] sm:$0xff] %v303_v19   ;;  %339 = vst [vmem:[%s438_s4 + $0x18] sm:$0xff] %v308_v20   ;;  %v136_v27 = vmax.f32 %v120_v21, 0.0  ;;  %v137_v28 = vmax.f32 %v121_v22, 0.0  ;;  %v102_v29 = vmul.f32 %v288_v45, %v86_v40  ;;  %v103_v30 = vmul.f32 %v289_v46, %v86_v40 }
  0x2f   :  { %v313_v31 = vpack.c.bf16 %v135_v24, %v134_v23  ;;  %v138_v32 = vmax.f32 %v122_v25, 0.0  ;;  %v139_v33 = vmax.f32 %v123_v26, 0.0 }
  0x30   :  { %v318_v34 = vpack.c.bf16 %v137_v28, %v136_v27  ;;  %v124_v35 = vadd.f32 %v108_v55, %v102_v29  ;;  %v125_v36 = vadd.f32 %v108_v55, %v103_v30 }
  0x31   :  { %340 = vst [vmem:[%s438_s4 + $0x20] sm:$0xff] %v313_v31   ;;  %v323_v37 = vpack.c.bf16 %v139_v33, %v138_v32 }
  0x32   :  { %341 = vst [vmem:[%s438_s4 + $0x28] sm:$0xff] %v318_v34   ;;  %v140_v38 = vmax.f32 %v124_v35, 0.0  ;;  %v141_v39 = vmax.f32 %v125_v36, 0.0 }
  0x33   :  { %342 = vst [vmem:[%s438_s4 + $0x30] sm:$0xff] %v323_v37  }
  0x34   :  { %v328_v40 = vpack.c.bf16 %v141_v39, %v140_v38 }
  0x36   :  { %343 = vst [vmem:[%s438_s4 + $0x38] sm:$0xff] %v328_v40  }

// kernel: _lambda_.11
= control target key start
LH: loop header
LB: loop body
LE: loop exit
PB: predicated region body
PF: predicated region fallthrough
CT: control target
= control target key end

     0   :  { %9 = vsyncpa [#allocation3], 0  ;;  %s2018_s12 = smov [#allocation2]   ;;  %s2320_s0 = inlined_call_operand.vmem [shape: bf16[128,1024], index: 0, kind: input, shape index: {}]   ;;  %s2321_s1 = inlined_call_operand.hbm [shape: bf16[1024,128], index: 1, kind: input, shape index: {}]   ;;  %s2322_s2 = inlined_call_operand.vmem [shape: bf16[128,128], index: 2, kind: output, shape index: {0}]   ;;  %s2323_s3 = inlined_call_operand.vmem [shape: f32[1,8,128], index: 3, kind: output, shape index: {1}]  }
   0x1   :  { %s17_s13 = sshll.u32 %s2018_s12, 4  ;;  %s1994_s16 = scalar_lea.hbm %s2321_s1, 8192  ;;  %s18_s13 = int_to_ptr.vmem [resolvable:$true] %s17_s13 }
   0x2   :  { %p1995_p0 = scmp.ne.s32.totalorder %s2321_s1, %s1994_s16  ;;  %p1998_p1 = scmp.lt.u32.totalorder %s1994_s16, %s2321_s1 }
   0x4   :  { %p2000_p2 = pnand %p1998_p1, %p1995_p0 }
   0x6   :  { %2003 = shalt.err (!%p2000_p2)
}
   0x7   :  { %s2004_s21 = scalar_lea.vmem %s18_s13, 8192  ;;  %p2009_p4 = scmp.lt.s32.totalorder %s18_s13, %s18_s13 }
   0x8   :  { %p2005_p3 = scmp.ne.s32.totalorder %s18_s13, %s2004_s21  ;;  %p2010_p5 = scmp.lt.s32.totalorder %s2004_s21, %s2004_s21 }
   0xa   :  { %p2011_p6 = por %p2010_p5, %p2009_p4 }
   0xc   :  { %p2012_p7 = pnand %p2011_p6, %p2005_p3 }
   0xe   :  { %2015 = shalt.err (!%p2012_p7)
}
   0xf   :  { %s2019_s22 = smov 64   ;;  %s2020_s23 = smov 4  }
  0x10   :  { %23 = dma.hbm_to_vmem [thread:$0]  %s2321_s1, 8192, %s18_s13, [#allocation3], %s2019_s22, %s2019_s22, %s2020_s23  }
  0x11   :  { %2016 = dma.done.wait [#allocation3], 8192  }
  0x12   :  { %2017 = vsyncadd [#allocation3], 4294959104  ;;  %v1930_v0 = vld [vmem:[#allocation2 + $0x40] sm:$0xff]   ;;  %v1934_v4 = vld [vmem:[#allocation2 + $0x48] sm:$0xff]   ;;  %vm1370_vm0 = vcmask 1040384   ;;  %vm1372_vm1 = vcmask 1041408  }
  0x13   :  { %v1931_v1 = vld [vmem:[#allocation2 + $0xc0] sm:$0xff]   ;;  %1671 = vmatprep.subr.bf16.mxu0 %v1930_v0  ;;  %v1935_v5 = vld [vmem:[#allocation2 + $0xc8] sm:$0xff]   ;;  %v1938_v8 = vld [vmem:[#allocation2 + $0x50] sm:$0xff]  }
  0x14   :  { %v1932_v2 = vld [vmem:[#allocation2] sm:$0xff]   ;;  %1735 = vmatprep.subr.bf16.mxu1 %v1931_v1  ;;  %v1936_v6 = vld [vmem:[#allocation2 + $0x8] sm:$0xff]   ;;  %v1939_v9 = vld [vmem:[#allocation2 + $0xd0] sm:$0xff]  }
  0x15   :  { %v1933_v3 = vld [vmem:[#allocation2 + $0x80] sm:$0xff]   ;;  %1672 = vmatpush3.bf16.msra.mxu0 %v1932_v2  ;;  %v1937_v7 = vld [vmem:[#allocation2 + $0x88] sm:$0xff]   ;;  %v1940_v10 = vld [vmem:[#allocation2 + $0x10] sm:$0xff]  }
  0x16   :  { %1736 = vmatpush3.bf16.msra.mxu1 %v1933_v3  ;;  %1673 = vmatprep.subr.bf16.mxu0 %v1934_v4  ;;  %v1941_v11 = vld [vmem:[#allocation2 + $0x90] sm:$0xff]   ;;  %v1942_v12 = vld [vmem:[#allocation2 + $0x58] sm:$0xff]   ;;  %v1946_v16 = vld [vmem:[#allocation2 + $0x60] sm:$0xff]  }
  0x17   :  { %1737 = vmatprep.subr.bf16.mxu1 %v1935_v5  ;;  %v1943_v13 = vld [vmem:[#allocation2 + $0xd8] sm:$0xff]   ;;  %v1947_v17 = vld [vmem:[#allocation2 + $0xe0] sm:$0xff]   ;;  %v1950_v20 = vld [vmem:[#allocation2 + $0x68] sm:$0xff]  }
  0x18   :  { %v1944_v14 = vld [vmem:[#allocation2 + $0x18] sm:$0xff]   ;;  %v1948_v18 = vld [vmem:[#allocation2 + $0x20] sm:$0xff]   ;;  %v1951_v21 = vld [vmem:[#allocation2 + $0xe8] sm:$0xff]  }
  0x19   :  { %1674 = vmatpush3.bf16.msra.mxu0 %v1936_v6  ;;  %v1945_v15 = vld [vmem:[#allocation2 + $0x98] sm:$0xff]   ;;  %v1949_v19 = vld [vmem:[#allocation2 + $0xa0] sm:$0xff]   ;;  %v1952_v22 = vld [vmem:[#allocation2 + $0x28] sm:$0xff]  }
  0x1a   :  { %1738 = vmatpush3.bf16.msra.mxu1 %v1937_v7  ;;  %1675 = vmatprep.subr.bf16.mxu0 %v1938_v8  ;;  %v1953_v23 = vld [vmem:[#allocation2 + $0xa8] sm:$0xff]   ;;  %v1954_v24 = vld [vmem:[#allocation2 + $0x70] sm:$0xff]   ;;  %v1958_v28 = vld [vmem:[#allocation2 + $0x78] sm:$0xff]  }
  0x1b   :  { %1739 = vmatprep.subr.bf16.mxu1 %v1939_v9  ;;  %v1955_v25 = vld [vmem:[#allocation2 + $0xf0] sm:$0xff]   ;;  %v1959_v29 = vld [vmem:[#allocation2 + $0xf8] sm:$0xff]   ;;  %v28_v32 = vld [vmem:[%s2320_s0] sm:$0xff] }
  0x1c   :  { %v1956_v26 = vld [vmem:[#allocation2 + $0x30] sm:$0xff]   ;;  %v1960_v30 = vld [vmem:[#allocation2 + $0x38] sm:$0xff]   ;;  %v32_v33 = vld [vmem:[%s2320_s0 + $0x20] sm:$0xff] }
  0x1d   :  { %1676 = vmatpush3.bf16.msra.mxu0 %v1940_v10  ;;  %v1957_v27 = vld [vmem:[#allocation2 + $0xb0] sm:$0xff]   ;;  %v1961_v31 = vld [vmem:[#allocation2 + $0xb8] sm:$0xff]   ;;  %v29_v34 = vld [vmem:[%s2320_s0 + $0x8] sm:$0xff]  ;;  %v1464_v35 = vcombine.low %v28_v32, %v32_v33  ;;  %v1465_v36 = vcombine.high %v28_v32, %v32_v33 }
  0x1e   :  { %1740 = vmatpush3.bf16.msra.mxu1 %v1941_v11  ;;  %1677 = vmatprep.subr.bf16.mxu0 %v1942_v12  ;;  %v33_v37 = vld [vmem:[%s2320_s0 + $0x28] sm:$0xff]  ;;  %v1962_v40 = vld [vmem:[#allocation2 + $0x140] sm:$0xff]   ;;  %v1970_v62 = vld [vmem:[#allocation2 + $0x150] sm:$0xff]  }
  0x1f   :  { %1741 = vmatprep.subr.bf16.mxu1 %v1943_v13  ;;  %v1466_v38 = vcombine.low %v29_v34, %v33_v37  ;;  %v1467_v39 = vcombine.high %v29_v34, %v33_v37  ;;  %956 = vmatprep.mubr.bf16.mxu0 %v1465_v36  ;;  %v1963_v41 = vld [vmem:[#allocation2 + $0x100] sm:$0xff]   ;;  %v37_v47 = vld [vmem:[%s2320_s0 + $0x48] sm:$0xff]  ;;  %v1971_v63 = vld [vmem:[#allocation2 + $0x110] sm:$0xff]  }
  0x20   :  { %v1964_v42 = vld [vmem:[#allocation2 + $0x1c0] sm:$0xff]   ;;  %v41_v48 = vld [vmem:[%s2320_s0 + $0x68] sm:$0xff]  ;;  %v1972_v0 = vld [vmem:[#allocation2 + $0x1d0] sm:$0xff]  }
  0x21   :  { %1678 = vmatpush3.bf16.msra.mxu0 %v1944_v14  ;;  %1053 = vmatprep.mubr.bf16.mxu1 %v1467_v39  ;;  %v1965_v43 = vld [vmem:[#allocation2 + $0x180] sm:$0xff]   ;;  %v1475_v49 = vcombine.high %v37_v47, %v41_v48  ;;  %v1966_v50 = vld [vmem:[#allocation2 + $0x148] sm:$0xff]   ;;  %v1474_v53 = vcombine.low %v37_v47, %v41_v48  ;;  %v1973_v1 = vld [vmem:[#allocation2 + $0x190] sm:$0xff]  }
  0x22   :  { %1742 = vmatpush3.bf16.msra.mxu1 %v1945_v15  ;;  %1679 = vmatprep.subr.bf16.mxu0 %v1946_v16  ;;  %v36_v44 = vld [vmem:[%s2320_s0 + $0x40] sm:$0xff]  ;;  %v1967_v52 = vld [vmem:[#allocation2 + $0x108] sm:$0xff]   ;;  %v1974_v10 = vld [vmem:[#allocation2 + $0x158] sm:$0xff]  }
  0x23   :  { %1743 = vmatprep.subr.bf16.mxu1 %v1947_v17  ;;  %v40_v45 = vld [vmem:[%s2320_s0 + $0x60] sm:$0xff]  ;;  %v1968_v54 = vld [vmem:[#allocation2 + $0x1c8] sm:$0xff]   ;;  %v1975_v11 = vld [vmem:[#allocation2 + $0x118] sm:$0xff]  }
  0x24   :  { %v1473_v46 = vcombine.high %v36_v44, %v40_v45  ;;  %v1472_v51 = vcombine.low %v36_v44, %v40_v45  ;;  %v1969_v55 = vld [vmem:[#allocation2 + $0x188] sm:$0xff]   ;;  %v44_v56 = vld [vmem:[%s2320_s0 + $0x80] sm:$0xff]  ;;  %v1976_v12 = vld [vmem:[#allocation2 + $0x1d8] sm:$0xff]  }
  0x25   :  { %1680 = vmatpush3.bf16.msra.mxu0 %v1948_v18  ;;  %v48_v57 = vld [vmem:[%s2320_s0 + $0xa0] sm:$0xff]  ;;  %v45_v58 = vld [vmem:[%s2320_s0 + $0x88] sm:$0xff]  ;;  %v1977_v13 = vld [vmem:[#allocation2 + $0x198] sm:$0xff]  }
  0x26   :  { %1744 = vmatpush3.bf16.msra.mxu1 %v1949_v19  ;;  %1681 = vmatprep.subr.bf16.mxu0 %v1950_v20  ;;  %v49_v59 = vld [vmem:[%s2320_s0 + $0xa8] sm:$0xff]  ;;  %v1481_v60 = vcombine.high %v44_v56, %v48_v57  ;;  %v1480_v2 = vcombine.low %v44_v56, %v48_v57  ;;  %v52_v3 = vld [vmem:[%s2320_s0 + $0xc0] sm:$0xff]  ;;  %v1987_v39 = vld [vmem:[#allocation2 + $0x130] sm:$0xff]  }
  0x27   :  { %1745 = vmatprep.subr.bf16.mxu1 %v1951_v21  ;;  %v1483_v61 = vcombine.high %v45_v58, %v49_v59  ;;  %v56_v4 = vld [vmem:[%s2320_s0 + $0xe0] sm:$0xff]  ;;  %v53_v5 = vld [vmem:[%s2320_s0 + $0xc8] sm:$0xff]  ;;  %v1482_v6 = vcombine.low %v45_v58, %v49_v59  ;;  %v1991_v48 = vld [vmem:[#allocation2 + $0x138] sm:$0xff]  }
  0x28   :  { %v1489_v7 = vcombine.high %v52_v3, %v56_v4  ;;  %v57_v8 = vld [vmem:[%s2320_s0 + $0xe8] sm:$0xff]  ;;  %v60_v14 = vld [vmem:[%s2320_s0 + $0x100] sm:$0xff]  ;;  %v1488_v19 = vcombine.low %v52_v3, %v56_v4 }
  0x29   :  { %1682 = vmatpush3.bf16.msra.mxu0 %v1952_v22  ;;  %v1491_v9 = vcombine.high %v53_v5, %v57_v8  ;;  %v64_v15 = vld [vmem:[%s2320_s0 + $0x120] sm:$0xff]  ;;  %v61_v16 = vld [vmem:[%s2320_s0 + $0x108] sm:$0xff]  ;;  %v1490_v21 = vcombine.low %v53_v5, %v57_v8  ;;  %v39_v8 = vld [vmem:[%s2320_s0 + $0x58] sm:$0xff] }
  0x2a   :  { %1746 = vmatpush3.bf16.msra.mxu1 %v1953_v23  ;;  %1683 = vmatprep.subr.bf16.mxu0 %v1954_v24  ;;  %v65_v17 = vld [vmem:[%s2320_s0 + $0x128] sm:$0xff]  ;;  %v1978_v18 = vld [vmem:[#allocation2 + $0x160] sm:$0xff]   ;;  %v1497_v22 = vcombine.high %v60_v14, %v64_v15  ;;  %v1496_v34 = vcombine.low %v60_v14, %v64_v15  ;;  %v46_v14 = vld [vmem:[%s2320_s0 + $0x90] sm:$0xff] }
  0x2b   :  { %1747 = vmatprep.subr.bf16.mxu1 %v1955_v25  ;;  %v1979_v20 = vld [vmem:[#allocation2 + $0x120] sm:$0xff]   ;;  %v1499_v24 = vcombine.high %v61_v16, %v65_v17  ;;  %v1984_v32 = vld [vmem:[#allocation2 + $0x1e8] sm:$0xff]   ;;  %v50_v15 = vld [vmem:[%s2320_s0 + $0xb0] sm:$0xff] }
  0x2c   :  { %v1980_v23 = vld [vmem:[#allocation2 + $0x1e0] sm:$0xff]   ;;  %v1985_v33 = vld [vmem:[#allocation2 + $0x1a8] sm:$0xff]  }
  0x2d   :  { %1684 = vmatpush3.bf16.msra.mxu0 %v1956_v26  ;;  %v1981_v25 = vld [vmem:[#allocation2 + $0x1a0] sm:$0xff]   ;;  %v77_v44 = vld [vmem:[%s2320_s0 + $0x188] sm:$0xff] }
  0x2e   :  { %1748 = vmatpush3.bf16.msra.mxu1 %v1957_v27  ;;  %1685 = vmatprep.subr.bf16.mxu0 %v1958_v28  ;;  %v68_v26 = vld [vmem:[%s2320_s0 + $0x140] sm:$0xff]  ;;  %v1982_v28 = vld [vmem:[#allocation2 + $0x168] sm:$0xff]  }
  0x2f   :  { %1749 = vmatprep.subr.bf16.mxu1 %v1959_v29  ;;  %v72_v27 = vld [vmem:[%s2320_s0 + $0x160] sm:$0xff]  ;;  %v69_v29 = vld [vmem:[%s2320_s0 + $0x148] sm:$0xff] }
  0x30   :  { %v1505_v36 = vcombine.high %v68_v26, %v72_v27  ;;  %v81_v45 = vld [vmem:[%s2320_s0 + $0x1a8] sm:$0xff]  ;;  %v1504_v47 = vcombine.low %v68_v26, %v72_v27  ;;  %v1484_v26 = vcombine.low %v46_v14, %v50_v15 }
  0x31   :  { %1686 = vmatpush3.bf16.msra.mxu0 %v1960_v30  ;;  %v73_v30 = vld [vmem:[%s2320_s0 + $0x168] sm:$0xff]  ;;  %v1514_v59 = vcombine.low %v77_v44, %v81_v45 }
  0x32   :  { %1750 = vmatpush3.bf16.msra.mxu1 %v1961_v31  ;;  %1799 = vmatprep.subr.bf16.mxu0 %v1962_v40  ;;  %v1983_v31 = vld [vmem:[#allocation2 + $0x128] sm:$0xff]   ;;  %v1507_v37 = vcombine.high %v69_v29, %v73_v30  ;;  %v1988_v40 = vld [vmem:[#allocation2 + $0x1f0] sm:$0xff]  }
  0x33   :  { %1863 = vmatprep.subr.bf16.mxu1 %v1964_v42  ;;  %v80_v42 = vld [vmem:[%s2320_s0 + $0x1a0] sm:$0xff]  ;;  %v85_v56 = vld [vmem:[%s2320_s0 + $0x1c8] sm:$0xff] }
  0x34   :  { %957 = vmatmul.mubr.bf16.vlgmr.msra.gmra.mrb[0].mxu0 %v1464_v35  ;;  %v1498_v35 = vcombine.low %v61_v16, %v65_v17  ;;  %v89_v57 = vld [vmem:[%s2320_s0 + $0x1e8] sm:$0xff]  ;;  %v47_v16 = vld [vmem:[%s2320_s0 + $0x98] sm:$0xff] }
  0x35   :  { %1054 = vmatmul.mubr.bf16.vlgmr.msra.gmra.mrb[0].mxu1 %v1466_v38  ;;  %1800 = vmatpush3.bf16.msra.mxu0 %v1963_v41  ;;  %v1986_v38 = vld [vmem:[#allocation2 + $0x170] sm:$0xff]   ;;  %v76_v41 = vld [vmem:[%s2320_s0 + $0x180] sm:$0xff]  ;;  %v1522_v3 = vcombine.low %v85_v56, %v89_v57  ;;  %v51_v17 = vld [vmem:[%s2320_s0 + $0xb8] sm:$0xff] }
  0x36   :  { %1864 = vmatpush3.bf16.msra.mxu1 %v1965_v43  ;;  %964 = vmatprep.mubr.bf16.mxu0 %v1473_v46  ;;  %v1989_v43 = vld [vmem:[#allocation2 + $0x1b0] sm:$0xff]   ;;  %v1990_v46 = vld [vmem:[#allocation2 + $0x178] sm:$0xff]   ;;  %v1512_v58 = vcombine.low %v76_v41, %v80_v42  ;;  %v1486_v27 = vcombine.low %v47_v16, %v51_v17 }
  0x37   :  { %1061 = vmatprep.mubr.bf16.mxu1 %v1475_v49  ;;  %1801 = vmatprep.subr.bf16.mxu0 %v1966_v50  ;;  %v1506_v49 = vcombine.low %v69_v29, %v73_v30  ;;  %v1513_v50 = vcombine.high %v76_v41, %v80_v42  ;;  %v62_v30 = vld [vmem:[%s2320_s0 + $0x110] sm:$0xff]  ;;  %v75_v41 = vld [vmem:[%s2320_s0 + $0x178] sm:$0xff] }
  0x38   :  { %1865 = vmatprep.subr.bf16.mxu1 %v1968_v54  ;;  %v84_v54 = vld [vmem:[%s2320_s0 + $0x1c0] sm:$0xff] }
  0x39   :  { %1802 = vmatpush3.bf16.msra.mxu0 %v1967_v52  ;;  %v1515_v52 = vcombine.high %v77_v44, %v81_v45 }
  0x3a   :  { %1866 = vmatpush3.bf16.msra.mxu1 %v1969_v55  ;;  %1803 = vmatprep.subr.bf16.mxu0 %v1970_v62  ;;  %v88_v55 = vld [vmem:[%s2320_s0 + $0x1e0] sm:$0xff]  ;;  %v30_v62 = vld [vmem:[%s2320_s0 + $0x10] sm:$0xff] }
  0x3b   :  { %1867 = vmatprep.subr.bf16.mxu1 %v1972_v0  ;;  %v31_v0 = vld [vmem:[%s2320_s0 + $0x18] sm:$0xff] }
  0x3c   :  { %965 = vmatmul.mubr.bf16.gmra.mrb[4].mxu0 %v1472_v51  ;;  %v1992_v51 = vld [vmem:[#allocation2 + $0x1f8] sm:$0xff]  }
  0x3d   :  { %1062 = vmatmul.mubr.bf16.gmra.mrb[4].mxu1 %v1474_v53  ;;  %972 = vmatprep.mubr.bf16.mxu0 %v1481_v60  ;;  %v1993_v53 = vld [vmem:[#allocation2 + $0x1b8] sm:$0xff]   ;;  %v1521_v60 = vcombine.high %v84_v54, %v88_v55 }
  0x3e   :  { %1069 = vmatprep.mubr.bf16.mxu1 %v1483_v61  ;;  %1804 = vmatpush3.bf16.msra.mxu0 %v1971_v63  ;;  %v1523_v61 = vcombine.high %v85_v56, %v89_v57  ;;  %v34_v63 = vld [vmem:[%s2320_s0 + $0x30] sm:$0xff]  ;;  %v87_v56 = vld [vmem:[%s2320_s0 + $0x1d8] sm:$0xff] }
  0x3f   :  { %1868 = vmatpush3.bf16.msra.mxu1 %v1973_v1  ;;  %1805 = vmatprep.subr.bf16.mxu0 %v1974_v10  ;;  %v35_v1 = vld [vmem:[%s2320_s0 + $0x38] sm:$0xff]  ;;  %v1469_v4 = vcombine.high %v30_v62, %v34_v63  ;;  %v1468_v10 = vcombine.low %v30_v62, %v34_v63 }
  0x40   :  { %1869 = vmatprep.subr.bf16.mxu1 %v1976_v12  ;;  %v1471_v5 = vcombine.high %v31_v0, %v35_v1  ;;  %v91_v57 = vld [vmem:[%s2320_s0 + $0x1f8] sm:$0xff] }
  0x41   :  { %v1526_v63 = vcombine.low %v87_v56, %v91_v57 }
  0x42   :  { %1806 = vmatpush3.bf16.msra.mxu0 %v1975_v11  ;;  %v1470_v11 = vcombine.low %v31_v0, %v35_v1 }
  0x43   :  { %1870 = vmatpush3.bf16.msra.mxu1 %v1977_v13  ;;  %1807 = vmatprep.subr.bf16.mxu0 %v1978_v18 }
  0x44   :  { %973 = vmatmul.mubr.bf16.gmra.mrb[8].mxu0 %v1480_v2  ;;  %1871 = vmatprep.subr.bf16.mxu1 %v1980_v23  ;;  %v1520_v2 = vcombine.low %v84_v54, %v88_v55  ;;  %v58_v23 = vld [vmem:[%s2320_s0 + $0xf0] sm:$0xff] }
  0x45   :  { %1070 = vmatmul.mubr.bf16.gmra.mrb[8].mxu1 %v1482_v6  ;;  %980 = vmatprep.mubr.bf16.mxu0 %v1489_v7  ;;  %v38_v6 = vld [vmem:[%s2320_s0 + $0x50] sm:$0xff] }
  0x46   :  { %1077 = vmatprep.mubr.bf16.mxu1 %v1491_v9  ;;  %1808 = vmatpush3.bf16.msra.mxu0 %v1979_v20  ;;  %v42_v7 = vld [vmem:[%s2320_s0 + $0x70] sm:$0xff]  ;;  %v43_v9 = vld [vmem:[%s2320_s0 + $0x78] sm:$0xff]  ;;  %v1485_v20 = vcombine.high %v46_v14, %v50_v15 }
  0x47   :  { %1872 = vmatpush3.bf16.msra.mxu1 %v1981_v25  ;;  %1809 = vmatprep.subr.bf16.mxu0 %v1982_v28  ;;  %v1477_v12 = vcombine.high %v38_v6, %v42_v7  ;;  %v1479_v13 = vcombine.high %v39_v8, %v43_v9  ;;  %v1476_v18 = vcombine.low %v38_v6, %v42_v7  ;;  %v59_v25 = vld [vmem:[%s2320_s0 + $0xf8] sm:$0xff]  ;;  %v86_v54 = vld [vmem:[%s2320_s0 + $0x1d0] sm:$0xff] }
  0x48   :  { %1873 = vmatprep.subr.bf16.mxu1 %v1984_v32  ;;  %v63_v32 = vld [vmem:[%s2320_s0 + $0x118] sm:$0xff]  ;;  %v90_v55 = vld [vmem:[%s2320_s0 + $0x1f0] sm:$0xff] }
  0x49   :  { %v1524_v62 = vcombine.low %v86_v54, %v90_v55 }
  0x4a   :  { %1810 = vmatpush3.bf16.msra.mxu0 %v1983_v31  ;;  %v66_v31 = vld [vmem:[%s2320_s0 + $0x130] sm:$0xff] }
  0x4b   :  { %1874 = vmatpush3.bf16.msra.mxu1 %v1985_v33  ;;  %1811 = vmatprep.subr.bf16.mxu0 %v1986_v38  ;;  %v67_v33 = vld [vmem:[%s2320_s0 + $0x138] sm:$0xff]  ;;  %v70_v38 = vld [vmem:[%s2320_s0 + $0x150] sm:$0xff]  ;;  %v1500_v42 = vcombine.low %v62_v30, %v66_v31 }
  0x4c   :  { %981 = vmatmul.mubr.bf16.gmra.mrb[12].mxu0 %v1488_v19  ;;  %1875 = vmatprep.subr.bf16.mxu1 %v1988_v40  ;;  %v1478_v19 = vcombine.low %v39_v8, %v43_v9  ;;  %v71_v40 = vld [vmem:[%s2320_s0 + $0x158] sm:$0xff] }
  0x4d   :  { %1078 = vmatmul.mubr.bf16.gmra.mrb[12].mxu1 %v1490_v21  ;;  %988 = vmatprep.mubr.bf16.mxu0 %v1497_v22  ;;  %v1487_v21 = vcombine.high %v47_v16, %v51_v17  ;;  %v54_v22 = vld [vmem:[%s2320_s0 + $0xd0] sm:$0xff]  ;;  %v1511_v45 = vcombine.high %v71_v40, %v75_v41 }
  0x4e   :  { %1085 = vmatprep.mubr.bf16.mxu1 %v1499_v24  ;;  %1812 = vmatpush3.bf16.msra.mxu0 %v1987_v39  ;;  %v55_v24 = vld [vmem:[%s2320_s0 + $0xd8] sm:$0xff]  ;;  %v1493_v28 = vcombine.high %v54_v22, %v58_v23  ;;  %v74_v39 = vld [vmem:[%s2320_s0 + $0x170] sm:$0xff] }
  0x4f   :  { %1876 = vmatpush3.bf16.msra.mxu1 %v1989_v43  ;;  %1813 = vmatprep.subr.bf16.mxu0 %v1990_v46  ;;  %v1495_v29 = vcombine.high %v55_v24, %v59_v25  ;;  %v1502_v43 = vcombine.low %v63_v32, %v67_v33  ;;  %v1509_v44 = vcombine.high %v70_v38, %v74_v39  ;;  %v78_v46 = vld [vmem:[%s2320_s0 + $0x190] sm:$0xff] }
  0x50   :  { %1877 = vmatprep.subr.bf16.mxu1 %v1992_v51  ;;  %v1510_v51 = vcombine.low %v71_v40, %v75_v41 }
  0x52   :  { %1814 = vmatpush3.bf16.msra.mxu0 %v1991_v48  ;;  %v79_v48 = vld [vmem:[%s2320_s0 + $0x198] sm:$0xff] }
  0x53   :  { %1878 = vmatpush3.bf16.msra.mxu1 %v1993_v53 }
  0x54   :  { %989 = vmatmul.mubr.bf16.gmra.mrb[16].mxu0 %v1496_v34  ;;  %v1492_v34 = vcombine.low %v54_v22, %v58_v23 }
  0x55   :  { %1086 = vmatmul.mubr.bf16.gmra.mrb[16].mxu1 %v1498_v35  ;;  %996 = vmatprep.mubr.bf16.mxu0 %v1505_v36  ;;  %v1494_v35 = vcombine.low %v55_v24, %v59_v25  ;;  %v1501_v36 = vcombine.high %v62_v30, %v66_v31 }
  0x56   :  { %1093 = vmatprep.mubr.bf16.mxu1 %v1507_v37  ;;  %v1503_v37 = vcombine.high %v63_v32, %v67_v33 }
  0x5c   :  { %997 = vmatmul.mubr.bf16.gmra.mrb[20].mxu0 %v1504_v47  ;;  %v82_v47 = vld [vmem:[%s2320_s0 + $0x1b0] sm:$0xff] }
  0x5d   :  { %1094 = vmatmul.mubr.bf16.gmra.mrb[20].mxu1 %v1506_v49  ;;  %1004 = vmatprep.mubr.bf16.mxu0 %v1513_v50  ;;  %v83_v49 = vld [vmem:[%s2320_s0 + $0x1b8] sm:$0xff]  ;;  %v1508_v50 = vcombine.low %v70_v38, %v74_v39 }
  0x5e   :  { %1101 = vmatprep.mubr.bf16.mxu1 %v1515_v52  ;;  %v1517_v52 = vcombine.high %v78_v46, %v82_v47  ;;  %v1519_v53 = vcombine.high %v79_v48, %v83_v49 }
  0x64   :  { %1005 = vmatmul.mubr.bf16.gmra.mrb[24].mxu0 %v1512_v58  ;;  %v1516_v58 = vcombine.low %v78_v46, %v82_v47 }
  0x65   :  { %1102 = vmatmul.mubr.bf16.gmra.mrb[24].mxu1 %v1514_v59  ;;  %1012 = vmatprep.mubr.bf16.mxu0 %v1521_v60  ;;  %v1518_v59 = vcombine.low %v79_v48, %v83_v49  ;;  %v1525_v60 = vcombine.high %v86_v54, %v90_v55 }
  0x66   :  { %1109 = vmatprep.mubr.bf16.mxu1 %v1523_v61  ;;  %v1527_v61 = vcombine.high %v87_v56, %v91_v57 }
  0x6c   :  { %1013 = vmatmul.mubr.bf16.gmra.mrb[28].mxu0 %v1520_v2 }
  0x6d   :  { %1110 = vmatmul.mubr.bf16.gmra.mrb[28].mxu1 %v1522_v3  ;;  %1150 = vmatprep.mubr.bf16.mxu0 %v1469_v4 }
  0x6e   :  { %1247 = vmatprep.mubr.bf16.mxu1 %v1471_v5 }
  0x74   :  { %1151 = vmatmul.mubr.bf16.vlgmr.msra.gmra.mrb[32].mxu0 %v1468_v10 }
  0x75   :  { %1248 = vmatmul.mubr.bf16.vlgmr.msra.gmra.mrb[32].mxu1 %v1470_v11  ;;  %1158 = vmatprep.mubr.bf16.mxu0 %v1477_v12 }
  0x76   :  { %1255 = vmatprep.mubr.bf16.mxu1 %v1479_v13 }
  0x7c   :  { %1159 = vmatmul.mubr.bf16.gmra.mrb[36].mxu0 %v1476_v18 }
  0x7d   :  { %1256 = vmatmul.mubr.bf16.gmra.mrb[36].mxu1 %v1478_v19  ;;  %1166 = vmatprep.mubr.bf16.mxu0 %v1485_v20 }
  0x7e   :  { %1263 = vmatprep.mubr.bf16.mxu1 %v1487_v21 }
  0x84   :  { %1167 = vmatmul.mubr.bf16.gmra.mrb[40].mxu0 %v1484_v26 }
  0x85   :  { %1264 = vmatmul.mubr.bf16.gmra.mrb[40].mxu1 %v1486_v27  ;;  %1174 = vmatprep.mubr.bf16.mxu0 %v1493_v28 }
  0x86   :  { %1271 = vmatprep.mubr.bf16.mxu1 %v1495_v29 }
  0x8c   :  { %1175 = vmatmul.mubr.bf16.gmra.mrb[44].mxu0 %v1492_v34 }
  0x8d   :  { %1272 = vmatmul.mubr.bf16.gmra.mrb[44].mxu1 %v1494_v35  ;;  %1182 = vmatprep.mubr.bf16.mxu0 %v1501_v36 }
  0x8e   :  { %1279 = vmatprep.mubr.bf16.mxu1 %v1503_v37 }
  0x94   :  { %1183 = vmatmul.mubr.bf16.gmra.mrb[48].mxu0 %v1500_v42 }
  0x95   :  { %1280 = vmatmul.mubr.bf16.gmra.mrb[48].mxu1 %v1502_v43  ;;  %1190 = vmatprep.mubr.bf16.mxu0 %v1509_v44 }
  0x96   :  { %1287 = vmatprep.mubr.bf16.mxu1 %v1511_v45 }
  0x9c   :  { %1191 = vmatmul.mubr.bf16.gmra.mrb[52].mxu0 %v1508_v50 }
  0x9d   :  { %1288 = vmatmul.mubr.bf16.gmra.mrb[52].mxu1 %v1510_v51  ;;  %1198 = vmatprep.mubr.bf16.mxu0 %v1517_v52 }
  0x9e   :  { %1295 = vmatprep.mubr.bf16.mxu1 %v1519_v53 }
  0xa4   :  { %1199 = vmatmul.mubr.bf16.gmra.mrb[56].mxu0 %v1516_v58 }
  0xa5   :  { %1296 = vmatmul.mubr.bf16.gmra.mrb[56].mxu1 %v1518_v59  ;;  %1206 = vmatprep.mubr.bf16.mxu0 %v1525_v60 }
  0xa6   :  { %1303 = vmatprep.mubr.bf16.mxu1 %v1527_v61 }
  0xac   :  { %1207 = vmatmul.mubr.bf16.gmra.mrb[60].mxu0 %v1524_v62 }
  0xad   :  { %1304 = vmatmul.mubr.bf16.gmra.mrb[60].mxu1 %v1526_v63 }
 0x107   :  { %v1687_v0 = vpop.f32.mrb[0].mxu0 }
 0x108   :  { %v1751_v1 = vpop.f32.mrb[0].mxu1  ;;  %v1688_v2 = vpop.f32.mrb[1].mxu0 }
 0x109   :  { %v1689_v3 = vadd.f32 %v1688_v2, %v1687_v0  ;;  %v1752_v4 = vpop.f32.mrb[1].mxu1  ;;  %v1690_v5 = vpop.f32.mrb[2].mxu0 }
 0x10a   :  { %v1753_v6 = vadd.f32 %v1752_v4, %v1751_v1  ;;  %v1754_v7 = vpop.f32.mrb[2].mxu1  ;;  %v1691_v8 = vpop.f32.mrb[3].mxu0 }
 0x10b   :  { %v1692_v9 = vadd.f32 %v1691_v8, %v1690_v5  ;;  %v1755_v10 = vpop.f32.mrb[3].mxu1 }
 0x10c   :  { %v2245_v11 = vadd.f32 %v1753_v6, %v1689_v3  ;;  %v1756_v12 = vadd.f32 %v1755_v10, %v1754_v7 }
 0x10e   :  { %v2247_v13 = vadd.f32 %v1756_v12, %v1692_v9 }
 0x10f   :  { %v1693_v14 = vpop.f32.mrb[4].mxu0 }
 0x110   :  { %v1757_v15 = vpop.f32.mrb[4].mxu1  ;;  %v1694_v16 = vpop.f32.mrb[5].mxu0 }
 0x111   :  { %v1695_v17 = vadd.f32 %v1694_v16, %v1693_v14  ;;  %v1758_v18 = vpop.f32.mrb[5].mxu1  ;;  %v1696_v19 = vpop.f32.mrb[6].mxu0 }
 0x112   :  { %v1759_v20 = vadd.f32 %v1758_v18, %v1757_v15  ;;  %v1760_v21 = vpop.f32.mrb[6].mxu1  ;;  %v1697_v22 = vpop.f32.mrb[7].mxu0 }
 0x113   :  { %v1698_v23 = vadd.f32 %v1697_v22, %v1696_v19  ;;  %v1761_v24 = vpop.f32.mrb[7].mxu1 }
 0x114   :  { %v2249_v25 = vadd.f32 %v1759_v20, %v1695_v17  ;;  %v1762_v26 = vadd.f32 %v1761_v24, %v1760_v21 }
 0x116   :  { %v2251_v27 = vadd.f32 %v1762_v26, %v1698_v23 }
 0x117   :  { %v1699_v28 = vpop.f32.mrb[8].mxu0 }
 0x118   :  { %v1763_v29 = vpop.f32.mrb[8].mxu1  ;;  %v1700_v30 = vpop.f32.mrb[9].mxu0 }
 0x119   :  { %v1701_v31 = vadd.f32 %v1700_v30, %v1699_v28  ;;  %v1764_v32 = vpop.f32.mrb[9].mxu1  ;;  %v1702_v33 = vpop.f32.mrb[10].mxu0 }
 0x11a   :  { %v1765_v34 = vadd.f32 %v1764_v32, %v1763_v29  ;;  %v1766_v35 = vpop.f32.mrb[10].mxu1  ;;  %v1703_v36 = vpop.f32.mrb[11].mxu0 }
 0x11b   :  { %v1704_v37 = vadd.f32 %v1703_v36, %v1702_v33  ;;  %v1767_v38 = vpop.f32.mrb[11].mxu1 }
 0x11c   :  { %v2253_v39 = vadd.f32 %v1765_v34, %v1701_v31  ;;  %v1768_v40 = vadd.f32 %v1767_v38, %v1766_v35 }
 0x11e   :  { %v2255_v41 = vadd.f32 %v1768_v40, %v1704_v37 }
 0x11f   :  { %v1705_v42 = vpop.f32.mrb[12].mxu0 }
 0x120   :  { %v1769_v43 = vpop.f32.mrb[12].mxu1  ;;  %v1706_v44 = vpop.f32.mrb[13].mxu0 }
 0x121   :  { %v1707_v45 = vadd.f32 %v1706_v44, %v1705_v42  ;;  %v1770_v46 = vpop.f32.mrb[13].mxu1  ;;  %v1708_v47 = vpop.f32.mrb[14].mxu0 }
 0x122   :  { %v1771_v48 = vadd.f32 %v1770_v46, %v1769_v43  ;;  %v1772_v49 = vpop.f32.mrb[14].mxu1  ;;  %v1709_v50 = vpop.f32.mrb[15].mxu0 }
 0x123   :  { %v1710_v51 = vadd.f32 %v1709_v50, %v1708_v47  ;;  %v1773_v52 = vpop.f32.mrb[15].mxu1 }
 0x124   :  { %v2257_v53 = vadd.f32 %v1771_v48, %v1707_v45  ;;  %v1774_v54 = vadd.f32 %v1773_v52, %v1772_v49 }
 0x126   :  { %v2259_v55 = vadd.f32 %v1774_v54, %v1710_v51 }
 0x127   :  { %v1711_v56 = vpop.f32.mrb[16].mxu0 }
 0x128   :  { %v1775_v57 = vpop.f32.mrb[16].mxu1  ;;  %v1712_v58 = vpop.f32.mrb[17].mxu0 }
 0x129   :  { %v1713_v59 = vadd.f32 %v1712_v58, %v1711_v56  ;;  %v1776_v60 = vpop.f32.mrb[17].mxu1  ;;  %v1714_v61 = vpop.f32.mrb[18].mxu0 }
 0x12a   :  { %v1777_v62 = vadd.f32 %v1776_v60, %v1775_v57  ;;  %v1778_v63 = vpop.f32.mrb[18].mxu1  ;;  %v1715_v0 = vpop.f32.mrb[19].mxu0 }
 0x12b   :  { %v1716_v1 = vadd.f32 %v1715_v0, %v1714_v61  ;;  %v1779_v2 = vpop.f32.mrb[19].mxu1 }
 0x12c   :  { %v2261_v3 = vadd.f32 %v1777_v62, %v1713_v59  ;;  %v1780_v4 = vadd.f32 %v1779_v2, %v1778_v63 }
 0x12e   :  { %v2263_v5 = vadd.f32 %v1780_v4, %v1716_v1 }
 0x12f   :  { %v1717_v6 = vpop.f32.mrb[20].mxu0 }
 0x130   :  { %v1781_v7 = vpop.f32.mrb[20].mxu1  ;;  %v1718_v8 = vpop.f32.mrb[21].mxu0 }
 0x131   :  { %v1719_v9 = vadd.f32 %v1718_v8, %v1717_v6  ;;  %v1782_v10 = vpop.f32.mrb[21].mxu1  ;;  %v1720_v12 = vpop.f32.mrb[22].mxu0 }
 0x132   :  { %v1783_v14 = vadd.f32 %v1782_v10, %v1781_v7  ;;  %v1784_v15 = vpop.f32.mrb[22].mxu1  ;;  %v1721_v16 = vpop.f32.mrb[23].mxu0 }
 0x133   :  { %v1722_v17 = vadd.f32 %v1721_v16, %v1720_v12  ;;  %v1785_v18 = vpop.f32.mrb[23].mxu1 }
 0x134   :  { %v2265_v19 = vadd.f32 %v1783_v14, %v1719_v9  ;;  %v1786_v20 = vadd.f32 %v1785_v18, %v1784_v15 }
 0x136   :  { %v2267_v21 = vadd.f32 %v1786_v20, %v1722_v17 }
 0x137   :  { %v1723_v22 = vpop.f32.mrb[24].mxu0 }
 0x138   :  { %v1787_v23 = vpop.f32.mrb[24].mxu1  ;;  %v1724_v24 = vpop.f32.mrb[25].mxu0 }
 0x139   :  { %v1725_v26 = vadd.f32 %v1724_v24, %v1723_v22  ;;  %v1788_v28 = vpop.f32.mrb[25].mxu1  ;;  %v1726_v29 = vpop.f32.mrb[26].mxu0 }
 0x13a   :  { %v1789_v30 = vadd.f32 %v1788_v28, %v1787_v23  ;;  %v1790_v31 = vpop.f32.mrb[26].mxu1  ;;  %v1727_v32 = vpop.f32.mrb[27].mxu0 }
 0x13b   :  { %v1728_v33 = vadd.f32 %v1727_v32, %v1726_v29  ;;  %v1791_v34 = vpop.f32.mrb[27].mxu1 }
 0x13c   :  { %v2269_v35 = vadd.f32 %v1789_v30, %v1725_v26  ;;  %v1792_v36 = vadd.f32 %v1791_v34, %v1790_v31 }
 0x13e   :  { %v2271_v37 = vadd.f32 %v1792_v36, %v1728_v33 }
 0x13f   :  { %v1729_v38 = vpop.f32.mrb[28].mxu0 }
 0x140   :  { %v1793_v40 = vpop.f32.mrb[28].mxu1  ;;  %v1730_v42 = vpop.f32.mrb[29].mxu0 }
 0x141   :  { %v1731_v43 = vadd.f32 %v1730_v42, %v1729_v38  ;;  %v1794_v44 = vpop.f32.mrb[29].mxu1  ;;  %v1732_v45 = vpop.f32.mrb[30].mxu0 }
 0x142   :  { %v1795_v46 = vadd.f32 %v1794_v44, %v1793_v40  ;;  %v1796_v47 = vpop.f32.mrb[30].mxu1  ;;  %v1733_v48 = vpop.f32.mrb[31].mxu0 }
 0x143   :  { %v1734_v49 = vadd.f32 %v1733_v48, %v1732_v45  ;;  %v1797_v50 = vpop.f32.mrb[31].mxu1 }
 0x144   :  { %v2273_v51 = vadd.f32 %v1795_v46, %v1731_v43  ;;  %v1798_v52 = vadd.f32 %v1797_v50, %v1796_v47 }
 0x146   :  { %v2275_v54 = vadd.f32 %v1798_v52, %v1734_v49 }
 0x147   :  { %v1815_v56 = vpop.f32.mrb[32].mxu0 }
 0x148   :  { %v1879_v57 = vpop.f32.mrb[32].mxu1  ;;  %v1816_v58 = vpop.f32.mrb[33].mxu0 }
 0x149   :  { %v1817_v59 = vadd.f32 %v1816_v58, %v1815_v56  ;;  %v1880_v60 = vpop.f32.mrb[33].mxu1  ;;  %v1818_v61 = vpop.f32.mrb[34].mxu0 }
 0x14a   :  { %v1881_v62 = vadd.f32 %v1880_v60, %v1879_v57  ;;  %v1882_v63 = vpop.f32.mrb[34].mxu1  ;;  %v1819_v0 = vpop.f32.mrb[35].mxu0 }
 0x14b   :  { %v1153_v1 = vadd.f32 %v1817_v59, %v2245_v11  ;;  %v1820_v2 = vadd.f32 %v1819_v0, %v1818_v61  ;;  %v1883_v4 = vpop.f32.mrb[35].mxu1 }
 0x14c   :  { %v1884_v6 = vadd.f32 %v1883_v4, %v1882_v63 }
 0x14d   :  { %v1250_v7 = vadd.f32 %v1881_v62, %v1153_v1  ;;  %v1156_v8 = vadd.f32 %v1820_v2, %v2247_v13 }
 0x14f   :  { %v1253_v9 = vadd.f32 %v1884_v6, %v1156_v8  ;;  %v1821_v10 = vpop.f32.mrb[36].mxu0  ;;  %v1333_v12 = vmul.f32 %v1250_v7, %v1250_v7 }
 0x150   :  { %v1885_v14 = vpop.f32.mrb[36].mxu1  ;;  %v1822_v15 = vpop.f32.mrb[37].mxu0 }
 0x151   :  { %v1312_v16 = vadd.f32 %v1253_v9, %v1250_v7  ;;  %v1334_v17 = vmul.f32 %v1253_v9, %v1253_v9  ;;  %v1627_v18 = vpack.c.bf16 %v1253_v9, %v1250_v7  ;;  %v1823_v20 = vadd.f32 %v1822_v15, %v1821_v10  ;;  %v1886_v22 = vpop.f32.mrb[37].mxu1  ;;  %v1824_v23 = vpop.f32.mrb[38].mxu0 }
 0x152   :  { %v1887_v24 = vadd.f32 %v1886_v22, %v1885_v14  ;;  %v1888_v26 = vpop.f32.mrb[38].mxu1  ;;  %v1825_v11 = vpop.f32.mrb[39].mxu0 }
 0x153   :  { %v1349_v28 = vadd.f32 %v1334_v17, %v1333_v12  ;;  %1628 = vst [vmem:[%s2322_s2] sm:$0xff] %v1627_v18   ;;  %v1161_v13 = vadd.f32 %v1823_v20, %v2249_v25  ;;  %v1826_v29 = vadd.f32 %v1825_v11, %v1824_v23  ;;  %v1889_v30 = vpop.f32.mrb[39].mxu1 }
 0x154   :  { %v1890_v31 = vadd.f32 %v1889_v30, %v1888_v26 }
 0x155   :  { %v1258_v32 = vadd.f32 %v1887_v24, %v1161_v13  ;;  %v1164_v33 = vadd.f32 %v1826_v29, %v2251_v27 }
 0x157   :  { %v1313_v34 = vadd.f32 %v1312_v16, %v1258_v32  ;;  %v1335_v36 = vmul.f32 %v1258_v32, %v1258_v32  ;;  %v1261_v38 = vadd.f32 %v1890_v31, %v1164_v33  ;;  %v1827_v40 = vpop.f32.mrb[40].mxu0 }
 0x158   :  { %v1891_v42 = vpop.f32.mrb[40].mxu1  ;;  %v1828_v43 = vpop.f32.mrb[41].mxu0 }
 0x159   :  { %v1350_v44 = vadd.f32 %v1349_v28, %v1335_v36  ;;  %v1314_v45 = vadd.f32 %v1313_v34, %v1261_v38  ;;  %v1336_v46 = vmul.f32 %v1261_v38, %v1261_v38  ;;  %v1632_v47 = vpack.c.bf16 %v1261_v38, %v1258_v32  ;;  %v1892_v48 = vpop.f32.mrb[41].mxu1  ;;  %v1830_v49 = vpop.f32.mrb[42].mxu0 }
 0x15a   :  { %v1829_v50 = vadd.f32 %v1828_v43, %v1827_v40  ;;  %v1893_v25 = vadd.f32 %v1892_v48, %v1891_v42  ;;  %v1894_v52 = vpop.f32.mrb[42].mxu1  ;;  %v1831_v56 = vpop.f32.mrb[43].mxu0 }
 0x15b   :  { %v1351_v57 = vadd.f32 %v1350_v44, %v1336_v46  ;;  %1664 = vst [vmem:[%s2322_s2 + $0x8] sm:$0xff] %v1632_v47   ;;  %v1832_v27 = vadd.f32 %v1831_v56, %v1830_v49  ;;  %v1895_v58 = vpop.f32.mrb[43].mxu1 }
 0x15c   :  { %v1169_v59 = vadd.f32 %v1829_v50, %v2253_v39  ;;  %v1896_v60 = vadd.f32 %v1895_v58, %v1894_v52 }
 0x15d   :  { %v1172_v61 = vadd.f32 %v1832_v27, %v2255_v41 }
 0x15e   :  { %v1266_v62 = vadd.f32 %v1893_v25, %v1169_v59 }
 0x15f   :  { %v1269_v63 = vadd.f32 %v1896_v60, %v1172_v61  ;;  %v1833_v0 = vpop.f32.mrb[44].mxu0 }
 0x160   :  { %v1315_v1 = vadd.f32 %v1314_v45, %v1266_v62  ;;  %v1337_v2 = vmul.f32 %v1266_v62, %v1266_v62  ;;  %v1897_v4 = vpop.f32.mrb[44].mxu1  ;;  %v1834_v6 = vpop.f32.mrb[45].mxu0 }
 0x161   :  { %v1338_v7 = vmul.f32 %v1269_v63, %v1269_v63  ;;  %v1637_v8 = vpack.c.bf16 %v1269_v63, %v1266_v62  ;;  %v1835_v9 = vadd.f32 %v1834_v6, %v1833_v0  ;;  %v1898_v10 = vpop.f32.mrb[45].mxu1  ;;  %v1836_v12 = vpop.f32.mrb[46].mxu0 }
 0x162   :  { %v1352_v14 = vadd.f32 %v1351_v57, %v1337_v2  ;;  %v1316_v15 = vadd.f32 %v1315_v1, %v1269_v63  ;;  %v1899_v16 = vadd.f32 %v1898_v10, %v1897_v4  ;;  %v1900_v17 = vpop.f32.mrb[46].mxu1  ;;  %v1837_v39 = vpop.f32.mrb[47].mxu0 }
 0x163   :  { %1665 = vst [vmem:[%s2322_s2 + $0x10] sm:$0xff] %v1637_v8   ;;  %v1177_v41 = vadd.f32 %v1835_v9, %v2257_v53  ;;  %v1838_v18 = vadd.f32 %v1837_v39, %v1836_v12  ;;  %v1901_v20 = vpop.f32.mrb[47].mxu1 }
 0x164   :  { %v1353_v22 = vadd.f32 %v1352_v14, %v1338_v7  ;;  %v1902_v23 = vadd.f32 %v1901_v20, %v1900_v17 }
 0x165   :  { %v1274_v24 = vadd.f32 %v1899_v16, %v1177_v41  ;;  %v1180_v26 = vadd.f32 %v1838_v18, %v2259_v55 }
 0x167   :  { %v1317_v11 = vadd.f32 %v1316_v15, %v1274_v24  ;;  %v1339_v28 = vmul.f32 %v1274_v24, %v1274_v24  ;;  %v1277_v13 = vadd.f32 %v1902_v23, %v1180_v26  ;;  %v1839_v29 = vpop.f32.mrb[48].mxu0 }
 0x168   :  { %v1903_v30 = vpop.f32.mrb[48].mxu1  ;;  %v1840_v31 = vpop.f32.mrb[49].mxu0 }
 0x169   :  { %v1354_v32 = vadd.f32 %v1353_v22, %v1339_v28  ;;  %v1318_v33 = vadd.f32 %v1317_v11, %v1277_v13  ;;  %v1340_v34 = vmul.f32 %v1277_v13, %v1277_v13  ;;  %v1642_v36 = vpack.c.bf16 %v1277_v13, %v1274_v24  ;;  %v1904_v38 = vpop.f32.mrb[49].mxu1  ;;  %v1842_v40 = vpop.f32.mrb[50].mxu0 }
 0x16a   :  { %v1841_v53 = vadd.f32 %v1840_v31, %v1839_v29  ;;  %v1905_v42 = vadd.f32 %v1904_v38, %v1903_v30  ;;  %v1906_v43 = vpop.f32.mrb[50].mxu1  ;;  %v1843_v44 = vpop.f32.mrb[51].mxu0 }
 0x16b   :  { %v1355_v45 = vadd.f32 %v1354_v32, %v1340_v34  ;;  %1666 = vst [vmem:[%s2322_s2 + $0x18] sm:$0xff] %v1642_v36   ;;  %v1844_v55 = vadd.f32 %v1843_v44, %v1842_v40  ;;  %v1907_v46 = vpop.f32.mrb[51].mxu1 }
 0x16c   :  { %v1185_v47 = vadd.f32 %v1841_v53, %v2261_v3  ;;  %v1908_v48 = vadd.f32 %v1907_v46, %v1906_v43 }
 0x16d   :  { %v1188_v49 = vadd.f32 %v1844_v55, %v2263_v5 }
 0x16e   :  { %v1282_v50 = vadd.f32 %v1905_v42, %v1185_v47 }
 0x16f   :  { %v1285_v25 = vadd.f32 %v1908_v48, %v1188_v49  ;;  %v1845_v52 = vpop.f32.mrb[52].mxu0 }
 0x170   :  { %v1319_v56 = vadd.f32 %v1318_v33, %v1282_v50  ;;  %v1341_v57 = vmul.f32 %v1282_v50, %v1282_v50  ;;  %v1909_v27 = vpop.f32.mrb[52].mxu1  ;;  %v1846_v58 = vpop.f32.mrb[53].mxu0 }
 0x171   :  { %v1342_v59 = vmul.f32 %v1285_v25, %v1285_v25  ;;  %v1647_v60 = vpack.c.bf16 %v1285_v25, %v1282_v50  ;;  %v1847_v61 = vadd.f32 %v1846_v58, %v1845_v52  ;;  %v1910_v62 = vpop.f32.mrb[53].mxu1  ;;  %v1848_v63 = vpop.f32.mrb[54].mxu0 }
 0x172   :  { %v1356_v0 = vadd.f32 %v1355_v45, %v1341_v57  ;;  %v1320_v1 = vadd.f32 %v1319_v56, %v1285_v25  ;;  %v1911_v2 = vadd.f32 %v1910_v62, %v1909_v27  ;;  %v1912_v4 = vpop.f32.mrb[54].mxu1  ;;  %v1849_v3 = vpop.f32.mrb[55].mxu0 }
 0x173   :  { %1667 = vst [vmem:[%s2322_s2 + $0x20] sm:$0xff] %v1647_v60   ;;  %v1193_v5 = vadd.f32 %v1847_v61, %v2265_v19  ;;  %v1850_v6 = vadd.f32 %v1849_v3, %v1848_v63  ;;  %v1913_v7 = vpop.f32.mrb[55].mxu1 }
 0x174   :  { %v1357_v8 = vadd.f32 %v1356_v0, %v1342_v59  ;;  %v1914_v9 = vadd.f32 %v1913_v7, %v1912_v4 }
 0x175   :  { %v1290_v10 = vadd.f32 %v1911_v2, %v1193_v5  ;;  %v1196_v12 = vadd.f32 %v1850_v6, %v2267_v21 }
 0x177   :  { %v1321_v14 = vadd.f32 %v1320_v1, %v1290_v10  ;;  %v1343_v15 = vmul.f32 %v1290_v10, %v1290_v10  ;;  %v1293_v16 = vadd.f32 %v1914_v9, %v1196_v12  ;;  %v1851_v17 = vpop.f32.mrb[56].mxu0 }
 0x178   :  { %v1915_v39 = vpop.f32.mrb[56].mxu1  ;;  %v1852_v41 = vpop.f32.mrb[57].mxu0 }
 0x179   :  { %v1358_v18 = vadd.f32 %v1357_v8, %v1343_v15  ;;  %v1322_v20 = vadd.f32 %v1321_v14, %v1293_v16  ;;  %v1344_v22 = vmul.f32 %v1293_v16, %v1293_v16  ;;  %v1652_v23 = vpack.c.bf16 %v1293_v16, %v1290_v10  ;;  %v1916_v24 = vpop.f32.mrb[57].mxu1  ;;  %v1854_v26 = vpop.f32.mrb[58].mxu0 }
 0x17a   :  { %v1853_v19 = vadd.f32 %v1852_v41, %v1851_v17  ;;  %v1917_v11 = vadd.f32 %v1916_v24, %v1915_v39  ;;  %v1918_v28 = vpop.f32.mrb[58].mxu1  ;;  %v1855_v13 = vpop.f32.mrb[59].mxu0 }
 0x17b   :  { %v1359_v29 = vadd.f32 %v1358_v18, %v1344_v22  ;;  %1668 = vst [vmem:[%s2322_s2 + $0x28] sm:$0xff] %v1652_v23   ;;  %v1856_v21 = vadd.f32 %v1855_v13, %v1854_v26  ;;  %v1919_v30 = vpop.f32.mrb[59].mxu1 }
 0x17c   :  { %v1201_v31 = vadd.f32 %v1853_v19, %v2269_v35  ;;  %v1920_v32 = vadd.f32 %v1919_v30, %v1918_v28 }
 0x17d   :  { %v1204_v33 = vadd.f32 %v1856_v21, %v2271_v37 }
 0x17e   :  { %v1298_v34 = vadd.f32 %v1917_v11, %v1201_v31 }
 0x17f   :  { %v1301_v36 = vadd.f32 %v1920_v32, %v1204_v33  ;;  %v1857_v38 = vpop.f32.mrb[60].mxu0 }
 0x180   :  { %v1323_v40 = vadd.f32 %v1322_v20, %v1298_v34  ;;  %v1345_v53 = vmul.f32 %v1298_v34, %v1298_v34  ;;  %v1921_v42 = vpop.f32.mrb[60].mxu1  ;;  %v1858_v43 = vpop.f32.mrb[61].mxu0 }
 0x181   :  { %v1346_v44 = vmul.f32 %v1301_v36, %v1301_v36  ;;  %v1657_v45 = vpack.c.bf16 %v1301_v36, %v1298_v34  ;;  %v1859_v55 = vadd.f32 %v1858_v43, %v1857_v38  ;;  %v1922_v46 = vpop.f32.mrb[61].mxu1  ;;  %v1860_v47 = vpop.f32.mrb[62].mxu0 }
 0x182   :  { %v1360_v48 = vadd.f32 %v1359_v29, %v1345_v53  ;;  %v1324_v49 = vadd.f32 %v1323_v40, %v1301_v36  ;;  %v1923_v50 = vadd.f32 %v1922_v46, %v1921_v42  ;;  %v1924_v25 = vpop.f32.mrb[62].mxu1  ;;  %v1861_v35 = vpop.f32.mrb[63].mxu0 }
 0x183   :  { %1669 = vst [vmem:[%s2322_s2 + $0x30] sm:$0xff] %v1657_v45   ;;  %v1209_v37 = vadd.f32 %v1859_v55, %v2273_v51  ;;  %v1862_v52 = vadd.f32 %v1861_v35, %v1860_v47  ;;  %v1925_v56 = vpop.f32.mrb[63].mxu1 }
 0x184   :  { %v1361_v57 = vadd.f32 %v1360_v48, %v1346_v44  ;;  %v1926_v27 = vadd.f32 %v1925_v56, %v1924_v25 }
 0x185   :  { %v1306_v58 = vadd.f32 %v1923_v50, %v1209_v37  ;;  %v1212_v59 = vadd.f32 %v1862_v52, %v2275_v54 }
 0x187   :  { %v1325_v60 = vadd.f32 %v1324_v49, %v1306_v58  ;;  %v1347_v61 = vmul.f32 %v1306_v58, %v1306_v58  ;;  %v1309_v62 = vadd.f32 %v1926_v27, %v1212_v59 }
 0x189   :  { %v1362_v63 = vadd.f32 %v1361_v57, %v1347_v61  ;;  %v1326_v0 = vadd.f32 %v1325_v60, %v1309_v62  ;;  %v1348_v1 = vmul.f32 %v1309_v62, %v1309_v62  ;;  %v1662_v2 = vpack.c.bf16 %v1309_v62, %v1306_v58 }
 0x18b   :  { %v1327_v4 = vrot.slane %v1326_v0, 4  ;;  %v1363_v3 = vadd.f32 %v1362_v63, %v1348_v1  ;;  %1670 = vst [vmem:[%s2322_s2 + $0x38] sm:$0xff] %v1662_v2  }
 0x18d   :  { %v1328_v51 = vadd.f32 %v1327_v4, %v1326_v0  ;;  %v1364_v5 = vrot.slane %v1363_v3, 4 }
 0x18f   :  { %v1329_v6 = vrot.slane %v1328_v51, 2  ;;  %v1365_v7 = vadd.f32 %v1364_v5, %v1363_v3 }
 0x191   :  { %v1330_v8 = vadd.f32 %v1329_v6, %v1328_v51  ;;  %v1366_v9 = vrot.slane %v1365_v7, 2 }
 0x193   :  { %v1331_v54 = vrot.slane %v1330_v8, 1  ;;  %v1367_v10 = vadd.f32 %v1366_v9, %v1365_v7 }
 0x195   :  { %v1368_v12 = vrot.slane %v1367_v10, 1  ;;  %v1332_v14 = vadd.f32 %v1331_v54, %v1330_v8 }
 0x197   :  { %v1369_v15 = vadd.f32 %v1368_v12, %v1367_v10 }
 0x199   :  { %v1371_v16 = vsel %vm1370_vm0, %v1332_v14, %v1369_v15 }
 0x19a   :  { %v1373_v17 = vsel %vm1372_vm1, %v1371_v16, 0.0 }
 0x19b   :  { %1374 = vst [vmem:[%s2323_s3] sm:$0xff] %v1373_v17 }
 0x19c   :  { %1463 = vsyncpa [#allocation3], 1 }

// kernel: _lambda_.14
= control target key start
LH: loop header
LB: loop body
LE: loop exit
PB: predicated region body
PF: predicated region fallthrough
CT: control target
= control target key end

     0   :  { %v1187_v6 = vmov 1966171168   ;;  %v33_v8 = vlaneseq  ;;  %s1820_s1 = inlined_call_operand.vmem [shape: f32[1,8,128], index: 1, kind: input, shape index: {}]   ;;  %s1821_s0 = inlined_call_operand.vmem [shape: bf16[512,128], index: 0, kind: input, shape index: {}]   ;;  %s1822_s2 = inlined_call_operand.vmem [shape: f32[1,128], index: 2, kind: input, shape index: {}]   ;;  %s1823_s3 = inlined_call_operand.vmem [shape: f32[1,128], index: 3, kind: input, shape index: {}]   ;;  %s1824_s4 = inlined_call_operand.vmem [shape: bf16[512,128], index: 4, kind: output, shape index: {}]  }
   0x1   :  { %v17_v0 = vld [vmem:[%s1820_s1] sm:$0xff]  ;;  %v31_v7 = vunpack.c.l.s4 %v1187_v6  ;;  %v1231_v13 = vld [vmem:[%s1821_s0 + $0x8] sm:$0xff]   ;;  %v1236_v14 = vld [vmem:[%s1821_s0 + $0x10] sm:$0xff]  }
   0x2   :  { %v1216_v1 = vmul.f32 0.001953125, %v17_v0  ;;  %v1221_v11 = vshrl.u32 %v33_v8, 7  ;;  %v1226_v12 = vld [vmem:[%s1821_s0] sm:$0xff]   ;;  %v1241_v15 = vld [vmem:[%s1821_s0 + $0x18] sm:$0xff]   ;;  %v840_v20 = vunpack.c.l.bf16 %v1231_v13  ;;  %v1255_v21 = vld [vmem:[%s1821_s0 + $0x28] sm:$0xff]   ;;  %v841_v24 = vunpack.c.h.bf16 %v1231_v13 }
   0x3   :  { %v32_v10 = vunpack.c.0.s8 %v31_v7  ;;  %v1246_v16 = vld [vmem:[%s1821_s0 + $0x20] sm:$0xff]   ;;  %v836_v17 = vunpack.c.l.bf16 %v1226_v12  ;;  %v837_v18 = vunpack.c.h.bf16 %v1226_v12  ;;  %v1260_v22 = vld [vmem:[%s1821_s0 + $0x30] sm:$0xff]   ;;  %v844_v25 = vunpack.c.l.bf16 %v1236_v14  ;;  %v1271_v27 = vld [vmem:[%s1821_s0 + $0x38] sm:$0xff]  }
   0x4   :  { %v20_v2 = vmul.f32 %v1216_v1, %v1216_v1  ;;  %v181_v19 = vsub.s32 0, %v1221_v11  ;;  %v845_v26 = vunpack.c.h.bf16 %v1236_v14  ;;  %v1276_v28 = vld [vmem:[%s1821_s0 + $0x40] sm:$0xff]   ;;  %v848_v29 = vunpack.c.l.bf16 %v1241_v15  ;;  %v1285_v33 = vld [vmem:[%s1821_s0 + $0x48] sm:$0xff]   ;;  %v1290_v34 = vld [vmem:[%s1821_s0 + $0x50] sm:$0xff]  }
   0x5   :  { %v1263_v23 = vsub.s32 %v32_v10, %v1221_v11  ;;  %v849_v30 = vunpack.c.h.bf16 %v1241_v15  ;;  %v852_v31 = vunpack.c.l.bf16 %v1246_v16  ;;  %v853_v32 = vunpack.c.h.bf16 %v1246_v16  ;;  %v1299_v39 = vld [vmem:[%s1821_s0 + $0x58] sm:$0xff]   ;;  %v1304_v40 = vld [vmem:[%s1821_s0 + $0x60] sm:$0xff]   ;;  %v1313_v45 = vld [vmem:[%s1821_s0 + $0x68] sm:$0xff]  }
   0x6   :  { %v22_v3 = vrot.slane %v20_v2, 7  ;;  %v856_v35 = vunpack.c.l.bf16 %v1255_v21  ;;  %v857_v36 = vunpack.c.h.bf16 %v1255_v21  ;;  %v860_v37 = vunpack.c.l.bf16 %v1260_v22  ;;  %v1318_v46 = vld [vmem:[%s1821_s0 + $0x70] sm:$0xff]   ;;  %v1327_v51 = vld [vmem:[%s1821_s0 + $0x78] sm:$0xff]   ;;  %v1332_v52 = vld [vmem:[%s1821_s0 + $0x80] sm:$0xff]  }
   0x7   :  { %v861_v38 = vunpack.c.h.bf16 %v1260_v22  ;;  %v864_v41 = vunpack.c.l.bf16 %v1271_v27  ;;  %v865_v42 = vunpack.c.h.bf16 %v1271_v27  ;;  %v868_v43 = vunpack.c.l.bf16 %v1276_v28  ;;  %v1341_v57 = vld [vmem:[%s1821_s0 + $0x88] sm:$0xff]   ;;  %v1346_v58 = vld [vmem:[%s1821_s0 + $0x90] sm:$0xff]   ;;  %v1355_v0 = vld [vmem:[%s1821_s0 + $0x98] sm:$0xff]  }
   0x8   :  { %v24_v4 = vsub.f32 %v1216_v1, %v22_v3  ;;  %v1364_v6 = vld [vmem:[%s1821_s0 + $0xa0] sm:$0xff]   ;;  %v1369_v7 = vld [vmem:[%s1821_s0 + $0xa8] sm:$0xff]   ;;  %v1408_v61 = vld [vmem:[%s1821_s0 + $0xd0] sm:$0xff]  }
   0x9   :  { %v1396_v10 = vld [vmem:[%s1821_s0 + $0xc8] sm:$0xff]   ;;  %v1417_v8 = vld [vmem:[%s1821_s0 + $0xd8] sm:$0xff]   ;;  %v1422_v62 = vld [vmem:[%s1821_s0 + $0xe0] sm:$0xff]  }
   0xa   :  { %v25_v5 = vmax.f32 %v24_v4, 0.0  ;;  %v1383_v4 = vld [vmem:[%s1821_s0 + $0xb8] sm:$0xff]   ;;  %v1431_v54 = vld [vmem:[%s1821_s0 + $0xe8] sm:$0xff]   ;;  %v949_v63 = vunpack.c.h.bf16 %v1422_v62 }
   0xb   :  { %v1444_v55 = vld [vmem:[%s1821_s0 + $0xf8] sm:$0xff]   ;;  %v952_v49 = vunpack.c.l.bf16 %v1431_v54 }
   0xc   :  { %v27_v9 = vadd.f32 1e-05, %v25_v5  ;;  %v1378_v5 = vld [vmem:[%s1821_s0 + $0xb0] sm:$0xff]   ;;  %v960_v53 = vunpack.c.l.bf16 %v1444_v55 }
   0xe   :  { %1185 = vrsqrt.f32 %v27_v9 }
  0x18   :  { %v1186_v59 = vpop.eup %1185 }
  0x19   :  { %v36_v2 = vrot.slane %v1186_v59, %v1263_v23  ;;  %v1391_v59 = vld [vmem:[%s1821_s0 + $0xc0] sm:$0xff]  }
  0x1b   :  { %v37_v3 = vcombine.high %v36_v2, %v36_v2  ;;  %v26_v2 = vld [vmem:[%s1822_s2] sm:$0x1] }
  0x1d   :  { %v44_v60 = vrot.slane %v37_v3, %v1263_v23  ;;  %v1439_v23 = vld [vmem:[%s1821_s0 + $0xf0] sm:$0xff]  }
  0x1e   :  { %v956_v47 = vunpack.c.l.bf16 %v1439_v23 }
  0x1f   :  { %v46_v56 = vmul.f32 %v44_v60, %v26_v2  ;;  %v47_v60 = vld [vmem:[%s1823_s3] sm:$0x1] }
  0x21   :  { %v48_v3 = vmul.f32 %v46_v56, %v1216_v1  ;;  %v1456_v9 = vrot.slane %v46_v56, %v181_v19 }
  0x23   :  { %v49_v44 = vsub.f32 %v47_v60, %v48_v3  ;;  %v184_v1 = vmul.f32 %v836_v17, %v1456_v9  ;;  %v185_v56 = vmul.f32 %v837_v18, %v1456_v9  ;;  %v186_v48 = vmul.f32 %v840_v20, %v1456_v9 }
  0x24   :  { %v187_v2 = vmul.f32 %v841_v24, %v1456_v9  ;;  %v188_v3 = vmul.f32 %v844_v25, %v1456_v9  ;;  %v189_v17 = vmul.f32 %v845_v26, %v1456_v9  ;;  %v190_v12 = vmul.f32 %v848_v29, %v1456_v9 }
  0x25   :  { %v1487_v18 = vrot.slane %v49_v44, %v181_v19  ;;  %v191_v13 = vmul.f32 %v849_v30, %v1456_v9  ;;  %v192_v20 = vmul.f32 %v852_v31, %v1456_v9  ;;  %v193_v14 = vmul.f32 %v853_v32, %v1456_v9 }
  0x26   :  { %v194_v24 = vmul.f32 %v856_v35, %v1456_v9  ;;  %v195_v11 = vmul.f32 %v857_v36, %v1456_v9  ;;  %v196_v15 = vmul.f32 %v860_v37, %v1456_v9  ;;  %v197_v19 = vmul.f32 %v861_v38, %v1456_v9 }
  0x27   :  { %v254_v25 = vadd.f32 %v1487_v18, %v184_v1  ;;  %v255_v16 = vadd.f32 %v1487_v18, %v185_v56  ;;  %v256_v26 = vadd.f32 %v1487_v18, %v186_v48  ;;  %v257_v29 = vadd.f32 %v1487_v18, %v187_v2 }
  0x28   :  { %v258_v30 = vadd.f32 %v1487_v18, %v188_v3  ;;  %v259_v21 = vadd.f32 %v1487_v18, %v189_v17  ;;  %v260_v31 = vadd.f32 %v1487_v18, %v190_v12  ;;  %v261_v32 = vadd.f32 %v1487_v18, %v191_v13 }
  0x29   :  { %v318_v35 = vmax.f32 %v254_v25, 0.0  ;;  %v319_v36 = vmax.f32 %v255_v16, 0.0  ;;  %v320_v22 = vmax.f32 %v256_v26, 0.0  ;;  %v321_v37 = vmax.f32 %v257_v29, 0.0 }
  0x2a   :  { %v322_v38 = vmax.f32 %v258_v30, 0.0  ;;  %v323_v44 = vmax.f32 %v259_v21, 0.0  ;;  %v324_v60 = vmax.f32 %v260_v31, 0.0  ;;  %v325_v1 = vmax.f32 %v261_v32, 0.0 }
  0x2b   :  { %v965_v56 = vpack.c.bf16 %v319_v36, %v318_v35  ;;  %v970_v48 = vpack.c.bf16 %v321_v37, %v320_v22  ;;  %v262_v2 = vadd.f32 %v1487_v18, %v192_v20  ;;  %v263_v3 = vadd.f32 %v1487_v18, %v193_v14 }
  0x2c   :  { %v975_v50 = vpack.c.bf16 %v323_v44, %v322_v38  ;;  %v980_v17 = vpack.c.bf16 %v325_v1, %v324_v60  ;;  %v264_v12 = vadd.f32 %v1487_v18, %v194_v24  ;;  %v265_v13 = vadd.f32 %v1487_v18, %v195_v11 }
  0x2d   :  { %966 = vst [vmem:[%s1824_s4] sm:$0xff] %v965_v56   ;;  %1153 = vst [vmem:[%s1824_s4 + $0x8] sm:$0xff] %v970_v48   ;;  %v326_v25 = vmax.f32 %v262_v2, 0.0  ;;  %v327_v16 = vmax.f32 %v263_v3, 0.0  ;;  %v266_v20 = vadd.f32 %v1487_v18, %v196_v15  ;;  %v267_v14 = vadd.f32 %v1487_v18, %v197_v19 }
  0x2e   :  { %1154 = vst [vmem:[%s1824_s4 + $0x10] sm:$0xff] %v975_v50   ;;  %1155 = vst [vmem:[%s1824_s4 + $0x18] sm:$0xff] %v980_v17   ;;  %v328_v24 = vmax.f32 %v264_v12, 0.0  ;;  %v329_v11 = vmax.f32 %v265_v13, 0.0  ;;  %v198_v26 = vmul.f32 %v864_v41, %v1456_v9  ;;  %v199_v15 = vmul.f32 %v865_v42, %v1456_v9 }
  0x2f   :  { %v985_v29 = vpack.c.bf16 %v327_v16, %v326_v25  ;;  %v330_v19 = vmax.f32 %v266_v20, 0.0  ;;  %v331_v30 = vmax.f32 %v267_v14, 0.0  ;;  %v200_v50 = vmul.f32 %v868_v43, %v1456_v9 }
  0x30   :  { %v990_v21 = vpack.c.bf16 %v329_v11, %v328_v24  ;;  %v268_v31 = vadd.f32 %v1487_v18, %v198_v26  ;;  %v269_v32 = vadd.f32 %v1487_v18, %v199_v15  ;;  %v1825_v35 = vunpack.c.h.bf16 %v1276_v28 }
  0x31   :  { %1156 = vst [vmem:[%s1824_s4 + $0x20] sm:$0xff] %v985_v29   ;;  %v995_v27 = vpack.c.bf16 %v331_v30, %v330_v19  ;;  %v270_v42 = vadd.f32 %v1487_v18, %v200_v50  ;;  %v1826_v36 = vunpack.c.l.bf16 %v1285_v33  ;;  %v1827_v22 = vunpack.c.h.bf16 %v1285_v33 }
  0x32   :  { %v201_v41 = vmul.f32 %v1825_v35, %v1456_v9  ;;  %1157 = vst [vmem:[%s1824_s4 + $0x28] sm:$0xff] %v990_v21   ;;  %v332_v28 = vmax.f32 %v268_v31, 0.0  ;;  %v333_v38 = vmax.f32 %v269_v32, 0.0  ;;  %v1828_v60 = vunpack.c.l.bf16 %v1290_v34 }
  0x33   :  { %v202_v43 = vmul.f32 %v1826_v36, %v1456_v9  ;;  %v203_v37 = vmul.f32 %v1827_v22, %v1456_v9  ;;  %1158 = vst [vmem:[%s1824_s4 + $0x30] sm:$0xff] %v995_v27   ;;  %v334_v56 = vmax.f32 %v270_v42, 0.0  ;;  %v1829_v2 = vunpack.c.h.bf16 %v1290_v34 }
  0x34   :  { %v271_v44 = vadd.f32 %v1487_v18, %v201_v41  ;;  %v204_v1 = vmul.f32 %v1828_v60, %v1456_v9  ;;  %v1000_v17 = vpack.c.bf16 %v333_v38, %v332_v28  ;;  %v1830_v25 = vunpack.c.l.bf16 %v1299_v39 }
  0x35   :  { %v272_v33 = vadd.f32 %v1487_v18, %v202_v43  ;;  %v273_v48 = vadd.f32 %v1487_v18, %v203_v37  ;;  %v205_v3 = vmul.f32 %v1829_v2, %v1456_v9  ;;  %v1831_v11 = vunpack.c.h.bf16 %v1299_v39 }
  0x36   :  { %v335_v12 = vmax.f32 %v271_v44, 0.0  ;;  %v274_v13 = vadd.f32 %v1487_v18, %v204_v1  ;;  %v206_v16 = vmul.f32 %v1830_v25, %v1456_v9  ;;  %1159 = vst [vmem:[%s1824_s4 + $0x38] sm:$0xff] %v1000_v17   ;;  %v1832_v19 = vunpack.c.l.bf16 %v1304_v40 }
  0x37   :  { %v336_v20 = vmax.f32 %v272_v33, 0.0  ;;  %v337_v14 = vmax.f32 %v273_v48, 0.0  ;;  %v275_v24 = vadd.f32 %v1487_v18, %v205_v3  ;;  %v207_v26 = vmul.f32 %v1831_v11, %v1456_v9 }
  0x38   :  { %v1005_v34 = vpack.c.bf16 %v335_v12, %v334_v56  ;;  %v338_v15 = vmax.f32 %v274_v13, 0.0  ;;  %v276_v29 = vadd.f32 %v1487_v18, %v206_v16  ;;  %v208_v30 = vmul.f32 %v1832_v19, %v1456_v9 }
  0x39   :  { %v1010_v50 = vpack.c.bf16 %v337_v14, %v336_v20  ;;  %v339_v21 = vmax.f32 %v275_v24, 0.0  ;;  %v277_v31 = vadd.f32 %v1487_v18, %v207_v26  ;;  %v1833_v39 = vunpack.c.h.bf16 %v1304_v40 }
  0x3a   :  { %1160 = vst [vmem:[%s1824_s4 + $0x40] sm:$0xff] %v1005_v34   ;;  %v340_v35 = vmax.f32 %v276_v29, 0.0  ;;  %v278_v41 = vadd.f32 %v1487_v18, %v208_v30  ;;  %v1834_v27 = vunpack.c.l.bf16 %v1313_v45  ;;  %v1835_v36 = vunpack.c.h.bf16 %v1313_v45 }
  0x3b   :  { %v209_v32 = vmul.f32 %v1833_v39, %v1456_v9  ;;  %1161 = vst [vmem:[%s1824_s4 + $0x48] sm:$0xff] %v1010_v50   ;;  %v1015_v40 = vpack.c.bf16 %v339_v21, %v338_v15  ;;  %v341_v22 = vmax.f32 %v277_v31, 0.0  ;;  %v1836_v28 = vunpack.c.l.bf16 %v1318_v46 }
  0x3c   :  { %v210_v42 = vmul.f32 %v1834_v27, %v1456_v9  ;;  %v211_v43 = vmul.f32 %v1835_v36, %v1456_v9  ;;  %v342_v44 = vmax.f32 %v278_v41, 0.0  ;;  %v1837_v45 = vunpack.c.h.bf16 %v1318_v46 }
  0x3d   :  { %v279_v37 = vadd.f32 %v1487_v18, %v209_v32  ;;  %v212_v38 = vmul.f32 %v1836_v28, %v1456_v9  ;;  %1162 = vst [vmem:[%s1824_s4 + $0x50] sm:$0xff] %v1015_v40   ;;  %v1020_v33 = vpack.c.bf16 %v341_v22, %v340_v35  ;;  %v1838_v3 = vunpack.c.l.bf16 %v1327_v51 }
  0x3e   :  { %v280_v60 = vadd.f32 %v1487_v18, %v210_v42  ;;  %v281_v1 = vadd.f32 %v1487_v18, %v211_v43  ;;  %v213_v56 = vmul.f32 %v1837_v45, %v1456_v9  ;;  %v1839_v46 = vunpack.c.h.bf16 %v1327_v51 }
  0x3f   :  { %v343_v48 = vmax.f32 %v279_v37, 0.0  ;;  %v282_v2 = vadd.f32 %v1487_v18, %v212_v38  ;;  %v214_v17 = vmul.f32 %v1838_v3, %v1456_v9  ;;  %1163 = vst [vmem:[%s1824_s4 + $0x58] sm:$0xff] %v1020_v33   ;;  %v1840_v11 = vunpack.c.l.bf16 %v1332_v52 }
  0x40   :  { %v344_v12 = vmax.f32 %v280_v60, 0.0  ;;  %v345_v13 = vmax.f32 %v281_v1, 0.0  ;;  %v283_v25 = vadd.f32 %v1487_v18, %v213_v56  ;;  %v215_v16 = vmul.f32 %v1839_v46, %v1456_v9 }
  0x41   :  { %v1025_v20 = vpack.c.bf16 %v343_v48, %v342_v44  ;;  %v346_v14 = vmax.f32 %v282_v2, 0.0  ;;  %v284_v24 = vadd.f32 %v1487_v18, %v214_v17  ;;  %v216_v26 = vmul.f32 %v1840_v11, %v1456_v9 }
  0x42   :  { %v1030_v34 = vpack.c.bf16 %v345_v13, %v344_v12  ;;  %v347_v15 = vmax.f32 %v283_v25, 0.0  ;;  %v285_v29 = vadd.f32 %v1487_v18, %v215_v16  ;;  %v1841_v51 = vunpack.c.h.bf16 %v1332_v52 }
  0x43   :  { %1164 = vst [vmem:[%s1824_s4 + $0x60] sm:$0xff] %v1025_v20   ;;  %v348_v30 = vmax.f32 %v284_v24, 0.0  ;;  %v286_v50 = vadd.f32 %v1487_v18, %v216_v26  ;;  %v1842_v21 = vunpack.c.l.bf16 %v1341_v57  ;;  %v1843_v39 = vunpack.c.h.bf16 %v1341_v57 }
  0x44   :  { %v217_v19 = vmul.f32 %v1841_v51, %v1456_v9  ;;  %1165 = vst [vmem:[%s1824_s4 + $0x68] sm:$0xff] %v1030_v34   ;;  %v1035_v52 = vpack.c.bf16 %v347_v15, %v346_v14  ;;  %v349_v35 = vmax.f32 %v285_v29, 0.0  ;;  %v1844_v27 = vunpack.c.l.bf16 %v1346_v58 }
  0x45   :  { %v218_v31 = vmul.f32 %v1842_v21, %v1456_v9  ;;  %v219_v32 = vmul.f32 %v1843_v39, %v1456_v9  ;;  %v350_v36 = vmax.f32 %v286_v50, 0.0  ;;  %v1845_v57 = vunpack.c.h.bf16 %v1346_v58 }
  0x46   :  { %v287_v41 = vadd.f32 %v1487_v18, %v217_v19  ;;  %v220_v42 = vmul.f32 %v1844_v27, %v1456_v9  ;;  %1166 = vst [vmem:[%s1824_s4 + $0x70] sm:$0xff] %v1035_v52   ;;  %v1040_v37 = vpack.c.bf16 %v349_v35, %v348_v30  ;;  %v1846_v44 = vunpack.c.l.bf16 %v1355_v0 }
  0x47   :  { %v288_v43 = vadd.f32 %v1487_v18, %v218_v31  ;;  %v289_v40 = vadd.f32 %v1487_v18, %v219_v32  ;;  %v221_v22 = vmul.f32 %v1845_v57, %v1456_v9  ;;  %v1847_v58 = vunpack.c.h.bf16 %v1355_v0 }
  0x48   :  { %v351_v28 = vmax.f32 %v287_v41, 0.0  ;;  %v290_v38 = vadd.f32 %v1487_v18, %v220_v42  ;;  %v222_v60 = vmul.f32 %v1846_v44, %v1456_v9  ;;  %1167 = vst [vmem:[%s1824_s4 + $0x78] sm:$0xff] %v1040_v37   ;;  %v1848_v17 = vunpack.c.l.bf16 %v1364_v6 }
  0x49   :  { %v352_v1 = vmax.f32 %v288_v43, 0.0  ;;  %v353_v45 = vmax.f32 %v289_v40, 0.0  ;;  %v291_v56 = vadd.f32 %v1487_v18, %v221_v22  ;;  %v223_v33 = vmul.f32 %v1847_v58, %v1456_v9 }
  0x4a   :  { %v1045_v48 = vpack.c.bf16 %v351_v28, %v350_v36  ;;  %v354_v2 = vmax.f32 %v290_v38, 0.0  ;;  %v292_v3 = vadd.f32 %v1487_v18, %v222_v60  ;;  %v224_v12 = vmul.f32 %v1848_v17, %v1456_v9 }
  0x4b   :  { %v1050_v13 = vpack.c.bf16 %v353_v45, %v352_v1  ;;  %v355_v25 = vmax.f32 %v291_v56, 0.0  ;;  %v293_v46 = vadd.f32 %v1487_v18, %v223_v33  ;;  %v1849_v0 = vunpack.c.h.bf16 %v1364_v6 }
  0x4c   :  { %1168 = vst [vmem:[%s1824_s4 + $0x80] sm:$0xff] %v1045_v48   ;;  %v356_v20 = vmax.f32 %v292_v3, 0.0  ;;  %v294_v14 = vadd.f32 %v1487_v18, %v224_v12  ;;  %v1850_v24 = vunpack.c.l.bf16 %v1369_v7  ;;  %v1851_v26 = vunpack.c.h.bf16 %v1369_v7 }
  0x4d   :  { %v225_v16 = vmul.f32 %v1849_v0, %v1456_v9  ;;  %1169 = vst [vmem:[%s1824_s4 + $0x88] sm:$0xff] %v1050_v13   ;;  %v1055_v6 = vpack.c.bf16 %v355_v25, %v354_v2  ;;  %v357_v15 = vmax.f32 %v293_v46, 0.0  ;;  %v1852_v51 = vunpack.c.l.bf16 %v1378_v5 }
  0x4e   :  { %v226_v11 = vmul.f32 %v1850_v24, %v1456_v9  ;;  %v227_v34 = vmul.f32 %v1851_v26, %v1456_v9  ;;  %v358_v30 = vmax.f32 %v294_v14, 0.0  ;;  %v1853_v7 = vunpack.c.h.bf16 %v1378_v5 }
  0x4f   :  { %v295_v29 = vadd.f32 %v1487_v18, %v225_v16  ;;  %v228_v19 = vmul.f32 %v1852_v51, %v1456_v9  ;;  %1170 = vst [vmem:[%s1824_s4 + $0x90] sm:$0xff] %v1055_v6   ;;  %v1060_v39 = vpack.c.bf16 %v357_v15, %v356_v20  ;;  %v1854_v35 = vunpack.c.l.bf16 %v1383_v4 }
  0x50   :  { %v296_v50 = vadd.f32 %v1487_v18, %v226_v11  ;;  %v297_v21 = vadd.f32 %v1487_v18, %v227_v34  ;;  %v229_v31 = vmul.f32 %v1853_v7, %v1456_v9  ;;  %v1855_v5 = vunpack.c.h.bf16 %v1383_v4 }
  0x51   :  { %v359_v32 = vmax.f32 %v295_v29, 0.0  ;;  %v298_v52 = vadd.f32 %v1487_v18, %v228_v19  ;;  %v230_v41 = vmul.f32 %v1854_v35, %v1456_v9  ;;  %1171 = vst [vmem:[%s1824_s4 + $0x98] sm:$0xff] %v1060_v39   ;;  %v1856_v37 = vunpack.c.l.bf16 %v1391_v59 }
  0x52   :  { %v360_v27 = vmax.f32 %v296_v50, 0.0  ;;  %v361_v42 = vmax.f32 %v297_v21, 0.0  ;;  %v299_v36 = vadd.f32 %v1487_v18, %v229_v31  ;;  %v231_v43 = vmul.f32 %v1855_v5, %v1456_v9 }
  0x53   :  { %v1065_v40 = vpack.c.bf16 %v359_v32, %v358_v30  ;;  %v362_v57 = vmax.f32 %v298_v52, 0.0  ;;  %v300_v22 = vadd.f32 %v1487_v18, %v230_v41  ;;  %v232_v28 = vmul.f32 %v1856_v37, %v1456_v9 }
  0x54   :  { %v1070_v38 = vpack.c.bf16 %v361_v42, %v360_v27  ;;  %v363_v44 = vmax.f32 %v299_v36, 0.0  ;;  %v301_v60 = vadd.f32 %v1487_v18, %v231_v43  ;;  %v1857_v4 = vunpack.c.h.bf16 %v1391_v59 }
  0x55   :  { %1172 = vst [vmem:[%s1824_s4 + $0xa0] sm:$0xff] %v1065_v40   ;;  %v364_v45 = vmax.f32 %v300_v22, 0.0  ;;  %v302_v56 = vadd.f32 %v1487_v18, %v232_v28  ;;  %v1858_v58 = vunpack.c.l.bf16 %v1396_v10  ;;  %v1859_v48 = vunpack.c.h.bf16 %v1396_v10 }
  0x56   :  { %v233_v1 = vmul.f32 %v1857_v4, %v1456_v9  ;;  %1173 = vst [vmem:[%s1824_s4 + $0xa8] sm:$0xff] %v1070_v38   ;;  %v1075_v59 = vpack.c.bf16 %v363_v44, %v362_v57  ;;  %v365_v3 = vmax.f32 %v301_v60, 0.0  ;;  %v1860_v12 = vunpack.c.l.bf16 %v1408_v61 }
  0x57   :  { %v234_v33 = vmul.f32 %v1858_v58, %v1456_v9  ;;  %v235_v2 = vmul.f32 %v1859_v48, %v1456_v9  ;;  %v366_v25 = vmax.f32 %v302_v56, 0.0  ;;  %v1861_v10 = vunpack.c.h.bf16 %v1408_v61 }
  0x58   :  { %v303_v17 = vadd.f32 %v1487_v18, %v233_v1  ;;  %v236_v13 = vmul.f32 %v1860_v12, %v1456_v9  ;;  %1174 = vst [vmem:[%s1824_s4 + $0xb0] sm:$0xff] %v1075_v59   ;;  %v1080_v20 = vpack.c.bf16 %v365_v3, %v364_v45  ;;  %v1862_v11 = vunpack.c.l.bf16 %v1417_v8 }
  0x59   :  { %v304_v46 = vadd.f32 %v1487_v18, %v234_v33  ;;  %v305_v0 = vadd.f32 %v1487_v18, %v235_v2  ;;  %v237_v16 = vmul.f32 %v1861_v10, %v1456_v9  ;;  %v1863_v61 = vunpack.c.h.bf16 %v1417_v8 }
  0x5a   :  { %v367_v14 = vmax.f32 %v303_v17, 0.0  ;;  %v306_v24 = vadd.f32 %v1487_v18, %v236_v13  ;;  %v238_v26 = vmul.f32 %v1862_v11, %v1456_v9  ;;  %1175 = vst [vmem:[%s1824_s4 + $0xb8] sm:$0xff] %v1080_v20   ;;  %v1864_v50 = vunpack.c.l.bf16 %v1422_v62 }
  0x5b   :  { %v368_v34 = vmax.f32 %v304_v46, 0.0  ;;  %v369_v6 = vmax.f32 %v305_v0, 0.0  ;;  %v307_v15 = vadd.f32 %v1487_v18, %v237_v16  ;;  %v239_v29 = vmul.f32 %v1863_v61, %v1456_v9 }
  0x5c   :  { %v1085_v51 = vpack.c.bf16 %v367_v14, %v366_v25  ;;  %v370_v19 = vmax.f32 %v306_v24, 0.0  ;;  %v308_v30 = vadd.f32 %v1487_v18, %v238_v26  ;;  %v240_v21 = vmul.f32 %v1864_v50, %v1456_v9 }
  0x5d   :  { %v1090_v7 = vpack.c.bf16 %v369_v6, %v368_v34  ;;  %v371_v31 = vmax.f32 %v307_v15, 0.0  ;;  %v309_v39 = vadd.f32 %v1487_v18, %v239_v29  ;;  %v241_v8 = vmul.f32 %v949_v63, %v1456_v9 }
  0x5e   :  { %1176 = vst [vmem:[%s1824_s4 + $0xc0] sm:$0xff] %v1085_v51   ;;  %v372_v32 = vmax.f32 %v308_v30, 0.0  ;;  %v310_v52 = vadd.f32 %v1487_v18, %v240_v21  ;;  %v242_v35 = vmul.f32 %v952_v49, %v1456_v9  ;;  %v1865_v41 = vunpack.c.h.bf16 %v1431_v54 }
  0x5f   :  { %1177 = vst [vmem:[%s1824_s4 + $0xc8] sm:$0xff] %v1090_v7   ;;  %v1095_v62 = vpack.c.bf16 %v371_v31, %v370_v19  ;;  %v373_v63 = vmax.f32 %v309_v39, 0.0  ;;  %v311_v42 = vadd.f32 %v1487_v18, %v241_v8  ;;  %v244_v36 = vmul.f32 %v956_v47, %v1456_v9 }
  0x60   :  { %v243_v27 = vmul.f32 %v1865_v41, %v1456_v9  ;;  %v374_v5 = vmax.f32 %v310_v52, 0.0  ;;  %v312_v43 = vadd.f32 %v1487_v18, %v242_v35  ;;  %v1866_v54 = vunpack.c.h.bf16 %v1439_v23 }
  0x61   :  { %1178 = vst [vmem:[%s1824_s4 + $0xd0] sm:$0xff] %v1095_v62   ;;  %v1100_v57 = vpack.c.bf16 %v373_v63, %v372_v32  ;;  %v375_v22 = vmax.f32 %v311_v42, 0.0  ;;  %v314_v37 = vadd.f32 %v1487_v18, %v244_v36  ;;  %v246_v47 = vmul.f32 %v960_v53, %v1456_v9 }
  0x62   :  { %v313_v49 = vadd.f32 %v1487_v18, %v243_v27  ;;  %v245_v40 = vmul.f32 %v1866_v54, %v1456_v9  ;;  %v376_v28 = vmax.f32 %v312_v43, 0.0  ;;  %v1867_v23 = vunpack.c.h.bf16 %v1444_v55 }
  0x63   :  { %1179 = vst [vmem:[%s1824_s4 + $0xd8] sm:$0xff] %v1100_v57   ;;  %v1105_v4 = vpack.c.bf16 %v375_v22, %v374_v5  ;;  %v378_v1 = vmax.f32 %v314_v37, 0.0  ;;  %v316_v45 = vadd.f32 %v1487_v18, %v246_v47 }
  0x64   :  { %v377_v38 = vmax.f32 %v313_v49, 0.0  ;;  %v315_v44 = vadd.f32 %v1487_v18, %v245_v40  ;;  %v247_v60 = vmul.f32 %v1867_v23, %v1456_v9 }
  0x65   :  { %1180 = vst [vmem:[%s1824_s4 + $0xe0] sm:$0xff] %v1105_v4   ;;  %v380_v33 = vmax.f32 %v316_v45, 0.0 }
  0x66   :  { %v1110_v56 = vpack.c.bf16 %v377_v38, %v376_v28  ;;  %v379_v58 = vmax.f32 %v315_v44, 0.0  ;;  %v317_v53 = vadd.f32 %v1487_v18, %v247_v60 }
  0x68   :  { %1181 = vst [vmem:[%s1824_s4 + $0xe8] sm:$0xff] %v1110_v56   ;;  %v1115_v55 = vpack.c.bf16 %v379_v58, %v378_v1  ;;  %v381_v9 = vmax.f32 %v317_v53, 0.0 }
  0x6a   :  { %1182 = vst [vmem:[%s1824_s4 + $0xf0] sm:$0xff] %v1115_v55   ;;  %v1120_v48 = vpack.c.bf16 %v381_v9, %v380_v33 }
  0x6c   :  { %1183 = vst [vmem:[%s1824_s4 + $0xf8] sm:$0xff] %v1120_v48  }

// kernel: _lambda_.13
= control target key start
LH: loop header
LB: loop body
LE: loop exit
PB: predicated region body
PF: predicated region fallthrough
CT: control target
= control target key end

     0   :  { %v2919_v0 = vmov 0   ;;  %vm1818_vm0 = vcmask 1040384   ;;  %vm1820_vm1 = vcmask 1041408   ;;  %s3551_s1 = inlined_call_operand.vmem [shape: bf16[512,128], index: 1, kind: input, shape index: {}]   ;;  %s3552_s0 = inlined_call_operand.vmem [shape: bf16[512,512], index: 0, kind: input, shape index: {}]   ;;  %s3553_s2 = inlined_call_operand.vmem [shape: bf16[512,128], index: 2, kind: output, shape index: {0}]   ;;  %s3554_s3 = inlined_call_operand.vmem [shape: f32[1,8,128], index: 3, kind: output, shape index: {1}]  }
   0x1   :  { %1038 = vmatprep.subr.bf16.mxu1 %v2919_v0  ;;  %1327 = vmatprep.subr.bf16.mxu0 %v2919_v0  ;;  %v2695_v1 = vld [vmem:[%s3551_s1] sm:$0xff]   ;;  %v2697_v3 = vld [vmem:[%s3551_s1 + $0x8] sm:$0xff]   ;;  %v2699_v5 = vld [vmem:[%s3551_s1 + $0x10] sm:$0xff]  }
   0x2   :  { %v2696_v2 = vld [vmem:[%s3551_s1 + $0x80] sm:$0xff]   ;;  %1039 = vmatpush1.bf16.msra.mxu1 %v2695_v1  ;;  %v2698_v4 = vld [vmem:[%s3551_s1 + $0x88] sm:$0xff]   ;;  %v2700_v6 = vld [vmem:[%s3551_s1 + $0x90] sm:$0xff]  }
   0x3   :  { %1328 = vmatpush1.bf16.msra.mxu0 %v2696_v2  ;;  %1040 = vmatprep.subr.bf16.mxu1 %v2919_v0  ;;  %v2701_v7 = vld [vmem:[%s3551_s1 + $0x18] sm:$0xff]   ;;  %v2703_v9 = vld [vmem:[%s3551_s1 + $0x20] sm:$0xff]   ;;  %v2705_v11 = vld [vmem:[%s3551_s1 + $0x28] sm:$0xff]  }
   0x4   :  { %1329 = vmatprep.subr.bf16.mxu0 %v2919_v0  ;;  %v2702_v8 = vld [vmem:[%s3551_s1 + $0x98] sm:$0xff]   ;;  %v2704_v10 = vld [vmem:[%s3551_s1 + $0xa0] sm:$0xff]   ;;  %v2706_v12 = vld [vmem:[%s3551_s1 + $0xa8] sm:$0xff]  }
   0x5   :  { %v2707_v13 = vld [vmem:[%s3551_s1 + $0x30] sm:$0xff]   ;;  %v2709_v15 = vld [vmem:[%s3551_s1 + $0x38] sm:$0xff]   ;;  %v2711_v17 = vld [vmem:[%s3551_s1 + $0x40] sm:$0xff]  }
   0x6   :  { %1041 = vmatpush1.bf16.msra.mxu1 %v2697_v3  ;;  %v2708_v14 = vld [vmem:[%s3551_s1 + $0xb0] sm:$0xff]   ;;  %v2710_v16 = vld [vmem:[%s3551_s1 + $0xb8] sm:$0xff]   ;;  %v2712_v18 = vld [vmem:[%s3551_s1 + $0xc0] sm:$0xff]  }
   0x7   :  { %1330 = vmatpush1.bf16.msra.mxu0 %v2698_v4  ;;  %1042 = vmatprep.subr.bf16.mxu1 %v2919_v0  ;;  %v2729_v19 = vld [vmem:[%s3552_s0 + $0x4] ss:$16 sps:$4 sm:$0xff]   ;;  %v2713_v20 = vld [vmem:[%s3551_s1 + $0x48] sm:$0xff]   ;;  %v2717_v25 = vld [vmem:[%s3551_s1 + $0x58] sm:$0xff]  }
   0x8   :  { %1331 = vmatprep.subr.bf16.mxu0 %v2919_v0  ;;  %v2732_v21 = vld [vmem:[%s3552_s0 + $0xc] ss:$16 sps:$4 sm:$0xff]   ;;  %1070 = vmatprep.mubr.bf16.mxu1 %v2729_v19  ;;  %v2715_v23 = vld [vmem:[%s3551_s1 + $0x50] sm:$0xff]   ;;  %v2719_v27 = vld [vmem:[%s3551_s1 + $0x60] sm:$0xff]  }
   0x9   :  { %v2714_v22 = vld [vmem:[%s3551_s1 + $0xc8] sm:$0xff]   ;;  %1359 = vmatprep.mubr.bf16.mxu0 %v2732_v21  ;;  %v2716_v24 = vld [vmem:[%s3551_s1 + $0xd0] sm:$0xff]   ;;  %v2718_v26 = vld [vmem:[%s3551_s1 + $0xd8] sm:$0xff]  }
   0xa   :  { %1043 = vmatpush1.bf16.msra.mxu1 %v2699_v5  ;;  %v2720_v28 = vld [vmem:[%s3551_s1 + $0xe0] sm:$0xff]   ;;  %v2721_v29 = vld [vmem:[%s3551_s1 + $0x68] sm:$0xff]   ;;  %v2723_v31 = vld [vmem:[%s3551_s1 + $0x70] sm:$0xff]  }
   0xb   :  { %1332 = vmatpush1.bf16.msra.mxu0 %v2700_v6  ;;  %1044 = vmatprep.subr.bf16.mxu1 %v2919_v0  ;;  %v2722_v30 = vld [vmem:[%s3551_s1 + $0xe8] sm:$0xff]   ;;  %v2724_v32 = vld [vmem:[%s3551_s1 + $0xf0] sm:$0xff]   ;;  %v2725_v33 = vld [vmem:[%s3551_s1 + $0x78] sm:$0xff]  }
   0xc   :  { %1333 = vmatprep.subr.bf16.mxu0 %v2919_v0  ;;  %v2726_v34 = vld [vmem:[%s3551_s1 + $0xf8] sm:$0xff]   ;;  %v2727_v35 = vld [vmem:[%s3552_s0] ss:$16 sps:$4 sm:$0xff]   ;;  %v2733_v37 = vld [vmem:[%s3552_s0 + $0x24] ss:$16 sps:$4 sm:$0xff]  }
   0xd   :  { %v2730_v36 = vld [vmem:[%s3552_s0 + $0x8] ss:$16 sps:$4 sm:$0xff]   ;;  %v2735_v38 = vld [vmem:[%s3552_s0 + $0x2c] ss:$16 sps:$4 sm:$0xff]   ;;  %v2737_v39 = vld [vmem:[%s3552_s0 + $0x20] ss:$16 sps:$4 sm:$0xff]  }
   0xe   :  { %1045 = vmatpush1.bf16.msra.mxu1 %v2701_v7  ;;  %v2738_v40 = vld [vmem:[%s3552_s0 + $0x28] ss:$16 sps:$4 sm:$0xff]   ;;  %v2739_v41 = vld [vmem:[%s3552_s0 + $0x44] ss:$16 sps:$4 sm:$0xff]   ;;  %v2741_v42 = vld [vmem:[%s3552_s0 + $0x4c] ss:$16 sps:$4 sm:$0xff]  }
   0xf   :  { %1334 = vmatpush1.bf16.msra.mxu0 %v2702_v8  ;;  %1046 = vmatprep.subr.bf16.mxu1 %v2919_v0  ;;  %v2743_v43 = vld [vmem:[%s3552_s0 + $0x40] ss:$16 sps:$4 sm:$0xff]   ;;  %v2744_v44 = vld [vmem:[%s3552_s0 + $0x48] ss:$16 sps:$4 sm:$0xff]   ;;  %v2745_v45 = vld [vmem:[%s3552_s0 + $0x64] ss:$16 sps:$4 sm:$0xff]  }
  0x10   :  { %1335 = vmatprep.subr.bf16.mxu0 %v2919_v0  ;;  %v2747_v46 = vld [vmem:[%s3552_s0 + $0x6c] ss:$16 sps:$4 sm:$0xff]   ;;  %v2749_v47 = vld [vmem:[%s3552_s0 + $0x60] ss:$16 sps:$4 sm:$0xff]   ;;  %v2750_v48 = vld [vmem:[%s3552_s0 + $0x68] ss:$16 sps:$4 sm:$0xff]  }
  0x11   :  { %v2751_v49 = vld [vmem:[%s3552_s0 + $0x84] ss:$16 sps:$4 sm:$0xff]   ;;  %v2753_v50 = vld [vmem:[%s3552_s0 + $0x8c] ss:$16 sps:$4 sm:$0xff]   ;;  %v2755_v51 = vld [vmem:[%s3552_s0 + $0x80] ss:$16 sps:$4 sm:$0xff]  }
  0x12   :  { %1047 = vmatpush1.bf16.msra.mxu1 %v2703_v9  ;;  %v2756_v52 = vld [vmem:[%s3552_s0 + $0x88] ss:$16 sps:$4 sm:$0xff]   ;;  %v2757_v53 = vld [vmem:[%s3552_s0 + $0xa4] ss:$16 sps:$4 sm:$0xff]   ;;  %v2759_v54 = vld [vmem:[%s3552_s0 + $0xac] ss:$16 sps:$4 sm:$0xff]  }
  0x13   :  { %1336 = vmatpush1.bf16.msra.mxu0 %v2704_v10  ;;  %1048 = vmatprep.subr.bf16.mxu1 %v2919_v0  ;;  %v2761_v55 = vld [vmem:[%s3552_s0 + $0xa0] ss:$16 sps:$4 sm:$0xff]   ;;  %v2762_v56 = vld [vmem:[%s3552_s0 + $0xa8] ss:$16 sps:$4 sm:$0xff]   ;;  %v2763_v57 = vld [vmem:[%s3552_s0 + $0xc4] ss:$16 sps:$4 sm:$0xff]  }
  0x14   :  { %1337 = vmatprep.subr.bf16.mxu0 %v2919_v0  ;;  %v2765_v58 = vld [vmem:[%s3552_s0 + $0xcc] ss:$16 sps:$4 sm:$0xff]   ;;  %v2767_v59 = vld [vmem:[%s3552_s0 + $0xc0] ss:$16 sps:$4 sm:$0xff]   ;;  %v2768_v60 = vld [vmem:[%s3552_s0 + $0xc8] ss:$16 sps:$4 sm:$0xff]  }
  0x15   :  { %v2769_v61 = vld [vmem:[%s3552_s0 + $0xe4] ss:$16 sps:$4 sm:$0xff]   ;;  %v2771_v62 = vld [vmem:[%s3552_s0 + $0xec] ss:$16 sps:$4 sm:$0xff]   ;;  %v2773_v63 = vld [vmem:[%s3552_s0 + $0xe0] ss:$16 sps:$4 sm:$0xff]  }
  0x16   :  { %1049 = vmatpush1.bf16.msra.mxu1 %v2705_v11  ;;  %v2775_v1 = vld [vmem:[%s3552_s0 + $0x104] ss:$16 sps:$4 sm:$0xff]   ;;  %v2777_v2 = vld [vmem:[%s3552_s0 + $0x10c] ss:$16 sps:$4 sm:$0xff]   ;;  %v2779_v3 = vld [vmem:[%s3552_s0 + $0x100] ss:$16 sps:$4 sm:$0xff]  }
  0x17   :  { %1338 = vmatpush1.bf16.msra.mxu0 %v2706_v12  ;;  %1050 = vmatprep.subr.bf16.mxu1 %v2919_v0  ;;  %v2780_v4 = vld [vmem:[%s3552_s0 + $0x108] ss:$16 sps:$4 sm:$0xff]   ;;  %v2781_v5 = vld [vmem:[%s3552_s0 + $0x124] ss:$16 sps:$4 sm:$0xff]   ;;  %v2783_v6 = vld [vmem:[%s3552_s0 + $0x12c] ss:$16 sps:$4 sm:$0xff]  }
  0x18   :  { %1339 = vmatprep.subr.bf16.mxu0 %v2919_v0  ;;  %v2785_v7 = vld [vmem:[%s3552_s0 + $0x120] ss:$16 sps:$4 sm:$0xff]   ;;  %v2786_v8 = vld [vmem:[%s3552_s0 + $0x128] ss:$16 sps:$4 sm:$0xff]   ;;  %v2787_v9 = vld [vmem:[%s3552_s0 + $0x144] ss:$16 sps:$4 sm:$0xff]  }
  0x19   :  { %v2789_v10 = vld [vmem:[%s3552_s0 + $0x14c] ss:$16 sps:$4 sm:$0xff]   ;;  %v2791_v11 = vld [vmem:[%s3552_s0 + $0x140] ss:$16 sps:$4 sm:$0xff]   ;;  %v2792_v12 = vld [vmem:[%s3552_s0 + $0x148] ss:$16 sps:$4 sm:$0xff]  }
  0x1a   :  { %1051 = vmatpush1.bf16.msra.mxu1 %v2707_v13  ;;  %v2793_v13 = vld [vmem:[%s3552_s0 + $0x164] ss:$16 sps:$4 sm:$0xff]   ;;  %v2803_v19 = vld [vmem:[%s3552_s0 + $0x180] ss:$16 sps:$4 sm:$0xff]  }
  0x1b   :  { %1340 = vmatpush1.bf16.msra.mxu0 %v2708_v14  ;;  %1052 = vmatprep.subr.bf16.mxu1 %v2919_v0  ;;  %v2795_v14 = vld [vmem:[%s3552_s0 + $0x16c] ss:$16 sps:$4 sm:$0xff]   ;;  %v2805_v21 = vld [vmem:[%s3552_s0 + $0x1a4] ss:$16 sps:$4 sm:$0xff]  }
  0x1c   :  { %1341 = vmatprep.subr.bf16.mxu0 %v2919_v0 }
  0x1e   :  { %1053 = vmatpush1.bf16.msra.mxu1 %v2709_v15  ;;  %v2797_v15 = vld [vmem:[%s3552_s0 + $0x160] ss:$16 sps:$4 sm:$0xff]  }
  0x1f   :  { %1342 = vmatpush1.bf16.msra.mxu0 %v2710_v16  ;;  %1054 = vmatprep.subr.bf16.mxu1 %v2919_v0  ;;  %v2798_v16 = vld [vmem:[%s3552_s0 + $0x168] ss:$16 sps:$4 sm:$0xff]  }
  0x20   :  { %1343 = vmatprep.subr.bf16.mxu0 %v2919_v0 }
  0x22   :  { %1055 = vmatpush1.bf16.msra.mxu1 %v2711_v17  ;;  %v2799_v17 = vld [vmem:[%s3552_s0 + $0x184] ss:$16 sps:$4 sm:$0xff]  }
  0x23   :  { %1344 = vmatpush1.bf16.msra.mxu0 %v2712_v18  ;;  %1056 = vmatprep.subr.bf16.mxu1 %v2919_v0  ;;  %v2801_v18 = vld [vmem:[%s3552_s0 + $0x18c] ss:$16 sps:$4 sm:$0xff]  }
  0x24   :  { %1345 = vmatprep.subr.bf16.mxu0 %v2919_v0 }
  0x26   :  { %1057 = vmatpush1.bf16.msra.mxu1 %v2713_v20  ;;  %v2804_v20 = vld [vmem:[%s3552_s0 + $0x188] ss:$16 sps:$4 sm:$0xff]  }
  0x27   :  { %1346 = vmatpush1.bf16.msra.mxu0 %v2714_v22  ;;  %1058 = vmatprep.subr.bf16.mxu1 %v2919_v0  ;;  %v2807_v22 = vld [vmem:[%s3552_s0 + $0x1ac] ss:$16 sps:$4 sm:$0xff]  }
  0x28   :  { %1347 = vmatprep.subr.bf16.mxu0 %v2919_v0 }
  0x2a   :  { %1059 = vmatpush1.bf16.msra.mxu1 %v2715_v23  ;;  %v2809_v23 = vld [vmem:[%s3552_s0 + $0x1a0] ss:$16 sps:$4 sm:$0xff]  }
  0x2b   :  { %1348 = vmatpush1.bf16.msra.mxu0 %v2716_v24  ;;  %1060 = vmatprep.subr.bf16.mxu1 %v2919_v0  ;;  %v2810_v24 = vld [vmem:[%s3552_s0 + $0x1a8] ss:$16 sps:$4 sm:$0xff]  }
  0x2c   :  { %1349 = vmatprep.subr.bf16.mxu0 %v2919_v0 }
  0x2e   :  { %1061 = vmatpush1.bf16.msra.mxu1 %v2717_v25  ;;  %v2811_v25 = vld [vmem:[%s3552_s0 + $0x1c4] ss:$16 sps:$4 sm:$0xff]  }
  0x2f   :  { %1350 = vmatpush1.bf16.msra.mxu0 %v2718_v26  ;;  %1062 = vmatprep.subr.bf16.mxu1 %v2919_v0  ;;  %v2813_v26 = vld [vmem:[%s3552_s0 + $0x1cc] ss:$16 sps:$4 sm:$0xff]  }
  0x30   :  { %1351 = vmatprep.subr.bf16.mxu0 %v2919_v0 }
  0x32   :  { %1063 = vmatpush1.bf16.msra.mxu1 %v2719_v27  ;;  %v2815_v27 = vld [vmem:[%s3552_s0 + $0x1c0] ss:$16 sps:$4 sm:$0xff]  }
  0x33   :  { %1352 = vmatpush1.bf16.msra.mxu0 %v2720_v28  ;;  %1064 = vmatprep.subr.bf16.mxu1 %v2919_v0  ;;  %v2816_v28 = vld [vmem:[%s3552_s0 + $0x1c8] ss:$16 sps:$4 sm:$0xff]  }
  0x34   :  { %1353 = vmatprep.subr.bf16.mxu0 %v2919_v0 }
  0x36   :  { %1065 = vmatpush1.bf16.msra.mxu1 %v2721_v29  ;;  %v2817_v29 = vld [vmem:[%s3552_s0 + $0x1e4] ss:$16 sps:$4 sm:$0xff]  }
  0x37   :  { %1354 = vmatpush1.bf16.msra.mxu0 %v2722_v30  ;;  %1066 = vmatprep.subr.bf16.mxu1 %v2919_v0  ;;  %v2819_v30 = vld [vmem:[%s3552_s0 + $0x1ec] ss:$16 sps:$4 sm:$0xff]  }
  0x38   :  { %1355 = vmatprep.subr.bf16.mxu0 %v2919_v0 }
  0x3a   :  { %1067 = vmatpush1.bf16.msra.mxu1 %v2723_v31  ;;  %v2821_v31 = vld [vmem:[%s3552_s0 + $0x1e0] ss:$16 sps:$4 sm:$0xff]  }
  0x3b   :  { %1356 = vmatpush1.bf16.msra.mxu0 %v2724_v32  ;;  %1068 = vmatprep.subr.bf16.mxu1 %v2919_v0  ;;  %v2822_v32 = vld [vmem:[%s3552_s0 + $0x1e8] ss:$16 sps:$4 sm:$0xff]  }
  0x3c   :  { %1357 = vmatprep.subr.bf16.mxu0 %v2919_v0  ;;  %v2774_v0 = vld [vmem:[%s3552_s0 + $0xe8] ss:$16 sps:$4 sm:$0xff]  }
  0x3e   :  { %1069 = vmatpush1.bf16.msra.mxu1 %v2725_v33  ;;  %v2823_v33 = vld [vmem:[%s3552_s0 + $0x204] ss:$16 sps:$4 sm:$0xff]  }
  0x3f   :  { %1358 = vmatpush1.bf16.msra.mxu0 %v2726_v34  ;;  %v2825_v34 = vld [vmem:[%s3552_s0 + $0x20c] ss:$16 sps:$4 sm:$0xff]  }
  0x41   :  { %1071 = vmatmul.mubr.bf16.vlgmr.msra.gmra.mrb[0].mxu1 %v2727_v35  ;;  %v2827_v35 = vld [vmem:[%s3552_s0 + $0x200] ss:$16 sps:$4 sm:$0xff]  }
  0x42   :  { %1360 = vmatmul.mubr.bf16.vlgmr.msra.gmra.mrb[0].mxu0 %v2730_v36  ;;  %1078 = vmatprep.mubr.bf16.mxu1 %v2733_v37  ;;  %v2828_v36 = vld [vmem:[%s3552_s0 + $0x208] ss:$16 sps:$4 sm:$0xff]   ;;  %v2829_v37 = vld [vmem:[%s3552_s0 + $0x224] ss:$16 sps:$4 sm:$0xff]  }
  0x43   :  { %1367 = vmatprep.mubr.bf16.mxu0 %v2735_v38  ;;  %v2831_v38 = vld [vmem:[%s3552_s0 + $0x22c] ss:$16 sps:$4 sm:$0xff]  }
  0x49   :  { %1079 = vmatmul.mubr.bf16.gmra.mrb[4].mxu1 %v2737_v39  ;;  %v2833_v39 = vld [vmem:[%s3552_s0 + $0x220] ss:$16 sps:$4 sm:$0xff]  }
  0x4a   :  { %1368 = vmatmul.mubr.bf16.gmra.mrb[4].mxu0 %v2738_v40  ;;  %1086 = vmatprep.mubr.bf16.mxu1 %v2739_v41  ;;  %v2834_v40 = vld [vmem:[%s3552_s0 + $0x228] ss:$16 sps:$4 sm:$0xff]   ;;  %v2835_v41 = vld [vmem:[%s3552_s0 + $0x244] ss:$16 sps:$4 sm:$0xff]  }
  0x4b   :  { %1375 = vmatprep.mubr.bf16.mxu0 %v2741_v42  ;;  %v2837_v42 = vld [vmem:[%s3552_s0 + $0x24c] ss:$16 sps:$4 sm:$0xff]  }
  0x51   :  { %1087 = vmatmul.mubr.bf16.gmra.mrb[8].mxu1 %v2743_v43  ;;  %v2839_v43 = vld [vmem:[%s3552_s0 + $0x240] ss:$16 sps:$4 sm:$0xff]  }
  0x52   :  { %1376 = vmatmul.mubr.bf16.gmra.mrb[8].mxu0 %v2744_v44  ;;  %1094 = vmatprep.mubr.bf16.mxu1 %v2745_v45  ;;  %v2840_v44 = vld [vmem:[%s3552_s0 + $0x248] ss:$16 sps:$4 sm:$0xff]   ;;  %v2841_v45 = vld [vmem:[%s3552_s0 + $0x264] ss:$16 sps:$4 sm:$0xff]  }
  0x53   :  { %1383 = vmatprep.mubr.bf16.mxu0 %v2747_v46  ;;  %v2843_v46 = vld [vmem:[%s3552_s0 + $0x26c] ss:$16 sps:$4 sm:$0xff]  }
  0x59   :  { %1095 = vmatmul.mubr.bf16.gmra.mrb[12].mxu1 %v2749_v47  ;;  %v2845_v47 = vld [vmem:[%s3552_s0 + $0x260] ss:$16 sps:$4 sm:$0xff]  }
  0x5a   :  { %1384 = vmatmul.mubr.bf16.gmra.mrb[12].mxu0 %v2750_v48  ;;  %1102 = vmatprep.mubr.bf16.mxu1 %v2751_v49  ;;  %v2846_v48 = vld [vmem:[%s3552_s0 + $0x268] ss:$16 sps:$4 sm:$0xff]   ;;  %v2847_v49 = vld [vmem:[%s3552_s0 + $0x284] ss:$16 sps:$4 sm:$0xff]  }
  0x5b   :  { %1391 = vmatprep.mubr.bf16.mxu0 %v2753_v50  ;;  %v2849_v50 = vld [vmem:[%s3552_s0 + $0x28c] ss:$16 sps:$4 sm:$0xff]  }
  0x61   :  { %1103 = vmatmul.mubr.bf16.gmra.mrb[16].mxu1 %v2755_v51  ;;  %v2851_v51 = vld [vmem:[%s3552_s0 + $0x280] ss:$16 sps:$4 sm:$0xff]  }
  0x62   :  { %1392 = vmatmul.mubr.bf16.gmra.mrb[16].mxu0 %v2756_v52  ;;  %1110 = vmatprep.mubr.bf16.mxu1 %v2757_v53  ;;  %v2852_v52 = vld [vmem:[%s3552_s0 + $0x288] ss:$16 sps:$4 sm:$0xff]   ;;  %v2853_v53 = vld [vmem:[%s3552_s0 + $0x2a4] ss:$16 sps:$4 sm:$0xff]  }
  0x63   :  { %1399 = vmatprep.mubr.bf16.mxu0 %v2759_v54  ;;  %v2855_v54 = vld [vmem:[%s3552_s0 + $0x2ac] ss:$16 sps:$4 sm:$0xff]  }
  0x69   :  { %1111 = vmatmul.mubr.bf16.gmra.mrb[20].mxu1 %v2761_v55  ;;  %v2857_v55 = vld [vmem:[%s3552_s0 + $0x2a0] ss:$16 sps:$4 sm:$0xff]  }
  0x6a   :  { %1400 = vmatmul.mubr.bf16.gmra.mrb[20].mxu0 %v2762_v56  ;;  %1118 = vmatprep.mubr.bf16.mxu1 %v2763_v57  ;;  %v2858_v56 = vld [vmem:[%s3552_s0 + $0x2a8] ss:$16 sps:$4 sm:$0xff]   ;;  %v2859_v57 = vld [vmem:[%s3552_s0 + $0x2c4] ss:$16 sps:$4 sm:$0xff]  }
  0x6b   :  { %1407 = vmatprep.mubr.bf16.mxu0 %v2765_v58  ;;  %v2861_v58 = vld [vmem:[%s3552_s0 + $0x2cc] ss:$16 sps:$4 sm:$0xff]  }
  0x71   :  { %1119 = vmatmul.mubr.bf16.gmra.mrb[24].mxu1 %v2767_v59  ;;  %v2863_v59 = vld [vmem:[%s3552_s0 + $0x2c0] ss:$16 sps:$4 sm:$0xff]  }
  0x72   :  { %1408 = vmatmul.mubr.bf16.gmra.mrb[24].mxu0 %v2768_v60  ;;  %1126 = vmatprep.mubr.bf16.mxu1 %v2769_v61  ;;  %v2864_v60 = vld [vmem:[%s3552_s0 + $0x2c8] ss:$16 sps:$4 sm:$0xff]   ;;  %v2865_v61 = vld [vmem:[%s3552_s0 + $0x2e4] ss:$16 sps:$4 sm:$0xff]  }
  0x73   :  { %1415 = vmatprep.mubr.bf16.mxu0 %v2771_v62  ;;  %v2867_v62 = vld [vmem:[%s3552_s0 + $0x2ec] ss:$16 sps:$4 sm:$0xff]  }
  0x79   :  { %1127 = vmatmul.mubr.bf16.gmra.mrb[28].mxu1 %v2773_v63  ;;  %v2869_v63 = vld [vmem:[%s3552_s0 + $0x2e0] ss:$16 sps:$4 sm:$0xff]  }
  0x7a   :  { %1416 = vmatmul.mubr.bf16.gmra.mrb[28].mxu0 %v2774_v0  ;;  %1134 = vmatprep.mubr.bf16.mxu1 %v2775_v1  ;;  %v2870_v0 = vld [vmem:[%s3552_s0 + $0x2e8] ss:$16 sps:$4 sm:$0xff]   ;;  %v2871_v1 = vld [vmem:[%s3552_s0 + $0x304] ss:$16 sps:$4 sm:$0xff]  }
  0x7b   :  { %1423 = vmatprep.mubr.bf16.mxu0 %v2777_v2  ;;  %v2873_v2 = vld [vmem:[%s3552_s0 + $0x30c] ss:$16 sps:$4 sm:$0xff]  }
  0x81   :  { %1135 = vmatmul.mubr.bf16.gmra.mrb[32].mxu1 %v2779_v3  ;;  %v2875_v3 = vld [vmem:[%s3552_s0 + $0x300] ss:$16 sps:$4 sm:$0xff]  }
  0x82   :  { %1424 = vmatmul.mubr.bf16.gmra.mrb[32].mxu0 %v2780_v4  ;;  %1142 = vmatprep.mubr.bf16.mxu1 %v2781_v5  ;;  %v2876_v4 = vld [vmem:[%s3552_s0 + $0x308] ss:$16 sps:$4 sm:$0xff]   ;;  %v2877_v5 = vld [vmem:[%s3552_s0 + $0x324] ss:$16 sps:$4 sm:$0xff]  }
  0x83   :  { %1431 = vmatprep.mubr.bf16.mxu0 %v2783_v6  ;;  %v2879_v6 = vld [vmem:[%s3552_s0 + $0x32c] ss:$16 sps:$4 sm:$0xff]  }
  0x89   :  { %1143 = vmatmul.mubr.bf16.gmra.mrb[36].mxu1 %v2785_v7  ;;  %v2881_v7 = vld [vmem:[%s3552_s0 + $0x320] ss:$16 sps:$4 sm:$0xff]  }
  0x8a   :  { %1432 = vmatmul.mubr.bf16.gmra.mrb[36].mxu0 %v2786_v8  ;;  %1150 = vmatprep.mubr.bf16.mxu1 %v2787_v9  ;;  %v2882_v8 = vld [vmem:[%s3552_s0 + $0x328] ss:$16 sps:$4 sm:$0xff]   ;;  %v2883_v9 = vld [vmem:[%s3552_s0 + $0x344] ss:$16 sps:$4 sm:$0xff]  }
  0x8b   :  { %1439 = vmatprep.mubr.bf16.mxu0 %v2789_v10  ;;  %v2885_v10 = vld [vmem:[%s3552_s0 + $0x34c] ss:$16 sps:$4 sm:$0xff]  }
  0x91   :  { %1151 = vmatmul.mubr.bf16.gmra.mrb[40].mxu1 %v2791_v11  ;;  %v2887_v11 = vld [vmem:[%s3552_s0 + $0x340] ss:$16 sps:$4 sm:$0xff]  }
  0x92   :  { %1440 = vmatmul.mubr.bf16.gmra.mrb[40].mxu0 %v2792_v12  ;;  %1158 = vmatprep.mubr.bf16.mxu1 %v2793_v13  ;;  %v2888_v12 = vld [vmem:[%s3552_s0 + $0x348] ss:$16 sps:$4 sm:$0xff]   ;;  %v2889_v13 = vld [vmem:[%s3552_s0 + $0x364] ss:$16 sps:$4 sm:$0xff]  }
  0x93   :  { %1447 = vmatprep.mubr.bf16.mxu0 %v2795_v14  ;;  %v2891_v14 = vld [vmem:[%s3552_s0 + $0x36c] ss:$16 sps:$4 sm:$0xff]  }
  0x99   :  { %1159 = vmatmul.mubr.bf16.gmra.mrb[44].mxu1 %v2797_v15 }
  0x9a   :  { %1448 = vmatmul.mubr.bf16.gmra.mrb[44].mxu0 %v2798_v16  ;;  %1166 = vmatprep.mubr.bf16.mxu1 %v2799_v17 }
  0x9b   :  { %1455 = vmatprep.mubr.bf16.mxu0 %v2801_v18  ;;  %v2893_v18 = vld [vmem:[%s3552_s0 + $0x360] ss:$16 sps:$4 sm:$0xff]  }
  0xa1   :  { %1167 = vmatmul.mubr.bf16.gmra.mrb[48].mxu1 %v2803_v19 }
  0xa2   :  { %1456 = vmatmul.mubr.bf16.gmra.mrb[48].mxu0 %v2804_v20  ;;  %1174 = vmatprep.mubr.bf16.mxu1 %v2805_v21 }
  0xa3   :  { %1463 = vmatprep.mubr.bf16.mxu0 %v2807_v22  ;;  %v2894_v22 = vld [vmem:[%s3552_s0 + $0x368] ss:$16 sps:$4 sm:$0xff]  }
  0xa9   :  { %1175 = vmatmul.mubr.bf16.gmra.mrb[52].mxu1 %v2809_v23  ;;  %v2895_v23 = vld [vmem:[%s3552_s0 + $0x384] ss:$16 sps:$4 sm:$0xff]  }
  0xaa   :  { %1464 = vmatmul.mubr.bf16.gmra.mrb[52].mxu0 %v2810_v24  ;;  %1182 = vmatprep.mubr.bf16.mxu1 %v2811_v25 }
  0xab   :  { %1471 = vmatprep.mubr.bf16.mxu0 %v2813_v26  ;;  %v2897_v26 = vld [vmem:[%s3552_s0 + $0x38c] ss:$16 sps:$4 sm:$0xff]  }
  0xb1   :  { %1183 = vmatmul.mubr.bf16.gmra.mrb[56].mxu1 %v2815_v27 }
  0xb2   :  { %1472 = vmatmul.mubr.bf16.gmra.mrb[56].mxu0 %v2816_v28  ;;  %1190 = vmatprep.mubr.bf16.mxu1 %v2817_v29 }
  0xb3   :  { %1479 = vmatprep.mubr.bf16.mxu0 %v2819_v30 }
  0xb9   :  { %1191 = vmatmul.mubr.bf16.gmra.mrb[60].mxu1 %v2821_v31 }
  0xba   :  { %1480 = vmatmul.mubr.bf16.gmra.mrb[60].mxu0 %v2822_v32  ;;  %1198 = vmatprep.mubr.bf16.mxu1 %v2823_v33 }
  0xbb   :  { %1487 = vmatprep.mubr.bf16.mxu0 %v2825_v34 }
  0xc1   :  { %1199 = vmatmul.mubr.bf16.gmra.mrb[64].mxu1 %v2827_v35 }
  0xc2   :  { %1488 = vmatmul.mubr.bf16.gmra.mrb[64].mxu0 %v2828_v36  ;;  %1206 = vmatprep.mubr.bf16.mxu1 %v2829_v37  ;;  %v2899_v37 = vld [vmem:[%s3552_s0 + $0x380] ss:$16 sps:$4 sm:$0xff]  }
  0xc3   :  { %1495 = vmatprep.mubr.bf16.mxu0 %v2831_v38 }
  0xc9   :  { %1207 = vmatmul.mubr.bf16.gmra.mrb[68].mxu1 %v2833_v39 }
  0xca   :  { %1496 = vmatmul.mubr.bf16.gmra.mrb[68].mxu0 %v2834_v40  ;;  %1214 = vmatprep.mubr.bf16.mxu1 %v2835_v41  ;;  %v2900_v41 = vld [vmem:[%s3552_s0 + $0x388] ss:$16 sps:$4 sm:$0xff]  }
  0xcb   :  { %1503 = vmatprep.mubr.bf16.mxu0 %v2837_v42 }
  0xd1   :  { %1215 = vmatmul.mubr.bf16.gmra.mrb[72].mxu1 %v2839_v43 }
  0xd2   :  { %1504 = vmatmul.mubr.bf16.gmra.mrb[72].mxu0 %v2840_v44  ;;  %1222 = vmatprep.mubr.bf16.mxu1 %v2841_v45  ;;  %v2901_v44 = vld [vmem:[%s3552_s0 + $0x3a4] ss:$16 sps:$4 sm:$0xff]   ;;  %v2903_v45 = vld [vmem:[%s3552_s0 + $0x3ac] ss:$16 sps:$4 sm:$0xff]  }
  0xd3   :  { %1511 = vmatprep.mubr.bf16.mxu0 %v2843_v46 }
  0xd9   :  { %1223 = vmatmul.mubr.bf16.gmra.mrb[76].mxu1 %v2845_v47 }
  0xda   :  { %1512 = vmatmul.mubr.bf16.gmra.mrb[76].mxu0 %v2846_v48  ;;  %1230 = vmatprep.mubr.bf16.mxu1 %v2847_v49 }
  0xdb   :  { %1519 = vmatprep.mubr.bf16.mxu0 %v2849_v50 }
  0xe1   :  { %1231 = vmatmul.mubr.bf16.gmra.mrb[80].mxu1 %v2851_v51 }
  0xe2   :  { %1520 = vmatmul.mubr.bf16.gmra.mrb[80].mxu0 %v2852_v52  ;;  %1238 = vmatprep.mubr.bf16.mxu1 %v2853_v53 }
  0xe3   :  { %1527 = vmatprep.mubr.bf16.mxu0 %v2855_v54 }
  0xe9   :  { %1239 = vmatmul.mubr.bf16.gmra.mrb[84].mxu1 %v2857_v55 }
  0xea   :  { %1528 = vmatmul.mubr.bf16.gmra.mrb[84].mxu0 %v2858_v56  ;;  %1246 = vmatprep.mubr.bf16.mxu1 %v2859_v57 }
  0xeb   :  { %1535 = vmatprep.mubr.bf16.mxu0 %v2861_v58  ;;  %v2905_v58 = vld [vmem:[%s3552_s0 + $0x3a0] ss:$16 sps:$4 sm:$0xff]  }
  0xf1   :  { %1247 = vmatmul.mubr.bf16.gmra.mrb[88].mxu1 %v2863_v59 }
  0xf2   :  { %1536 = vmatmul.mubr.bf16.gmra.mrb[88].mxu0 %v2864_v60  ;;  %1254 = vmatprep.mubr.bf16.mxu1 %v2865_v61 }
  0xf3   :  { %1543 = vmatprep.mubr.bf16.mxu0 %v2867_v62  ;;  %v2906_v62 = vld [vmem:[%s3552_s0 + $0x3a8] ss:$16 sps:$4 sm:$0xff]  }
  0xf9   :  { %1255 = vmatmul.mubr.bf16.gmra.mrb[92].mxu1 %v2869_v63 }
  0xfa   :  { %1544 = vmatmul.mubr.bf16.gmra.mrb[92].mxu0 %v2870_v0  ;;  %1262 = vmatprep.mubr.bf16.mxu1 %v2871_v1  ;;  %v2907_v1 = vld [vmem:[%s3552_s0 + $0x3c4] ss:$16 sps:$4 sm:$0xff]  }
  0xfb   :  { %1551 = vmatprep.mubr.bf16.mxu0 %v2873_v2  ;;  %v2909_v2 = vld [vmem:[%s3552_s0 + $0x3cc] ss:$16 sps:$4 sm:$0xff]  }
 0x101   :  { %1263 = vmatmul.mubr.bf16.gmra.mrb[96].mxu1 %v2875_v3 }
 0x102   :  { %1552 = vmatmul.mubr.bf16.gmra.mrb[96].mxu0 %v2876_v4  ;;  %1270 = vmatprep.mubr.bf16.mxu1 %v2877_v5 }
 0x103   :  { %1559 = vmatprep.mubr.bf16.mxu0 %v2879_v6 }
 0x109   :  { %1271 = vmatmul.mubr.bf16.gmra.mrb[100].mxu1 %v2881_v7 }
 0x10a   :  { %1560 = vmatmul.mubr.bf16.gmra.mrb[100].mxu0 %v2882_v8  ;;  %1278 = vmatprep.mubr.bf16.mxu1 %v2883_v9 }
 0x10b   :  { %1567 = vmatprep.mubr.bf16.mxu0 %v2885_v10 }
 0x111   :  { %1279 = vmatmul.mubr.bf16.gmra.mrb[104].mxu1 %v2887_v11 }
 0x112   :  { %1568 = vmatmul.mubr.bf16.gmra.mrb[104].mxu0 %v2888_v12  ;;  %1286 = vmatprep.mubr.bf16.mxu1 %v2889_v13 }
 0x113   :  { %1575 = vmatprep.mubr.bf16.mxu0 %v2891_v14 }
 0x114   :  { %v1072_v15 = vpop.f32.mrb[0].mxu1 }
 0x115   :  { %v1361_v16 = vpop.f32.mrb[0].mxu0  ;;  %v1074_v17 = vpop.f32.mrb[1].mxu1 }
 0x116   :  { %v1362_v19 = vadd.f32 %v1361_v16, %v1072_v15  ;;  %v1363_v20 = vpop.f32.mrb[1].mxu0  ;;  %v1075_v21 = vpop.f32.mrb[2].mxu1  ;;  %v2911_v15 = vld [vmem:[%s3552_s0 + $0x3c0] ss:$16 sps:$4 sm:$0xff]  }
 0x117   :  { %v1364_v24 = vpop.f32.mrb[2].mxu0  ;;  %v1077_v25 = vpop.f32.mrb[3].mxu1 }
 0x118   :  { %v1365_v27 = vadd.f32 %v1364_v24, %v1075_v21  ;;  %v1366_v28 = vpop.f32.mrb[3].mxu0  ;;  %v1685_v29 = vmul.f32 %v1362_v19, %v1362_v19 }
 0x119   :  { %1287 = vmatmul.mubr.bf16.gmra.mrb[108].mxu1 %v2893_v18 }
 0x11a   :  { %v1616_v30 = vadd.f32 %v1365_v27, %v1362_v19  ;;  %v1686_v31 = vmul.f32 %v1365_v27, %v1365_v27  ;;  %v2442_v32 = vpack.c.bf16 %v1365_v27, %v1362_v19  ;;  %1576 = vmatmul.mubr.bf16.gmra.mrb[108].mxu0 %v2894_v22  ;;  %1294 = vmatprep.mubr.bf16.mxu1 %v2895_v23  ;;  %v2912_v19 = vld [vmem:[%s3552_s0 + $0x3c8] ss:$16 sps:$4 sm:$0xff]   ;;  %v2913_v22 = vld [vmem:[%s3552_s0 + $0x3e4] ss:$16 sps:$4 sm:$0xff]   ;;  %v2915_v23 = vld [vmem:[%s3552_s0 + $0x3ec] ss:$16 sps:$4 sm:$0xff]  }
 0x11b   :  { %1583 = vmatprep.mubr.bf16.mxu0 %v2897_v26 }
 0x11c   :  { %v1749_v33 = vadd.f32 %v1686_v31, %v1685_v29  ;;  %2443 = vst [vmem:[%s3553_s2] sm:$0xff] %v2442_v32   ;;  %v1080_v34 = vpop.f32.mrb[4].mxu1 }
 0x11d   :  { %v1369_v35 = vpop.f32.mrb[4].mxu0  ;;  %v1082_v36 = vpop.f32.mrb[5].mxu1 }
 0x11e   :  { %v1370_v38 = vadd.f32 %v1369_v35, %v1080_v34  ;;  %v1371_v39 = vpop.f32.mrb[5].mxu0  ;;  %v1083_v40 = vpop.f32.mrb[6].mxu1  ;;  %v2917_v36 = vld [vmem:[%s3552_s0 + $0x3e0] ss:$16 sps:$4 sm:$0xff]  }
 0x11f   :  { %v1372_v42 = vpop.f32.mrb[6].mxu0  ;;  %v1085_v43 = vpop.f32.mrb[7].mxu1 }
 0x120   :  { %v1617_v46 = vadd.f32 %v1616_v30, %v1370_v38  ;;  %v1687_v47 = vmul.f32 %v1370_v38, %v1370_v38  ;;  %v1373_v48 = vadd.f32 %v1372_v42, %v1083_v40  ;;  %v1374_v49 = vpop.f32.mrb[7].mxu0  ;;  %v2918_v40 = vld [vmem:[%s3552_s0 + $0x3e8] ss:$16 sps:$4 sm:$0xff]  }
 0x121   :  { %1295 = vmatmul.mubr.bf16.gmra.mrb[112].mxu1 %v2899_v37 }
 0x122   :  { %v1750_v50 = vadd.f32 %v1749_v33, %v1687_v47  ;;  %v1618_v51 = vadd.f32 %v1617_v46, %v1373_v48  ;;  %v1688_v52 = vmul.f32 %v1373_v48, %v1373_v48  ;;  %v2447_v53 = vpack.c.bf16 %v1373_v48, %v1370_v38  ;;  %1584 = vmatmul.mubr.bf16.gmra.mrb[112].mxu0 %v2900_v41 }
 0x123   :  { %1302 = vmatprep.mubr.bf16.mxu1 %v2901_v44  ;;  %1591 = vmatprep.mubr.bf16.mxu0 %v2903_v45 }
 0x124   :  { %v1751_v54 = vadd.f32 %v1750_v50, %v1688_v52  ;;  %2599 = vst [vmem:[%s3553_s2 + $0x8] sm:$0xff] %v2447_v53   ;;  %v1088_v55 = vpop.f32.mrb[8].mxu1 }
 0x125   :  { %v1377_v56 = vpop.f32.mrb[8].mxu0  ;;  %v1090_v57 = vpop.f32.mrb[9].mxu1 }
 0x126   :  { %v1378_v59 = vadd.f32 %v1377_v56, %v1088_v55  ;;  %v1379_v60 = vpop.f32.mrb[9].mxu0  ;;  %v1091_v61 = vpop.f32.mrb[10].mxu1 }
 0x127   :  { %v1380_v63 = vpop.f32.mrb[10].mxu0  ;;  %v1093_v0 = vpop.f32.mrb[11].mxu1 }
 0x128   :  { %v1619_v3 = vadd.f32 %v1618_v51, %v1378_v59  ;;  %v1689_v4 = vmul.f32 %v1378_v59, %v1378_v59  ;;  %v1381_v5 = vadd.f32 %v1380_v63, %v1091_v61  ;;  %v1382_v6 = vpop.f32.mrb[11].mxu0 }
 0x129   :  { %1303 = vmatmul.mubr.bf16.gmra.mrb[116].mxu1 %v2905_v58 }
 0x12a   :  { %v1752_v7 = vadd.f32 %v1751_v54, %v1689_v4  ;;  %v1620_v8 = vadd.f32 %v1619_v3, %v1381_v5  ;;  %v1690_v9 = vmul.f32 %v1381_v5, %v1381_v5  ;;  %v2452_v10 = vpack.c.bf16 %v1381_v5, %v1378_v59  ;;  %1592 = vmatmul.mubr.bf16.gmra.mrb[116].mxu0 %v2906_v62 }
 0x12b   :  { %1310 = vmatprep.mubr.bf16.mxu1 %v2907_v1  ;;  %1599 = vmatprep.mubr.bf16.mxu0 %v2909_v2 }
 0x12c   :  { %v1753_v11 = vadd.f32 %v1752_v7, %v1690_v9  ;;  %2600 = vst [vmem:[%s3553_s2 + $0x10] sm:$0xff] %v2452_v10   ;;  %v1096_v12 = vpop.f32.mrb[12].mxu1 }
 0x12d   :  { %v1385_v13 = vpop.f32.mrb[12].mxu0  ;;  %v1098_v14 = vpop.f32.mrb[13].mxu1 }
 0x12e   :  { %v1386_v16 = vadd.f32 %v1385_v13, %v1096_v12  ;;  %v1387_v17 = vpop.f32.mrb[13].mxu0  ;;  %v1099_v18 = vpop.f32.mrb[14].mxu1 }
 0x12f   :  { %v1388_v20 = vpop.f32.mrb[14].mxu0  ;;  %v1101_v21 = vpop.f32.mrb[15].mxu1 }
 0x130   :  { %v1621_v24 = vadd.f32 %v1620_v8, %v1386_v16  ;;  %v1691_v25 = vmul.f32 %v1386_v16, %v1386_v16  ;;  %v1389_v26 = vadd.f32 %v1388_v20, %v1099_v18  ;;  %v1390_v27 = vpop.f32.mrb[15].mxu0 }
 0x131   :  { %1311 = vmatmul.mubr.bf16.gmra.mrb[120].mxu1 %v2911_v15 }
 0x132   :  { %v1754_v28 = vadd.f32 %v1753_v11, %v1691_v25  ;;  %v1622_v29 = vadd.f32 %v1621_v24, %v1389_v26  ;;  %v1692_v30 = vmul.f32 %v1389_v26, %v1389_v26  ;;  %v2457_v31 = vpack.c.bf16 %v1389_v26, %v1386_v16  ;;  %1600 = vmatmul.mubr.bf16.gmra.mrb[120].mxu0 %v2912_v19 }
 0x133   :  { %1318 = vmatprep.mubr.bf16.mxu1 %v2913_v22  ;;  %1607 = vmatprep.mubr.bf16.mxu0 %v2915_v23 }
 0x134   :  { %v1755_v32 = vadd.f32 %v1754_v28, %v1692_v30  ;;  %2601 = vst [vmem:[%s3553_s2 + $0x18] sm:$0xff] %v2457_v31   ;;  %v1104_v33 = vpop.f32.mrb[16].mxu1 }
 0x135   :  { %v1393_v34 = vpop.f32.mrb[16].mxu0  ;;  %v1106_v35 = vpop.f32.mrb[17].mxu1 }
 0x136   :  { %v1394_v37 = vadd.f32 %v1393_v34, %v1104_v33  ;;  %v1395_v38 = vpop.f32.mrb[17].mxu0  ;;  %v1107_v39 = vpop.f32.mrb[18].mxu1 }
 0x137   :  { %v1396_v41 = vpop.f32.mrb[18].mxu0  ;;  %v1109_v42 = vpop.f32.mrb[19].mxu1 }
 0x138   :  { %v1623_v43 = vadd.f32 %v1622_v29, %v1394_v37  ;;  %v1693_v44 = vmul.f32 %v1394_v37, %v1394_v37  ;;  %v1397_v45 = vadd.f32 %v1396_v41, %v1107_v39  ;;  %v1398_v46 = vpop.f32.mrb[19].mxu0 }
 0x139   :  { %1319 = vmatmul.mubr.bf16.gmra.mrb[124].mxu1 %v2917_v36 }
 0x13a   :  { %v1756_v47 = vadd.f32 %v1755_v32, %v1693_v44  ;;  %v1624_v48 = vadd.f32 %v1623_v43, %v1397_v45  ;;  %v1694_v49 = vmul.f32 %v1397_v45, %v1397_v45  ;;  %v2462_v50 = vpack.c.bf16 %v1397_v45, %v1394_v37  ;;  %1608 = vmatmul.mubr.bf16.gmra.mrb[124].mxu0 %v2918_v40 }
 0x13c   :  { %v1757_v51 = vadd.f32 %v1756_v47, %v1694_v49  ;;  %2602 = vst [vmem:[%s3553_s2 + $0x20] sm:$0xff] %v2462_v50   ;;  %v1112_v52 = vpop.f32.mrb[20].mxu1 }
 0x13d   :  { %v1401_v53 = vpop.f32.mrb[20].mxu0  ;;  %v1114_v54 = vpop.f32.mrb[21].mxu1 }
 0x13e   :  { %v1402_v55 = vadd.f32 %v1401_v53, %v1112_v52  ;;  %v1403_v56 = vpop.f32.mrb[21].mxu0  ;;  %v1115_v57 = vpop.f32.mrb[22].mxu1 }
 0x13f   :  { %v1404_v58 = vpop.f32.mrb[22].mxu0  ;;  %v1117_v59 = vpop.f32.mrb[23].mxu1 }
 0x140   :  { %v1625_v60 = vadd.f32 %v1624_v48, %v1402_v55  ;;  %v1695_v61 = vmul.f32 %v1402_v55, %v1402_v55  ;;  %v1405_v62 = vadd.f32 %v1404_v58, %v1115_v57  ;;  %v1406_v63 = vpop.f32.mrb[23].mxu0 }
 0x142   :  { %v1758_v0 = vadd.f32 %v1757_v51, %v1695_v61  ;;  %v1626_v1 = vadd.f32 %v1625_v60, %v1405_v62  ;;  %v1696_v2 = vmul.f32 %v1405_v62, %v1405_v62  ;;  %v2467_v3 = vpack.c.bf16 %v1405_v62, %v1402_v55 }
 0x144   :  { %v1759_v4 = vadd.f32 %v1758_v0, %v1696_v2  ;;  %2603 = vst [vmem:[%s3553_s2 + $0x28] sm:$0xff] %v2467_v3   ;;  %v1120_v5 = vpop.f32.mrb[24].mxu1 }
 0x145   :  { %v1409_v6 = vpop.f32.mrb[24].mxu0  ;;  %v1122_v7 = vpop.f32.mrb[25].mxu1 }
 0x146   :  { %v1410_v8 = vadd.f32 %v1409_v6, %v1120_v5  ;;  %v1411_v9 = vpop.f32.mrb[25].mxu0  ;;  %v1123_v10 = vpop.f32.mrb[26].mxu1 }
 0x147   :  { %v1412_v11 = vpop.f32.mrb[26].mxu0  ;;  %v1125_v12 = vpop.f32.mrb[27].mxu1 }
 0x148   :  { %v1627_v13 = vadd.f32 %v1626_v1, %v1410_v8  ;;  %v1697_v14 = vmul.f32 %v1410_v8, %v1410_v8  ;;  %v1413_v15 = vadd.f32 %v1412_v11, %v1123_v10  ;;  %v1414_v16 = vpop.f32.mrb[27].mxu0 }
 0x14a   :  { %v1760_v17 = vadd.f32 %v1759_v4, %v1697_v14  ;;  %v1628_v18 = vadd.f32 %v1627_v13, %v1413_v15  ;;  %v1698_v19 = vmul.f32 %v1413_v15, %v1413_v15  ;;  %v2472_v20 = vpack.c.bf16 %v1413_v15, %v1410_v8 }
 0x14c   :  { %v1761_v21 = vadd.f32 %v1760_v17, %v1698_v19  ;;  %2604 = vst [vmem:[%s3553_s2 + $0x30] sm:$0xff] %v2472_v20   ;;  %v1128_v22 = vpop.f32.mrb[28].mxu1 }
 0x14d   :  { %v1417_v23 = vpop.f32.mrb[28].mxu0  ;;  %v1130_v24 = vpop.f32.mrb[29].mxu1 }
 0x14e   :  { %v1418_v25 = vadd.f32 %v1417_v23, %v1128_v22  ;;  %v1419_v26 = vpop.f32.mrb[29].mxu0  ;;  %v1131_v27 = vpop.f32.mrb[30].mxu1 }
 0x14f   :  { %v1420_v28 = vpop.f32.mrb[30].mxu0  ;;  %v1133_v29 = vpop.f32.mrb[31].mxu1 }
 0x150   :  { %v1629_v30 = vadd.f32 %v1628_v18, %v1418_v25  ;;  %v1699_v31 = vmul.f32 %v1418_v25, %v1418_v25  ;;  %v1421_v32 = vadd.f32 %v1420_v28, %v1131_v27  ;;  %v1422_v33 = vpop.f32.mrb[31].mxu0 }
 0x152   :  { %v1762_v34 = vadd.f32 %v1761_v21, %v1699_v31  ;;  %v1630_v35 = vadd.f32 %v1629_v30, %v1421_v32  ;;  %v1700_v36 = vmul.f32 %v1421_v32, %v1421_v32  ;;  %v2477_v37 = vpack.c.bf16 %v1421_v32, %v1418_v25 }
 0x154   :  { %v1763_v38 = vadd.f32 %v1762_v34, %v1700_v36  ;;  %2605 = vst [vmem:[%s3553_s2 + $0x38] sm:$0xff] %v2477_v37   ;;  %v1136_v39 = vpop.f32.mrb[32].mxu1 }
 0x155   :  { %v1425_v40 = vpop.f32.mrb[32].mxu0  ;;  %v1138_v41 = vpop.f32.mrb[33].mxu1 }
 0x156   :  { %v1426_v42 = vadd.f32 %v1425_v40, %v1136_v39  ;;  %v1427_v43 = vpop.f32.mrb[33].mxu0  ;;  %v1139_v44 = vpop.f32.mrb[34].mxu1 }
 0x157   :  { %v1428_v45 = vpop.f32.mrb[34].mxu0  ;;  %v1141_v46 = vpop.f32.mrb[35].mxu1 }
 0x158   :  { %v1631_v47 = vadd.f32 %v1630_v35, %v1426_v42  ;;  %v1701_v48 = vmul.f32 %v1426_v42, %v1426_v42  ;;  %v1429_v49 = vadd.f32 %v1428_v45, %v1139_v44  ;;  %v1430_v50 = vpop.f32.mrb[35].mxu0 }
 0x15a   :  { %v1764_v51 = vadd.f32 %v1763_v38, %v1701_v48  ;;  %v1632_v52 = vadd.f32 %v1631_v47, %v1429_v49  ;;  %v1702_v53 = vmul.f32 %v1429_v49, %v1429_v49  ;;  %v2482_v54 = vpack.c.bf16 %v1429_v49, %v1426_v42 }
 0x15c   :  { %v1765_v55 = vadd.f32 %v1764_v51, %v1702_v53  ;;  %2606 = vst [vmem:[%s3553_s2 + $0x40] sm:$0xff] %v2482_v54   ;;  %v1144_v56 = vpop.f32.mrb[36].mxu1 }
 0x15d   :  { %v1433_v57 = vpop.f32.mrb[36].mxu0  ;;  %v1146_v58 = vpop.f32.mrb[37].mxu1 }
 0x15e   :  { %v1434_v59 = vadd.f32 %v1433_v57, %v1144_v56  ;;  %v1435_v60 = vpop.f32.mrb[37].mxu0  ;;  %v1147_v61 = vpop.f32.mrb[38].mxu1 }
 0x15f   :  { %v1436_v62 = vpop.f32.mrb[38].mxu0  ;;  %v1149_v63 = vpop.f32.mrb[39].mxu1 }
 0x160   :  { %v1633_v0 = vadd.f32 %v1632_v52, %v1434_v59  ;;  %v1703_v1 = vmul.f32 %v1434_v59, %v1434_v59  ;;  %v1437_v2 = vadd.f32 %v1436_v62, %v1147_v61  ;;  %v1438_v3 = vpop.f32.mrb[39].mxu0 }
 0x162   :  { %v1766_v4 = vadd.f32 %v1765_v55, %v1703_v1  ;;  %v1634_v5 = vadd.f32 %v1633_v0, %v1437_v2  ;;  %v1704_v6 = vmul.f32 %v1437_v2, %v1437_v2  ;;  %v2487_v7 = vpack.c.bf16 %v1437_v2, %v1434_v59 }
 0x164   :  { %v1767_v8 = vadd.f32 %v1766_v4, %v1704_v6  ;;  %2607 = vst [vmem:[%s3553_s2 + $0x48] sm:$0xff] %v2487_v7   ;;  %v1152_v9 = vpop.f32.mrb[40].mxu1 }
 0x165   :  { %v1441_v10 = vpop.f32.mrb[40].mxu0  ;;  %v1154_v11 = vpop.f32.mrb[41].mxu1 }
 0x166   :  { %v1442_v12 = vadd.f32 %v1441_v10, %v1152_v9  ;;  %v1443_v13 = vpop.f32.mrb[41].mxu0  ;;  %v1155_v14 = vpop.f32.mrb[42].mxu1 }
 0x167   :  { %v1444_v15 = vpop.f32.mrb[42].mxu0  ;;  %v1157_v16 = vpop.f32.mrb[43].mxu1 }
 0x168   :  { %v1635_v17 = vadd.f32 %v1634_v5, %v1442_v12  ;;  %v1705_v18 = vmul.f32 %v1442_v12, %v1442_v12  ;;  %v1445_v19 = vadd.f32 %v1444_v15, %v1155_v14  ;;  %v1446_v20 = vpop.f32.mrb[43].mxu0 }
 0x16a   :  { %v1768_v21 = vadd.f32 %v1767_v8, %v1705_v18  ;;  %v1636_v22 = vadd.f32 %v1635_v17, %v1445_v19  ;;  %v1706_v23 = vmul.f32 %v1445_v19, %v1445_v19  ;;  %v2492_v24 = vpack.c.bf16 %v1445_v19, %v1442_v12 }
 0x16c   :  { %v1769_v25 = vadd.f32 %v1768_v21, %v1706_v23  ;;  %2608 = vst [vmem:[%s3553_s2 + $0x50] sm:$0xff] %v2492_v24   ;;  %v1160_v26 = vpop.f32.mrb[44].mxu1 }
 0x16d   :  { %v1449_v27 = vpop.f32.mrb[44].mxu0  ;;  %v1162_v28 = vpop.f32.mrb[45].mxu1 }
 0x16e   :  { %v1450_v29 = vadd.f32 %v1449_v27, %v1160_v26  ;;  %v1451_v30 = vpop.f32.mrb[45].mxu0  ;;  %v1163_v31 = vpop.f32.mrb[46].mxu1 }
 0x16f   :  { %v1452_v32 = vpop.f32.mrb[46].mxu0  ;;  %v1165_v33 = vpop.f32.mrb[47].mxu1 }
 0x170   :  { %v1637_v34 = vadd.f32 %v1636_v22, %v1450_v29  ;;  %v1707_v35 = vmul.f32 %v1450_v29, %v1450_v29  ;;  %v1453_v36 = vadd.f32 %v1452_v32, %v1163_v31  ;;  %v1454_v37 = vpop.f32.mrb[47].mxu0 }
 0x172   :  { %v1770_v38 = vadd.f32 %v1769_v25, %v1707_v35  ;;  %v1638_v39 = vadd.f32 %v1637_v34, %v1453_v36  ;;  %v1708_v40 = vmul.f32 %v1453_v36, %v1453_v36  ;;  %v2497_v41 = vpack.c.bf16 %v1453_v36, %v1450_v29 }
 0x174   :  { %v1771_v42 = vadd.f32 %v1770_v38, %v1708_v40  ;;  %2609 = vst [vmem:[%s3553_s2 + $0x58] sm:$0xff] %v2497_v41   ;;  %v1168_v43 = vpop.f32.mrb[48].mxu1 }
 0x175   :  { %v1457_v44 = vpop.f32.mrb[48].mxu0  ;;  %v1170_v45 = vpop.f32.mrb[49].mxu1 }
 0x176   :  { %v1458_v46 = vadd.f32 %v1457_v44, %v1168_v43  ;;  %v1459_v47 = vpop.f32.mrb[49].mxu0  ;;  %v1171_v48 = vpop.f32.mrb[50].mxu1 }
 0x177   :  { %v1460_v49 = vpop.f32.mrb[50].mxu0  ;;  %v1173_v50 = vpop.f32.mrb[51].mxu1 }
 0x178   :  { %v1639_v51 = vadd.f32 %v1638_v39, %v1458_v46  ;;  %v1709_v52 = vmul.f32 %v1458_v46, %v1458_v46  ;;  %v1461_v53 = vadd.f32 %v1460_v49, %v1171_v48  ;;  %v1462_v54 = vpop.f32.mrb[51].mxu0 }
 0x17a   :  { %v1772_v55 = vadd.f32 %v1771_v42, %v1709_v52  ;;  %v1640_v56 = vadd.f32 %v1639_v51, %v1461_v53  ;;  %v1710_v57 = vmul.f32 %v1461_v53, %v1461_v53  ;;  %v2502_v58 = vpack.c.bf16 %v1461_v53, %v1458_v46 }
 0x17c   :  { %v1773_v59 = vadd.f32 %v1772_v55, %v1710_v57  ;;  %2610 = vst [vmem:[%s3553_s2 + $0x60] sm:$0xff] %v2502_v58   ;;  %v1176_v60 = vpop.f32.mrb[52].mxu1 }
 0x17d   :  { %v1465_v61 = vpop.f32.mrb[52].mxu0  ;;  %v1178_v62 = vpop.f32.mrb[53].mxu1 }
 0x17e   :  { %v1466_v63 = vadd.f32 %v1465_v61, %v1176_v60  ;;  %v1467_v0 = vpop.f32.mrb[53].mxu0  ;;  %v1179_v1 = vpop.f32.mrb[54].mxu1 }
 0x17f   :  { %v1468_v2 = vpop.f32.mrb[54].mxu0  ;;  %v1181_v3 = vpop.f32.mrb[55].mxu1 }
 0x180   :  { %v1641_v4 = vadd.f32 %v1640_v56, %v1466_v63  ;;  %v1711_v5 = vmul.f32 %v1466_v63, %v1466_v63  ;;  %v1469_v6 = vadd.f32 %v1468_v2, %v1179_v1  ;;  %v1470_v7 = vpop.f32.mrb[55].mxu0 }
 0x182   :  { %v1774_v8 = vadd.f32 %v1773_v59, %v1711_v5  ;;  %v1642_v9 = vadd.f32 %v1641_v4, %v1469_v6  ;;  %v1712_v10 = vmul.f32 %v1469_v6, %v1469_v6  ;;  %v2507_v11 = vpack.c.bf16 %v1469_v6, %v1466_v63 }
 0x184   :  { %v1775_v12 = vadd.f32 %v1774_v8, %v1712_v10  ;;  %2611 = vst [vmem:[%s3553_s2 + $0x68] sm:$0xff] %v2507_v11   ;;  %v1184_v13 = vpop.f32.mrb[56].mxu1 }
 0x185   :  { %v1473_v14 = vpop.f32.mrb[56].mxu0  ;;  %v1186_v15 = vpop.f32.mrb[57].mxu1 }
 0x186   :  { %v1474_v16 = vadd.f32 %v1473_v14, %v1184_v13  ;;  %v1475_v17 = vpop.f32.mrb[57].mxu0  ;;  %v1187_v18 = vpop.f32.mrb[58].mxu1 }
 0x187   :  { %v1476_v19 = vpop.f32.mrb[58].mxu0  ;;  %v1189_v20 = vpop.f32.mrb[59].mxu1 }
 0x188   :  { %v1643_v21 = vadd.f32 %v1642_v9, %v1474_v16  ;;  %v1713_v22 = vmul.f32 %v1474_v16, %v1474_v16  ;;  %v1477_v23 = vadd.f32 %v1476_v19, %v1187_v18  ;;  %v1478_v24 = vpop.f32.mrb[59].mxu0 }
 0x18a   :  { %v1776_v25 = vadd.f32 %v1775_v12, %v1713_v22  ;;  %v1644_v26 = vadd.f32 %v1643_v21, %v1477_v23  ;;  %v1714_v27 = vmul.f32 %v1477_v23, %v1477_v23  ;;  %v2512_v28 = vpack.c.bf16 %v1477_v23, %v1474_v16 }
 0x18c   :  { %v1777_v29 = vadd.f32 %v1776_v25, %v1714_v27  ;;  %2612 = vst [vmem:[%s3553_s2 + $0x70] sm:$0xff] %v2512_v28   ;;  %v1192_v30 = vpop.f32.mrb[60].mxu1 }
 0x18d   :  { %v1481_v31 = vpop.f32.mrb[60].mxu0  ;;  %v1194_v32 = vpop.f32.mrb[61].mxu1 }
 0x18e   :  { %v1482_v33 = vadd.f32 %v1481_v31, %v1192_v30  ;;  %v1483_v34 = vpop.f32.mrb[61].mxu0  ;;  %v1195_v35 = vpop.f32.mrb[62].mxu1 }
 0x18f   :  { %v1484_v36 = vpop.f32.mrb[62].mxu0  ;;  %v1197_v37 = vpop.f32.mrb[63].mxu1 }
 0x190   :  { %v1645_v38 = vadd.f32 %v1644_v26, %v1482_v33  ;;  %v1715_v39 = vmul.f32 %v1482_v33, %v1482_v33  ;;  %v1485_v40 = vadd.f32 %v1484_v36, %v1195_v35  ;;  %v1486_v41 = vpop.f32.mrb[63].mxu0 }
 0x192   :  { %v1778_v42 = vadd.f32 %v1777_v29, %v1715_v39  ;;  %v1646_v43 = vadd.f32 %v1645_v38, %v1485_v40  ;;  %v1716_v44 = vmul.f32 %v1485_v40, %v1485_v40  ;;  %v2517_v45 = vpack.c.bf16 %v1485_v40, %v1482_v33 }
 0x194   :  { %v1779_v46 = vadd.f32 %v1778_v42, %v1716_v44  ;;  %2613 = vst [vmem:[%s3553_s2 + $0x78] sm:$0xff] %v2517_v45   ;;  %v1200_v47 = vpop.f32.mrb[64].mxu1 }
 0x195   :  { %v1489_v48 = vpop.f32.mrb[64].mxu0  ;;  %v1202_v49 = vpop.f32.mrb[65].mxu1 }
 0x196   :  { %v1490_v50 = vadd.f32 %v1489_v48, %v1200_v47  ;;  %v1491_v51 = vpop.f32.mrb[65].mxu0  ;;  %v1203_v52 = vpop.f32.mrb[66].mxu1 }
 0x197   :  { %v1492_v53 = vpop.f32.mrb[66].mxu0  ;;  %v1205_v54 = vpop.f32.mrb[67].mxu1 }
 0x198   :  { %v1647_v55 = vadd.f32 %v1646_v43, %v1490_v50  ;;  %v1717_v56 = vmul.f32 %v1490_v50, %v1490_v50  ;;  %v1493_v57 = vadd.f32 %v1492_v53, %v1203_v52  ;;  %v1494_v58 = vpop.f32.mrb[67].mxu0 }
 0x19a   :  { %v1780_v59 = vadd.f32 %v1779_v46, %v1717_v56  ;;  %v1648_v60 = vadd.f32 %v1647_v55, %v1493_v57  ;;  %v1718_v61 = vmul.f32 %v1493_v57, %v1493_v57  ;;  %v2522_v62 = vpack.c.bf16 %v1493_v57, %v1490_v50 }
 0x19c   :  { %v1781_v63 = vadd.f32 %v1780_v59, %v1718_v61  ;;  %2614 = vst [vmem:[%s3553_s2 + $0x80] sm:$0xff] %v2522_v62   ;;  %v1208_v0 = vpop.f32.mrb[68].mxu1 }
 0x19d   :  { %v1497_v1 = vpop.f32.mrb[68].mxu0  ;;  %v1210_v2 = vpop.f32.mrb[69].mxu1 }
 0x19e   :  { %v1498_v3 = vadd.f32 %v1497_v1, %v1208_v0  ;;  %v1499_v4 = vpop.f32.mrb[69].mxu0  ;;  %v1211_v5 = vpop.f32.mrb[70].mxu1 }
 0x19f   :  { %v1500_v6 = vpop.f32.mrb[70].mxu0  ;;  %v1213_v7 = vpop.f32.mrb[71].mxu1 }
 0x1a0   :  { %v1649_v8 = vadd.f32 %v1648_v60, %v1498_v3  ;;  %v1719_v9 = vmul.f32 %v1498_v3, %v1498_v3  ;;  %v1501_v10 = vadd.f32 %v1500_v6, %v1211_v5  ;;  %v1502_v11 = vpop.f32.mrb[71].mxu0 }
 0x1a2   :  { %v1782_v12 = vadd.f32 %v1781_v63, %v1719_v9  ;;  %v1650_v13 = vadd.f32 %v1649_v8, %v1501_v10  ;;  %v1720_v14 = vmul.f32 %v1501_v10, %v1501_v10  ;;  %v2527_v15 = vpack.c.bf16 %v1501_v10, %v1498_v3 }
 0x1a4   :  { %v1783_v16 = vadd.f32 %v1782_v12, %v1720_v14  ;;  %2615 = vst [vmem:[%s3553_s2 + $0x88] sm:$0xff] %v2527_v15   ;;  %v1216_v17 = vpop.f32.mrb[72].mxu1 }
 0x1a5   :  { %v1505_v18 = vpop.f32.mrb[72].mxu0  ;;  %v1218_v19 = vpop.f32.mrb[73].mxu1 }
 0x1a6   :  { %v1506_v20 = vadd.f32 %v1505_v18, %v1216_v17  ;;  %v1507_v21 = vpop.f32.mrb[73].mxu0  ;;  %v1219_v22 = vpop.f32.mrb[74].mxu1 }
 0x1a7   :  { %v1508_v23 = vpop.f32.mrb[74].mxu0  ;;  %v1221_v24 = vpop.f32.mrb[75].mxu1 }
 0x1a8   :  { %v1651_v25 = vadd.f32 %v1650_v13, %v1506_v20  ;;  %v1721_v26 = vmul.f32 %v1506_v20, %v1506_v20  ;;  %v1509_v27 = vadd.f32 %v1508_v23, %v1219_v22  ;;  %v1510_v28 = vpop.f32.mrb[75].mxu0 }
 0x1aa   :  { %v1784_v29 = vadd.f32 %v1783_v16, %v1721_v26  ;;  %v1652_v30 = vadd.f32 %v1651_v25, %v1509_v27  ;;  %v1722_v31 = vmul.f32 %v1509_v27, %v1509_v27  ;;  %v2532_v32 = vpack.c.bf16 %v1509_v27, %v1506_v20 }
 0x1ac   :  { %v1785_v33 = vadd.f32 %v1784_v29, %v1722_v31  ;;  %2616 = vst [vmem:[%s3553_s2 + $0x90] sm:$0xff] %v2532_v32   ;;  %v1224_v34 = vpop.f32.mrb[76].mxu1 }
 0x1ad   :  { %v1513_v35 = vpop.f32.mrb[76].mxu0  ;;  %v1226_v36 = vpop.f32.mrb[77].mxu1 }
 0x1ae   :  { %v1514_v37 = vadd.f32 %v1513_v35, %v1224_v34  ;;  %v1515_v38 = vpop.f32.mrb[77].mxu0  ;;  %v1227_v39 = vpop.f32.mrb[78].mxu1 }
 0x1af   :  { %v1516_v40 = vpop.f32.mrb[78].mxu0  ;;  %v1229_v41 = vpop.f32.mrb[79].mxu1 }
 0x1b0   :  { %v1653_v42 = vadd.f32 %v1652_v30, %v1514_v37  ;;  %v1723_v43 = vmul.f32 %v1514_v37, %v1514_v37  ;;  %v1517_v44 = vadd.f32 %v1516_v40, %v1227_v39  ;;  %v1518_v45 = vpop.f32.mrb[79].mxu0 }
 0x1b2   :  { %v1786_v46 = vadd.f32 %v1785_v33, %v1723_v43  ;;  %v1654_v47 = vadd.f32 %v1653_v42, %v1517_v44  ;;  %v1724_v48 = vmul.f32 %v1517_v44, %v1517_v44  ;;  %v2537_v49 = vpack.c.bf16 %v1517_v44, %v1514_v37 }
 0x1b4   :  { %v1787_v50 = vadd.f32 %v1786_v46, %v1724_v48  ;;  %2617 = vst [vmem:[%s3553_s2 + $0x98] sm:$0xff] %v2537_v49   ;;  %v1232_v51 = vpop.f32.mrb[80].mxu1 }
 0x1b5   :  { %v1521_v52 = vpop.f32.mrb[80].mxu0  ;;  %v1234_v53 = vpop.f32.mrb[81].mxu1 }
 0x1b6   :  { %v1522_v54 = vadd.f32 %v1521_v52, %v1232_v51  ;;  %v1523_v55 = vpop.f32.mrb[81].mxu0  ;;  %v1235_v56 = vpop.f32.mrb[82].mxu1 }
 0x1b7   :  { %v1524_v57 = vpop.f32.mrb[82].mxu0  ;;  %v1237_v58 = vpop.f32.mrb[83].mxu1 }
 0x1b8   :  { %v1655_v59 = vadd.f32 %v1654_v47, %v1522_v54  ;;  %v1725_v60 = vmul.f32 %v1522_v54, %v1522_v54  ;;  %v1525_v61 = vadd.f32 %v1524_v57, %v1235_v56  ;;  %v1526_v62 = vpop.f32.mrb[83].mxu0 }
 0x1ba   :  { %v1788_v63 = vadd.f32 %v1787_v50, %v1725_v60  ;;  %v1656_v0 = vadd.f32 %v1655_v59, %v1525_v61  ;;  %v1726_v1 = vmul.f32 %v1525_v61, %v1525_v61  ;;  %v2542_v2 = vpack.c.bf16 %v1525_v61, %v1522_v54 }
 0x1bc   :  { %v1789_v3 = vadd.f32 %v1788_v63, %v1726_v1  ;;  %2618 = vst [vmem:[%s3553_s2 + $0xa0] sm:$0xff] %v2542_v2   ;;  %v1240_v4 = vpop.f32.mrb[84].mxu1 }
 0x1bd   :  { %v1529_v5 = vpop.f32.mrb[84].mxu0  ;;  %v1242_v6 = vpop.f32.mrb[85].mxu1 }
 0x1be   :  { %v1530_v7 = vadd.f32 %v1529_v5, %v1240_v4  ;;  %v1531_v8 = vpop.f32.mrb[85].mxu0  ;;  %v1243_v9 = vpop.f32.mrb[86].mxu1 }
 0x1bf   :  { %v1532_v10 = vpop.f32.mrb[86].mxu0  ;;  %v1245_v11 = vpop.f32.mrb[87].mxu1 }
 0x1c0   :  { %v1657_v12 = vadd.f32 %v1656_v0, %v1530_v7  ;;  %v1727_v13 = vmul.f32 %v1530_v7, %v1530_v7  ;;  %v1533_v14 = vadd.f32 %v1532_v10, %v1243_v9  ;;  %v1534_v15 = vpop.f32.mrb[87].mxu0 }
 0x1c2   :  { %v1790_v16 = vadd.f32 %v1789_v3, %v1727_v13  ;;  %v1658_v17 = vadd.f32 %v1657_v12, %v1533_v14  ;;  %v1728_v18 = vmul.f32 %v1533_v14, %v1533_v14  ;;  %v2547_v19 = vpack.c.bf16 %v1533_v14, %v1530_v7 }
 0x1c4   :  { %v1791_v20 = vadd.f32 %v1790_v16, %v1728_v18  ;;  %2619 = vst [vmem:[%s3553_s2 + $0xa8] sm:$0xff] %v2547_v19   ;;  %v1248_v21 = vpop.f32.mrb[88].mxu1 }
 0x1c5   :  { %v1537_v22 = vpop.f32.mrb[88].mxu0  ;;  %v1250_v23 = vpop.f32.mrb[89].mxu1 }
 0x1c6   :  { %v1538_v24 = vadd.f32 %v1537_v22, %v1248_v21  ;;  %v1539_v25 = vpop.f32.mrb[89].mxu0  ;;  %v1251_v26 = vpop.f32.mrb[90].mxu1 }
 0x1c7   :  { %v1540_v27 = vpop.f32.mrb[90].mxu0  ;;  %v1253_v28 = vpop.f32.mrb[91].mxu1 }
 0x1c8   :  { %v1659_v29 = vadd.f32 %v1658_v17, %v1538_v24  ;;  %v1729_v30 = vmul.f32 %v1538_v24, %v1538_v24  ;;  %v1541_v31 = vadd.f32 %v1540_v27, %v1251_v26  ;;  %v1542_v32 = vpop.f32.mrb[91].mxu0 }
 0x1ca   :  { %v1792_v33 = vadd.f32 %v1791_v20, %v1729_v30  ;;  %v1660_v34 = vadd.f32 %v1659_v29, %v1541_v31  ;;  %v1730_v35 = vmul.f32 %v1541_v31, %v1541_v31  ;;  %v2552_v36 = vpack.c.bf16 %v1541_v31, %v1538_v24 }
 0x1cc   :  { %v1793_v37 = vadd.f32 %v1792_v33, %v1730_v35  ;;  %2620 = vst [vmem:[%s3553_s2 + $0xb0] sm:$0xff] %v2552_v36   ;;  %v1256_v38 = vpop.f32.mrb[92].mxu1 }
 0x1cd   :  { %v1545_v39 = vpop.f32.mrb[92].mxu0  ;;  %v1258_v40 = vpop.f32.mrb[93].mxu1 }
 0x1ce   :  { %v1546_v41 = vadd.f32 %v1545_v39, %v1256_v38  ;;  %v1547_v42 = vpop.f32.mrb[93].mxu0  ;;  %v1259_v43 = vpop.f32.mrb[94].mxu1 }
 0x1cf   :  { %v1548_v44 = vpop.f32.mrb[94].mxu0  ;;  %v1261_v45 = vpop.f32.mrb[95].mxu1 }
 0x1d0   :  { %v1661_v46 = vadd.f32 %v1660_v34, %v1546_v41  ;;  %v1731_v47 = vmul.f32 %v1546_v41, %v1546_v41  ;;  %v1549_v48 = vadd.f32 %v1548_v44, %v1259_v43  ;;  %v1550_v49 = vpop.f32.mrb[95].mxu0 }
 0x1d2   :  { %v1794_v50 = vadd.f32 %v1793_v37, %v1731_v47  ;;  %v1662_v51 = vadd.f32 %v1661_v46, %v1549_v48  ;;  %v1732_v52 = vmul.f32 %v1549_v48, %v1549_v48  ;;  %v2557_v53 = vpack.c.bf16 %v1549_v48, %v1546_v41 }
 0x1d4   :  { %v1795_v54 = vadd.f32 %v1794_v50, %v1732_v52  ;;  %2621 = vst [vmem:[%s3553_s2 + $0xb8] sm:$0xff] %v2557_v53   ;;  %v1264_v55 = vpop.f32.mrb[96].mxu1 }
 0x1d5   :  { %v1553_v56 = vpop.f32.mrb[96].mxu0  ;;  %v1266_v57 = vpop.f32.mrb[97].mxu1 }
 0x1d6   :  { %v1554_v58 = vadd.f32 %v1553_v56, %v1264_v55  ;;  %v1555_v59 = vpop.f32.mrb[97].mxu0  ;;  %v1267_v60 = vpop.f32.mrb[98].mxu1 }
 0x1d7   :  { %v1556_v61 = vpop.f32.mrb[98].mxu0  ;;  %v1269_v62 = vpop.f32.mrb[99].mxu1 }
 0x1d8   :  { %v1663_v63 = vadd.f32 %v1662_v51, %v1554_v58  ;;  %v1733_v0 = vmul.f32 %v1554_v58, %v1554_v58  ;;  %v1557_v1 = vadd.f32 %v1556_v61, %v1267_v60  ;;  %v1558_v2 = vpop.f32.mrb[99].mxu0 }
 0x1da   :  { %v1796_v3 = vadd.f32 %v1795_v54, %v1733_v0  ;;  %v1664_v4 = vadd.f32 %v1663_v63, %v1557_v1  ;;  %v1734_v5 = vmul.f32 %v1557_v1, %v1557_v1  ;;  %v2562_v6 = vpack.c.bf16 %v1557_v1, %v1554_v58 }
 0x1dc   :  { %v1797_v7 = vadd.f32 %v1796_v3, %v1734_v5  ;;  %2622 = vst [vmem:[%s3553_s2 + $0xc0] sm:$0xff] %v2562_v6   ;;  %v1272_v8 = vpop.f32.mrb[100].mxu1 }
 0x1dd   :  { %v1561_v9 = vpop.f32.mrb[100].mxu0  ;;  %v1274_v10 = vpop.f32.mrb[101].mxu1 }
 0x1de   :  { %v1562_v11 = vadd.f32 %v1561_v9, %v1272_v8  ;;  %v1563_v12 = vpop.f32.mrb[101].mxu0  ;;  %v1275_v13 = vpop.f32.mrb[102].mxu1 }
 0x1df   :  { %v1564_v14 = vpop.f32.mrb[102].mxu0  ;;  %v1277_v15 = vpop.f32.mrb[103].mxu1 }
 0x1e0   :  { %v1665_v16 = vadd.f32 %v1664_v4, %v1562_v11  ;;  %v1735_v17 = vmul.f32 %v1562_v11, %v1562_v11  ;;  %v1565_v18 = vadd.f32 %v1564_v14, %v1275_v13  ;;  %v1566_v19 = vpop.f32.mrb[103].mxu0 }
 0x1e2   :  { %v1798_v20 = vadd.f32 %v1797_v7, %v1735_v17  ;;  %v1666_v21 = vadd.f32 %v1665_v16, %v1565_v18  ;;  %v1736_v22 = vmul.f32 %v1565_v18, %v1565_v18  ;;  %v2567_v23 = vpack.c.bf16 %v1565_v18, %v1562_v11 }
 0x1e4   :  { %v1799_v24 = vadd.f32 %v1798_v20, %v1736_v22  ;;  %2623 = vst [vmem:[%s3553_s2 + $0xc8] sm:$0xff] %v2567_v23   ;;  %v1280_v25 = vpop.f32.mrb[104].mxu1 }
 0x1e5   :  { %v1569_v26 = vpop.f32.mrb[104].mxu0  ;;  %v1282_v27 = vpop.f32.mrb[105].mxu1 }
 0x1e6   :  { %v1570_v28 = vadd.f32 %v1569_v26, %v1280_v25  ;;  %v1571_v29 = vpop.f32.mrb[105].mxu0  ;;  %v1283_v30 = vpop.f32.mrb[106].mxu1 }
 0x1e7   :  { %v1572_v31 = vpop.f32.mrb[106].mxu0  ;;  %v1285_v32 = vpop.f32.mrb[107].mxu1 }
 0x1e8   :  { %v1667_v33 = vadd.f32 %v1666_v21, %v1570_v28  ;;  %v1737_v34 = vmul.f32 %v1570_v28, %v1570_v28  ;;  %v1573_v35 = vadd.f32 %v1572_v31, %v1283_v30  ;;  %v1574_v36 = vpop.f32.mrb[107].mxu0 }
 0x1ea   :  { %v1800_v37 = vadd.f32 %v1799_v24, %v1737_v34  ;;  %v1668_v38 = vadd.f32 %v1667_v33, %v1573_v35  ;;  %v1738_v39 = vmul.f32 %v1573_v35, %v1573_v35  ;;  %v2572_v40 = vpack.c.bf16 %v1573_v35, %v1570_v28 }
 0x1ec   :  { %v1801_v41 = vadd.f32 %v1800_v37, %v1738_v39  ;;  %2624 = vst [vmem:[%s3553_s2 + $0xd0] sm:$0xff] %v2572_v40   ;;  %v1288_v42 = vpop.f32.mrb[108].mxu1 }
 0x1ed   :  { %v1577_v43 = vpop.f32.mrb[108].mxu0  ;;  %v1290_v44 = vpop.f32.mrb[109].mxu1 }
 0x1ee   :  { %v1578_v45 = vadd.f32 %v1577_v43, %v1288_v42  ;;  %v1579_v46 = vpop.f32.mrb[109].mxu0  ;;  %v1291_v47 = vpop.f32.mrb[110].mxu1 }
 0x1ef   :  { %v1580_v48 = vpop.f32.mrb[110].mxu0  ;;  %v1293_v49 = vpop.f32.mrb[111].mxu1 }
 0x1f0   :  { %v1669_v50 = vadd.f32 %v1668_v38, %v1578_v45  ;;  %v1739_v51 = vmul.f32 %v1578_v45, %v1578_v45  ;;  %v1581_v52 = vadd.f32 %v1580_v48, %v1291_v47  ;;  %v1582_v53 = vpop.f32.mrb[111].mxu0 }
 0x1f2   :  { %v1802_v54 = vadd.f32 %v1801_v41, %v1739_v51  ;;  %v1670_v55 = vadd.f32 %v1669_v50, %v1581_v52  ;;  %v1740_v56 = vmul.f32 %v1581_v52, %v1581_v52  ;;  %v2577_v57 = vpack.c.bf16 %v1581_v52, %v1578_v45 }
 0x1f4   :  { %v1803_v58 = vadd.f32 %v1802_v54, %v1740_v56  ;;  %2625 = vst [vmem:[%s3553_s2 + $0xd8] sm:$0xff] %v2577_v57   ;;  %v1296_v59 = vpop.f32.mrb[112].mxu1 }
 0x1f5   :  { %v1585_v60 = vpop.f32.mrb[112].mxu0  ;;  %v1298_v61 = vpop.f32.mrb[113].mxu1 }
 0x1f6   :  { %v1586_v62 = vadd.f32 %v1585_v60, %v1296_v59  ;;  %v1587_v63 = vpop.f32.mrb[113].mxu0  ;;  %v1299_v0 = vpop.f32.mrb[114].mxu1 }
 0x1f7   :  { %v1588_v1 = vpop.f32.mrb[114].mxu0  ;;  %v1301_v2 = vpop.f32.mrb[115].mxu1 }
 0x1f8   :  { %v1671_v3 = vadd.f32 %v1670_v55, %v1586_v62  ;;  %v1741_v4 = vmul.f32 %v1586_v62, %v1586_v62  ;;  %v1589_v5 = vadd.f32 %v1588_v1, %v1299_v0  ;;  %v1590_v6 = vpop.f32.mrb[115].mxu0 }
 0x1fa   :  { %v1804_v7 = vadd.f32 %v1803_v58, %v1741_v4  ;;  %v1672_v8 = vadd.f32 %v1671_v3, %v1589_v5  ;;  %v1742_v9 = vmul.f32 %v1589_v5, %v1589_v5  ;;  %v2582_v10 = vpack.c.bf16 %v1589_v5, %v1586_v62 }
 0x1fc   :  { %v1805_v11 = vadd.f32 %v1804_v7, %v1742_v9  ;;  %2626 = vst [vmem:[%s3553_s2 + $0xe0] sm:$0xff] %v2582_v10   ;;  %v1304_v12 = vpop.f32.mrb[116].mxu1 }
 0x1fd   :  { %v1593_v13 = vpop.f32.mrb[116].mxu0  ;;  %v1306_v14 = vpop.f32.mrb[117].mxu1 }
 0x1fe   :  { %v1594_v15 = vadd.f32 %v1593_v13, %v1304_v12  ;;  %v1595_v16 = vpop.f32.mrb[117].mxu0  ;;  %v1307_v17 = vpop.f32.mrb[118].mxu1 }
 0x1ff   :  { %v1596_v18 = vpop.f32.mrb[118].mxu0  ;;  %v1309_v19 = vpop.f32.mrb[119].mxu1 }
 0x200   :  { %v1673_v20 = vadd.f32 %v1672_v8, %v1594_v15  ;;  %v1743_v21 = vmul.f32 %v1594_v15, %v1594_v15  ;;  %v1597_v22 = vadd.f32 %v1596_v18, %v1307_v17  ;;  %v1598_v23 = vpop.f32.mrb[119].mxu0 }
 0x202   :  { %v1806_v24 = vadd.f32 %v1805_v11, %v1743_v21  ;;  %v1674_v25 = vadd.f32 %v1673_v20, %v1597_v22  ;;  %v1744_v26 = vmul.f32 %v1597_v22, %v1597_v22  ;;  %v2587_v27 = vpack.c.bf16 %v1597_v22, %v1594_v15 }
 0x204   :  { %v1807_v28 = vadd.f32 %v1806_v24, %v1744_v26  ;;  %2627 = vst [vmem:[%s3553_s2 + $0xe8] sm:$0xff] %v2587_v27   ;;  %v1312_v29 = vpop.f32.mrb[120].mxu1 }
 0x205   :  { %v1601_v30 = vpop.f32.mrb[120].mxu0  ;;  %v1314_v31 = vpop.f32.mrb[121].mxu1 }
 0x206   :  { %v1602_v32 = vadd.f32 %v1601_v30, %v1312_v29  ;;  %v1603_v33 = vpop.f32.mrb[121].mxu0  ;;  %v1315_v34 = vpop.f32.mrb[122].mxu1 }
 0x207   :  { %v1604_v35 = vpop.f32.mrb[122].mxu0  ;;  %v1317_v36 = vpop.f32.mrb[123].mxu1 }
 0x208   :  { %v1675_v37 = vadd.f32 %v1674_v25, %v1602_v32  ;;  %v1745_v38 = vmul.f32 %v1602_v32, %v1602_v32  ;;  %v1605_v39 = vadd.f32 %v1604_v35, %v1315_v34  ;;  %v1606_v40 = vpop.f32.mrb[123].mxu0 }
 0x20a   :  { %v1808_v41 = vadd.f32 %v1807_v28, %v1745_v38  ;;  %v1676_v42 = vadd.f32 %v1675_v37, %v1605_v39  ;;  %v1746_v43 = vmul.f32 %v1605_v39, %v1605_v39  ;;  %v2592_v44 = vpack.c.bf16 %v1605_v39, %v1602_v32 }
 0x20c   :  { %v1809_v45 = vadd.f32 %v1808_v41, %v1746_v43  ;;  %2628 = vst [vmem:[%s3553_s2 + $0xf0] sm:$0xff] %v2592_v44   ;;  %v1320_v46 = vpop.f32.mrb[124].mxu1 }
 0x20d   :  { %v1609_v47 = vpop.f32.mrb[124].mxu0  ;;  %v1322_v48 = vpop.f32.mrb[125].mxu1 }
 0x20e   :  { %v1610_v49 = vadd.f32 %v1609_v47, %v1320_v46  ;;  %v1611_v50 = vpop.f32.mrb[125].mxu0  ;;  %v1323_v51 = vpop.f32.mrb[126].mxu1 }
 0x20f   :  { %v1612_v52 = vpop.f32.mrb[126].mxu0  ;;  %v1325_v53 = vpop.f32.mrb[127].mxu1 }
 0x210   :  { %v1677_v54 = vadd.f32 %v1676_v42, %v1610_v49  ;;  %v1747_v55 = vmul.f32 %v1610_v49, %v1610_v49  ;;  %v1613_v56 = vadd.f32 %v1612_v52, %v1323_v51  ;;  %v1614_v57 = vpop.f32.mrb[127].mxu0 }
 0x212   :  { %v1810_v58 = vadd.f32 %v1809_v45, %v1747_v55  ;;  %v1678_v59 = vadd.f32 %v1677_v54, %v1613_v56  ;;  %v1748_v60 = vmul.f32 %v1613_v56, %v1613_v56  ;;  %v2597_v61 = vpack.c.bf16 %v1613_v56, %v1610_v49 }
 0x214   :  { %v1679_v62 = vrot.slane %v1678_v59, 4  ;;  %v1811_v63 = vadd.f32 %v1810_v58, %v1748_v60  ;;  %2629 = vst [vmem:[%s3553_s2 + $0xf8] sm:$0xff] %v2597_v61  }
 0x216   :  { %v1680_v0 = vadd.f32 %v1679_v62, %v1678_v59  ;;  %v1812_v1 = vrot.slane %v1811_v63, 4 }
 0x218   :  { %v1681_v2 = vrot.slane %v1680_v0, 2  ;;  %v1813_v3 = vadd.f32 %v1812_v1, %v1811_v63 }
 0x21a   :  { %v1682_v4 = vadd.f32 %v1681_v2, %v1680_v0  ;;  %v1814_v5 = vrot.slane %v1813_v3, 2 }
 0x21c   :  { %v1683_v6 = vrot.slane %v1682_v4, 1  ;;  %v1815_v7 = vadd.f32 %v1814_v5, %v1813_v3 }
 0x21e   :  { %v1816_v8 = vrot.slane %v1815_v7, 1  ;;  %v1684_v9 = vadd.f32 %v1683_v6, %v1682_v4 }
 0x220   :  { %v1817_v10 = vadd.f32 %v1816_v8, %v1815_v7 }
 0x222   :  { %v1819_v11 = vsel %vm1818_vm0, %v1684_v9, %v1817_v10 }
 0x223   :  { %v1821_v12 = vsel %vm1820_vm1, %v1819_v11, 0.0 }
 0x224   :  { %1822 = vst [vmem:[%s3554_s3] sm:$0xff] %v1821_v12 }

// kernel: _lambda_.15
= control target key start
LH: loop header
LB: loop body
LE: loop exit
PB: predicated region body
PF: predicated region fallthrough
CT: control target
= control target key end

     0   :  { %v6790_v0 = vmov 0   ;;  %vm3513_vm0 = vcmask 1040384   ;;  %vm3515_vm1 = vcmask 1041408   ;;  %s8814_s1 = inlined_call_operand.vmem [shape: bf16[256,128], index: 1, kind: input, shape index: {}]   ;;  %s8815_s0 = inlined_call_operand.vmem [shape: bf16[2048,256], index: 0, kind: input, shape index: {}]   ;;  %s8816_s2 = inlined_call_operand.vmem [shape: bf16[2048,128], index: 2, kind: output, shape index: {0}]   ;;  %s8817_s3 = inlined_call_operand.vmem [shape: f32[1,8,128], index: 3, kind: output, shape index: {1}]  }
   0x1   :  { %1678 = vmatprep.subr.bf16.mxu0 %v6790_v0  ;;  %v6390_v1 = vld [vmem:[%s8814_s1] sm:$0xff]   ;;  %6357 = vmatprep.subr.bf16.mxu1 %v6790_v0  ;;  %v6391_v2 = vld [vmem:[%s8814_s1 + $0x8] sm:$0xff]   ;;  %v6392_v3 = vld [vmem:[%s8814_s1 + $0x10] sm:$0xff]  }
   0x2   :  { %1679 = vmatpush1.bf16.msra.mxu0 %v6390_v1  ;;  %6373 = vmatpush1.bf16.msra.mxu1 %v6390_v1  ;;  %v6393_v4 = vld [vmem:[%s8814_s1 + $0x18] sm:$0xff]   ;;  %v6394_v5 = vld [vmem:[%s8814_s1 + $0x20] sm:$0xff]   ;;  %v6395_v7 = vld [vmem:[%s8814_s1 + $0x28] sm:$0xff]  }
   0x3   :  { %1680 = vmatprep.subr.bf16.mxu0 %v6790_v0  ;;  %6358 = vmatprep.subr.bf16.mxu1 %v6790_v0  ;;  %v6408_v6 = vld [vmem:[%s8815_s0 + $0x4] ss:$8 sps:$4 sm:$0xff]   ;;  %v6396_v8 = vld [vmem:[%s8814_s1 + $0x30] sm:$0xff]   ;;  %v6397_v9 = vld [vmem:[%s8814_s1 + $0x38] sm:$0xff]  }
   0x4   :  { %1710 = vmatprep.mubr.bf16.mxu0 %v6408_v6  ;;  %v6398_v10 = vld [vmem:[%s8814_s1 + $0x40] sm:$0xff]   ;;  %v6399_v11 = vld [vmem:[%s8814_s1 + $0x48] sm:$0xff]   ;;  %v6400_v12 = vld [vmem:[%s8814_s1 + $0x50] sm:$0xff]  }
   0x5   :  { %v6401_v13 = vld [vmem:[%s8814_s1 + $0x58] sm:$0xff]   ;;  %v6402_v14 = vld [vmem:[%s8814_s1 + $0x60] sm:$0xff]   ;;  %v6403_v15 = vld [vmem:[%s8814_s1 + $0x68] sm:$0xff]  }
   0x6   :  { %1681 = vmatpush1.bf16.msra.mxu0 %v6391_v2  ;;  %6374 = vmatpush1.bf16.msra.mxu1 %v6391_v2  ;;  %v6404_v16 = vld [vmem:[%s8814_s1 + $0x70] sm:$0xff]   ;;  %v6405_v17 = vld [vmem:[%s8814_s1 + $0x78] sm:$0xff]   ;;  %v6406_v18 = vld [vmem:[%s8815_s0] ss:$8 sps:$4 sm:$0xff]  }
   0x7   :  { %1682 = vmatprep.subr.bf16.mxu0 %v6790_v0  ;;  %6359 = vmatprep.subr.bf16.mxu1 %v6790_v0  ;;  %v6409_v19 = vld [vmem:[%s8815_s0 + $0x14] ss:$8 sps:$4 sm:$0xff]   ;;  %v6411_v20 = vld [vmem:[%s8815_s0 + $0x10] ss:$8 sps:$4 sm:$0xff]   ;;  %v6412_v21 = vld [vmem:[%s8815_s0 + $0x24] ss:$8 sps:$4 sm:$0xff]  }
   0x8   :  { %v6414_v22 = vld [vmem:[%s8815_s0 + $0x20] ss:$8 sps:$4 sm:$0xff]   ;;  %v6415_v23 = vld [vmem:[%s8815_s0 + $0x34] ss:$8 sps:$4 sm:$0xff]   ;;  %v6417_v24 = vld [vmem:[%s8815_s0 + $0x30] ss:$8 sps:$4 sm:$0xff]  }
   0x9   :  { %v6418_v25 = vld [vmem:[%s8815_s0 + $0x44] ss:$8 sps:$4 sm:$0xff]   ;;  %v6420_v26 = vld [vmem:[%s8815_s0 + $0x40] ss:$8 sps:$4 sm:$0xff]   ;;  %v6421_v27 = vld [vmem:[%s8815_s0 + $0x54] ss:$8 sps:$4 sm:$0xff]  }
   0xa   :  { %1683 = vmatpush1.bf16.msra.mxu0 %v6392_v3  ;;  %6375 = vmatpush1.bf16.msra.mxu1 %v6392_v3  ;;  %v6423_v28 = vld [vmem:[%s8815_s0 + $0x50] ss:$8 sps:$4 sm:$0xff]   ;;  %v6424_v29 = vld [vmem:[%s8815_s0 + $0x64] ss:$8 sps:$4 sm:$0xff]   ;;  %v6426_v30 = vld [vmem:[%s8815_s0 + $0x60] ss:$8 sps:$4 sm:$0xff]  }
   0xb   :  { %1684 = vmatprep.subr.bf16.mxu0 %v6790_v0  ;;  %6360 = vmatprep.subr.bf16.mxu1 %v6790_v0  ;;  %v6427_v31 = vld [vmem:[%s8815_s0 + $0x74] ss:$8 sps:$4 sm:$0xff]   ;;  %v6429_v32 = vld [vmem:[%s8815_s0 + $0x70] ss:$8 sps:$4 sm:$0xff]   ;;  %v6430_v33 = vld [vmem:[%s8815_s0 + $0x84] ss:$8 sps:$4 sm:$0xff]  }
   0xc   :  { %v6432_v34 = vld [vmem:[%s8815_s0 + $0x80] ss:$8 sps:$4 sm:$0xff]   ;;  %v6433_v35 = vld [vmem:[%s8815_s0 + $0x94] ss:$8 sps:$4 sm:$0xff]   ;;  %v6435_v36 = vld [vmem:[%s8815_s0 + $0x90] ss:$8 sps:$4 sm:$0xff]  }
   0xd   :  { %v6436_v37 = vld [vmem:[%s8815_s0 + $0xa4] ss:$8 sps:$4 sm:$0xff]   ;;  %v6438_v38 = vld [vmem:[%s8815_s0 + $0xa0] ss:$8 sps:$4 sm:$0xff]   ;;  %v6439_v39 = vld [vmem:[%s8815_s0 + $0xb4] ss:$8 sps:$4 sm:$0xff]  }
   0xe   :  { %1685 = vmatpush1.bf16.msra.mxu0 %v6393_v4  ;;  %6376 = vmatpush1.bf16.msra.mxu1 %v6393_v4  ;;  %v6441_v40 = vld [vmem:[%s8815_s0 + $0xb0] ss:$8 sps:$4 sm:$0xff]   ;;  %v6442_v41 = vld [vmem:[%s8815_s0 + $0xc4] ss:$8 sps:$4 sm:$0xff]   ;;  %v6444_v42 = vld [vmem:[%s8815_s0 + $0xc0] ss:$8 sps:$4 sm:$0xff]  }
   0xf   :  { %1686 = vmatprep.subr.bf16.mxu0 %v6790_v0  ;;  %6361 = vmatprep.subr.bf16.mxu1 %v6790_v0  ;;  %v6445_v43 = vld [vmem:[%s8815_s0 + $0xd4] ss:$8 sps:$4 sm:$0xff]   ;;  %v6447_v44 = vld [vmem:[%s8815_s0 + $0xd0] ss:$8 sps:$4 sm:$0xff]   ;;  %v6448_v45 = vld [vmem:[%s8815_s0 + $0xe4] ss:$8 sps:$4 sm:$0xff]  }
  0x10   :  { %v6450_v46 = vld [vmem:[%s8815_s0 + $0xe0] ss:$8 sps:$4 sm:$0xff]   ;;  %v6451_v47 = vld [vmem:[%s8815_s0 + $0xf4] ss:$8 sps:$4 sm:$0xff]   ;;  %v6453_v48 = vld [vmem:[%s8815_s0 + $0xf0] ss:$8 sps:$4 sm:$0xff]  }
  0x11   :  { %v6454_v49 = vld [vmem:[%s8815_s0 + $0x104] ss:$8 sps:$4 sm:$0xff]   ;;  %v6502_v51 = vld [vmem:[%s8815_s0 + $0x400] ss:$8 sps:$4 sm:$0xff]   ;;  %v6457_v53 = vld [vmem:[%s8815_s0 + $0x114] ss:$8 sps:$4 sm:$0xff]  }
  0x12   :  { %1687 = vmatpush1.bf16.msra.mxu0 %v6394_v5  ;;  %6377 = vmatpush1.bf16.msra.mxu1 %v6394_v5  ;;  %v6504_v50 = vld [vmem:[%s8815_s0 + $0x404] ss:$8 sps:$4 sm:$0xff]   ;;  %v6456_v52 = vld [vmem:[%s8815_s0 + $0x100] ss:$8 sps:$4 sm:$0xff]   ;;  %v6508_v54 = vld [vmem:[%s8815_s0 + $0x414] ss:$8 sps:$4 sm:$0xff]  }
  0x13   :  { %1688 = vmatprep.subr.bf16.mxu0 %v6790_v0  ;;  %6362 = vmatprep.subr.bf16.mxu1 %v6790_v0  ;;  %v6510_v55 = vld [vmem:[%s8815_s0 + $0x410] ss:$8 sps:$4 sm:$0xff]   ;;  %v6460_v57 = vld [vmem:[%s8815_s0 + $0x124] ss:$8 sps:$4 sm:$0xff]   ;;  %v6516_v59 = vld [vmem:[%s8815_s0 + $0x420] ss:$8 sps:$4 sm:$0xff]  }
  0x14   :  { %2222 = vmatprep.mubr.bf16.mxu1 %v6504_v50  ;;  %v6459_v56 = vld [vmem:[%s8815_s0 + $0x110] ss:$8 sps:$4 sm:$0xff]   ;;  %v6514_v58 = vld [vmem:[%s8815_s0 + $0x424] ss:$8 sps:$4 sm:$0xff]   ;;  %v6462_v60 = vld [vmem:[%s8815_s0 + $0x120] ss:$8 sps:$4 sm:$0xff]  }
  0x15   :  { %v6463_v61 = vld [vmem:[%s8815_s0 + $0x134] ss:$8 sps:$4 sm:$0xff]   ;;  %v6522_v63 = vld [vmem:[%s8815_s0 + $0x430] ss:$8 sps:$4 sm:$0xff]   ;;  %v6466_v1 = vld [vmem:[%s8815_s0 + $0x144] ss:$8 sps:$4 sm:$0xff]  }
  0x16   :  { %1689 = vmatpush1.bf16.msra.mxu0 %v6395_v7  ;;  %6378 = vmatpush1.bf16.msra.mxu1 %v6395_v7  ;;  %v6520_v62 = vld [vmem:[%s8815_s0 + $0x434] ss:$8 sps:$4 sm:$0xff]   ;;  %v6526_v2 = vld [vmem:[%s8815_s0 + $0x444] ss:$8 sps:$4 sm:$0xff]   ;;  %v6528_v3 = vld [vmem:[%s8815_s0 + $0x440] ss:$8 sps:$4 sm:$0xff]  }
  0x17   :  { %1690 = vmatprep.subr.bf16.mxu0 %v6790_v0  ;;  %6363 = vmatprep.subr.bf16.mxu1 %v6790_v0  ;;  %v6468_v4 = vld [vmem:[%s8815_s0 + $0x140] ss:$8 sps:$4 sm:$0xff]   ;;  %v6469_v5 = vld [vmem:[%s8815_s0 + $0x154] ss:$8 sps:$4 sm:$0xff]   ;;  %v6534_v7 = vld [vmem:[%s8815_s0 + $0x450] ss:$8 sps:$4 sm:$0xff]  }
  0x18   :  { %v6532_v6 = vld [vmem:[%s8815_s0 + $0x454] ss:$8 sps:$4 sm:$0xff]  }
  0x1a   :  { %1691 = vmatpush1.bf16.msra.mxu0 %v6396_v8  ;;  %6379 = vmatpush1.bf16.msra.mxu1 %v6396_v8  ;;  %v6471_v8 = vld [vmem:[%s8815_s0 + $0x150] ss:$8 sps:$4 sm:$0xff]  }
  0x1b   :  { %1692 = vmatprep.subr.bf16.mxu0 %v6790_v0  ;;  %6364 = vmatprep.subr.bf16.mxu1 %v6790_v0 }
  0x1e   :  { %1693 = vmatpush1.bf16.msra.mxu0 %v6397_v9  ;;  %6380 = vmatpush1.bf16.msra.mxu1 %v6397_v9  ;;  %v6472_v9 = vld [vmem:[%s8815_s0 + $0x164] ss:$8 sps:$4 sm:$0xff]  }
  0x1f   :  { %1694 = vmatprep.subr.bf16.mxu0 %v6790_v0  ;;  %6365 = vmatprep.subr.bf16.mxu1 %v6790_v0 }
  0x22   :  { %1695 = vmatpush1.bf16.msra.mxu0 %v6398_v10  ;;  %6381 = vmatpush1.bf16.msra.mxu1 %v6398_v10  ;;  %v6538_v10 = vld [vmem:[%s8815_s0 + $0x464] ss:$8 sps:$4 sm:$0xff]  }
  0x23   :  { %1696 = vmatprep.subr.bf16.mxu0 %v6790_v0  ;;  %6366 = vmatprep.subr.bf16.mxu1 %v6790_v0 }
  0x26   :  { %1697 = vmatpush1.bf16.msra.mxu0 %v6399_v11  ;;  %6382 = vmatpush1.bf16.msra.mxu1 %v6399_v11  ;;  %v6540_v11 = vld [vmem:[%s8815_s0 + $0x460] ss:$8 sps:$4 sm:$0xff]  }
  0x27   :  { %1698 = vmatprep.subr.bf16.mxu0 %v6790_v0  ;;  %6367 = vmatprep.subr.bf16.mxu1 %v6790_v0 }
  0x2a   :  { %1699 = vmatpush1.bf16.msra.mxu0 %v6400_v12  ;;  %6383 = vmatpush1.bf16.msra.mxu1 %v6400_v12  ;;  %v6474_v12 = vld [vmem:[%s8815_s0 + $0x160] ss:$8 sps:$4 sm:$0xff]  }
  0x2b   :  { %1700 = vmatprep.subr.bf16.mxu0 %v6790_v0  ;;  %6368 = vmatprep.subr.bf16.mxu1 %v6790_v0 }
  0x2e   :  { %1701 = vmatpush1.bf16.msra.mxu0 %v6401_v13  ;;  %6384 = vmatpush1.bf16.msra.mxu1 %v6401_v13  ;;  %v6475_v13 = vld [vmem:[%s8815_s0 + $0x174] ss:$8 sps:$4 sm:$0xff]  }
  0x2f   :  { %1702 = vmatprep.subr.bf16.mxu0 %v6790_v0  ;;  %6369 = vmatprep.subr.bf16.mxu1 %v6790_v0 }
  0x32   :  { %1703 = vmatpush1.bf16.msra.mxu0 %v6402_v14  ;;  %6385 = vmatpush1.bf16.msra.mxu1 %v6402_v14  ;;  %v6544_v14 = vld [vmem:[%s8815_s0 + $0x474] ss:$8 sps:$4 sm:$0xff]  }
  0x33   :  { %1704 = vmatprep.subr.bf16.mxu0 %v6790_v0  ;;  %6370 = vmatprep.subr.bf16.mxu1 %v6790_v0 }
  0x36   :  { %1705 = vmatpush1.bf16.msra.mxu0 %v6403_v15  ;;  %6386 = vmatpush1.bf16.msra.mxu1 %v6403_v15  ;;  %v6546_v15 = vld [vmem:[%s8815_s0 + $0x470] ss:$8 sps:$4 sm:$0xff]  }
  0x37   :  { %1706 = vmatprep.subr.bf16.mxu0 %v6790_v0  ;;  %6371 = vmatprep.subr.bf16.mxu1 %v6790_v0 }
  0x3a   :  { %1707 = vmatpush1.bf16.msra.mxu0 %v6404_v16  ;;  %6387 = vmatpush1.bf16.msra.mxu1 %v6404_v16  ;;  %v6477_v16 = vld [vmem:[%s8815_s0 + $0x170] ss:$8 sps:$4 sm:$0xff]  }
  0x3b   :  { %1708 = vmatprep.subr.bf16.mxu0 %v6790_v0  ;;  %6372 = vmatprep.subr.bf16.mxu1 %v6790_v0  ;;  %v6465_v0 = vld [vmem:[%s8815_s0 + $0x130] ss:$8 sps:$4 sm:$0xff]  }
  0x3e   :  { %1709 = vmatpush1.bf16.msra.mxu0 %v6405_v17  ;;  %6388 = vmatpush1.bf16.msra.mxu1 %v6405_v17  ;;  %v6478_v17 = vld [vmem:[%s8815_s0 + $0x184] ss:$8 sps:$4 sm:$0xff]  }
  0x41   :  { %1711 = vmatmul.mubr.bf16.vlgmr.msra.gmra.mrb[0].mxu0 %v6406_v18  ;;  %2223 = vmatmul.mubr.bf16.vlgmr.msra.gmra.mrb[0].mxu1 %v6502_v51  ;;  %v6550_v18 = vld [vmem:[%s8815_s0 + $0x484] ss:$8 sps:$4 sm:$0xff]   ;;  %v6493_v51 = vld [vmem:[%s8815_s0 + $0x1d4] ss:$8 sps:$4 sm:$0xff]  }
  0x42   :  { %1718 = vmatprep.mubr.bf16.mxu0 %v6409_v19  ;;  %2230 = vmatprep.mubr.bf16.mxu1 %v6508_v54  ;;  %v6552_v19 = vld [vmem:[%s8815_s0 + $0x480] ss:$8 sps:$4 sm:$0xff]  }
  0x49   :  { %1719 = vmatmul.mubr.bf16.gmra.mrb[4].mxu0 %v6411_v20  ;;  %2231 = vmatmul.mubr.bf16.gmra.mrb[4].mxu1 %v6510_v55  ;;  %v6480_v20 = vld [vmem:[%s8815_s0 + $0x180] ss:$8 sps:$4 sm:$0xff]  }
  0x4a   :  { %1726 = vmatprep.mubr.bf16.mxu0 %v6412_v21  ;;  %2238 = vmatprep.mubr.bf16.mxu1 %v6514_v58  ;;  %v6481_v21 = vld [vmem:[%s8815_s0 + $0x194] ss:$8 sps:$4 sm:$0xff]  }
  0x4b   :  { %v6580_v58 = vld [vmem:[%s8815_s0 + $0x4d4] ss:$8 sps:$4 sm:$0xff]  }
  0x51   :  { %1727 = vmatmul.mubr.bf16.gmra.mrb[8].mxu0 %v6414_v22  ;;  %2239 = vmatmul.mubr.bf16.gmra.mrb[8].mxu1 %v6516_v59  ;;  %v6556_v22 = vld [vmem:[%s8815_s0 + $0x494] ss:$8 sps:$4 sm:$0xff]  }
  0x52   :  { %1734 = vmatprep.mubr.bf16.mxu0 %v6415_v23  ;;  %2246 = vmatprep.mubr.bf16.mxu1 %v6520_v62  ;;  %v6558_v23 = vld [vmem:[%s8815_s0 + $0x490] ss:$8 sps:$4 sm:$0xff]  }
  0x59   :  { %1735 = vmatmul.mubr.bf16.gmra.mrb[12].mxu0 %v6417_v24  ;;  %2247 = vmatmul.mubr.bf16.gmra.mrb[12].mxu1 %v6522_v63  ;;  %v6483_v24 = vld [vmem:[%s8815_s0 + $0x190] ss:$8 sps:$4 sm:$0xff]  }
  0x5a   :  { %1742 = vmatprep.mubr.bf16.mxu0 %v6418_v25  ;;  %2254 = vmatprep.mubr.bf16.mxu1 %v6526_v2  ;;  %v6484_v25 = vld [vmem:[%s8815_s0 + $0x1a4] ss:$8 sps:$4 sm:$0xff]  }
  0x5b   :  { %v6496_v2 = vld [vmem:[%s8815_s0 + $0x1e4] ss:$8 sps:$4 sm:$0xff]  }
  0x61   :  { %1743 = vmatmul.mubr.bf16.gmra.mrb[16].mxu0 %v6420_v26  ;;  %2255 = vmatmul.mubr.bf16.gmra.mrb[16].mxu1 %v6528_v3  ;;  %v6562_v26 = vld [vmem:[%s8815_s0 + $0x4a4] ss:$8 sps:$4 sm:$0xff]  }
  0x62   :  { %1750 = vmatprep.mubr.bf16.mxu0 %v6421_v27  ;;  %2262 = vmatprep.mubr.bf16.mxu1 %v6532_v6  ;;  %v6564_v27 = vld [vmem:[%s8815_s0 + $0x4a0] ss:$8 sps:$4 sm:$0xff]  }
  0x69   :  { %1751 = vmatmul.mubr.bf16.gmra.mrb[20].mxu0 %v6423_v28  ;;  %2263 = vmatmul.mubr.bf16.gmra.mrb[20].mxu1 %v6534_v7  ;;  %v6486_v28 = vld [vmem:[%s8815_s0 + $0x1a0] ss:$8 sps:$4 sm:$0xff]  }
  0x6a   :  { %1758 = vmatprep.mubr.bf16.mxu0 %v6424_v29  ;;  %2270 = vmatprep.mubr.bf16.mxu1 %v6538_v10  ;;  %v6487_v29 = vld [vmem:[%s8815_s0 + $0x1b4] ss:$8 sps:$4 sm:$0xff]  }
  0x71   :  { %1759 = vmatmul.mubr.bf16.gmra.mrb[24].mxu0 %v6426_v30  ;;  %2271 = vmatmul.mubr.bf16.gmra.mrb[24].mxu1 %v6540_v11  ;;  %v6568_v30 = vld [vmem:[%s8815_s0 + $0x4b4] ss:$8 sps:$4 sm:$0xff]   ;;  %v6588_v11 = vld [vmem:[%s8815_s0 + $0x4e0] ss:$8 sps:$4 sm:$0xff]  }
  0x72   :  { %1766 = vmatprep.mubr.bf16.mxu0 %v6427_v31  ;;  %2278 = vmatprep.mubr.bf16.mxu1 %v6544_v14 }
  0x79   :  { %1767 = vmatmul.mubr.bf16.gmra.mrb[28].mxu0 %v6429_v32  ;;  %2279 = vmatmul.mubr.bf16.gmra.mrb[28].mxu1 %v6546_v15  ;;  %v6570_v32 = vld [vmem:[%s8815_s0 + $0x4b0] ss:$8 sps:$4 sm:$0xff]   ;;  %v6498_v15 = vld [vmem:[%s8815_s0 + $0x1e0] ss:$8 sps:$4 sm:$0xff]  }
  0x7a   :  { %1774 = vmatprep.mubr.bf16.mxu0 %v6430_v33  ;;  %2286 = vmatprep.mubr.bf16.mxu1 %v6550_v18 }
  0x81   :  { %1775 = vmatmul.mubr.bf16.gmra.mrb[32].mxu0 %v6432_v34  ;;  %2287 = vmatmul.mubr.bf16.gmra.mrb[32].mxu1 %v6552_v19  ;;  %v6489_v34 = vld [vmem:[%s8815_s0 + $0x1b0] ss:$8 sps:$4 sm:$0xff]  }
  0x82   :  { %1782 = vmatprep.mubr.bf16.mxu0 %v6433_v35  ;;  %2294 = vmatprep.mubr.bf16.mxu1 %v6556_v22 }
  0x89   :  { %1783 = vmatmul.mubr.bf16.gmra.mrb[36].mxu0 %v6435_v36  ;;  %2295 = vmatmul.mubr.bf16.gmra.mrb[36].mxu1 %v6558_v23  ;;  %v6490_v36 = vld [vmem:[%s8815_s0 + $0x1c4] ss:$8 sps:$4 sm:$0xff]  }
  0x8a   :  { %1790 = vmatprep.mubr.bf16.mxu0 %v6436_v37  ;;  %2302 = vmatprep.mubr.bf16.mxu1 %v6562_v26  ;;  %v6594_v26 = vld [vmem:[%s8815_s0 + $0x4f0] ss:$8 sps:$4 sm:$0xff]  }
  0x91   :  { %1791 = vmatmul.mubr.bf16.gmra.mrb[40].mxu0 %v6438_v38  ;;  %2303 = vmatmul.mubr.bf16.gmra.mrb[40].mxu1 %v6564_v27 }
  0x92   :  { %1798 = vmatprep.mubr.bf16.mxu0 %v6439_v39  ;;  %2310 = vmatprep.mubr.bf16.mxu1 %v6568_v30  ;;  %v6501_v30 = vld [vmem:[%s8815_s0 + $0x1f0] ss:$8 sps:$4 sm:$0xff]  }
  0x99   :  { %1799 = vmatmul.mubr.bf16.gmra.mrb[44].mxu0 %v6441_v40  ;;  %2311 = vmatmul.mubr.bf16.gmra.mrb[44].mxu1 %v6570_v32  ;;  %v6505_v32 = vld [vmem:[%s8815_s0 + $0x204] ss:$8 sps:$4 sm:$0xff]  }
  0x9a   :  { %1806 = vmatprep.mubr.bf16.mxu0 %v6442_v41 }
  0xa1   :  { %1807 = vmatmul.mubr.bf16.gmra.mrb[48].mxu0 %v6444_v42 }
  0xa2   :  { %1814 = vmatprep.mubr.bf16.mxu0 %v6445_v43  ;;  %v6574_v43 = vld [vmem:[%s8815_s0 + $0x4c4] ss:$8 sps:$4 sm:$0xff]  }
  0xa3   :  { %2318 = vmatprep.mubr.bf16.mxu1 %v6574_v43 }
  0xa9   :  { %1815 = vmatmul.mubr.bf16.gmra.mrb[52].mxu0 %v6447_v44 }
  0xaa   :  { %1822 = vmatprep.mubr.bf16.mxu0 %v6448_v45  ;;  %v6576_v45 = vld [vmem:[%s8815_s0 + $0x4c0] ss:$8 sps:$4 sm:$0xff]  }
  0xab   :  { %2319 = vmatmul.mubr.bf16.gmra.mrb[48].mxu1 %v6576_v45  ;;  %v6507_v45 = vld [vmem:[%s8815_s0 + $0x200] ss:$8 sps:$4 sm:$0xff]  }
  0xac   :  { %2326 = vmatprep.mubr.bf16.mxu1 %v6580_v58 }
  0xb1   :  { %1823 = vmatmul.mubr.bf16.gmra.mrb[56].mxu0 %v6450_v46 }
  0xb2   :  { %1830 = vmatprep.mubr.bf16.mxu0 %v6451_v47 }
  0xb9   :  { %1831 = vmatmul.mubr.bf16.gmra.mrb[60].mxu0 %v6453_v48 }
  0xba   :  { %1838 = vmatprep.mubr.bf16.mxu0 %v6454_v49  ;;  %v6492_v49 = vld [vmem:[%s8815_s0 + $0x1c0] ss:$8 sps:$4 sm:$0xff]  }
  0xc1   :  { %1839 = vmatmul.mubr.bf16.gmra.mrb[64].mxu0 %v6456_v52 }
  0xc2   :  { %1846 = vmatprep.mubr.bf16.mxu0 %v6457_v53 }
  0xc9   :  { %1847 = vmatmul.mubr.bf16.gmra.mrb[68].mxu0 %v6459_v56 }
  0xca   :  { %1854 = vmatprep.mubr.bf16.mxu0 %v6460_v57 }
  0xd1   :  { %1855 = vmatmul.mubr.bf16.gmra.mrb[72].mxu0 %v6462_v60  ;;  %v6582_v60 = vld [vmem:[%s8815_s0 + $0x4d0] ss:$8 sps:$4 sm:$0xff]  }
  0xd2   :  { %1862 = vmatprep.mubr.bf16.mxu0 %v6463_v61  ;;  %2327 = vmatmul.mubr.bf16.gmra.mrb[52].mxu1 %v6582_v60  ;;  %v6513_v60 = vld [vmem:[%s8815_s0 + $0x210] ss:$8 sps:$4 sm:$0xff]  }
  0xd9   :  { %1863 = vmatmul.mubr.bf16.gmra.mrb[76].mxu0 %v6465_v0  ;;  %v6495_v0 = vld [vmem:[%s8815_s0 + $0x1d0] ss:$8 sps:$4 sm:$0xff]  }
  0xda   :  { %1870 = vmatprep.mubr.bf16.mxu0 %v6466_v1 }
  0xe1   :  { %1871 = vmatmul.mubr.bf16.gmra.mrb[80].mxu0 %v6468_v4 }
  0xe2   :  { %1878 = vmatprep.mubr.bf16.mxu0 %v6469_v5 }
  0xe9   :  { %1879 = vmatmul.mubr.bf16.gmra.mrb[84].mxu0 %v6471_v8 }
  0xea   :  { %1886 = vmatprep.mubr.bf16.mxu0 %v6472_v9  ;;  %v6586_v9 = vld [vmem:[%s8815_s0 + $0x4e4] ss:$8 sps:$4 sm:$0xff]  }
  0xeb   :  { %2334 = vmatprep.mubr.bf16.mxu1 %v6586_v9 }
  0xec   :  { %2335 = vmatmul.mubr.bf16.gmra.mrb[56].mxu1 %v6588_v11  ;;  %v6519_v11 = vld [vmem:[%s8815_s0 + $0x220] ss:$8 sps:$4 sm:$0xff]  }
  0xf1   :  { %1887 = vmatmul.mubr.bf16.gmra.mrb[88].mxu0 %v6474_v12 }
  0xf2   :  { %1894 = vmatprep.mubr.bf16.mxu0 %v6475_v13 }
  0xf9   :  { %1895 = vmatmul.mubr.bf16.gmra.mrb[92].mxu0 %v6477_v16 }
  0xfa   :  { %1902 = vmatprep.mubr.bf16.mxu0 %v6478_v17  ;;  %v6499_v17 = vld [vmem:[%s8815_s0 + $0x1f4] ss:$8 sps:$4 sm:$0xff]  }
 0x101   :  { %1903 = vmatmul.mubr.bf16.gmra.mrb[96].mxu0 %v6480_v20 }
 0x102   :  { %1910 = vmatprep.mubr.bf16.mxu0 %v6481_v21 }
 0x109   :  { %1911 = vmatmul.mubr.bf16.gmra.mrb[100].mxu0 %v6483_v24  ;;  %v6592_v24 = vld [vmem:[%s8815_s0 + $0x4f4] ss:$8 sps:$4 sm:$0xff]  }
 0x10a   :  { %1918 = vmatprep.mubr.bf16.mxu0 %v6484_v25  ;;  %2342 = vmatprep.mubr.bf16.mxu1 %v6592_v24 }
 0x10b   :  { %2343 = vmatmul.mubr.bf16.gmra.mrb[60].mxu1 %v6594_v26  ;;  %v6525_v26 = vld [vmem:[%s8815_s0 + $0x230] ss:$8 sps:$4 sm:$0xff]  }
 0x111   :  { %1919 = vmatmul.mubr.bf16.gmra.mrb[104].mxu0 %v6486_v28 }
 0x112   :  { %1926 = vmatprep.mubr.bf16.mxu0 %v6487_v29 }
 0x114   :  { %v1712_v31 = vpop.f32.mrb[0].mxu0 }
 0x115   :  { %v1714_v33 = vpop.f32.mrb[1].mxu0  ;;  %v2996_v37 = vmul.f32 %v1712_v31, %v1712_v31 }
 0x116   :  { %v1715_v35 = vpop.f32.mrb[2].mxu0 }
 0x117   :  { %v2735_v38 = vadd.f32 %v1715_v35, %v1712_v31  ;;  %v2997_v39 = vmul.f32 %v1715_v35, %v1715_v35  ;;  %v5593_v40 = vpack.c.bf16 %v1715_v35, %v1712_v31  ;;  %v1717_v41 = vpop.f32.mrb[3].mxu0 }
 0x118   :  { %v6600_v41 = vld [vmem:[%s8815_s0 + $0x500] ss:$8 sps:$4 sm:$0xff]  }
 0x119   :  { %v3252_v42 = vadd.f32 %v2997_v39, %v2996_v37  ;;  %5594 = vst [vmem:[%s8816_s2] sm:$0xff] %v5593_v40   ;;  %1927 = vmatmul.mubr.bf16.gmra.mrb[108].mxu0 %v6489_v34  ;;  %v6598_v39 = vld [vmem:[%s8815_s0 + $0x504] ss:$8 sps:$4 sm:$0xff]  }
 0x11a   :  { %1934 = vmatprep.mubr.bf16.mxu0 %v6490_v36  ;;  %2350 = vmatprep.mubr.bf16.mxu1 %v6598_v39 }
 0x11b   :  { %2351 = vmatmul.mubr.bf16.gmra.mrb[64].mxu1 %v6600_v41  ;;  %v6531_v41 = vld [vmem:[%s8815_s0 + $0x240] ss:$8 sps:$4 sm:$0xff]  }
 0x11c   :  { %v1720_v44 = vpop.f32.mrb[4].mxu0 }
 0x11d   :  { %v2736_v46 = vadd.f32 %v2735_v38, %v1720_v44  ;;  %v2998_v47 = vmul.f32 %v1720_v44, %v1720_v44  ;;  %v1722_v48 = vpop.f32.mrb[5].mxu0 }
 0x11e   :  { %v1723_v50 = vpop.f32.mrb[6].mxu0 }
 0x11f   :  { %v3253_v52 = vadd.f32 %v3252_v42, %v2998_v47  ;;  %v2737_v53 = vadd.f32 %v2736_v46, %v1723_v50  ;;  %v2999_v54 = vmul.f32 %v1723_v50, %v1723_v50  ;;  %v5598_v55 = vpack.c.bf16 %v1723_v50, %v1720_v44  ;;  %v1725_v56 = vpop.f32.mrb[7].mxu0  ;;  %v6511_v47 = vld [vmem:[%s8815_s0 + $0x214] ss:$8 sps:$4 sm:$0xff]  }
 0x120   :  { %v6606_v56 = vld [vmem:[%s8815_s0 + $0x510] ss:$8 sps:$4 sm:$0xff]  }
 0x121   :  { %v3254_v57 = vadd.f32 %v3253_v52, %v2999_v54  ;;  %6230 = vst [vmem:[%s8816_s2 + $0x8] sm:$0xff] %v5598_v55   ;;  %1935 = vmatmul.mubr.bf16.gmra.mrb[112].mxu0 %v6492_v49  ;;  %v6604_v54 = vld [vmem:[%s8815_s0 + $0x514] ss:$8 sps:$4 sm:$0xff]  }
 0x122   :  { %1942 = vmatprep.mubr.bf16.mxu0 %v6493_v51  ;;  %2358 = vmatprep.mubr.bf16.mxu1 %v6604_v54 }
 0x123   :  { %2359 = vmatmul.mubr.bf16.gmra.mrb[68].mxu1 %v6606_v56  ;;  %v6537_v56 = vld [vmem:[%s8815_s0 + $0x250] ss:$8 sps:$4 sm:$0xff]  }
 0x124   :  { %v1728_v59 = vpop.f32.mrb[8].mxu0 }
 0x125   :  { %v2738_v61 = vadd.f32 %v2737_v53, %v1728_v59  ;;  %v3000_v62 = vmul.f32 %v1728_v59, %v1728_v59  ;;  %v1730_v63 = vpop.f32.mrb[9].mxu0 }
 0x126   :  { %v1731_v1 = vpop.f32.mrb[10].mxu0 }
 0x127   :  { %v3255_v3 = vadd.f32 %v3254_v57, %v3000_v62  ;;  %v2739_v4 = vadd.f32 %v2738_v61, %v1731_v1  ;;  %v3001_v5 = vmul.f32 %v1731_v1, %v1731_v1  ;;  %v5603_v6 = vpack.c.bf16 %v1731_v1, %v1728_v59  ;;  %v1733_v7 = vpop.f32.mrb[11].mxu0  ;;  %v6517_v62 = vld [vmem:[%s8815_s0 + $0x224] ss:$8 sps:$4 sm:$0xff]  }
 0x128   :  { %v6612_v7 = vld [vmem:[%s8815_s0 + $0x520] ss:$8 sps:$4 sm:$0xff]  }
 0x129   :  { %v3256_v8 = vadd.f32 %v3255_v3, %v3001_v5  ;;  %6231 = vst [vmem:[%s8816_s2 + $0x10] sm:$0xff] %v5603_v6   ;;  %1943 = vmatmul.mubr.bf16.gmra.mrb[116].mxu0 %v6495_v0  ;;  %v6610_v5 = vld [vmem:[%s8815_s0 + $0x524] ss:$8 sps:$4 sm:$0xff]  }
 0x12a   :  { %1950 = vmatprep.mubr.bf16.mxu0 %v6496_v2  ;;  %2366 = vmatprep.mubr.bf16.mxu1 %v6610_v5 }
 0x12b   :  { %2367 = vmatmul.mubr.bf16.gmra.mrb[72].mxu1 %v6612_v7  ;;  %v6543_v7 = vld [vmem:[%s8815_s0 + $0x260] ss:$8 sps:$4 sm:$0xff]  }
 0x12c   :  { %v1736_v10 = vpop.f32.mrb[12].mxu0 }
 0x12d   :  { %v2740_v12 = vadd.f32 %v2739_v4, %v1736_v10  ;;  %v3002_v13 = vmul.f32 %v1736_v10, %v1736_v10  ;;  %v1738_v14 = vpop.f32.mrb[13].mxu0 }
 0x12e   :  { %v1739_v16 = vpop.f32.mrb[14].mxu0 }
 0x12f   :  { %v3257_v18 = vadd.f32 %v3256_v8, %v3002_v13  ;;  %v2741_v19 = vadd.f32 %v2740_v12, %v1739_v16  ;;  %v3003_v20 = vmul.f32 %v1739_v16, %v1739_v16  ;;  %v5608_v21 = vpack.c.bf16 %v1739_v16, %v1736_v10  ;;  %v1741_v22 = vpop.f32.mrb[15].mxu0  ;;  %v6523_v13 = vld [vmem:[%s8815_s0 + $0x234] ss:$8 sps:$4 sm:$0xff]  }
 0x130   :  { %v6618_v22 = vld [vmem:[%s8815_s0 + $0x530] ss:$8 sps:$4 sm:$0xff]  }
 0x131   :  { %v3258_v23 = vadd.f32 %v3257_v18, %v3003_v20  ;;  %6232 = vst [vmem:[%s8816_s2 + $0x18] sm:$0xff] %v5608_v21   ;;  %1951 = vmatmul.mubr.bf16.gmra.mrb[120].mxu0 %v6498_v15  ;;  %v6616_v20 = vld [vmem:[%s8815_s0 + $0x534] ss:$8 sps:$4 sm:$0xff]  }
 0x132   :  { %1958 = vmatprep.mubr.bf16.mxu0 %v6499_v17  ;;  %2374 = vmatprep.mubr.bf16.mxu1 %v6616_v20 }
 0x133   :  { %2375 = vmatmul.mubr.bf16.gmra.mrb[76].mxu1 %v6618_v22  ;;  %v6549_v22 = vld [vmem:[%s8815_s0 + $0x270] ss:$8 sps:$4 sm:$0xff]  }
 0x134   :  { %v1744_v25 = vpop.f32.mrb[16].mxu0 }
 0x135   :  { %v2742_v27 = vadd.f32 %v2741_v19, %v1744_v25  ;;  %v3004_v28 = vmul.f32 %v1744_v25, %v1744_v25  ;;  %v1746_v29 = vpop.f32.mrb[17].mxu0 }
 0x136   :  { %v1747_v31 = vpop.f32.mrb[18].mxu0 }
 0x137   :  { %v3259_v33 = vadd.f32 %v3258_v23, %v3004_v28  ;;  %v2743_v34 = vadd.f32 %v2742_v27, %v1747_v31  ;;  %v3005_v35 = vmul.f32 %v1747_v31, %v1747_v31  ;;  %v5613_v36 = vpack.c.bf16 %v1747_v31, %v1744_v25  ;;  %v1749_v37 = vpop.f32.mrb[19].mxu0  ;;  %v6529_v28 = vld [vmem:[%s8815_s0 + $0x244] ss:$8 sps:$4 sm:$0xff]  }
 0x138   :  { %v6624_v37 = vld [vmem:[%s8815_s0 + $0x540] ss:$8 sps:$4 sm:$0xff]  }
 0x139   :  { %v3260_v38 = vadd.f32 %v3259_v33, %v3005_v35  ;;  %6233 = vst [vmem:[%s8816_s2 + $0x20] sm:$0xff] %v5613_v36   ;;  %1959 = vmatmul.mubr.bf16.gmra.mrb[124].mxu0 %v6501_v30  ;;  %v6622_v35 = vld [vmem:[%s8815_s0 + $0x544] ss:$8 sps:$4 sm:$0xff]  }
 0x13a   :  { %1966 = vmatprep.mubr.bf16.mxu0 %v6505_v32  ;;  %2382 = vmatprep.mubr.bf16.mxu1 %v6622_v35 }
 0x13b   :  { %2383 = vmatmul.mubr.bf16.gmra.mrb[80].mxu1 %v6624_v37  ;;  %v6555_v37 = vld [vmem:[%s8815_s0 + $0x280] ss:$8 sps:$4 sm:$0xff]  }
 0x13c   :  { %v1752_v40 = vpop.f32.mrb[20].mxu0 }
 0x13d   :  { %v2744_v42 = vadd.f32 %v2743_v34, %v1752_v40  ;;  %v3006_v43 = vmul.f32 %v1752_v40, %v1752_v40  ;;  %v1754_v44 = vpop.f32.mrb[21].mxu0 }
 0x13e   :  { %v1755_v46 = vpop.f32.mrb[22].mxu0 }
 0x13f   :  { %v3261_v48 = vadd.f32 %v3260_v38, %v3006_v43  ;;  %v2745_v49 = vadd.f32 %v2744_v42, %v1755_v46  ;;  %v3007_v50 = vmul.f32 %v1755_v46, %v1755_v46  ;;  %v5618_v51 = vpack.c.bf16 %v1755_v46, %v1752_v40  ;;  %v1757_v52 = vpop.f32.mrb[23].mxu0  ;;  %v6535_v43 = vld [vmem:[%s8815_s0 + $0x254] ss:$8 sps:$4 sm:$0xff]  }
 0x140   :  { %v6630_v52 = vld [vmem:[%s8815_s0 + $0x550] ss:$8 sps:$4 sm:$0xff]  }
 0x141   :  { %v3262_v53 = vadd.f32 %v3261_v48, %v3007_v50  ;;  %6234 = vst [vmem:[%s8816_s2 + $0x28] sm:$0xff] %v5618_v51   ;;  %1967 = vmatmul.mubr.bf16.gmra.mrb[128].mxu0 %v6507_v45  ;;  %v6628_v50 = vld [vmem:[%s8815_s0 + $0x554] ss:$8 sps:$4 sm:$0xff]  }
 0x142   :  { %1974 = vmatprep.mubr.bf16.mxu0 %v6511_v47  ;;  %2390 = vmatprep.mubr.bf16.mxu1 %v6628_v50 }
 0x143   :  { %2391 = vmatmul.mubr.bf16.gmra.mrb[84].mxu1 %v6630_v52  ;;  %v6561_v52 = vld [vmem:[%s8815_s0 + $0x290] ss:$8 sps:$4 sm:$0xff]  }
 0x144   :  { %v1760_v55 = vpop.f32.mrb[24].mxu0 }
 0x145   :  { %v2746_v57 = vadd.f32 %v2745_v49, %v1760_v55  ;;  %v3008_v58 = vmul.f32 %v1760_v55, %v1760_v55  ;;  %v1762_v59 = vpop.f32.mrb[25].mxu0 }
 0x146   :  { %v1763_v61 = vpop.f32.mrb[26].mxu0 }
 0x147   :  { %v3263_v63 = vadd.f32 %v3262_v53, %v3008_v58  ;;  %v2747_v0 = vadd.f32 %v2746_v57, %v1763_v61  ;;  %v3009_v1 = vmul.f32 %v1763_v61, %v1763_v61  ;;  %v5623_v2 = vpack.c.bf16 %v1763_v61, %v1760_v55  ;;  %v1765_v3 = vpop.f32.mrb[27].mxu0  ;;  %v6541_v58 = vld [vmem:[%s8815_s0 + $0x264] ss:$8 sps:$4 sm:$0xff]  }
 0x148   :  { %v6636_v3 = vld [vmem:[%s8815_s0 + $0x560] ss:$8 sps:$4 sm:$0xff]  }
 0x149   :  { %v3264_v4 = vadd.f32 %v3263_v63, %v3009_v1  ;;  %6235 = vst [vmem:[%s8816_s2 + $0x30] sm:$0xff] %v5623_v2   ;;  %1975 = vmatmul.mubr.bf16.gmra.mrb[132].mxu0 %v6513_v60  ;;  %v6634_v1 = vld [vmem:[%s8815_s0 + $0x564] ss:$8 sps:$4 sm:$0xff]  }
 0x14a   :  { %1982 = vmatprep.mubr.bf16.mxu0 %v6517_v62  ;;  %2398 = vmatprep.mubr.bf16.mxu1 %v6634_v1 }
 0x14b   :  { %2399 = vmatmul.mubr.bf16.gmra.mrb[88].mxu1 %v6636_v3  ;;  %v6567_v3 = vld [vmem:[%s8815_s0 + $0x2a0] ss:$8 sps:$4 sm:$0xff]  }
 0x14c   :  { %v1768_v6 = vpop.f32.mrb[28].mxu0 }
 0x14d   :  { %v2748_v8 = vadd.f32 %v2747_v0, %v1768_v6  ;;  %v3010_v9 = vmul.f32 %v1768_v6, %v1768_v6  ;;  %v1770_v10 = vpop.f32.mrb[29].mxu0 }
 0x14e   :  { %v1771_v12 = vpop.f32.mrb[30].mxu0 }
 0x14f   :  { %v3265_v14 = vadd.f32 %v3264_v4, %v3010_v9  ;;  %v2749_v15 = vadd.f32 %v2748_v8, %v1771_v12  ;;  %v3011_v16 = vmul.f32 %v1771_v12, %v1771_v12  ;;  %v5628_v17 = vpack.c.bf16 %v1771_v12, %v1768_v6  ;;  %v1773_v18 = vpop.f32.mrb[31].mxu0  ;;  %v6547_v9 = vld [vmem:[%s8815_s0 + $0x274] ss:$8 sps:$4 sm:$0xff]  }
 0x150   :  { %v6642_v18 = vld [vmem:[%s8815_s0 + $0x570] ss:$8 sps:$4 sm:$0xff]  }
 0x151   :  { %v3266_v19 = vadd.f32 %v3265_v14, %v3011_v16  ;;  %6236 = vst [vmem:[%s8816_s2 + $0x38] sm:$0xff] %v5628_v17   ;;  %1983 = vmatmul.mubr.bf16.gmra.mrb[136].mxu0 %v6519_v11  ;;  %v6640_v16 = vld [vmem:[%s8815_s0 + $0x574] ss:$8 sps:$4 sm:$0xff]  }
 0x152   :  { %1990 = vmatprep.mubr.bf16.mxu0 %v6523_v13  ;;  %2406 = vmatprep.mubr.bf16.mxu1 %v6640_v16 }
 0x153   :  { %2407 = vmatmul.mubr.bf16.gmra.mrb[92].mxu1 %v6642_v18 }
 0x154   :  { %v1776_v21 = vpop.f32.mrb[32].mxu0 }
 0x155   :  { %v2750_v23 = vadd.f32 %v2749_v15, %v1776_v21  ;;  %v3012_v24 = vmul.f32 %v1776_v21, %v1776_v21  ;;  %v1778_v25 = vpop.f32.mrb[33].mxu0 }
 0x156   :  { %v1779_v27 = vpop.f32.mrb[34].mxu0 }
 0x157   :  { %v3267_v29 = vadd.f32 %v3266_v19, %v3012_v24  ;;  %v2751_v30 = vadd.f32 %v2750_v23, %v1779_v27  ;;  %v3013_v31 = vmul.f32 %v1779_v27, %v1779_v27  ;;  %v5633_v32 = vpack.c.bf16 %v1779_v27, %v1776_v21  ;;  %v1781_v33 = vpop.f32.mrb[35].mxu0  ;;  %v6553_v24 = vld [vmem:[%s8815_s0 + $0x284] ss:$8 sps:$4 sm:$0xff]  }
 0x158   :  { %v6648_v33 = vld [vmem:[%s8815_s0 + $0x580] ss:$8 sps:$4 sm:$0xff]  }
 0x159   :  { %v3268_v34 = vadd.f32 %v3267_v29, %v3013_v31  ;;  %6237 = vst [vmem:[%s8816_s2 + $0x40] sm:$0xff] %v5633_v32   ;;  %1991 = vmatmul.mubr.bf16.gmra.mrb[140].mxu0 %v6525_v26  ;;  %v6646_v31 = vld [vmem:[%s8815_s0 + $0x584] ss:$8 sps:$4 sm:$0xff]  }
 0x15a   :  { %1998 = vmatprep.mubr.bf16.mxu0 %v6529_v28  ;;  %2414 = vmatprep.mubr.bf16.mxu1 %v6646_v31 }
 0x15b   :  { %2415 = vmatmul.mubr.bf16.gmra.mrb[96].mxu1 %v6648_v33 }
 0x15c   :  { %v1784_v36 = vpop.f32.mrb[36].mxu0 }
 0x15d   :  { %v2752_v38 = vadd.f32 %v2751_v30, %v1784_v36  ;;  %v3014_v39 = vmul.f32 %v1784_v36, %v1784_v36  ;;  %v1786_v40 = vpop.f32.mrb[37].mxu0 }
 0x15e   :  { %v1787_v42 = vpop.f32.mrb[38].mxu0 }
 0x15f   :  { %v3269_v44 = vadd.f32 %v3268_v34, %v3014_v39  ;;  %v2753_v45 = vadd.f32 %v2752_v38, %v1787_v42  ;;  %v3015_v46 = vmul.f32 %v1787_v42, %v1787_v42  ;;  %v5638_v47 = vpack.c.bf16 %v1787_v42, %v1784_v36  ;;  %v1789_v48 = vpop.f32.mrb[39].mxu0  ;;  %v6559_v39 = vld [vmem:[%s8815_s0 + $0x294] ss:$8 sps:$4 sm:$0xff]  }
 0x160   :  { %v6654_v48 = vld [vmem:[%s8815_s0 + $0x590] ss:$8 sps:$4 sm:$0xff]  }
 0x161   :  { %v3270_v49 = vadd.f32 %v3269_v44, %v3015_v46  ;;  %6238 = vst [vmem:[%s8816_s2 + $0x48] sm:$0xff] %v5638_v47   ;;  %1999 = vmatmul.mubr.bf16.gmra.mrb[144].mxu0 %v6531_v41  ;;  %v6652_v46 = vld [vmem:[%s8815_s0 + $0x594] ss:$8 sps:$4 sm:$0xff]  }
 0x162   :  { %2006 = vmatprep.mubr.bf16.mxu0 %v6535_v43  ;;  %2422 = vmatprep.mubr.bf16.mxu1 %v6652_v46 }
 0x163   :  { %2423 = vmatmul.mubr.bf16.gmra.mrb[100].mxu1 %v6654_v48 }
 0x164   :  { %v1792_v51 = vpop.f32.mrb[40].mxu0 }
 0x165   :  { %v2754_v53 = vadd.f32 %v2753_v45, %v1792_v51  ;;  %v3016_v54 = vmul.f32 %v1792_v51, %v1792_v51  ;;  %v1794_v55 = vpop.f32.mrb[41].mxu0 }
 0x166   :  { %v1795_v57 = vpop.f32.mrb[42].mxu0 }
 0x167   :  { %v3271_v59 = vadd.f32 %v3270_v49, %v3016_v54  ;;  %v2755_v60 = vadd.f32 %v2754_v53, %v1795_v57  ;;  %v3017_v61 = vmul.f32 %v1795_v57, %v1795_v57  ;;  %v5643_v62 = vpack.c.bf16 %v1795_v57, %v1792_v51  ;;  %v1797_v63 = vpop.f32.mrb[43].mxu0  ;;  %v6565_v54 = vld [vmem:[%s8815_s0 + $0x2a4] ss:$8 sps:$4 sm:$0xff]  }
 0x168   :  { %v6660_v63 = vld [vmem:[%s8815_s0 + $0x5a0] ss:$8 sps:$4 sm:$0xff]  }
 0x169   :  { %v3272_v0 = vadd.f32 %v3271_v59, %v3017_v61  ;;  %6239 = vst [vmem:[%s8816_s2 + $0x50] sm:$0xff] %v5643_v62   ;;  %2007 = vmatmul.mubr.bf16.gmra.mrb[148].mxu0 %v6537_v56  ;;  %v6658_v61 = vld [vmem:[%s8815_s0 + $0x5a4] ss:$8 sps:$4 sm:$0xff]  }
 0x16a   :  { %2014 = vmatprep.mubr.bf16.mxu0 %v6541_v58  ;;  %2430 = vmatprep.mubr.bf16.mxu1 %v6658_v61 }
 0x16b   :  { %2431 = vmatmul.mubr.bf16.gmra.mrb[104].mxu1 %v6660_v63  ;;  %v6585_v63 = vld [vmem:[%s8815_s0 + $0x2d0] ss:$8 sps:$4 sm:$0xff]  }
 0x16c   :  { %v1800_v2 = vpop.f32.mrb[44].mxu0 }
 0x16d   :  { %v2756_v4 = vadd.f32 %v2755_v60, %v1800_v2  ;;  %v3018_v5 = vmul.f32 %v1800_v2, %v1800_v2  ;;  %v1802_v6 = vpop.f32.mrb[45].mxu0 }
 0x16e   :  { %v1803_v8 = vpop.f32.mrb[46].mxu0 }
 0x16f   :  { %v3273_v10 = vadd.f32 %v3272_v0, %v3018_v5  ;;  %v2757_v11 = vadd.f32 %v2756_v4, %v1803_v8  ;;  %v3019_v12 = vmul.f32 %v1803_v8, %v1803_v8  ;;  %v5648_v13 = vpack.c.bf16 %v1803_v8, %v1800_v2  ;;  %v1805_v14 = vpop.f32.mrb[47].mxu0  ;;  %v6571_v5 = vld [vmem:[%s8815_s0 + $0x2b4] ss:$8 sps:$4 sm:$0xff]  }
 0x171   :  { %v3274_v15 = vadd.f32 %v3273_v10, %v3019_v12  ;;  %6240 = vst [vmem:[%s8816_s2 + $0x58] sm:$0xff] %v5648_v13   ;;  %2015 = vmatmul.mubr.bf16.gmra.mrb[152].mxu0 %v6543_v7  ;;  %v7362_v12 = vpop.f32.mrb[0].mxu1 }
 0x172   :  { %2022 = vmatprep.mubr.bf16.mxu0 %v6547_v9  ;;  %v2226_v13 = vpop.f32.mrb[1].mxu1 }
 0x173   :  { %v7364_v14 = vpop.f32.mrb[2].mxu1 }
 0x174   :  { %v1808_v17 = vpop.f32.mrb[48].mxu0  ;;  %v2229_v18 = vpop.f32.mrb[3].mxu1 }
 0x175   :  { %v2758_v19 = vadd.f32 %v2757_v11, %v1808_v17  ;;  %v3020_v20 = vmul.f32 %v1808_v17, %v1808_v17  ;;  %v1810_v21 = vpop.f32.mrb[49].mxu0 }
 0x176   :  { %v1811_v23 = vpop.f32.mrb[50].mxu0 }
 0x177   :  { %v3275_v25 = vadd.f32 %v3274_v15, %v3020_v20  ;;  %v2759_v26 = vadd.f32 %v2758_v19, %v1811_v23  ;;  %v3021_v27 = vmul.f32 %v1811_v23, %v1811_v23  ;;  %v5653_v28 = vpack.c.bf16 %v1811_v23, %v1808_v17  ;;  %v1813_v29 = vpop.f32.mrb[51].mxu0  ;;  %v6664_v15 = vld [vmem:[%s8815_s0 + $0x5b4] ss:$8 sps:$4 sm:$0xff]   ;;  %v6666_v19 = vld [vmem:[%s8815_s0 + $0x5b0] ss:$8 sps:$4 sm:$0xff]  }
 0x178   :  { %v5913_v17 = vpack.c.bf16 %v7364_v14, %v7362_v12  ;;  %v6573_v23 = vld [vmem:[%s8815_s0 + $0x2b0] ss:$8 sps:$4 sm:$0xff]   ;;  %2438 = vmatprep.mubr.bf16.mxu1 %v6664_v15 }
 0x179   :  { %v3276_v30 = vadd.f32 %v3275_v25, %v3021_v27  ;;  %6241 = vst [vmem:[%s8816_s2 + $0x60] sm:$0xff] %v5653_v28   ;;  %2023 = vmatmul.mubr.bf16.gmra.mrb[156].mxu0 %v6549_v22  ;;  %v6577_v25 = vld [vmem:[%s8815_s0 + $0x2c4] ss:$8 sps:$4 sm:$0xff]   ;;  %2439 = vmatmul.mubr.bf16.gmra.mrb[108].mxu1 %v6666_v19 }
 0x17a   :  { %2030 = vmatprep.mubr.bf16.mxu0 %v6553_v24  ;;  %6293 = vst [vmem:[%s8816_s2 + $0x200] sm:$0xff] %v5913_v17   ;;  %v6684_v17 = vld [vmem:[%s8815_s0 + $0x5e0] ss:$8 sps:$4 sm:$0xff]  }
 0x17c   :  { %v1816_v32 = vpop.f32.mrb[52].mxu0 }
 0x17d   :  { %v2760_v34 = vadd.f32 %v2759_v26, %v1816_v32  ;;  %v3022_v35 = vmul.f32 %v1816_v32, %v1816_v32  ;;  %v1818_v36 = vpop.f32.mrb[53].mxu0 }
 0x17e   :  { %v1819_v38 = vpop.f32.mrb[54].mxu0 }
 0x17f   :  { %v3277_v40 = vadd.f32 %v3276_v30, %v3022_v35  ;;  %v2761_v41 = vadd.f32 %v2760_v34, %v1819_v38  ;;  %v3023_v42 = vmul.f32 %v1819_v38, %v1819_v38  ;;  %v5658_v43 = vpack.c.bf16 %v1819_v38, %v1816_v32  ;;  %v1821_v44 = vpop.f32.mrb[55].mxu0  ;;  %v7386_v32 = vpop.f32.mrb[4].mxu1  ;;  %v6670_v35 = vld [vmem:[%s8815_s0 + $0x5c4] ss:$8 sps:$4 sm:$0xff]  }
 0x180   :  { %v2234_v33 = vpop.f32.mrb[5].mxu1  ;;  %2446 = vmatprep.mubr.bf16.mxu1 %v6670_v35  ;;  %v6688_v35 = vld [vmem:[%s8815_s0 + $0x5f4] ss:$8 sps:$4 sm:$0xff]  }
 0x181   :  { %v3278_v45 = vadd.f32 %v3277_v40, %v3023_v42  ;;  %6242 = vst [vmem:[%s8816_s2 + $0x68] sm:$0xff] %v5658_v43   ;;  %2031 = vmatmul.mubr.bf16.gmra.mrb[160].mxu0 %v6555_v37  ;;  %v7388_v34 = vpop.f32.mrb[6].mxu1  ;;  %v6579_v43 = vld [vmem:[%s8815_s0 + $0x2c0] ss:$8 sps:$4 sm:$0xff]  }
 0x182   :  { %2038 = vmatprep.mubr.bf16.mxu0 %v6559_v39  ;;  %v5918_v37 = vpack.c.bf16 %v7388_v34, %v7386_v32  ;;  %v2237_v38 = vpop.f32.mrb[7].mxu1  ;;  %v6672_v39 = vld [vmem:[%s8815_s0 + $0x5c0] ss:$8 sps:$4 sm:$0xff]  }
 0x183   :  { %2447 = vmatmul.mubr.bf16.gmra.mrb[112].mxu1 %v6672_v39  ;;  %v6690_v39 = vld [vmem:[%s8815_s0 + $0x5f0] ss:$8 sps:$4 sm:$0xff]  }
 0x184   :  { %v1824_v47 = vpop.f32.mrb[56].mxu0  ;;  %6294 = vst [vmem:[%s8816_s2 + $0x208] sm:$0xff] %v5918_v37  }
 0x185   :  { %v2762_v49 = vadd.f32 %v2761_v41, %v1824_v47  ;;  %v3024_v50 = vmul.f32 %v1824_v47, %v1824_v47  ;;  %v1826_v51 = vpop.f32.mrb[57].mxu0 }
 0x186   :  { %v1827_v53 = vpop.f32.mrb[58].mxu0 }
 0x187   :  { %v3279_v55 = vadd.f32 %v3278_v45, %v3024_v50  ;;  %v2763_v56 = vadd.f32 %v2762_v49, %v1827_v53  ;;  %v3025_v57 = vmul.f32 %v1827_v53, %v1827_v53  ;;  %v5663_v58 = vpack.c.bf16 %v1827_v53, %v1824_v47  ;;  %v1829_v59 = vpop.f32.mrb[59].mxu0  ;;  %v6583_v45 = vld [vmem:[%s8815_s0 + $0x2d4] ss:$8 sps:$4 sm:$0xff]  }
 0x188   :  { %v6678_v59 = vld [vmem:[%s8815_s0 + $0x5d0] ss:$8 sps:$4 sm:$0xff]  }
 0x189   :  { %v3280_v60 = vadd.f32 %v3279_v55, %v3025_v57  ;;  %6243 = vst [vmem:[%s8816_s2 + $0x70] sm:$0xff] %v5663_v58   ;;  %2039 = vmatmul.mubr.bf16.gmra.mrb[164].mxu0 %v6561_v52  ;;  %v7410_v52 = vpop.f32.mrb[8].mxu1  ;;  %v6676_v55 = vld [vmem:[%s8815_s0 + $0x5d4] ss:$8 sps:$4 sm:$0xff]  }
 0x18a   :  { %2046 = vmatprep.mubr.bf16.mxu0 %v6565_v54  ;;  %v2242_v53 = vpop.f32.mrb[9].mxu1  ;;  %2454 = vmatprep.mubr.bf16.mxu1 %v6676_v55 }
 0x18b   :  { %v7412_v54 = vpop.f32.mrb[10].mxu1  ;;  %2455 = vmatmul.mubr.bf16.gmra.mrb[116].mxu1 %v6678_v59 }
 0x18c   :  { %v1832_v62 = vpop.f32.mrb[60].mxu0  ;;  %v5923_v57 = vpack.c.bf16 %v7412_v54, %v7410_v52  ;;  %v2245_v58 = vpop.f32.mrb[11].mxu1 }
 0x18d   :  { %v2764_v0 = vadd.f32 %v2763_v56, %v1832_v62  ;;  %v3026_v1 = vmul.f32 %v1832_v62, %v1832_v62  ;;  %v1834_v2 = vpop.f32.mrb[61].mxu0 }
 0x18e   :  { %v1835_v4 = vpop.f32.mrb[62].mxu0  ;;  %6295 = vst [vmem:[%s8816_s2 + $0x210] sm:$0xff] %v5923_v57   ;;  %v6694_v57 = vld [vmem:[%s8815_s0 + $0x604] ss:$8 sps:$4 sm:$0xff]  }
 0x18f   :  { %v3281_v6 = vadd.f32 %v3280_v60, %v3026_v1  ;;  %v2765_v7 = vadd.f32 %v2764_v0, %v1835_v4  ;;  %v3027_v8 = vmul.f32 %v1835_v4, %v1835_v4  ;;  %v5668_v9 = vpack.c.bf16 %v1835_v4, %v1832_v62  ;;  %v1837_v10 = vpop.f32.mrb[63].mxu0  ;;  %v6589_v1 = vld [vmem:[%s8815_s0 + $0x2e4] ss:$8 sps:$4 sm:$0xff]  }
 0x191   :  { %v3282_v11 = vadd.f32 %v3281_v6, %v3027_v8  ;;  %6244 = vst [vmem:[%s8816_s2 + $0x78] sm:$0xff] %v5668_v9   ;;  %2047 = vmatmul.mubr.bf16.gmra.mrb[168].mxu0 %v6567_v3  ;;  %v7434_v8 = vpop.f32.mrb[12].mxu1 }
 0x192   :  { %2054 = vmatprep.mubr.bf16.mxu0 %v6571_v5  ;;  %v2250_v9 = vpop.f32.mrb[13].mxu1 }
 0x193   :  { %v7436_v10 = vpop.f32.mrb[14].mxu1 }
 0x194   :  { %v1840_v16 = vpop.f32.mrb[64].mxu0  ;;  %v5928_v15 = vpack.c.bf16 %v7436_v10, %v7434_v8 }
 0x195   :  { %v2766_v20 = vadd.f32 %v2765_v7, %v1840_v16  ;;  %v3028_v21 = vmul.f32 %v1840_v16, %v1840_v16  ;;  %v1842_v22 = vpop.f32.mrb[65].mxu0 }
 0x196   :  { %v1843_v24 = vpop.f32.mrb[66].mxu0  ;;  %6296 = vst [vmem:[%s8816_s2 + $0x218] sm:$0xff] %v5928_v15  }
 0x197   :  { %v3283_v26 = vadd.f32 %v3282_v11, %v3028_v21  ;;  %v2767_v27 = vadd.f32 %v2766_v20, %v1843_v24  ;;  %v3029_v28 = vmul.f32 %v1843_v24, %v1843_v24  ;;  %v5673_v29 = vpack.c.bf16 %v1843_v24, %v1840_v16  ;;  %v1845_v30 = vpop.f32.mrb[67].mxu0  ;;  %v6682_v11 = vld [vmem:[%s8815_s0 + $0x5e4] ss:$8 sps:$4 sm:$0xff]   ;;  %v2253_v16 = vpop.f32.mrb[15].mxu1  ;;  %v6591_v21 = vld [vmem:[%s8815_s0 + $0x2e0] ss:$8 sps:$4 sm:$0xff]  }
 0x198   :  { %2462 = vmatprep.mubr.bf16.mxu1 %v6682_v11  ;;  %v7458_v30 = vpop.f32.mrb[16].mxu1 }
 0x199   :  { %v3284_v31 = vadd.f32 %v3283_v26, %v3029_v28  ;;  %6245 = vst [vmem:[%s8816_s2 + $0x80] sm:$0xff] %v5673_v29   ;;  %2055 = vmatmul.mubr.bf16.gmra.mrb[172].mxu0 %v6573_v23  ;;  %v6595_v23 = vld [vmem:[%s8815_s0 + $0x2f4] ss:$8 sps:$4 sm:$0xff]   ;;  %2463 = vmatmul.mubr.bf16.gmra.mrb[120].mxu1 %v6684_v17 }
 0x19a   :  { %2062 = vmatprep.mubr.bf16.mxu0 %v6577_v25  ;;  %2470 = vmatprep.mubr.bf16.mxu1 %v6688_v35  ;;  %v6697_v17 = vld [vmem:[%s8815_s0 + $0x614] ss:$8 sps:$4 sm:$0xff]  }
 0x19c   :  { %v1848_v36 = vpop.f32.mrb[68].mxu0 }
 0x19d   :  { %v2768_v40 = vadd.f32 %v2767_v27, %v1848_v36  ;;  %v3030_v41 = vmul.f32 %v1848_v36, %v1848_v36  ;;  %v1850_v42 = vpop.f32.mrb[69].mxu0 }
 0x19e   :  { %v1851_v44 = vpop.f32.mrb[70].mxu0 }
 0x19f   :  { %v3285_v46 = vadd.f32 %v3284_v31, %v3030_v41  ;;  %v2769_v47 = vadd.f32 %v2768_v40, %v1851_v44  ;;  %v3031_v48 = vmul.f32 %v1851_v44, %v1851_v44  ;;  %v5678_v49 = vpack.c.bf16 %v1851_v44, %v1848_v36  ;;  %v1853_v50 = vpop.f32.mrb[71].mxu0  ;;  %v2258_v31 = vpop.f32.mrb[17].mxu1 }
 0x1a0   :  { %v7460_v33 = vpop.f32.mrb[18].mxu1 }
 0x1a1   :  { %v3286_v51 = vadd.f32 %v3285_v46, %v3031_v48  ;;  %6246 = vst [vmem:[%s8816_s2 + $0x88] sm:$0xff] %v5678_v49   ;;  %2063 = vmatmul.mubr.bf16.gmra.mrb[176].mxu0 %v6579_v43  ;;  %v5933_v37 = vpack.c.bf16 %v7460_v33, %v7458_v30  ;;  %v2261_v38 = vpop.f32.mrb[19].mxu1  ;;  %v6597_v43 = vld [vmem:[%s8815_s0 + $0x2f0] ss:$8 sps:$4 sm:$0xff]   ;;  %2471 = vmatmul.mubr.bf16.gmra.mrb[124].mxu1 %v6690_v39 }
 0x1a2   :  { %2070 = vmatprep.mubr.bf16.mxu0 %v6583_v45  ;;  %v6601_v45 = vld [vmem:[%s8815_s0 + $0x304] ss:$8 sps:$4 sm:$0xff]   ;;  %v7482_v53 = vpop.f32.mrb[20].mxu1  ;;  %2478 = vmatprep.mubr.bf16.mxu1 %v6694_v57 }
 0x1a3   :  { %6297 = vst [vmem:[%s8816_s2 + $0x220] sm:$0xff] %v5933_v37   ;;  %v2266_v55 = vpop.f32.mrb[21].mxu1 }
 0x1a4   :  { %v1856_v56 = vpop.f32.mrb[72].mxu0 }
 0x1a5   :  { %v2770_v60 = vadd.f32 %v2769_v47, %v1856_v56  ;;  %v3032_v61 = vmul.f32 %v1856_v56, %v1856_v56  ;;  %v1858_v62 = vpop.f32.mrb[73].mxu0 }
 0x1a6   :  { %v1859_v0 = vpop.f32.mrb[74].mxu0 }
 0x1a7   :  { %v3287_v2 = vadd.f32 %v3286_v51, %v3032_v61  ;;  %v2771_v3 = vadd.f32 %v2770_v60, %v1859_v0  ;;  %v3033_v4 = vmul.f32 %v1859_v0, %v1859_v0  ;;  %v5683_v5 = vpack.c.bf16 %v1859_v0, %v1856_v56  ;;  %v1861_v6 = vpop.f32.mrb[75].mxu0  ;;  %v7484_v56 = vpop.f32.mrb[22].mxu1  ;;  %v6696_v61 = vld [vmem:[%s8815_s0 + $0x600] ss:$8 sps:$4 sm:$0xff]  }
 0x1a8   :  { %v5938_v59 = vpack.c.bf16 %v7484_v56, %v7482_v53  ;;  %v2269_v60 = vpop.f32.mrb[23].mxu1 }
 0x1a9   :  { %v3288_v7 = vadd.f32 %v3287_v2, %v3033_v4  ;;  %6247 = vst [vmem:[%s8816_s2 + $0x90] sm:$0xff] %v5683_v5   ;;  %2071 = vmatmul.mubr.bf16.gmra.mrb[180].mxu0 %v6585_v63  ;;  %2479 = vmatmul.mubr.bf16.gmra.mrb[128].mxu1 %v6696_v61 }
 0x1aa   :  { %2078 = vmatprep.mubr.bf16.mxu0 %v6589_v1  ;;  %v6603_v1 = vld [vmem:[%s8815_s0 + $0x300] ss:$8 sps:$4 sm:$0xff]   ;;  %6298 = vst [vmem:[%s8816_s2 + $0x228] sm:$0xff] %v5938_v59   ;;  %2486 = vmatprep.mubr.bf16.mxu1 %v6697_v17  ;;  %v6625_v17 = vld [vmem:[%s8815_s0 + $0x344] ss:$8 sps:$4 sm:$0xff]  }
 0x1ac   :  { %v1864_v13 = vpop.f32.mrb[76].mxu0 }
 0x1ad   :  { %v2772_v18 = vadd.f32 %v2771_v3, %v1864_v13  ;;  %v3034_v19 = vmul.f32 %v1864_v13, %v1864_v13  ;;  %v1866_v20 = vpop.f32.mrb[77].mxu0  ;;  %v6607_v3 = vld [vmem:[%s8815_s0 + $0x314] ss:$8 sps:$4 sm:$0xff]  }
 0x1ae   :  { %v1867_v22 = vpop.f32.mrb[78].mxu0 }
 0x1af   :  { %v3289_v24 = vadd.f32 %v3288_v7, %v3034_v19  ;;  %v2773_v25 = vadd.f32 %v2772_v18, %v1867_v22  ;;  %v3035_v26 = vmul.f32 %v1867_v22, %v1867_v22  ;;  %v5688_v27 = vpack.c.bf16 %v1867_v22, %v1864_v13  ;;  %v1869_v28 = vpop.f32.mrb[79].mxu0  ;;  %v7506_v13 = vpop.f32.mrb[24].mxu1 }
 0x1b0   :  { %v2274_v15 = vpop.f32.mrb[25].mxu1 }
 0x1b1   :  { %v3290_v29 = vadd.f32 %v3289_v24, %v3035_v26  ;;  %6248 = vst [vmem:[%s8816_s2 + $0x98] sm:$0xff] %v5688_v27   ;;  %2079 = vmatmul.mubr.bf16.gmra.mrb[184].mxu0 %v6591_v21  ;;  %v7508_v16 = vpop.f32.mrb[26].mxu1  ;;  %v6699_v21 = vld [vmem:[%s8815_s0 + $0x610] ss:$8 sps:$4 sm:$0xff]   ;;  %v6613_v27 = vld [vmem:[%s8815_s0 + $0x324] ss:$8 sps:$4 sm:$0xff]  }
 0x1b2   :  { %2086 = vmatprep.mubr.bf16.mxu0 %v6595_v23  ;;  %v5943_v19 = vpack.c.bf16 %v7508_v16, %v7506_v13  ;;  %v2277_v20 = vpop.f32.mrb[27].mxu1  ;;  %2487 = vmatmul.mubr.bf16.gmra.mrb[132].mxu1 %v6699_v21 }
 0x1b3   :  { %v7530_v38 = vpop.f32.mrb[28].mxu1 }
 0x1b4   :  { %v1872_v36 = vpop.f32.mrb[80].mxu0  ;;  %6299 = vst [vmem:[%s8816_s2 + $0x230] sm:$0xff] %v5943_v19   ;;  %v2282_v39 = vpop.f32.mrb[29].mxu1 }
 0x1b5   :  { %v2774_v40 = vadd.f32 %v2773_v25, %v1872_v36  ;;  %v3036_v41 = vmul.f32 %v1872_v36, %v1872_v36  ;;  %v1874_v42 = vpop.f32.mrb[81].mxu0  ;;  %v6609_v25 = vld [vmem:[%s8815_s0 + $0x310] ss:$8 sps:$4 sm:$0xff]  }
 0x1b6   :  { %v1875_v44 = vpop.f32.mrb[82].mxu0 }
 0x1b7   :  { %v3291_v46 = vadd.f32 %v3290_v29, %v3036_v41  ;;  %v2775_v47 = vadd.f32 %v2774_v40, %v1875_v44  ;;  %v3037_v48 = vmul.f32 %v1875_v44, %v1875_v44  ;;  %v5693_v49 = vpack.c.bf16 %v1875_v44, %v1872_v36  ;;  %v1877_v50 = vpop.f32.mrb[83].mxu0  ;;  %v7532_v40 = vpop.f32.mrb[30].mxu1  ;;  %v6700_v41 = vld [vmem:[%s8815_s0 + $0x624] ss:$8 sps:$4 sm:$0xff]  }
 0x1b8   :  { %v2285_v44 = vpop.f32.mrb[31].mxu1  ;;  %2494 = vmatprep.mubr.bf16.mxu1 %v6700_v41  ;;  %v6627_v41 = vld [vmem:[%s8815_s0 + $0x340] ss:$8 sps:$4 sm:$0xff]  }
 0x1b9   :  { %v3292_v51 = vadd.f32 %v3291_v46, %v3037_v48  ;;  %6249 = vst [vmem:[%s8816_s2 + $0xa0] sm:$0xff] %v5693_v49   ;;  %2087 = vmatmul.mubr.bf16.gmra.mrb[188].mxu0 %v6597_v43  ;;  %v5948_v43 = vpack.c.bf16 %v7532_v40, %v7530_v38  ;;  %v6615_v49 = vld [vmem:[%s8815_s0 + $0x320] ss:$8 sps:$4 sm:$0xff]  }
 0x1ba   :  { %2094 = vmatprep.mubr.bf16.mxu0 %v6601_v45  ;;  %v6702_v45 = vld [vmem:[%s8815_s0 + $0x620] ss:$8 sps:$4 sm:$0xff]  }
 0x1bb   :  { %6300 = vst [vmem:[%s8816_s2 + $0x238] sm:$0xff] %v5948_v43   ;;  %2495 = vmatmul.mubr.bf16.gmra.mrb[136].mxu1 %v6702_v45  ;;  %v6631_v43 = vld [vmem:[%s8815_s0 + $0x354] ss:$8 sps:$4 sm:$0xff]  }
 0x1bc   :  { %v1880_v58 = vpop.f32.mrb[84].mxu0 }
 0x1bd   :  { %v2776_v62 = vadd.f32 %v2775_v47, %v1880_v58  ;;  %v3038_v63 = vmul.f32 %v1880_v58, %v1880_v58  ;;  %v1882_v0 = vpop.f32.mrb[85].mxu0 }
 0x1be   :  { %v1883_v2 = vpop.f32.mrb[86].mxu0 }
 0x1bf   :  { %v3293_v4 = vadd.f32 %v3292_v51, %v3038_v63  ;;  %v2777_v5 = vadd.f32 %v2776_v62, %v1883_v2  ;;  %v3039_v6 = vmul.f32 %v1883_v2, %v1883_v2  ;;  %v5698_v7 = vpack.c.bf16 %v1883_v2, %v1880_v58  ;;  %v1885_v9 = vpop.f32.mrb[87].mxu0  ;;  %v6619_v51 = vld [vmem:[%s8815_s0 + $0x334] ss:$8 sps:$4 sm:$0xff]   ;;  %v7554_v62 = vpop.f32.mrb[32].mxu1 }
 0x1c0   :  { %v2290_v63 = vpop.f32.mrb[33].mxu1 }
 0x1c1   :  { %v3294_v11 = vadd.f32 %v3293_v4, %v3039_v6  ;;  %6250 = vst [vmem:[%s8816_s2 + $0xa8] sm:$0xff] %v5698_v7   ;;  %2095 = vmatmul.mubr.bf16.gmra.mrb[192].mxu0 %v6603_v1  ;;  %v7556_v0 = vpop.f32.mrb[34].mxu1  ;;  %v6703_v1 = vld [vmem:[%s8815_s0 + $0x634] ss:$8 sps:$4 sm:$0xff]  }
 0x1c2   :  { %2102 = vmatprep.mubr.bf16.mxu0 %v6607_v3  ;;  %v5953_v3 = vpack.c.bf16 %v7556_v0, %v7554_v62  ;;  %v2293_v4 = vpop.f32.mrb[35].mxu1  ;;  %2502 = vmatprep.mubr.bf16.mxu1 %v6703_v1 }
 0x1c4   :  { %v1888_v18 = vpop.f32.mrb[88].mxu0  ;;  %6301 = vst [vmem:[%s8816_s2 + $0x240] sm:$0xff] %v5953_v3   ;;  %v6633_v3 = vld [vmem:[%s8815_s0 + $0x350] ss:$8 sps:$4 sm:$0xff]  }
 0x1c5   :  { %v2778_v22 = vadd.f32 %v2777_v5, %v1888_v18  ;;  %v3040_v23 = vmul.f32 %v1888_v18, %v1888_v18  ;;  %v1890_v24 = vpop.f32.mrb[89].mxu0  ;;  %v6705_v5 = vld [vmem:[%s8815_s0 + $0x630] ss:$8 sps:$4 sm:$0xff]  }
 0x1c6   :  { %v1891_v26 = vpop.f32.mrb[90].mxu0  ;;  %2503 = vmatmul.mubr.bf16.gmra.mrb[140].mxu1 %v6705_v5  ;;  %v7578_v24 = vpop.f32.mrb[36].mxu1  ;;  %v6637_v5 = vld [vmem:[%s8815_s0 + $0x364] ss:$8 sps:$4 sm:$0xff]  }
 0x1c7   :  { %v3295_v28 = vadd.f32 %v3294_v11, %v3040_v23  ;;  %v2779_v29 = vadd.f32 %v2778_v22, %v1891_v26  ;;  %v3041_v31 = vmul.f32 %v1891_v26, %v1891_v26  ;;  %v5703_v35 = vpack.c.bf16 %v1891_v26, %v1888_v18  ;;  %v1893_v36 = vpop.f32.mrb[91].mxu0  ;;  %v6621_v11 = vld [vmem:[%s8815_s0 + $0x330] ss:$8 sps:$4 sm:$0xff]  }
 0x1c9   :  { %v3296_v37 = vadd.f32 %v3295_v28, %v3041_v31  ;;  %6251 = vst [vmem:[%s8816_s2 + $0xb0] sm:$0xff] %v5703_v35   ;;  %2103 = vmatmul.mubr.bf16.gmra.mrb[196].mxu0 %v6609_v25  ;;  %v2298_v25 = vpop.f32.mrb[37].mxu1  ;;  %v6708_v35 = vld [vmem:[%s8815_s0 + $0x640] ss:$8 sps:$4 sm:$0xff]  }
 0x1ca   :  { %2110 = vmatprep.mubr.bf16.mxu0 %v6613_v27  ;;  %v7580_v26 = vpop.f32.mrb[38].mxu1  ;;  %v6706_v27 = vld [vmem:[%s8815_s0 + $0x644] ss:$8 sps:$4 sm:$0xff]  }
 0x1cb   :  { %v2301_v31 = vpop.f32.mrb[39].mxu1  ;;  %2510 = vmatprep.mubr.bf16.mxu1 %v6706_v27  ;;  %v6714_v27 = vld [vmem:[%s8815_s0 + $0x660] ss:$8 sps:$4 sm:$0xff]  }
 0x1cc   :  { %v1896_v42 = vpop.f32.mrb[92].mxu0 }
 0x1cd   :  { %v2780_v46 = vadd.f32 %v2779_v29, %v1896_v42  ;;  %v3042_v47 = vmul.f32 %v1896_v42, %v1896_v42  ;;  %v1898_v48 = vpop.f32.mrb[93].mxu0  ;;  %v5958_v29 = vpack.c.bf16 %v7580_v26, %v7578_v24 }
 0x1ce   :  { %v1899_v50 = vpop.f32.mrb[94].mxu0  ;;  %2511 = vmatmul.mubr.bf16.gmra.mrb[144].mxu1 %v6708_v35  ;;  %v6639_v35 = vld [vmem:[%s8815_s0 + $0x360] ss:$8 sps:$4 sm:$0xff]  }
 0x1cf   :  { %v3297_v55 = vadd.f32 %v3296_v37, %v3042_v47  ;;  %v2781_v57 = vadd.f32 %v2780_v46, %v1899_v50  ;;  %v3043_v58 = vmul.f32 %v1899_v50, %v1899_v50  ;;  %v5708_v59 = vpack.c.bf16 %v1899_v50, %v1896_v42  ;;  %v1901_v60 = vpop.f32.mrb[95].mxu0  ;;  %6302 = vst [vmem:[%s8816_s2 + $0x248] sm:$0xff] %v5958_v29   ;;  %v7602_v50 = vpop.f32.mrb[40].mxu1 }
 0x1d1   :  { %v3298_v61 = vadd.f32 %v3297_v55, %v3043_v58  ;;  %6252 = vst [vmem:[%s8816_s2 + $0xb8] sm:$0xff] %v5708_v59   ;;  %2111 = vmatmul.mubr.bf16.gmra.mrb[200].mxu0 %v6615_v49 }
 0x1d2   :  { %2118 = vmatprep.mubr.bf16.mxu0 %v6619_v51  ;;  %v2306_v51 = vpop.f32.mrb[41].mxu1 }
 0x1d3   :  { %v7604_v55 = vpop.f32.mrb[42].mxu1 }
 0x1d4   :  { %v1904_v2 = vpop.f32.mrb[96].mxu0  ;;  %v5963_v59 = vpack.c.bf16 %v7604_v55, %v7602_v50  ;;  %v2309_v60 = vpop.f32.mrb[43].mxu1 }
 0x1d5   :  { %v2782_v6 = vadd.f32 %v2781_v57, %v1904_v2  ;;  %v3044_v7 = vmul.f32 %v1904_v2, %v1904_v2  ;;  %v1906_v9 = vpop.f32.mrb[97].mxu0  ;;  %v6709_v57 = vld [vmem:[%s8815_s0 + $0x654] ss:$8 sps:$4 sm:$0xff]  }
 0x1d6   :  { %v1907_v15 = vpop.f32.mrb[98].mxu0  ;;  %2518 = vmatprep.mubr.bf16.mxu1 %v6709_v57  ;;  %6303 = vst [vmem:[%s8816_s2 + $0x250] sm:$0xff] %v5963_v59   ;;  %v6717_v59 = vld [vmem:[%s8815_s0 + $0x670] ss:$8 sps:$4 sm:$0xff]  }
 0x1d7   :  { %v3299_v18 = vadd.f32 %v3298_v61, %v3044_v7  ;;  %v2783_v19 = vadd.f32 %v2782_v6, %v1907_v15  ;;  %v3045_v20 = vmul.f32 %v1907_v15, %v1907_v15  ;;  %v5713_v21 = vpack.c.bf16 %v1907_v15, %v1904_v2  ;;  %v1909_v22 = vpop.f32.mrb[99].mxu0  ;;  %v6711_v61 = vld [vmem:[%s8815_s0 + $0x650] ss:$8 sps:$4 sm:$0xff]  }
 0x1d8   :  { %2519 = vmatmul.mubr.bf16.gmra.mrb[148].mxu1 %v6711_v61 }
 0x1d9   :  { %v3300_v23 = vadd.f32 %v3299_v18, %v3045_v20  ;;  %6253 = vst [vmem:[%s8816_s2 + $0xc0] sm:$0xff] %v5713_v21   ;;  %2119 = vmatmul.mubr.bf16.gmra.mrb[204].mxu0 %v6621_v11  ;;  %v7626_v18 = vpop.f32.mrb[44].mxu1  ;;  %v6712_v21 = vld [vmem:[%s8815_s0 + $0x664] ss:$8 sps:$4 sm:$0xff]  }
 0x1da   :  { %2126 = vmatprep.mubr.bf16.mxu0 %v6625_v17  ;;  %2526 = vmatprep.mubr.bf16.mxu1 %v6712_v21  ;;  %v6718_v21 = vld [vmem:[%s8815_s0 + $0x684] ss:$8 sps:$4 sm:$0xff]  }
 0x1dc   :  { %v1912_v28 = vpop.f32.mrb[100].mxu0 }
 0x1dd   :  { %v2784_v36 = vadd.f32 %v2783_v19, %v1912_v28  ;;  %v3046_v37 = vmul.f32 %v1912_v28, %v1912_v28  ;;  %v1914_v39 = vpop.f32.mrb[101].mxu0  ;;  %v2314_v19 = vpop.f32.mrb[45].mxu1 }
 0x1de   :  { %v1915_v42 = vpop.f32.mrb[102].mxu0  ;;  %v7628_v20 = vpop.f32.mrb[46].mxu1 }
 0x1df   :  { %v3301_v44 = vadd.f32 %v3300_v23, %v3046_v37  ;;  %v2785_v45 = vadd.f32 %v2784_v36, %v1915_v42  ;;  %v3047_v46 = vmul.f32 %v1915_v42, %v1915_v42  ;;  %v5718_v47 = vpack.c.bf16 %v1915_v42, %v1912_v28  ;;  %v1917_v48 = vpop.f32.mrb[103].mxu0  ;;  %v2317_v25 = vpop.f32.mrb[47].mxu1  ;;  %v6643_v37 = vld [vmem:[%s8815_s0 + $0x374] ss:$8 sps:$4 sm:$0xff]  }
 0x1e0   :  { %v5968_v23 = vpack.c.bf16 %v7628_v20, %v7626_v18  ;;  %2527 = vmatmul.mubr.bf16.gmra.mrb[152].mxu1 %v6714_v27  ;;  %v6720_v27 = vld [vmem:[%s8815_s0 + $0x680] ss:$8 sps:$4 sm:$0xff]  }
 0x1e1   :  { %v3302_v49 = vadd.f32 %v3301_v44, %v3047_v46  ;;  %6254 = vst [vmem:[%s8816_s2 + $0xc8] sm:$0xff] %v5718_v47   ;;  %2127 = vmatmul.mubr.bf16.gmra.mrb[208].mxu0 %v6627_v41  ;;  %v7650_v46 = vpop.f32.mrb[48].mxu1 }
 0x1e2   :  { %2134 = vmatprep.mubr.bf16.mxu0 %v6631_v43  ;;  %6304 = vst [vmem:[%s8816_s2 + $0x258] sm:$0xff] %v5968_v23   ;;  %v2322_v47 = vpop.f32.mrb[49].mxu1 }
 0x1e3   :  { %v7652_v48 = vpop.f32.mrb[50].mxu1 }
 0x1e4   :  { %v1920_v58 = vpop.f32.mrb[104].mxu0  ;;  %v5973_v57 = vpack.c.bf16 %v7652_v48, %v7650_v46 }
 0x1e5   :  { %v2786_v63 = vadd.f32 %v2785_v45, %v1920_v58  ;;  %v3048_v1 = vmul.f32 %v1920_v58, %v1920_v58  ;;  %v1922_v2 = vpop.f32.mrb[105].mxu0 }
 0x1e6   :  { %v1923_v4 = vpop.f32.mrb[106].mxu0  ;;  %6305 = vst [vmem:[%s8816_s2 + $0x260] sm:$0xff] %v5973_v57   ;;  %v6721_v57 = vld [vmem:[%s8815_s0 + $0x694] ss:$8 sps:$4 sm:$0xff]  }
 0x1e7   :  { %v3303_v6 = vadd.f32 %v3302_v49, %v3048_v1  ;;  %v2787_v7 = vadd.f32 %v2786_v63, %v1923_v4  ;;  %v3049_v9 = vmul.f32 %v1923_v4, %v1923_v4  ;;  %v5723_v11 = vpack.c.bf16 %v1923_v4, %v1920_v58  ;;  %v1925_v15 = vpop.f32.mrb[107].mxu0  ;;  %v6715_v49 = vld [vmem:[%s8815_s0 + $0x674] ss:$8 sps:$4 sm:$0xff]   ;;  %v2325_v58 = vpop.f32.mrb[51].mxu1  ;;  %v6645_v1 = vld [vmem:[%s8815_s0 + $0x370] ss:$8 sps:$4 sm:$0xff]  }
 0x1e8   :  { %2534 = vmatprep.mubr.bf16.mxu1 %v6715_v49  ;;  %v7674_v15 = vpop.f32.mrb[52].mxu1 }
 0x1e9   :  { %v3304_v17 = vadd.f32 %v3303_v6, %v3049_v9  ;;  %6255 = vst [vmem:[%s8816_s2 + $0xd0] sm:$0xff] %v5723_v11   ;;  %2135 = vmatmul.mubr.bf16.gmra.mrb[212].mxu0 %v6633_v3  ;;  %v6649_v3 = vld [vmem:[%s8815_s0 + $0x384] ss:$8 sps:$4 sm:$0xff]   ;;  %2535 = vmatmul.mubr.bf16.gmra.mrb[156].mxu1 %v6717_v59 }
 0x1ea   :  { %2142 = vmatprep.mubr.bf16.mxu0 %v6637_v5  ;;  %2542 = vmatprep.mubr.bf16.mxu1 %v6718_v21 }
 0x1ec   :  { %v1928_v22 = vpop.f32.mrb[108].mxu0 }
 0x1ed   :  { %v2788_v28 = vadd.f32 %v2787_v7, %v1928_v22  ;;  %v3050_v29 = vmul.f32 %v1928_v22, %v1928_v22  ;;  %v1930_v31 = vpop.f32.mrb[109].mxu0 }
 0x1ee   :  { %v1931_v36 = vpop.f32.mrb[110].mxu0 }
 0x1ef   :  { %v3305_v39 = vadd.f32 %v3304_v17, %v3050_v29  ;;  %v2789_v41 = vadd.f32 %v2788_v28, %v1931_v36  ;;  %v3051_v42 = vmul.f32 %v1931_v36, %v1931_v36  ;;  %v5728_v43 = vpack.c.bf16 %v1931_v36, %v1928_v22  ;;  %v1933_v44 = vpop.f32.mrb[111].mxu0  ;;  %v2330_v17 = vpop.f32.mrb[53].mxu1 }
 0x1f0   :  { %v7676_v19 = vpop.f32.mrb[54].mxu1 }
 0x1f1   :  { %v3306_v45 = vadd.f32 %v3305_v39, %v3051_v42  ;;  %6256 = vst [vmem:[%s8816_s2 + $0xd8] sm:$0xff] %v5728_v43   ;;  %2143 = vmatmul.mubr.bf16.gmra.mrb[216].mxu0 %v6639_v35  ;;  %v5978_v23 = vpack.c.bf16 %v7676_v19, %v7674_v15  ;;  %v2333_v25 = vpop.f32.mrb[55].mxu1  ;;  %v6651_v35 = vld [vmem:[%s8815_s0 + $0x380] ss:$8 sps:$4 sm:$0xff]   ;;  %2543 = vmatmul.mubr.bf16.gmra.mrb[160].mxu1 %v6720_v27  ;;  %v6724_v27 = vld [vmem:[%s8815_s0 + $0x6a4] ss:$8 sps:$4 sm:$0xff]  }
 0x1f2   :  { %2150 = vmatprep.mubr.bf16.mxu0 %v6643_v37  ;;  %v6655_v37 = vld [vmem:[%s8815_s0 + $0x394] ss:$8 sps:$4 sm:$0xff]   ;;  %v7698_v47 = vpop.f32.mrb[56].mxu1  ;;  %2550 = vmatprep.mubr.bf16.mxu1 %v6721_v57 }
 0x1f3   :  { %6306 = vst [vmem:[%s8816_s2 + $0x268] sm:$0xff] %v5978_v23   ;;  %v2338_v49 = vpop.f32.mrb[57].mxu1 }
 0x1f4   :  { %v1936_v51 = vpop.f32.mrb[112].mxu0 }
 0x1f5   :  { %v2790_v60 = vadd.f32 %v2789_v41, %v1936_v51  ;;  %v3052_v61 = vmul.f32 %v1936_v51, %v1936_v51  ;;  %v1938_v63 = vpop.f32.mrb[113].mxu0 }
 0x1f6   :  { %v1939_v2 = vpop.f32.mrb[114].mxu0 }
 0x1f7   :  { %v3307_v4 = vadd.f32 %v3306_v45, %v3052_v61  ;;  %v2791_v5 = vadd.f32 %v2790_v60, %v1939_v2  ;;  %v3053_v6 = vmul.f32 %v1939_v2, %v1939_v2  ;;  %v5733_v7 = vpack.c.bf16 %v1939_v2, %v1936_v51  ;;  %v1941_v9 = vpop.f32.mrb[115].mxu0  ;;  %v7700_v51 = vpop.f32.mrb[58].mxu1  ;;  %v6723_v61 = vld [vmem:[%s8815_s0 + $0x690] ss:$8 sps:$4 sm:$0xff]  }
 0x1f8   :  { %v5983_v59 = vpack.c.bf16 %v7700_v51, %v7698_v47  ;;  %v2341_v60 = vpop.f32.mrb[59].mxu1 }
 0x1f9   :  { %v3308_v11 = vadd.f32 %v3307_v4, %v3053_v6  ;;  %6257 = vst [vmem:[%s8816_s2 + $0xe0] sm:$0xff] %v5733_v7   ;;  %2151 = vmatmul.mubr.bf16.gmra.mrb[220].mxu0 %v6645_v1  ;;  %2551 = vmatmul.mubr.bf16.gmra.mrb[164].mxu1 %v6723_v61 }
 0x1fa   :  { %2158 = vmatprep.mubr.bf16.mxu0 %v6649_v3  ;;  %v6657_v3 = vld [vmem:[%s8815_s0 + $0x390] ss:$8 sps:$4 sm:$0xff]   ;;  %6307 = vst [vmem:[%s8816_s2 + $0x270] sm:$0xff] %v5983_v59   ;;  %2558 = vmatprep.mubr.bf16.mxu1 %v6724_v27 }
 0x1fc   :  { %v1944_v22 = vpop.f32.mrb[116].mxu0 }
 0x1fd   :  { %v2792_v28 = vadd.f32 %v2791_v5, %v1944_v22  ;;  %v3054_v29 = vmul.f32 %v1944_v22, %v1944_v22  ;;  %v1946_v31 = vpop.f32.mrb[117].mxu0  ;;  %v6661_v5 = vld [vmem:[%s8815_s0 + $0x3a4] ss:$8 sps:$4 sm:$0xff]  }
 0x1fe   :  { %v1947_v36 = vpop.f32.mrb[118].mxu0 }
 0x1ff   :  { %v3309_v39 = vadd.f32 %v3308_v11, %v3054_v29  ;;  %v2793_v41 = vadd.f32 %v2792_v28, %v1947_v36  ;;  %v3055_v42 = vmul.f32 %v1947_v36, %v1947_v36  ;;  %v5738_v43 = vpack.c.bf16 %v1947_v36, %v1944_v22  ;;  %v1949_v44 = vpop.f32.mrb[119].mxu0  ;;  %v7722_v22 = vpop.f32.mrb[60].mxu1 }
 0x200   :  { %v2346_v23 = vpop.f32.mrb[61].mxu1 }
 0x201   :  { %v3310_v45 = vadd.f32 %v3309_v39, %v3055_v42  ;;  %6258 = vst [vmem:[%s8816_s2 + $0xe8] sm:$0xff] %v5738_v43   ;;  %2159 = vmatmul.mubr.bf16.gmra.mrb[224].mxu0 %v6651_v35  ;;  %v7724_v25 = vpop.f32.mrb[62].mxu1  ;;  %v6726_v35 = vld [vmem:[%s8815_s0 + $0x6a0] ss:$8 sps:$4 sm:$0xff]   ;;  %v6667_v43 = vld [vmem:[%s8815_s0 + $0x3b4] ss:$8 sps:$4 sm:$0xff]  }
 0x202   :  { %2166 = vmatprep.mubr.bf16.mxu0 %v6655_v37  ;;  %v5988_v29 = vpack.c.bf16 %v7724_v25, %v7722_v22  ;;  %v2349_v31 = vpop.f32.mrb[63].mxu1  ;;  %2559 = vmatmul.mubr.bf16.gmra.mrb[168].mxu1 %v6726_v35 }
 0x203   :  { %v7746_v60 = vpop.f32.mrb[64].mxu1 }
 0x204   :  { %v1952_v58 = vpop.f32.mrb[120].mxu0  ;;  %6308 = vst [vmem:[%s8816_s2 + $0x278] sm:$0xff] %v5988_v29   ;;  %v2354_v61 = vpop.f32.mrb[65].mxu1 }
 0x205   :  { %v2794_v63 = vadd.f32 %v2793_v41, %v1952_v58  ;;  %v3056_v1 = vmul.f32 %v1952_v58, %v1952_v58  ;;  %v1954_v2 = vpop.f32.mrb[121].mxu0  ;;  %v6663_v41 = vld [vmem:[%s8815_s0 + $0x3a0] ss:$8 sps:$4 sm:$0xff]  }
 0x206   :  { %v1955_v4 = vpop.f32.mrb[122].mxu0 }
 0x207   :  { %v3311_v6 = vadd.f32 %v3310_v45, %v3056_v1  ;;  %v2795_v7 = vadd.f32 %v2794_v63, %v1955_v4  ;;  %v3057_v9 = vmul.f32 %v1955_v4, %v1955_v4  ;;  %v5743_v11 = vpack.c.bf16 %v1955_v4, %v1952_v58  ;;  %v1957_v17 = vpop.f32.mrb[123].mxu0  ;;  %v7748_v63 = vpop.f32.mrb[66].mxu1  ;;  %v6727_v1 = vld [vmem:[%s8815_s0 + $0x6b4] ss:$8 sps:$4 sm:$0xff]  }
 0x208   :  { %v2357_v4 = vpop.f32.mrb[67].mxu1  ;;  %2566 = vmatprep.mubr.bf16.mxu1 %v6727_v1  ;;  %v6679_v1 = vld [vmem:[%s8815_s0 + $0x3d4] ss:$8 sps:$4 sm:$0xff]  }
 0x209   :  { %v3312_v21 = vadd.f32 %v3311_v6, %v3057_v9  ;;  %6259 = vst [vmem:[%s8816_s2 + $0xf0] sm:$0xff] %v5743_v11   ;;  %2167 = vmatmul.mubr.bf16.gmra.mrb[228].mxu0 %v6657_v3  ;;  %v5993_v3 = vpack.c.bf16 %v7748_v63, %v7746_v60  ;;  %v6669_v11 = vld [vmem:[%s8815_s0 + $0x3b0] ss:$8 sps:$4 sm:$0xff]  }
 0x20a   :  { %2174 = vmatprep.mubr.bf16.mxu0 %v6661_v5  ;;  %v6729_v5 = vld [vmem:[%s8815_s0 + $0x6b0] ss:$8 sps:$4 sm:$0xff]  }
 0x20b   :  { %6309 = vst [vmem:[%s8816_s2 + $0x280] sm:$0xff] %v5993_v3   ;;  %2567 = vmatmul.mubr.bf16.gmra.mrb[172].mxu1 %v6729_v5 }
 0x20c   :  { %v1960_v28 = vpop.f32.mrb[124].mxu0 }
 0x20d   :  { %v2796_v36 = vadd.f32 %v2795_v7, %v1960_v28  ;;  %v3058_v37 = vmul.f32 %v1960_v28, %v1960_v28  ;;  %v1962_v39 = vpop.f32.mrb[125].mxu0 }
 0x20e   :  { %v1963_v42 = vpop.f32.mrb[126].mxu0 }
 0x20f   :  { %v3313_v44 = vadd.f32 %v3312_v21, %v3058_v37  ;;  %v2797_v45 = vadd.f32 %v2796_v36, %v1963_v42  ;;  %v3059_v49 = vmul.f32 %v1963_v42, %v1963_v42  ;;  %v5748_v57 = vpack.c.bf16 %v1963_v42, %v1960_v28  ;;  %v1965_v58 = vpop.f32.mrb[127].mxu0  ;;  %v6673_v21 = vld [vmem:[%s8815_s0 + $0x3c4] ss:$8 sps:$4 sm:$0xff]   ;;  %v7770_v36 = vpop.f32.mrb[68].mxu1 }
 0x210   :  { %v2362_v37 = vpop.f32.mrb[69].mxu1 }
 0x211   :  { %v3314_v59 = vadd.f32 %v3313_v44, %v3059_v49  ;;  %6260 = vst [vmem:[%s8816_s2 + $0xf8] sm:$0xff] %v5748_v57   ;;  %2175 = vmatmul.mubr.bf16.gmra.mrb[232].mxu0 %v6663_v41  ;;  %v7772_v39 = vpop.f32.mrb[70].mxu1  ;;  %v6730_v41 = vld [vmem:[%s8815_s0 + $0x6c4] ss:$8 sps:$4 sm:$0xff]  }
 0x212   :  { %2182 = vmatprep.mubr.bf16.mxu0 %v6667_v43  ;;  %v5998_v43 = vpack.c.bf16 %v7772_v39, %v7770_v36  ;;  %v2365_v44 = vpop.f32.mrb[71].mxu1  ;;  %2574 = vmatprep.mubr.bf16.mxu1 %v6730_v41  ;;  %v6681_v41 = vld [vmem:[%s8815_s0 + $0x3d0] ss:$8 sps:$4 sm:$0xff]  }
 0x214   :  { %v1968_v2 = vpop.f32.mrb[128].mxu0  ;;  %6310 = vst [vmem:[%s8816_s2 + $0x288] sm:$0xff] %v5998_v43   ;;  %v6685_v43 = vld [vmem:[%s8815_s0 + $0x3e4] ss:$8 sps:$4 sm:$0xff]  }
 0x215   :  { %v2798_v6 = vadd.f32 %v2797_v45, %v1968_v2  ;;  %v3060_v7 = vmul.f32 %v1968_v2, %v1968_v2  ;;  %v1970_v9 = vpop.f32.mrb[129].mxu0  ;;  %v6732_v45 = vld [vmem:[%s8815_s0 + $0x6c0] ss:$8 sps:$4 sm:$0xff]  }
 0x216   :  { %v1971_v17 = vpop.f32.mrb[130].mxu0  ;;  %2575 = vmatmul.mubr.bf16.gmra.mrb[176].mxu1 %v6732_v45  ;;  %v7794_v9 = vpop.f32.mrb[72].mxu1 }
 0x217   :  { %v3315_v23 = vadd.f32 %v3314_v59, %v3060_v7  ;;  %v2799_v27 = vadd.f32 %v2798_v6, %v1971_v17  ;;  %v3061_v28 = vmul.f32 %v1971_v17, %v1971_v17  ;;  %v5753_v29 = vpack.c.bf16 %v1971_v17, %v1968_v2  ;;  %v1973_v31 = vpop.f32.mrb[131].mxu0  ;;  %v6675_v59 = vld [vmem:[%s8815_s0 + $0x3c0] ss:$8 sps:$4 sm:$0xff]  }
 0x219   :  { %v3316_v35 = vadd.f32 %v3315_v23, %v3061_v28  ;;  %6261 = vst [vmem:[%s8816_s2 + $0x100] sm:$0xff] %v5753_v29   ;;  %2183 = vmatmul.mubr.bf16.gmra.mrb[236].mxu0 %v6669_v11  ;;  %v2370_v11 = vpop.f32.mrb[73].mxu1  ;;  %v6735_v29 = vld [vmem:[%s8815_s0 + $0x6d0] ss:$8 sps:$4 sm:$0xff]  }
 0x21a   :  { %2190 = vmatprep.mubr.bf16.mxu0 %v6673_v21  ;;  %v7796_v17 = vpop.f32.mrb[74].mxu1  ;;  %v6733_v21 = vld [vmem:[%s8815_s0 + $0x6d4] ss:$8 sps:$4 sm:$0xff]  }
 0x21b   :  { %v2373_v28 = vpop.f32.mrb[75].mxu1  ;;  %2582 = vmatprep.mubr.bf16.mxu1 %v6733_v21 }
 0x21c   :  { %v1976_v42 = vpop.f32.mrb[132].mxu0 }
 0x21d   :  { %v2800_v49 = vadd.f32 %v2799_v27, %v1976_v42  ;;  %v3062_v57 = vmul.f32 %v1976_v42, %v1976_v42  ;;  %v1978_v58 = vpop.f32.mrb[133].mxu0  ;;  %v6003_v27 = vpack.c.bf16 %v7796_v17, %v7794_v9 }
 0x21e   :  { %v1979_v61 = vpop.f32.mrb[134].mxu0  ;;  %2583 = vmatmul.mubr.bf16.gmra.mrb[180].mxu1 %v6735_v29  ;;  %v6691_v29 = vld [vmem:[%s8815_s0 + $0x3f4] ss:$8 sps:$4 sm:$0xff]  }
 0x21f   :  { %v3317_v2 = vadd.f32 %v3316_v35, %v3062_v57  ;;  %v2801_v3 = vadd.f32 %v2800_v49, %v1979_v61  ;;  %v3063_v4 = vmul.f32 %v1979_v61, %v1979_v61  ;;  %v5758_v5 = vpack.c.bf16 %v1979_v61, %v1976_v42  ;;  %v1981_v6 = vpop.f32.mrb[135].mxu0  ;;  %6311 = vst [vmem:[%s8816_s2 + $0x290] sm:$0xff] %v6003_v27   ;;  %v7818_v61 = vpop.f32.mrb[76].mxu1  ;;  %v6687_v27 = vld [vmem:[%s8815_s0 + $0x3e0] ss:$8 sps:$4 sm:$0xff]  }
 0x221   :  { %v3318_v7 = vadd.f32 %v3317_v2, %v3063_v4  ;;  %6262 = vst [vmem:[%s8816_s2 + $0x108] sm:$0xff] %v5758_v5   ;;  %2191 = vmatmul.mubr.bf16.gmra.mrb[240].mxu0 %v6675_v59 }
 0x222   :  { %2198 = vmatprep.mubr.bf16.mxu0 %v6679_v1  ;;  %v2378_v1 = vpop.f32.mrb[77].mxu1 }
 0x223   :  { %v7820_v2 = vpop.f32.mrb[78].mxu1 }
 0x224   :  { %v1984_v23 = vpop.f32.mrb[136].mxu0  ;;  %v6008_v5 = vpack.c.bf16 %v7820_v2, %v7818_v61  ;;  %v2381_v6 = vpop.f32.mrb[79].mxu1 }
 0x225   :  { %v2802_v31 = vadd.f32 %v2801_v3, %v1984_v23  ;;  %v3064_v35 = vmul.f32 %v1984_v23, %v1984_v23  ;;  %v1986_v37 = vpop.f32.mrb[137].mxu0  ;;  %v6736_v3 = vld [vmem:[%s8815_s0 + $0x6e4] ss:$8 sps:$4 sm:$0xff]  }
 0x226   :  { %v1987_v42 = vpop.f32.mrb[138].mxu0  ;;  %2590 = vmatprep.mubr.bf16.mxu1 %v6736_v3  ;;  %6312 = vst [vmem:[%s8816_s2 + $0x298] sm:$0xff] %v6008_v5   ;;  %v6741_v3 = vld [vmem:[%s8815_s0 + $0x6f0] ss:$8 sps:$4 sm:$0xff]  }
 0x227   :  { %v3319_v44 = vadd.f32 %v3318_v7, %v3064_v35  ;;  %v2803_v45 = vadd.f32 %v2802_v31, %v1987_v42  ;;  %v3065_v49 = vmul.f32 %v1987_v42, %v1987_v42  ;;  %v5763_v57 = vpack.c.bf16 %v1987_v42, %v1984_v23  ;;  %v1989_v58 = vpop.f32.mrb[139].mxu0  ;;  %v6738_v7 = vld [vmem:[%s8815_s0 + $0x6e0] ss:$8 sps:$4 sm:$0xff]  }
 0x228   :  { %2591 = vmatmul.mubr.bf16.gmra.mrb[184].mxu1 %v6738_v7  ;;  %v6693_v7 = vld [vmem:[%s8815_s0 + $0x3f0] ss:$8 sps:$4 sm:$0xff]  }
 0x229   :  { %v3320_v59 = vadd.f32 %v3319_v44, %v3065_v49  ;;  %6263 = vst [vmem:[%s8816_s2 + $0x110] sm:$0xff] %v5763_v57   ;;  %2199 = vmatmul.mubr.bf16.gmra.mrb[244].mxu0 %v6681_v41  ;;  %v7842_v44 = vpop.f32.mrb[80].mxu1  ;;  %v6739_v57 = vld [vmem:[%s8815_s0 + $0x6f4] ss:$8 sps:$4 sm:$0xff]  }
 0x22a   :  { %2206 = vmatprep.mubr.bf16.mxu0 %v6685_v43  ;;  %2598 = vmatprep.mubr.bf16.mxu1 %v6739_v57 }
 0x22c   :  { %v1992_v4 = vpop.f32.mrb[140].mxu0 }
 0x22d   :  { %v2804_v11 = vadd.f32 %v2803_v45, %v1992_v4  ;;  %v3066_v21 = vmul.f32 %v1992_v4, %v1992_v4  ;;  %v1994_v23 = vpop.f32.mrb[141].mxu0  ;;  %v2386_v45 = vpop.f32.mrb[81].mxu1 }
 0x22e   :  { %v1995_v28 = vpop.f32.mrb[142].mxu0  ;;  %v7844_v49 = vpop.f32.mrb[82].mxu1 }
 0x22f   :  { %v3321_v31 = vadd.f32 %v3320_v59, %v3066_v21  ;;  %v2805_v35 = vadd.f32 %v2804_v11, %v1995_v28  ;;  %v3067_v37 = vmul.f32 %v1995_v28, %v1995_v28  ;;  %v5768_v41 = vpack.c.bf16 %v1995_v28, %v1992_v4  ;;  %v1997_v42 = vpop.f32.mrb[143].mxu0  ;;  %v2389_v1 = vpop.f32.mrb[83].mxu1 }
 0x230   :  { %v6013_v59 = vpack.c.bf16 %v7844_v49, %v7842_v44  ;;  %2599 = vmatmul.mubr.bf16.gmra.mrb[188].mxu1 %v6741_v3  ;;  %v6742_v42 = vld [vmem:[%s8815_s0 + $0x704] ss:$8 sps:$4 sm:$0xff]  }
 0x231   :  { %v3322_v43 = vadd.f32 %v3321_v31, %v3067_v37  ;;  %6264 = vst [vmem:[%s8816_s2 + $0x118] sm:$0xff] %v5768_v41   ;;  %2207 = vmatmul.mubr.bf16.gmra.mrb[248].mxu0 %v6687_v27  ;;  %2606 = vmatprep.mubr.bf16.mxu1 %v6742_v42 }
 0x232   :  { %2214 = vmatprep.mubr.bf16.mxu0 %v6691_v29  ;;  %6313 = vst [vmem:[%s8816_s2 + $0x2a0] sm:$0xff] %v6013_v59  }
 0x234   :  { %v2000_v58 = vpop.f32.mrb[144].mxu0 }
 0x235   :  { %v2806_v4 = vadd.f32 %v2805_v35, %v2000_v58  ;;  %v3068_v5 = vmul.f32 %v2000_v58, %v2000_v58  ;;  %v2002_v6 = vpop.f32.mrb[145].mxu0  ;;  %v7863_v35 = vpop.f32.mrb[84].mxu1 }
 0x236   :  { %v2003_v11 = vpop.f32.mrb[146].mxu0  ;;  %v2394_v37 = vpop.f32.mrb[85].mxu1 }
 0x237   :  { %v3323_v21 = vadd.f32 %v3322_v43, %v3068_v5  ;;  %v2807_v23 = vadd.f32 %v2806_v4, %v2003_v11  ;;  %v3069_v27 = vmul.f32 %v2003_v11, %v2003_v11  ;;  %v5773_v28 = vpack.c.bf16 %v2003_v11, %v2000_v58  ;;  %v2005_v29 = vpop.f32.mrb[147].mxu0  ;;  %v7865_v41 = vpop.f32.mrb[86].mxu1  ;;  %v6744_v58 = vld [vmem:[%s8815_s0 + $0x700] ss:$8 sps:$4 sm:$0xff]   ;;  %v6745_v37 = vld [vmem:[%s8815_s0 + $0x714] ss:$8 sps:$4 sm:$0xff]  }
 0x238   :  { %v6018_v45 = vpack.c.bf16 %v7865_v41, %v7863_v35  ;;  %v2397_v57 = vpop.f32.mrb[87].mxu1  ;;  %2607 = vmatmul.mubr.bf16.gmra.mrb[192].mxu1 %v6744_v58 }
 0x239   :  { %v3324_v31 = vadd.f32 %v3323_v21, %v3069_v27  ;;  %6265 = vst [vmem:[%s8816_s2 + $0x120] sm:$0xff] %v5773_v28   ;;  %2215 = vmatmul.mubr.bf16.gmra.mrb[252].mxu0 %v6693_v7  ;;  %2614 = vmatprep.mubr.bf16.mxu1 %v6745_v37 }
 0x23a   :  { %6314 = vst [vmem:[%s8816_s2 + $0x2a8] sm:$0xff] %v6018_v45   ;;  %v6747_v45 = vld [vmem:[%s8815_s0 + $0x710] ss:$8 sps:$4 sm:$0xff]  }
 0x23c   :  { %v2008_v43 = vpop.f32.mrb[148].mxu0 }
 0x23d   :  { %v2808_v59 = vadd.f32 %v2807_v23, %v2008_v43  ;;  %v3070_v1 = vmul.f32 %v2008_v43, %v2008_v43  ;;  %v2010_v3 = vpop.f32.mrb[149].mxu0  ;;  %v7881_v23 = vpop.f32.mrb[88].mxu1 }
 0x23e   :  { %v2011_v4 = vpop.f32.mrb[150].mxu0  ;;  %v2402_v28 = vpop.f32.mrb[89].mxu1 }
 0x23f   :  { %v3325_v5 = vadd.f32 %v3324_v31, %v3070_v1  ;;  %v2809_v6 = vadd.f32 %v2808_v59, %v2011_v4  ;;  %v3071_v7 = vmul.f32 %v2011_v4, %v2011_v4  ;;  %v5778_v11 = vpack.c.bf16 %v2011_v4, %v2008_v43  ;;  %v2013_v21 = vpop.f32.mrb[151].mxu0  ;;  %v7883_v29 = vpop.f32.mrb[90].mxu1 }
 0x240   :  { %v6023_v31 = vpack.c.bf16 %v7883_v29, %v7881_v23  ;;  %v2405_v43 = vpop.f32.mrb[91].mxu1  ;;  %2615 = vmatmul.mubr.bf16.gmra.mrb[196].mxu1 %v6747_v45  ;;  %v6750_v45 = vld [vmem:[%s8815_s0 + $0x720] ss:$8 sps:$4 sm:$0xff]  }
 0x241   :  { %v3326_v27 = vadd.f32 %v3325_v5, %v3071_v7  ;;  %6266 = vst [vmem:[%s8816_s2 + $0x128] sm:$0xff] %v5778_v11  }
 0x242   :  { %6315 = vst [vmem:[%s8816_s2 + $0x2b0] sm:$0xff] %v6023_v31   ;;  %v6748_v31 = vld [vmem:[%s8815_s0 + $0x724] ss:$8 sps:$4 sm:$0xff]  }
 0x243   :  { %2622 = vmatprep.mubr.bf16.mxu1 %v6748_v31 }
 0x244   :  { %v2016_v42 = vpop.f32.mrb[152].mxu0 }
 0x245   :  { %v2810_v57 = vadd.f32 %v2809_v6, %v2016_v42  ;;  %v3072_v58 = vmul.f32 %v2016_v42, %v2016_v42  ;;  %v2018_v59 = vpop.f32.mrb[153].mxu0  ;;  %v7899_v6 = vpop.f32.mrb[92].mxu1 }
 0x246   :  { %v2019_v1 = vpop.f32.mrb[154].mxu0  ;;  %8914 = vst [vmem:[#allocation2_spill] sm:$0xff] %v7899_v6  ;;  %v2410_v28 = vpop.f32.mrb[93].mxu1 }
 0x247   :  { %v3327_v3 = vadd.f32 %v3326_v27, %v3072_v58  ;;  %v2811_v4 = vadd.f32 %v2810_v57, %v2019_v1  ;;  %v3073_v5 = vmul.f32 %v2019_v1, %v2019_v1  ;;  %v5783_v7 = vpack.c.bf16 %v2019_v1, %v2016_v42  ;;  %v2021_v11 = vpop.f32.mrb[155].mxu0  ;;  %v7901_v37 = vpop.f32.mrb[94].mxu1 }
 0x248   :  { %8915 = vst [vmem:[#allocation3_spill] sm:$0xff] %v7901_v37  ;;  %v6028_v27 = vpack.c.bf16 %v7901_v37, %v7899_v6  ;;  %v2413_v42 = vpop.f32.mrb[95].mxu1  ;;  %2623 = vmatmul.mubr.bf16.gmra.mrb[200].mxu1 %v6750_v45 }
 0x249   :  { %v3328_v21 = vadd.f32 %v3327_v3, %v3073_v5  ;;  %6267 = vst [vmem:[%s8816_s2 + $0x130] sm:$0xff] %v5783_v7  }
 0x24a   :  { %6316 = vst [vmem:[%s8816_s2 + $0x2b8] sm:$0xff] %v6028_v27   ;;  %v6751_v27 = vld [vmem:[%s8815_s0 + $0x734] ss:$8 sps:$4 sm:$0xff]  }
 0x24b   :  { %2630 = vmatprep.mubr.bf16.mxu1 %v6751_v27 }
 0x24c   :  { %v2024_v43 = vpop.f32.mrb[156].mxu0 }
 0x24d   :  { %v2812_v57 = vadd.f32 %v2811_v4, %v2024_v43  ;;  %v3074_v58 = vmul.f32 %v2024_v43, %v2024_v43  ;;  %v2026_v59 = vpop.f32.mrb[157].mxu0  ;;  %v7917_v4 = vpop.f32.mrb[96].mxu1 }
 0x24e   :  { %v2027_v1 = vpop.f32.mrb[158].mxu0  ;;  %8916 = vst [vmem:[#allocation4_spill] sm:$0xff] %v7917_v4  ;;  %v2418_v59 = vpop.f32.mrb[97].mxu1 }
 0x24f   :  { %v3329_v3 = vadd.f32 %v3328_v21, %v3074_v58  ;;  %v2813_v5 = vadd.f32 %v2812_v57, %v2027_v1  ;;  %v3075_v7 = vmul.f32 %v2027_v1, %v2027_v1  ;;  %v5788_v11 = vpack.c.bf16 %v2027_v1, %v2024_v43  ;;  %v2029_v28 = vpop.f32.mrb[159].mxu0  ;;  %v7919_v31 = vpop.f32.mrb[98].mxu1  ;;  %v6753_v57 = vld [vmem:[%s8815_s0 + $0x730] ss:$8 sps:$4 sm:$0xff]  }
 0x250   :  { %8917 = vst [vmem:[#allocation5_spill] sm:$0xff] %v7919_v31  ;;  %v6033_v21 = vpack.c.bf16 %v7919_v31, %v7917_v4  ;;  %v2421_v43 = vpop.f32.mrb[99].mxu1  ;;  %2631 = vmatmul.mubr.bf16.gmra.mrb[204].mxu1 %v6753_v57 }
 0x251   :  { %v3330_v42 = vadd.f32 %v3329_v3, %v3075_v7  ;;  %6268 = vst [vmem:[%s8816_s2 + $0x138] sm:$0xff] %v5788_v11  }
 0x252   :  { %6317 = vst [vmem:[%s8816_s2 + $0x2c0] sm:$0xff] %v6033_v21   ;;  %v6754_v21 = vld [vmem:[%s8815_s0 + $0x744] ss:$8 sps:$4 sm:$0xff]  }
 0x253   :  { %2638 = vmatprep.mubr.bf16.mxu1 %v6754_v21 }
 0x254   :  { %v2032_v45 = vpop.f32.mrb[160].mxu0 }
 0x255   :  { %v2814_v58 = vadd.f32 %v2813_v5, %v2032_v45  ;;  %v3076_v1 = vmul.f32 %v2032_v45, %v2032_v45  ;;  %v2034_v3 = vpop.f32.mrb[161].mxu0  ;;  %v7935_v5 = vpop.f32.mrb[100].mxu1 }
 0x256   :  { %v2035_v7 = vpop.f32.mrb[162].mxu0  ;;  %8918 = vst [vmem:[#allocation6_spill] sm:$0xff] %v7935_v5  ;;  %v2426_v3 = vpop.f32.mrb[101].mxu1 }
 0x257   :  { %v3331_v11 = vadd.f32 %v3330_v42, %v3076_v1  ;;  %v2815_v28 = vadd.f32 %v2814_v58, %v2035_v7  ;;  %v3077_v59 = vmul.f32 %v2035_v7, %v2035_v7  ;;  %v5793_v37 = vpack.c.bf16 %v2035_v7, %v2032_v45  ;;  %v2037_v31 = vpop.f32.mrb[163].mxu0  ;;  %v7937_v27 = vpop.f32.mrb[102].mxu1 }
 0x258   :  { %8919 = vst [vmem:[#allocation7_spill] sm:$0xff] %v7937_v27  ;;  %v6038_v42 = vpack.c.bf16 %v7937_v27, %v7935_v5  ;;  %v2429_v45 = vpop.f32.mrb[103].mxu1  ;;  %v6756_v31 = vld [vmem:[%s8815_s0 + $0x740] ss:$8 sps:$4 sm:$0xff]  }
 0x259   :  { %v3332_v43 = vadd.f32 %v3331_v11, %v3077_v59  ;;  %6269 = vst [vmem:[%s8816_s2 + $0x140] sm:$0xff] %v5793_v37   ;;  %2639 = vmatmul.mubr.bf16.gmra.mrb[208].mxu1 %v6756_v31 }
 0x25a   :  { %6318 = vst [vmem:[%s8816_s2 + $0x2c8] sm:$0xff] %v6038_v42   ;;  %v6757_v42 = vld [vmem:[%s8815_s0 + $0x754] ss:$8 sps:$4 sm:$0xff]  }
 0x25b   :  { %2646 = vmatprep.mubr.bf16.mxu1 %v6757_v42 }
 0x25c   :  { %v2040_v57 = vpop.f32.mrb[164].mxu0 }
 0x25d   :  { %v2816_v58 = vadd.f32 %v2815_v28, %v2040_v57  ;;  %v3078_v37 = vmul.f32 %v2040_v57, %v2040_v57  ;;  %v2042_v1 = vpop.f32.mrb[165].mxu0  ;;  %v7953_v28 = vpop.f32.mrb[104].mxu1 }
 0x25e   :  { %v2043_v7 = vpop.f32.mrb[166].mxu0  ;;  %8920 = vst [vmem:[#allocation8_spill] sm:$0xff] %v7953_v28  ;;  %v2434_v1 = vpop.f32.mrb[105].mxu1 }
 0x25f   :  { %v3333_v11 = vadd.f32 %v3332_v43, %v3078_v37  ;;  %v2817_v59 = vadd.f32 %v2816_v58, %v2043_v7  ;;  %v3079_v3 = vmul.f32 %v2043_v7, %v2043_v7  ;;  %v5798_v4 = vpack.c.bf16 %v2043_v7, %v2040_v57  ;;  %v2045_v27 = vpop.f32.mrb[167].mxu0  ;;  %v7955_v21 = vpop.f32.mrb[106].mxu1 }
 0x260   :  { %8921 = vst [vmem:[#allocation9_spill] sm:$0xff] %v7955_v21  ;;  %v6043_v43 = vpack.c.bf16 %v7955_v21, %v7953_v28  ;;  %v2437_v57 = vpop.f32.mrb[107].mxu1  ;;  %v6759_v27 = vld [vmem:[%s8815_s0 + $0x750] ss:$8 sps:$4 sm:$0xff]  }
 0x261   :  { %v3334_v45 = vadd.f32 %v3333_v11, %v3079_v3  ;;  %6270 = vst [vmem:[%s8816_s2 + $0x148] sm:$0xff] %v5798_v4   ;;  %2647 = vmatmul.mubr.bf16.gmra.mrb[212].mxu1 %v6759_v27 }
 0x262   :  { %6319 = vst [vmem:[%s8816_s2 + $0x2d0] sm:$0xff] %v6043_v43   ;;  %v6760_v43 = vld [vmem:[%s8815_s0 + $0x764] ss:$8 sps:$4 sm:$0xff]  }
 0x263   :  { %2654 = vmatprep.mubr.bf16.mxu1 %v6760_v43 }
 0x264   :  { %v2048_v31 = vpop.f32.mrb[168].mxu0 }
 0x265   :  { %v2818_v58 = vadd.f32 %v2817_v59, %v2048_v31  ;;  %v3080_v4 = vmul.f32 %v2048_v31, %v2048_v31  ;;  %v2050_v37 = vpop.f32.mrb[169].mxu0  ;;  %v7971_v59 = vpop.f32.mrb[108].mxu1 }
 0x266   :  { %v2051_v7 = vpop.f32.mrb[170].mxu0  ;;  %8922 = vst [vmem:[#allocation10_spill] sm:$0xff] %v7971_v59  ;;  %v2442_v37 = vpop.f32.mrb[109].mxu1 }
 0x267   :  { %v3335_v11 = vadd.f32 %v3334_v45, %v3080_v4  ;;  %v2819_v3 = vadd.f32 %v2818_v58, %v2051_v7  ;;  %v3081_v1 = vmul.f32 %v2051_v7, %v2051_v7  ;;  %v5803_v5 = vpack.c.bf16 %v2051_v7, %v2048_v31  ;;  %v2053_v21 = vpop.f32.mrb[171].mxu0  ;;  %v7973_v42 = vpop.f32.mrb[110].mxu1 }
 0x268   :  { %8923 = vst [vmem:[#allocation11_spill] sm:$0xff] %v7973_v42  ;;  %v6048_v45 = vpack.c.bf16 %v7973_v42, %v7971_v59  ;;  %v2445_v31 = vpop.f32.mrb[111].mxu1  ;;  %v6762_v21 = vld [vmem:[%s8815_s0 + $0x760] ss:$8 sps:$4 sm:$0xff]  }
 0x269   :  { %v3336_v57 = vadd.f32 %v3335_v11, %v3081_v1  ;;  %6271 = vst [vmem:[%s8816_s2 + $0x150] sm:$0xff] %v5803_v5   ;;  %2655 = vmatmul.mubr.bf16.gmra.mrb[216].mxu1 %v6762_v21 }
 0x26a   :  { %6320 = vst [vmem:[%s8816_s2 + $0x2d8] sm:$0xff] %v6048_v45   ;;  %v6763_v45 = vld [vmem:[%s8815_s0 + $0x774] ss:$8 sps:$4 sm:$0xff]  }
 0x26b   :  { %2662 = vmatprep.mubr.bf16.mxu1 %v6763_v45 }
 0x26c   :  { %v2056_v27 = vpop.f32.mrb[172].mxu0 }
 0x26d   :  { %v2820_v58 = vadd.f32 %v2819_v3, %v2056_v27  ;;  %v3082_v5 = vmul.f32 %v2056_v27, %v2056_v27  ;;  %v2058_v4 = vpop.f32.mrb[173].mxu0  ;;  %v7989_v3 = vpop.f32.mrb[112].mxu1 }
 0x26e   :  { %v2059_v7 = vpop.f32.mrb[174].mxu0  ;;  %8924 = vst [vmem:[#allocation12_spill] sm:$0xff] %v7989_v3  ;;  %v2450_v4 = vpop.f32.mrb[113].mxu1 }
 0x26f   :  { %v3337_v11 = vadd.f32 %v3336_v57, %v3082_v5  ;;  %v2821_v1 = vadd.f32 %v2820_v58, %v2059_v7  ;;  %v3083_v37 = vmul.f32 %v2059_v7, %v2059_v7  ;;  %v5808_v28 = vpack.c.bf16 %v2059_v7, %v2056_v27  ;;  %v2061_v42 = vpop.f32.mrb[175].mxu0  ;;  %v7991_v43 = vpop.f32.mrb[114].mxu1 }
 0x270   :  { %8925 = vst [vmem:[#allocation13_spill] sm:$0xff] %v7991_v43  ;;  %v6053_v57 = vpack.c.bf16 %v7991_v43, %v7989_v3  ;;  %v2453_v27 = vpop.f32.mrb[115].mxu1  ;;  %v6765_v42 = vld [vmem:[%s8815_s0 + $0x770] ss:$8 sps:$4 sm:$0xff]  }
 0x271   :  { %v3338_v31 = vadd.f32 %v3337_v11, %v3083_v37  ;;  %6272 = vst [vmem:[%s8816_s2 + $0x158] sm:$0xff] %v5808_v28   ;;  %2663 = vmatmul.mubr.bf16.gmra.mrb[220].mxu1 %v6765_v42 }
 0x272   :  { %6321 = vst [vmem:[%s8816_s2 + $0x2e0] sm:$0xff] %v6053_v57   ;;  %v6766_v57 = vld [vmem:[%s8815_s0 + $0x784] ss:$8 sps:$4 sm:$0xff]  }
 0x273   :  { %2670 = vmatprep.mubr.bf16.mxu1 %v6766_v57 }
 0x274   :  { %v2064_v21 = vpop.f32.mrb[176].mxu0 }
 0x275   :  { %v2822_v58 = vadd.f32 %v2821_v1, %v2064_v21  ;;  %v3084_v28 = vmul.f32 %v2064_v21, %v2064_v21  ;;  %v2066_v5 = vpop.f32.mrb[177].mxu0  ;;  %v8007_v1 = vpop.f32.mrb[116].mxu1 }
 0x276   :  { %v2067_v7 = vpop.f32.mrb[178].mxu0  ;;  %8926 = vst [vmem:[#allocation14_spill] sm:$0xff] %v8007_v1  ;;  %v2458_v5 = vpop.f32.mrb[117].mxu1 }
 0x277   :  { %v3339_v11 = vadd.f32 %v3338_v31, %v3084_v28  ;;  %v2823_v37 = vadd.f32 %v2822_v58, %v2067_v7  ;;  %v3085_v4 = vmul.f32 %v2067_v7, %v2067_v7  ;;  %v5813_v59 = vpack.c.bf16 %v2067_v7, %v2064_v21  ;;  %v2069_v43 = vpop.f32.mrb[179].mxu0  ;;  %v8009_v45 = vpop.f32.mrb[118].mxu1 }
 0x278   :  { %8927 = vst [vmem:[#allocation15_spill] sm:$0xff] %v8009_v45  ;;  %v6058_v31 = vpack.c.bf16 %v8009_v45, %v8007_v1  ;;  %v2461_v21 = vpop.f32.mrb[119].mxu1  ;;  %v6768_v43 = vld [vmem:[%s8815_s0 + $0x780] ss:$8 sps:$4 sm:$0xff]  }
 0x279   :  { %v3340_v27 = vadd.f32 %v3339_v11, %v3085_v4  ;;  %6273 = vst [vmem:[%s8816_s2 + $0x160] sm:$0xff] %v5813_v59   ;;  %2671 = vmatmul.mubr.bf16.gmra.mrb[224].mxu1 %v6768_v43 }
 0x27a   :  { %6322 = vst [vmem:[%s8816_s2 + $0x2e8] sm:$0xff] %v6058_v31   ;;  %v6769_v31 = vld [vmem:[%s8815_s0 + $0x794] ss:$8 sps:$4 sm:$0xff]  }
 0x27b   :  { %2678 = vmatprep.mubr.bf16.mxu1 %v6769_v31 }
 0x27c   :  { %v2072_v42 = vpop.f32.mrb[180].mxu0 }
 0x27d   :  { %v2824_v58 = vadd.f32 %v2823_v37, %v2072_v42  ;;  %v3086_v59 = vmul.f32 %v2072_v42, %v2072_v42  ;;  %v2074_v28 = vpop.f32.mrb[181].mxu0  ;;  %v8025_v37 = vpop.f32.mrb[120].mxu1 }
 0x27e   :  { %v2075_v7 = vpop.f32.mrb[182].mxu0  ;;  %8928 = vst [vmem:[#allocation16_spill] sm:$0xff] %v8025_v37  ;;  %v2466_v28 = vpop.f32.mrb[121].mxu1 }
 0x27f   :  { %v3341_v11 = vadd.f32 %v3340_v27, %v3086_v59  ;;  %v2825_v4 = vadd.f32 %v2824_v58, %v2075_v7  ;;  %v3087_v5 = vmul.f32 %v2075_v7, %v2075_v7  ;;  %v5818_v3 = vpack.c.bf16 %v2075_v7, %v2072_v42  ;;  %v2077_v45 = vpop.f32.mrb[183].mxu0  ;;  %v8027_v57 = vpop.f32.mrb[122].mxu1 }
 0x280   :  { %8929 = vst [vmem:[#allocation17_spill] sm:$0xff] %v8027_v57  ;;  %v6063_v27 = vpack.c.bf16 %v8027_v57, %v8025_v37  ;;  %v2469_v42 = vpop.f32.mrb[123].mxu1  ;;  %v6771_v45 = vld [vmem:[%s8815_s0 + $0x790] ss:$8 sps:$4 sm:$0xff]  }
 0x281   :  { %v3342_v21 = vadd.f32 %v3341_v11, %v3087_v5  ;;  %6274 = vst [vmem:[%s8816_s2 + $0x168] sm:$0xff] %v5818_v3   ;;  %2679 = vmatmul.mubr.bf16.gmra.mrb[228].mxu1 %v6771_v45 }
 0x282   :  { %6323 = vst [vmem:[%s8816_s2 + $0x2f0] sm:$0xff] %v6063_v27   ;;  %v6772_v27 = vld [vmem:[%s8815_s0 + $0x7a4] ss:$8 sps:$4 sm:$0xff]  }
 0x283   :  { %2686 = vmatprep.mubr.bf16.mxu1 %v6772_v27 }
 0x284   :  { %v2080_v43 = vpop.f32.mrb[184].mxu0 }
 0x285   :  { %v2826_v58 = vadd.f32 %v2825_v4, %v2080_v43  ;;  %v3088_v3 = vmul.f32 %v2080_v43, %v2080_v43  ;;  %v2082_v59 = vpop.f32.mrb[185].mxu0  ;;  %v8043_v4 = vpop.f32.mrb[124].mxu1 }
 0x286   :  { %v2083_v7 = vpop.f32.mrb[186].mxu0  ;;  %8930 = vst [vmem:[#allocation18_spill] sm:$0xff] %v8043_v4  ;;  %v2474_v59 = vpop.f32.mrb[125].mxu1 }
 0x287   :  { %v3343_v11 = vadd.f32 %v3342_v21, %v3088_v3  ;;  %v2827_v5 = vadd.f32 %v2826_v58, %v2083_v7  ;;  %v3089_v28 = vmul.f32 %v2083_v7, %v2083_v7  ;;  %v5823_v1 = vpack.c.bf16 %v2083_v7, %v2080_v43  ;;  %v2085_v57 = vpop.f32.mrb[187].mxu0  ;;  %v8045_v31 = vpop.f32.mrb[126].mxu1 }
 0x288   :  { %8931 = vst [vmem:[#allocation19_spill] sm:$0xff] %v8045_v31  ;;  %v6068_v21 = vpack.c.bf16 %v8045_v31, %v8043_v4  ;;  %v2477_v43 = vpop.f32.mrb[127].mxu1  ;;  %v6774_v57 = vld [vmem:[%s8815_s0 + $0x7a0] ss:$8 sps:$4 sm:$0xff]  }
 0x289   :  { %v3344_v42 = vadd.f32 %v3343_v11, %v3089_v28  ;;  %6275 = vst [vmem:[%s8816_s2 + $0x170] sm:$0xff] %v5823_v1   ;;  %2687 = vmatmul.mubr.bf16.gmra.mrb[232].mxu1 %v6774_v57 }
 0x28a   :  { %6324 = vst [vmem:[%s8816_s2 + $0x2f8] sm:$0xff] %v6068_v21   ;;  %v6775_v21 = vld [vmem:[%s8815_s0 + $0x7b4] ss:$8 sps:$4 sm:$0xff]  }
 0x28b   :  { %2694 = vmatprep.mubr.bf16.mxu1 %v6775_v21 }
 0x28c   :  { %v2088_v45 = vpop.f32.mrb[188].mxu0 }
 0x28d   :  { %v2828_v58 = vadd.f32 %v2827_v5, %v2088_v45  ;;  %v3090_v1 = vmul.f32 %v2088_v45, %v2088_v45  ;;  %v2090_v3 = vpop.f32.mrb[189].mxu0  ;;  %v8061_v5 = vpop.f32.mrb[128].mxu1 }
 0x28e   :  { %v2091_v7 = vpop.f32.mrb[190].mxu0  ;;  %8932 = vst [vmem:[#allocation20_spill] sm:$0xff] %v8061_v5  ;;  %v2482_v3 = vpop.f32.mrb[129].mxu1 }
 0x28f   :  { %v3345_v11 = vadd.f32 %v3344_v42, %v3090_v1  ;;  %v2829_v28 = vadd.f32 %v2828_v58, %v2091_v7  ;;  %v3091_v59 = vmul.f32 %v2091_v7, %v2091_v7  ;;  %v5828_v37 = vpack.c.bf16 %v2091_v7, %v2088_v45  ;;  %v2093_v31 = vpop.f32.mrb[191].mxu0  ;;  %v8063_v27 = vpop.f32.mrb[130].mxu1 }
 0x290   :  { %8933 = vst [vmem:[#allocation21_spill] sm:$0xff] %v8063_v27  ;;  %v2485_v42 = vpop.f32.mrb[131].mxu1  ;;  %v6777_v31 = vld [vmem:[%s8815_s0 + $0x7b0] ss:$8 sps:$4 sm:$0xff]   ;;  %v6073_v7 = vpack.c.bf16 %v8063_v27, %v8061_v5 }
 0x291   :  { %v3346_v43 = vadd.f32 %v3345_v11, %v3091_v59  ;;  %6276 = vst [vmem:[%s8816_s2 + $0x178] sm:$0xff] %v5828_v37   ;;  %2695 = vmatmul.mubr.bf16.gmra.mrb[236].mxu1 %v6777_v31  ;;  %v6780_v31 = vld [vmem:[%s8815_s0 + $0x7c0] ss:$8 sps:$4 sm:$0xff]  }
 0x292   :  { %6325 = vst [vmem:[%s8816_s2 + $0x300] sm:$0xff] %v6073_v7  }
 0x294   :  { %v2096_v57 = vpop.f32.mrb[192].mxu0 }
 0x295   :  { %v2830_v45 = vadd.f32 %v2829_v28, %v2096_v57  ;;  %v3092_v58 = vmul.f32 %v2096_v57, %v2096_v57  ;;  %v2098_v1 = vpop.f32.mrb[193].mxu0  ;;  %v8079_v28 = vpop.f32.mrb[132].mxu1 }
 0x296   :  { %v2099_v37 = vpop.f32.mrb[194].mxu0  ;;  %8934 = vst [vmem:[#allocation22_spill] sm:$0xff] %v8079_v28  ;;  %v2490_v21 = vpop.f32.mrb[133].mxu1 }
 0x297   :  { %v3347_v11 = vadd.f32 %v3346_v43, %v3092_v58  ;;  %v2831_v59 = vadd.f32 %v2830_v45, %v2099_v37  ;;  %v3093_v3 = vmul.f32 %v2099_v37, %v2099_v37  ;;  %v5833_v4 = vpack.c.bf16 %v2099_v37, %v2096_v57  ;;  %v2101_v6 = vpop.f32.mrb[195].mxu0  ;;  %v8081_v1 = vpop.f32.mrb[134].mxu1  ;;  %v6778_v43 = vld [vmem:[%s8815_s0 + $0x7c4] ss:$8 sps:$4 sm:$0xff]  }
 0x298   :  { %8935 = vst [vmem:[#allocation23_spill] sm:$0xff] %v8081_v1  ;;  %v2493_v6 = vpop.f32.mrb[135].mxu1  ;;  %2702 = vmatprep.mubr.bf16.mxu1 %v6778_v43  ;;  %v6078_v7 = vpack.c.bf16 %v8081_v1, %v8079_v28 }
 0x299   :  { %v3348_v42 = vadd.f32 %v3347_v11, %v3093_v3  ;;  %6277 = vst [vmem:[%s8816_s2 + $0x180] sm:$0xff] %v5833_v4   ;;  %2703 = vmatmul.mubr.bf16.gmra.mrb[240].mxu1 %v6780_v31  ;;  %v6783_v31 = vld [vmem:[%s8815_s0 + $0x7d0] ss:$8 sps:$4 sm:$0xff]  }
 0x29a   :  { %6326 = vst [vmem:[%s8816_s2 + $0x308] sm:$0xff] %v6078_v7  }
 0x29c   :  { %v2104_v57 = vpop.f32.mrb[196].mxu0 }
 0x29d   :  { %v2832_v45 = vadd.f32 %v2831_v59, %v2104_v57  ;;  %v3094_v58 = vmul.f32 %v2104_v57, %v2104_v57  ;;  %v2106_v37 = vpop.f32.mrb[197].mxu0  ;;  %v8097_v59 = vpop.f32.mrb[136].mxu1 }
 0x29e   :  { %v2107_v4 = vpop.f32.mrb[198].mxu0  ;;  %8936 = vst [vmem:[#allocation24_spill] sm:$0xff] %v8097_v59  ;;  %v2498_v43 = vpop.f32.mrb[137].mxu1 }
 0x29f   :  { %v3349_v11 = vadd.f32 %v3348_v42, %v3094_v58  ;;  %v2833_v3 = vadd.f32 %v2832_v45, %v2107_v4  ;;  %v3095_v21 = vmul.f32 %v2107_v4, %v2107_v4  ;;  %v5838_v27 = vpack.c.bf16 %v2107_v4, %v2104_v57  ;;  %v2109_v5 = vpop.f32.mrb[199].mxu0  ;;  %v8099_v37 = vpop.f32.mrb[138].mxu1  ;;  %v6781_v42 = vld [vmem:[%s8815_s0 + $0x7d4] ss:$8 sps:$4 sm:$0xff]  }
 0x2a0   :  { %8937 = vst [vmem:[#allocation25_spill] sm:$0xff] %v8099_v37  ;;  %v2501_v5 = vpop.f32.mrb[139].mxu1  ;;  %2710 = vmatprep.mubr.bf16.mxu1 %v6781_v42  ;;  %v6083_v7 = vpack.c.bf16 %v8099_v37, %v8097_v59 }
 0x2a1   :  { %v3350_v6 = vadd.f32 %v3349_v11, %v3095_v21  ;;  %6278 = vst [vmem:[%s8816_s2 + $0x188] sm:$0xff] %v5838_v27   ;;  %2711 = vmatmul.mubr.bf16.gmra.mrb[244].mxu1 %v6783_v31  ;;  %v6786_v31 = vld [vmem:[%s8815_s0 + $0x7e0] ss:$8 sps:$4 sm:$0xff]  }
 0x2a2   :  { %6327 = vst [vmem:[%s8816_s2 + $0x310] sm:$0xff] %v6083_v7  }
 0x2a4   :  { %v2112_v57 = vpop.f32.mrb[200].mxu0 }
 0x2a5   :  { %v2834_v45 = vadd.f32 %v2833_v3, %v2112_v57  ;;  %v3096_v58 = vmul.f32 %v2112_v57, %v2112_v57  ;;  %v2114_v4 = vpop.f32.mrb[201].mxu0  ;;  %v8115_v3 = vpop.f32.mrb[140].mxu1 }
 0x2a6   :  { %v2115_v27 = vpop.f32.mrb[202].mxu0  ;;  %8938 = vst [vmem:[#allocation26_spill] sm:$0xff] %v8115_v3  ;;  %v2506_v42 = vpop.f32.mrb[141].mxu1 }
 0x2a7   :  { %v3351_v11 = vadd.f32 %v3350_v6, %v3096_v58  ;;  %v2835_v21 = vadd.f32 %v2834_v45, %v2115_v27  ;;  %v3097_v43 = vmul.f32 %v2115_v27, %v2115_v27  ;;  %v5843_v1 = vpack.c.bf16 %v2115_v27, %v2112_v57  ;;  %v2117_v28 = vpop.f32.mrb[203].mxu0  ;;  %v8117_v4 = vpop.f32.mrb[142].mxu1  ;;  %v6784_v6 = vld [vmem:[%s8815_s0 + $0x7e4] ss:$8 sps:$4 sm:$0xff]  }
 0x2a8   :  { %8939 = vst [vmem:[#allocation27_spill] sm:$0xff] %v8117_v4  ;;  %v2509_v28 = vpop.f32.mrb[143].mxu1  ;;  %2718 = vmatprep.mubr.bf16.mxu1 %v6784_v6  ;;  %v6088_v7 = vpack.c.bf16 %v8117_v4, %v8115_v3 }
 0x2a9   :  { %v3352_v5 = vadd.f32 %v3351_v11, %v3097_v43  ;;  %6279 = vst [vmem:[%s8816_s2 + $0x190] sm:$0xff] %v5843_v1   ;;  %2719 = vmatmul.mubr.bf16.gmra.mrb[248].mxu1 %v6786_v31  ;;  %v6789_v31 = vld [vmem:[%s8815_s0 + $0x7f0] ss:$8 sps:$4 sm:$0xff]  }
 0x2aa   :  { %6328 = vst [vmem:[%s8816_s2 + $0x318] sm:$0xff] %v6088_v7  }
 0x2ac   :  { %v2120_v57 = vpop.f32.mrb[204].mxu0 }
 0x2ad   :  { %v2836_v45 = vadd.f32 %v2835_v21, %v2120_v57  ;;  %v3098_v58 = vmul.f32 %v2120_v57, %v2120_v57  ;;  %v2122_v27 = vpop.f32.mrb[205].mxu0  ;;  %v8133_v21 = vpop.f32.mrb[144].mxu1 }
 0x2ae   :  { %v2123_v1 = vpop.f32.mrb[206].mxu0  ;;  %8940 = vst [vmem:[#allocation28_spill] sm:$0xff] %v8133_v21  ;;  %v2514_v6 = vpop.f32.mrb[145].mxu1 }
 0x2af   :  { %v3353_v11 = vadd.f32 %v3352_v5, %v3098_v58  ;;  %v2837_v43 = vadd.f32 %v2836_v45, %v2123_v1  ;;  %v3099_v42 = vmul.f32 %v2123_v1, %v2123_v1  ;;  %v5848_v37 = vpack.c.bf16 %v2123_v1, %v2120_v57  ;;  %v2125_v59 = vpop.f32.mrb[207].mxu0  ;;  %v8135_v27 = vpop.f32.mrb[146].mxu1  ;;  %v6787_v5 = vld [vmem:[%s8815_s0 + $0x7f4] ss:$8 sps:$4 sm:$0xff]  }
 0x2b0   :  { %8941 = vst [vmem:[#allocation29_spill] sm:$0xff] %v8135_v27  ;;  %v2517_v59 = vpop.f32.mrb[147].mxu1  ;;  %2726 = vmatprep.mubr.bf16.mxu1 %v6787_v5  ;;  %v6093_v7 = vpack.c.bf16 %v8135_v27, %v8133_v21 }
 0x2b1   :  { %v3354_v28 = vadd.f32 %v3353_v11, %v3099_v42  ;;  %6280 = vst [vmem:[%s8816_s2 + $0x198] sm:$0xff] %v5848_v37   ;;  %2727 = vmatmul.mubr.bf16.gmra.mrb[252].mxu1 %v6789_v31 }
 0x2b2   :  { %6329 = vst [vmem:[%s8816_s2 + $0x320] sm:$0xff] %v6093_v7  }
 0x2b4   :  { %v2128_v57 = vpop.f32.mrb[208].mxu0 }
 0x2b5   :  { %v2838_v45 = vadd.f32 %v2837_v43, %v2128_v57  ;;  %v3100_v58 = vmul.f32 %v2128_v57, %v2128_v57  ;;  %v2130_v1 = vpop.f32.mrb[209].mxu0  ;;  %v8151_v43 = vpop.f32.mrb[148].mxu1 }
 0x2b6   :  { %v2131_v37 = vpop.f32.mrb[210].mxu0  ;;  %8942 = vst [vmem:[#allocation30_spill] sm:$0xff] %v8151_v43  ;;  %v2522_v5 = vpop.f32.mrb[149].mxu1 }
 0x2b7   :  { %v3355_v11 = vadd.f32 %v3354_v28, %v3100_v58  ;;  %v2839_v42 = vadd.f32 %v2838_v45, %v2131_v37  ;;  %v3101_v6 = vmul.f32 %v2131_v37, %v2131_v37  ;;  %v5853_v4 = vpack.c.bf16 %v2131_v37, %v2128_v57  ;;  %v2133_v3 = vpop.f32.mrb[211].mxu0  ;;  %v8153_v1 = vpop.f32.mrb[150].mxu1 }
 0x2b8   :  { %8943 = vst [vmem:[#allocation31_spill] sm:$0xff] %v8153_v1  ;;  %v2525_v28 = vpop.f32.mrb[151].mxu1  ;;  %v6098_v37 = vpack.c.bf16 %v8153_v1, %v8151_v43 }
 0x2b9   :  { %v3356_v59 = vadd.f32 %v3355_v11, %v3101_v6  ;;  %6281 = vst [vmem:[%s8816_s2 + $0x1a0] sm:$0xff] %v5853_v4  }
 0x2ba   :  { %6330 = vst [vmem:[%s8816_s2 + $0x328] sm:$0xff] %v6098_v37  }
 0x2bc   :  { %v2136_v31 = vpop.f32.mrb[212].mxu0 }
 0x2bd   :  { %v2840_v45 = vadd.f32 %v2839_v42, %v2136_v31  ;;  %v3102_v58 = vmul.f32 %v2136_v31, %v2136_v31  ;;  %v2138_v57 = vpop.f32.mrb[213].mxu0  ;;  %v8163_v42 = vpop.f32.mrb[152].mxu1 }
 0x2be   :  { %v2139_v3 = vpop.f32.mrb[214].mxu0  ;;  %8944 = vst [vmem:[#allocation32_spill] sm:$0xff] %v8163_v42  ;;  %v2530_v5 = vpop.f32.mrb[153].mxu1 }
 0x2bf   :  { %v3357_v7 = vadd.f32 %v3356_v59, %v3102_v58  ;;  %v2841_v11 = vadd.f32 %v2840_v45, %v2139_v3  ;;  %v3103_v6 = vmul.f32 %v2139_v3, %v2139_v3  ;;  %v5858_v27 = vpack.c.bf16 %v2139_v3, %v2136_v31  ;;  %v2141_v21 = vpop.f32.mrb[215].mxu0  ;;  %v8165_v28 = vpop.f32.mrb[154].mxu1 }
 0x2c0   :  { %8945 = vst [vmem:[#allocation33_spill] sm:$0xff] %v8165_v28  ;;  %v2533_v59 = vpop.f32.mrb[155].mxu1  ;;  %v6103_v3 = vpack.c.bf16 %v8165_v28, %v8163_v42 }
 0x2c1   :  { %v3358_v4 = vadd.f32 %v3357_v7, %v3103_v6  ;;  %6282 = vst [vmem:[%s8816_s2 + $0x1a8] sm:$0xff] %v5858_v27  }
 0x2c2   :  { %6331 = vst [vmem:[%s8816_s2 + $0x330] sm:$0xff] %v6103_v3  }
 0x2c4   :  { %v2144_v57 = vpop.f32.mrb[216].mxu0 }
 0x2c5   :  { %v2842_v45 = vadd.f32 %v2841_v11, %v2144_v57  ;;  %v3104_v58 = vmul.f32 %v2144_v57, %v2144_v57  ;;  %v2146_v31 = vpop.f32.mrb[217].mxu0  ;;  %v8175_v11 = vpop.f32.mrb[156].mxu1 }
 0x2c6   :  { %v2147_v21 = vpop.f32.mrb[218].mxu0  ;;  %8946 = vst [vmem:[#allocation34_spill] sm:$0xff] %v8175_v11  ;;  %v2538_v5 = vpop.f32.mrb[157].mxu1 }
 0x2c7   :  { %v3359_v37 = vadd.f32 %v3358_v4, %v3104_v58  ;;  %v2843_v7 = vadd.f32 %v2842_v45, %v2147_v21  ;;  %v3105_v6 = vmul.f32 %v2147_v21, %v2147_v21  ;;  %v5863_v1 = vpack.c.bf16 %v2147_v21, %v2144_v57  ;;  %v2149_v43 = vpop.f32.mrb[219].mxu0  ;;  %v8177_v59 = vpop.f32.mrb[158].mxu1 }
 0x2c8   :  { %8947 = vst [vmem:[#allocation35_spill] sm:$0xff] %v8177_v59  ;;  %v2541_v4 = vpop.f32.mrb[159].mxu1  ;;  %v6108_v21 = vpack.c.bf16 %v8177_v59, %v8175_v11 }
 0x2c9   :  { %v3360_v27 = vadd.f32 %v3359_v37, %v3105_v6  ;;  %6283 = vst [vmem:[%s8816_s2 + $0x1b0] sm:$0xff] %v5863_v1  }
 0x2ca   :  { %6332 = vst [vmem:[%s8816_s2 + $0x338] sm:$0xff] %v6108_v21  }
 0x2cc   :  { %v2152_v31 = vpop.f32.mrb[220].mxu0 }
 0x2cd   :  { %v2844_v45 = vadd.f32 %v2843_v7, %v2152_v31  ;;  %v3106_v58 = vmul.f32 %v2152_v31, %v2152_v31  ;;  %v2154_v57 = vpop.f32.mrb[221].mxu0  ;;  %v8187_v7 = vpop.f32.mrb[160].mxu1 }
 0x2ce   :  { %v2155_v43 = vpop.f32.mrb[222].mxu0  ;;  %8948 = vst [vmem:[#allocation36_spill] sm:$0xff] %v8187_v7  ;;  %v2546_v5 = vpop.f32.mrb[161].mxu1 }
 0x2cf   :  { %v3361_v3 = vadd.f32 %v3360_v27, %v3106_v58  ;;  %v2845_v37 = vadd.f32 %v2844_v45, %v2155_v43  ;;  %v3107_v6 = vmul.f32 %v2155_v43, %v2155_v43  ;;  %v5868_v28 = vpack.c.bf16 %v2155_v43, %v2152_v31  ;;  %v2157_v42 = vpop.f32.mrb[223].mxu0  ;;  %v8189_v4 = vpop.f32.mrb[162].mxu1 }
 0x2d0   :  { %8949 = vst [vmem:[#allocation37_spill] sm:$0xff] %v8189_v4  ;;  %v2549_v27 = vpop.f32.mrb[163].mxu1  ;;  %v6113_v43 = vpack.c.bf16 %v8189_v4, %v8187_v7 }
 0x2d1   :  { %v3362_v1 = vadd.f32 %v3361_v3, %v3107_v6  ;;  %6284 = vst [vmem:[%s8816_s2 + $0x1b8] sm:$0xff] %v5868_v28  }
 0x2d2   :  { %6333 = vst [vmem:[%s8816_s2 + $0x340] sm:$0xff] %v6113_v43  }
 0x2d4   :  { %v2160_v57 = vpop.f32.mrb[224].mxu0 }
 0x2d5   :  { %v2846_v45 = vadd.f32 %v2845_v37, %v2160_v57  ;;  %v3108_v58 = vmul.f32 %v2160_v57, %v2160_v57  ;;  %v2162_v31 = vpop.f32.mrb[225].mxu0  ;;  %v8199_v37 = vpop.f32.mrb[164].mxu1 }
 0x2d6   :  { %v2163_v42 = vpop.f32.mrb[226].mxu0  ;;  %8950 = vst [vmem:[#allocation38_spill] sm:$0xff] %v8199_v37  ;;  %v2554_v5 = vpop.f32.mrb[165].mxu1 }
 0x2d7   :  { %v3363_v21 = vadd.f32 %v3362_v1, %v3108_v58  ;;  %v2847_v3 = vadd.f32 %v2846_v45, %v2163_v42  ;;  %v3109_v6 = vmul.f32 %v2163_v42, %v2163_v42  ;;  %v5873_v59 = vpack.c.bf16 %v2163_v42, %v2160_v57  ;;  %v2165_v11 = vpop.f32.mrb[227].mxu0  ;;  %v8201_v27 = vpop.f32.mrb[166].mxu1 }
 0x2d8   :  { %8951 = vst [vmem:[#allocation39_spill] sm:$0xff] %v8201_v27  ;;  %v2557_v1 = vpop.f32.mrb[167].mxu1  ;;  %v6118_v42 = vpack.c.bf16 %v8201_v27, %v8199_v37 }
 0x2d9   :  { %v3364_v28 = vadd.f32 %v3363_v21, %v3109_v6  ;;  %6285 = vst [vmem:[%s8816_s2 + $0x1c0] sm:$0xff] %v5873_v59  }
 0x2da   :  { %6334 = vst [vmem:[%s8816_s2 + $0x348] sm:$0xff] %v6118_v42  }
 0x2dc   :  { %v2168_v31 = vpop.f32.mrb[228].mxu0 }
 0x2dd   :  { %v2848_v45 = vadd.f32 %v2847_v3, %v2168_v31  ;;  %v3110_v58 = vmul.f32 %v2168_v31, %v2168_v31  ;;  %v2170_v57 = vpop.f32.mrb[229].mxu0  ;;  %v8211_v3 = vpop.f32.mrb[168].mxu1 }
 0x2de   :  { %v2171_v11 = vpop.f32.mrb[230].mxu0  ;;  %8952 = vst [vmem:[#allocation40_spill] sm:$0xff] %v8211_v3  ;;  %v2562_v5 = vpop.f32.mrb[169].mxu1 }
 0x2df   :  { %v3365_v43 = vadd.f32 %v3364_v28, %v3110_v58  ;;  %v2849_v21 = vadd.f32 %v2848_v45, %v2171_v11  ;;  %v3111_v6 = vmul.f32 %v2171_v11, %v2171_v11  ;;  %v5878_v4 = vpack.c.bf16 %v2171_v11, %v2168_v31  ;;  %v2173_v7 = vpop.f32.mrb[231].mxu0  ;;  %v8213_v1 = vpop.f32.mrb[170].mxu1 }
 0x2e0   :  { %8953 = vst [vmem:[#allocation41_spill] sm:$0xff] %v8213_v1  ;;  %v2565_v28 = vpop.f32.mrb[171].mxu1  ;;  %v6123_v11 = vpack.c.bf16 %v8213_v1, %v8211_v3 }
 0x2e1   :  { %v3366_v59 = vadd.f32 %v3365_v43, %v3111_v6  ;;  %6286 = vst [vmem:[%s8816_s2 + $0x1c8] sm:$0xff] %v5878_v4  }
 0x2e2   :  { %6335 = vst [vmem:[%s8816_s2 + $0x350] sm:$0xff] %v6123_v11  }
 0x2e4   :  { %v2176_v57 = vpop.f32.mrb[232].mxu0 }
 0x2e5   :  { %v2850_v45 = vadd.f32 %v2849_v21, %v2176_v57  ;;  %v3112_v58 = vmul.f32 %v2176_v57, %v2176_v57  ;;  %v2178_v31 = vpop.f32.mrb[233].mxu0  ;;  %v8223_v21 = vpop.f32.mrb[172].mxu1 }
 0x2e6   :  { %v2179_v7 = vpop.f32.mrb[234].mxu0  ;;  %8954 = vst [vmem:[#allocation42_spill] sm:$0xff] %v8223_v21  ;;  %v2570_v5 = vpop.f32.mrb[173].mxu1 }
 0x2e7   :  { %v3367_v42 = vadd.f32 %v3366_v59, %v3112_v58  ;;  %v2851_v43 = vadd.f32 %v2850_v45, %v2179_v7  ;;  %v3113_v6 = vmul.f32 %v2179_v7, %v2179_v7  ;;  %v5883_v27 = vpack.c.bf16 %v2179_v7, %v2176_v57  ;;  %v2181_v37 = vpop.f32.mrb[235].mxu0  ;;  %v8225_v28 = vpop.f32.mrb[174].mxu1 }
 0x2e8   :  { %8955 = vst [vmem:[#allocation43_spill] sm:$0xff] %v8225_v28  ;;  %v2573_v59 = vpop.f32.mrb[175].mxu1  ;;  %v6128_v7 = vpack.c.bf16 %v8225_v28, %v8223_v21 }
 0x2e9   :  { %v3368_v4 = vadd.f32 %v3367_v42, %v3113_v6  ;;  %6287 = vst [vmem:[%s8816_s2 + $0x1d0] sm:$0xff] %v5883_v27  }
 0x2ea   :  { %6336 = vst [vmem:[%s8816_s2 + $0x358] sm:$0xff] %v6128_v7  }
 0x2ec   :  { %v2184_v31 = vpop.f32.mrb[236].mxu0 }
 0x2ed   :  { %v2852_v45 = vadd.f32 %v2851_v43, %v2184_v31  ;;  %v3114_v58 = vmul.f32 %v2184_v31, %v2184_v31  ;;  %v2186_v57 = vpop.f32.mrb[237].mxu0  ;;  %v8235_v43 = vpop.f32.mrb[176].mxu1 }
 0x2ee   :  { %v2187_v37 = vpop.f32.mrb[238].mxu0  ;;  %8956 = vst [vmem:[#allocation44_spill] sm:$0xff] %v8235_v43  ;;  %v2578_v5 = vpop.f32.mrb[177].mxu1 }
 0x2ef   :  { %v3369_v11 = vadd.f32 %v3368_v4, %v3114_v58  ;;  %v2853_v42 = vadd.f32 %v2852_v45, %v2187_v37  ;;  %v3115_v6 = vmul.f32 %v2187_v37, %v2187_v37  ;;  %v5888_v1 = vpack.c.bf16 %v2187_v37, %v2184_v31  ;;  %v2189_v3 = vpop.f32.mrb[239].mxu0  ;;  %v8237_v59 = vpop.f32.mrb[178].mxu1 }
 0x2f0   :  { %8957 = vst [vmem:[#allocation45_spill] sm:$0xff] %v8237_v59  ;;  %v2581_v4 = vpop.f32.mrb[179].mxu1  ;;  %v6133_v37 = vpack.c.bf16 %v8237_v59, %v8235_v43 }
 0x2f1   :  { %v3370_v27 = vadd.f32 %v3369_v11, %v3115_v6  ;;  %6288 = vst [vmem:[%s8816_s2 + $0x1d8] sm:$0xff] %v5888_v1  }
 0x2f2   :  { %6337 = vst [vmem:[%s8816_s2 + $0x360] sm:$0xff] %v6133_v37  }
 0x2f4   :  { %v2192_v57 = vpop.f32.mrb[240].mxu0 }
 0x2f5   :  { %v2854_v45 = vadd.f32 %v2853_v42, %v2192_v57  ;;  %v3116_v58 = vmul.f32 %v2192_v57, %v2192_v57  ;;  %v2194_v31 = vpop.f32.mrb[241].mxu0  ;;  %v8247_v42 = vpop.f32.mrb[180].mxu1 }
 0x2f6   :  { %v2195_v3 = vpop.f32.mrb[242].mxu0  ;;  %8958 = vst [vmem:[#allocation46_spill] sm:$0xff] %v8247_v42  ;;  %v2586_v5 = vpop.f32.mrb[181].mxu1 }
 0x2f7   :  { %v3371_v7 = vadd.f32 %v3370_v27, %v3116_v58  ;;  %v2855_v11 = vadd.f32 %v2854_v45, %v2195_v3  ;;  %v3117_v6 = vmul.f32 %v2195_v3, %v2195_v3  ;;  %v5893_v28 = vpack.c.bf16 %v2195_v3, %v2192_v57  ;;  %v2197_v21 = vpop.f32.mrb[243].mxu0  ;;  %v8249_v4 = vpop.f32.mrb[182].mxu1 }
 0x2f8   :  { %8959 = vst [vmem:[#allocation47_spill] sm:$0xff] %v8249_v4  ;;  %v2589_v27 = vpop.f32.mrb[183].mxu1  ;;  %v6138_v3 = vpack.c.bf16 %v8249_v4, %v8247_v42 }
 0x2f9   :  { %v3372_v1 = vadd.f32 %v3371_v7, %v3117_v6  ;;  %6289 = vst [vmem:[%s8816_s2 + $0x1e0] sm:$0xff] %v5893_v28  }
 0x2fa   :  { %6338 = vst [vmem:[%s8816_s2 + $0x368] sm:$0xff] %v6138_v3  }
 0x2fc   :  { %v2200_v31 = vpop.f32.mrb[244].mxu0 }
 0x2fd   :  { %v2856_v45 = vadd.f32 %v2855_v11, %v2200_v31  ;;  %v3118_v58 = vmul.f32 %v2200_v31, %v2200_v31  ;;  %v2202_v57 = vpop.f32.mrb[245].mxu0  ;;  %v8259_v11 = vpop.f32.mrb[184].mxu1 }
 0x2fe   :  { %v2203_v21 = vpop.f32.mrb[246].mxu0  ;;  %8960 = vst [vmem:[#allocation48_spill] sm:$0xff] %v8259_v11  ;;  %v2594_v5 = vpop.f32.mrb[185].mxu1 }
 0x2ff   :  { %v3373_v37 = vadd.f32 %v3372_v1, %v3118_v58  ;;  %v2857_v7 = vadd.f32 %v2856_v45, %v2203_v21  ;;  %v3119_v6 = vmul.f32 %v2203_v21, %v2203_v21  ;;  %v5898_v59 = vpack.c.bf16 %v2203_v21, %v2200_v31  ;;  %v2205_v43 = vpop.f32.mrb[247].mxu0  ;;  %v8261_v27 = vpop.f32.mrb[186].mxu1 }
 0x300   :  { %8961 = vst [vmem:[#allocation49_spill] sm:$0xff] %v8261_v27  ;;  %v2597_v1 = vpop.f32.mrb[187].mxu1  ;;  %v6143_v21 = vpack.c.bf16 %v8261_v27, %v8259_v11 }
 0x301   :  { %v3374_v28 = vadd.f32 %v3373_v37, %v3119_v6  ;;  %6290 = vst [vmem:[%s8816_s2 + $0x1e8] sm:$0xff] %v5898_v59  }
 0x302   :  { %6339 = vst [vmem:[%s8816_s2 + $0x370] sm:$0xff] %v6143_v21  }
 0x304   :  { %v2208_v57 = vpop.f32.mrb[248].mxu0 }
 0x305   :  { %v2858_v45 = vadd.f32 %v2857_v7, %v2208_v57  ;;  %v3120_v58 = vmul.f32 %v2208_v57, %v2208_v57  ;;  %v2210_v31 = vpop.f32.mrb[249].mxu0  ;;  %v8271_v7 = vpop.f32.mrb[188].mxu1 }
 0x306   :  { %v2211_v43 = vpop.f32.mrb[250].mxu0  ;;  %v2602_v5 = vpop.f32.mrb[189].mxu1 }
 0x307   :  { %v3375_v3 = vadd.f32 %v3374_v28, %v3120_v58  ;;  %v2859_v37 = vadd.f32 %v2858_v45, %v2211_v43  ;;  %v3121_v6 = vmul.f32 %v2211_v43, %v2211_v43  ;;  %v5903_v4 = vpack.c.bf16 %v2211_v43, %v2208_v57  ;;  %v2213_v42 = vpop.f32.mrb[251].mxu0  ;;  %v8273_v1 = vpop.f32.mrb[190].mxu1 }
 0x308   :  { %v2605_v28 = vpop.f32.mrb[191].mxu1  ;;  %v6148_v43 = vpack.c.bf16 %v8273_v1, %v8271_v7 }
 0x309   :  { %v3376_v59 = vadd.f32 %v3375_v3, %v3121_v6  ;;  %6291 = vst [vmem:[%s8816_s2 + $0x1f0] sm:$0xff] %v5903_v4   ;;  %v3124_v4 = vmul.f32 %v7362_v12, %v7362_v12 }
 0x30a   :  { %6340 = vst [vmem:[%s8816_s2 + $0x378] sm:$0xff] %v6148_v43  }
 0x30b   :  { %v8286_v28 = vpop.f32.mrb[192].mxu1 }
 0x30c   :  { %v2216_v31 = vpop.f32.mrb[252].mxu0 }
 0x30d   :  { %v2860_v45 = vadd.f32 %v2859_v37, %v2216_v31  ;;  %v3122_v58 = vmul.f32 %v2216_v31, %v2216_v31  ;;  %v2218_v57 = vpop.f32.mrb[253].mxu0 }
 0x30e   :  { %v2219_v42 = vpop.f32.mrb[254].mxu0 }
 0x30f   :  { %v3377_v21 = vadd.f32 %v3376_v59, %v3122_v58  ;;  %v2861_v3 = vadd.f32 %v2860_v45, %v2219_v42  ;;  %v3123_v6 = vmul.f32 %v2219_v42, %v2219_v42  ;;  %v5908_v27 = vpack.c.bf16 %v2219_v42, %v2216_v31  ;;  %v2221_v11 = vpop.f32.mrb[255].mxu0  ;;  %v2610_v59 = vpop.f32.mrb[193].mxu1 }
 0x310   :  { %v3125_v11 = vmul.f32 %v7364_v14, %v7364_v14  ;;  %v8291_v58 = vpop.f32.mrb[194].mxu1  ;;  %v3129_v59 = vmul.f32 %v7412_v54, %v7412_v54 }
 0x311   :  { %v2862_v37 = vadd.f32 %v2861_v3, %v7362_v12  ;;  %v3378_v5 = vadd.f32 %v3377_v21, %v3123_v6  ;;  %6292 = vst [vmem:[%s8816_s2 + $0x1f8] sm:$0xff] %v5908_v27   ;;  %v2613_v57 = vpop.f32.mrb[195].mxu1  ;;  %v3126_v12 = vmul.f32 %v7386_v32, %v7386_v32  ;;  %v6153_v27 = vpack.c.bf16 %v8291_v58, %v8286_v28 }
 0x312   :  { %v3127_v21 = vmul.f32 %v7388_v34, %v7388_v34  ;;  %v3130_v57 = vmul.f32 %v7434_v8, %v7434_v8 }
 0x313   :  { %v2863_v31 = vadd.f32 %v2862_v37, %v7364_v14  ;;  %v3379_v45 = vadd.f32 %v3378_v5, %v3124_v4  ;;  %6341 = vst [vmem:[%s8816_s2 + $0x380] sm:$0xff] %v6153_v27   ;;  %v3128_v14 = vmul.f32 %v7410_v52, %v7410_v52  ;;  %v8307_v37 = vpop.f32.mrb[196].mxu1 }
 0x314   :  { %v2618_v5 = vpop.f32.mrb[197].mxu1 }
 0x315   :  { %v2864_v42 = vadd.f32 %v2863_v31, %v7386_v32  ;;  %v3380_v43 = vadd.f32 %v3379_v45, %v3125_v11  ;;  %v8312_v31 = vpop.f32.mrb[198].mxu1 }
 0x316   :  { %v2621_v45 = vpop.f32.mrb[199].mxu1 }
 0x317   :  { %v2865_v3 = vadd.f32 %v2864_v42, %v7388_v34  ;;  %v3381_v6 = vadd.f32 %v3380_v43, %v3126_v12  ;;  %v3131_v43 = vmul.f32 %v7436_v10, %v7436_v10 }
 0x319   :  { %v2866_v4 = vadd.f32 %v2865_v3, %v7410_v52  ;;  %v3382_v32 = vadd.f32 %v3381_v6, %v3127_v21  ;;  %v6158_v52 = vpack.c.bf16 %v8312_v31, %v8307_v37 }
 0x31b   :  { %v2867_v11 = vadd.f32 %v2866_v4, %v7412_v54  ;;  %v3383_v34 = vadd.f32 %v3382_v32, %v3128_v14  ;;  %6342 = vst [vmem:[%s8816_s2 + $0x388] sm:$0xff] %v6158_v52   ;;  %v3132_v54 = vmul.f32 %v7458_v30, %v7458_v30  ;;  %v8328_v6 = vpop.f32.mrb[200].mxu1  ;;  %v3133_v4 = vmul.f32 %v7460_v33, %v7460_v33 }
 0x31c   :  { %v2626_v14 = vpop.f32.mrb[201].mxu1 }
 0x31d   :  { %v2868_v12 = vadd.f32 %v2867_v11, %v7434_v8  ;;  %v3384_v42 = vadd.f32 %v3383_v34, %v3129_v59  ;;  %v8333_v5 = vpop.f32.mrb[202].mxu1  ;;  %v3134_v11 = vmul.f32 %v7482_v53, %v7482_v53  ;;  %v3138_v14 = vmul.f32 %v7530_v38, %v7530_v38 }
 0x31e   :  { %v2629_v59 = vpop.f32.mrb[203].mxu1 }
 0x31f   :  { %v2869_v27 = vadd.f32 %v2868_v12, %v7436_v10  ;;  %v3385_v21 = vadd.f32 %v3384_v42, %v3130_v57  ;;  %v3135_v57 = vmul.f32 %v7484_v56, %v7484_v56 }
 0x321   :  { %v2870_v3 = vadd.f32 %v2869_v27, %v7458_v30  ;;  %v3386_v8 = vadd.f32 %v3385_v21, %v3131_v43  ;;  %v6163_v30 = vpack.c.bf16 %v8333_v5, %v8328_v6  ;;  %v3137_v21 = vmul.f32 %v7508_v16, %v7508_v16 }
 0x323   :  { %v2871_v32 = vadd.f32 %v2870_v3, %v7460_v33  ;;  %v3387_v10 = vadd.f32 %v3386_v8, %v3132_v54  ;;  %6343 = vst [vmem:[%s8816_s2 + $0x390] sm:$0xff] %v6163_v30   ;;  %v3136_v33 = vmul.f32 %v7506_v13, %v7506_v13  ;;  %v8349_v43 = vpop.f32.mrb[204].mxu1 }
 0x324   :  { %v2634_v27 = vpop.f32.mrb[205].mxu1 }
 0x325   :  { %v2872_v34 = vadd.f32 %v2871_v32, %v7482_v53  ;;  %v3388_v45 = vadd.f32 %v3387_v10, %v3133_v4  ;;  %v8354_v3 = vpop.f32.mrb[206].mxu1  ;;  %v3139_v10 = vmul.f32 %v7532_v40, %v7532_v40 }
 0x326   :  { %v2637_v8 = vpop.f32.mrb[207].mxu1 }
 0x327   :  { %v2873_v12 = vadd.f32 %v2872_v34, %v7484_v56  ;;  %v3389_v42 = vadd.f32 %v3388_v45, %v3134_v11 }
 0x329   :  { %v2874_v52 = vadd.f32 %v2873_v12, %v7506_v13  ;;  %v3390_v53 = vadd.f32 %v3389_v42, %v3135_v57  ;;  %v6168_v13 = vpack.c.bf16 %v8354_v3, %v8349_v43  ;;  %v3141_v57 = vmul.f32 %v7556_v0, %v7556_v0 }
 0x32b   :  { %v2875_v54 = vadd.f32 %v2874_v52, %v7508_v16  ;;  %v3391_v56 = vadd.f32 %v3390_v53, %v3136_v33  ;;  %6344 = vst [vmem:[%s8816_s2 + $0x398] sm:$0xff] %v6168_v13   ;;  %v3140_v16 = vmul.f32 %v7554_v62, %v7554_v62  ;;  %v3142_v52 = vmul.f32 %v7578_v24, %v7578_v24 }
 0x32c   :  { %v8370_v45 = vpop.f32.mrb[208].mxu1 }
 0x32d   :  { %v2876_v4 = vadd.f32 %v2875_v54, %v7530_v38  ;;  %v3392_v32 = vadd.f32 %v3391_v56, %v3137_v21  ;;  %v2642_v30 = vpop.f32.mrb[209].mxu1  ;;  %v3143_v21 = vmul.f32 %v7580_v26, %v7580_v26 }
 0x32e   :  { %v8375_v42 = vpop.f32.mrb[210].mxu1 }
 0x32f   :  { %v2877_v59 = vadd.f32 %v2876_v4, %v7532_v40  ;;  %v3393_v11 = vadd.f32 %v3392_v32, %v3138_v14  ;;  %v2645_v33 = vpop.f32.mrb[211].mxu1  ;;  %v3145_v32 = vmul.f32 %v7604_v55, %v7604_v55 }
 0x331   :  { %v2878_v34 = vadd.f32 %v2877_v59, %v7554_v62  ;;  %v3394_v38 = vadd.f32 %v3393_v11, %v3139_v10  ;;  %v6173_v62 = vpack.c.bf16 %v8375_v42, %v8370_v45  ;;  %v3146_v11 = vmul.f32 %v7626_v18, %v7626_v18 }
 0x333   :  { %v2879_v12 = vadd.f32 %v2878_v34, %v7556_v0  ;;  %v3395_v40 = vadd.f32 %v3394_v38, %v3140_v16  ;;  %6345 = vst [vmem:[%s8816_s2 + $0x3a0] sm:$0xff] %v6173_v62   ;;  %v3144_v0 = vmul.f32 %v7602_v50, %v7602_v50  ;;  %v3147_v38 = vmul.f32 %v7628_v20, %v7628_v20 }
 0x334   :  { %v8391_v14 = vpop.f32.mrb[212].mxu1 }
 0x335   :  { %v2880_v53 = vadd.f32 %v2879_v12, %v7578_v24  ;;  %v3396_v27 = vadd.f32 %v3395_v40, %v3141_v57  ;;  %v2650_v4 = vpop.f32.mrb[213].mxu1 }
 0x336   :  { %v8396_v10 = vpop.f32.mrb[214].mxu1 }
 0x337   :  { %v2881_v54 = vadd.f32 %v2880_v53, %v7580_v26  ;;  %v3397_v56 = vadd.f32 %v3396_v27, %v3142_v52  ;;  %v2653_v59 = vpop.f32.mrb[215].mxu1  ;;  %v3149_v52 = vmul.f32 %v7652_v48, %v7652_v48 }
 0x339   :  { %v2882_v8 = vadd.f32 %v2881_v54, %v7602_v50  ;;  %v3398_v24 = vadd.f32 %v3397_v56, %v3143_v21  ;;  %v6178_v50 = vpack.c.bf16 %v8396_v10, %v8391_v14  ;;  %v3150_v21 = vmul.f32 %v7674_v15, %v7674_v15 }
 0x33b   :  { %v2883_v13 = vadd.f32 %v2882_v8, %v7604_v55  ;;  %v3399_v26 = vadd.f32 %v3398_v24, %v3144_v0  ;;  %6346 = vst [vmem:[%s8816_s2 + $0x3a8] sm:$0xff] %v6178_v50   ;;  %v3148_v55 = vmul.f32 %v7650_v46, %v7650_v46  ;;  %v3151_v0 = vmul.f32 %v7676_v19, %v7676_v19 }
 0x33c   :  { %v8412_v40 = vpop.f32.mrb[216].mxu1 }
 0x33d   :  { %v2884_v16 = vadd.f32 %v2883_v13, %v7626_v18  ;;  %v3400_v34 = vadd.f32 %v3399_v26, %v3145_v32  ;;  %v2658_v33 = vpop.f32.mrb[217].mxu1  ;;  %v3153_v26 = vmul.f32 %v7700_v51, %v7700_v51 }
 0x33e   :  { %v8417_v27 = vpop.f32.mrb[218].mxu1 }
 0x33f   :  { %v2885_v30 = vadd.f32 %v2884_v16, %v7628_v20  ;;  %v3401_v57 = vadd.f32 %v3400_v34, %v3146_v11  ;;  %v2661_v62 = vpop.f32.mrb[219].mxu1  ;;  %v3154_v34 = vmul.f32 %v7722_v22, %v7722_v22 }
 0x341   :  { %v2886_v12 = vadd.f32 %v2885_v30, %v7650_v46  ;;  %v3402_v18 = vadd.f32 %v3401_v57, %v3147_v38  ;;  %v6183_v46 = vpack.c.bf16 %v8417_v27, %v8412_v40  ;;  %v3155_v30 = vmul.f32 %v7724_v25, %v7724_v25 }
 0x343   :  { %v2887_v53 = vadd.f32 %v2886_v12, %v7652_v48  ;;  %v3403_v20 = vadd.f32 %v3402_v18, %v3148_v55  ;;  %6347 = vst [vmem:[%s8816_s2 + $0x3b0] sm:$0xff] %v6183_v46   ;;  %v3152_v48 = vmul.f32 %v7698_v47, %v7698_v47  ;;  %v3159_v46 = vmul.f32 %v7772_v39, %v7772_v39 }
 0x344   :  { %v8433_v32 = vpop.f32.mrb[220].mxu1 }
 0x345   :  { %v2888_v54 = vadd.f32 %v2887_v53, %v7674_v15  ;;  %v3404_v56 = vadd.f32 %v3403_v20, %v3149_v52  ;;  %v2666_v13 = vpop.f32.mrb[221].mxu1  ;;  %v3157_v52 = vmul.f32 %v7748_v63, %v7748_v63 }
 0x346   :  { %v8438_v11 = vpop.f32.mrb[222].mxu1 }
 0x347   :  { %v2889_v8 = vadd.f32 %v2888_v54, %v7676_v19  ;;  %v3405_v24 = vadd.f32 %v3404_v56, %v3150_v21  ;;  %v2669_v16 = vpop.f32.mrb[223].mxu1  ;;  %v3158_v21 = vmul.f32 %v7770_v36, %v7770_v36 }
 0x349   :  { %v2890_v4 = vadd.f32 %v2889_v8, %v7698_v47  ;;  %v3406_v15 = vadd.f32 %v3405_v24, %v3151_v0  ;;  %v6188_v47 = vpack.c.bf16 %v8438_v11, %v8433_v32 }
 0x34b   :  { %v2891_v59 = vadd.f32 %v2890_v4, %v7700_v51  ;;  %v3407_v19 = vadd.f32 %v3406_v15, %v3152_v48  ;;  %6348 = vst [vmem:[%s8816_s2 + $0x3b8] sm:$0xff] %v6188_v47   ;;  %v3156_v51 = vmul.f32 %v7746_v60, %v7746_v60  ;;  %v3161_v15 = vmul.f32 %v7796_v17, %v7796_v17 }
 0x34c   :  { %v8454_v18 = vpop.f32.mrb[224].mxu1 }
 0x34d   :  { %v2892_v50 = vadd.f32 %v2891_v59, %v7722_v22  ;;  %v3408_v38 = vadd.f32 %v3407_v19, %v3153_v26  ;;  %v2674_v33 = vpop.f32.mrb[225].mxu1  ;;  %v3162_v19 = vmul.f32 %v7818_v61, %v7818_v61 }
 0x34e   :  { %v8459_v20 = vpop.f32.mrb[226].mxu1 }
 0x34f   :  { %v2893_v57 = vadd.f32 %v2892_v50, %v7724_v25  ;;  %v3409_v55 = vadd.f32 %v3408_v38, %v3154_v34  ;;  %v2677_v62 = vpop.f32.mrb[227].mxu1  ;;  %v3163_v50 = vmul.f32 %v7820_v2, %v7820_v2 }
 0x350   :  { %v3167_v62 = vmul.f32 %v7865_v41, %v7865_v41 }
 0x351   :  { %v2894_v12 = vadd.f32 %v2893_v57, %v7746_v60  ;;  %v3410_v22 = vadd.f32 %v3409_v55, %v3155_v30  ;;  %v6193_v60 = vpack.c.bf16 %v8459_v20, %v8454_v18 }
 0x353   :  { %v2895_v53 = vadd.f32 %v2894_v12, %v7748_v63  ;;  %v3411_v25 = vadd.f32 %v3410_v22, %v3156_v51  ;;  %6349 = vst [vmem:[%s8816_s2 + $0x3c0] sm:$0xff] %v6193_v60   ;;  %v3160_v63 = vmul.f32 %v7794_v9, %v7794_v9  ;;  %v3165_v51 = vmul.f32 %v7844_v49, %v7844_v49 }
 0x354   :  { %v8475_v48 = vpop.f32.mrb[228].mxu1 }
 0x355   :  { %v2896_v54 = vadd.f32 %v2895_v53, %v7770_v36  ;;  %v3412_v56 = vadd.f32 %v3411_v25, %v3157_v52  ;;  %v2682_v4 = vpop.f32.mrb[229].mxu1  ;;  %v3166_v52 = vmul.f32 %v7863_v35, %v7863_v35 }
 0x356   :  { %v8480_v26 = vpop.f32.mrb[230].mxu1 }
 0x357   :  { %v2897_v0 = vadd.f32 %v2896_v54, %v7772_v39  ;;  %v3413_v8 = vadd.f32 %v3412_v56, %v3158_v21  ;;  %v2685_v59 = vpop.f32.mrb[231].mxu1 }
 0x359   :  { %v2898_v24 = vadd.f32 %v2897_v0, %v7794_v9  ;;  %v3414_v36 = vadd.f32 %v3413_v8, %v3159_v46  ;;  %v6198_v9 = vpack.c.bf16 %v8480_v26, %v8475_v48  ;;  %v3169_v0 = vmul.f32 %v7883_v29, %v7883_v29 }
 0x35b   :  { %v2899_v13 = vadd.f32 %v2898_v24, %v7796_v17  ;;  %v3415_v39 = vadd.f32 %v3414_v36, %v3160_v63  ;;  %6350 = vst [vmem:[%s8816_s2 + $0x3c8] sm:$0xff] %v6198_v9   ;;  %v3164_v17 = vmul.f32 %v7842_v44, %v7842_v44  ;;  %v8962_v36 = vld [vmem:[#allocation2_spill] sm:$0xff] }
 0x35c   :  { %v8496_v57 = vpop.f32.mrb[232].mxu1  ;;  %v3170_v4 = vmul.f32 %v8962_v36, %v8962_v36 }
 0x35d   :  { %v2900_v16 = vadd.f32 %v2899_v13, %v7818_v61  ;;  %v3416_v34 = vadd.f32 %v3415_v39, %v3161_v15  ;;  %v2690_v55 = vpop.f32.mrb[233].mxu1  ;;  %v8963_v39 = vld [vmem:[#allocation3_spill] sm:$0xff] }
 0x35e   :  { %v8501_v22 = vpop.f32.mrb[234].mxu1  ;;  %v3171_v59 = vmul.f32 %v8963_v39, %v8963_v39 }
 0x35f   :  { %v2901_v38 = vadd.f32 %v2900_v16, %v7820_v2  ;;  %v3417_v47 = vadd.f32 %v3416_v34, %v3162_v19  ;;  %v2693_v33 = vpop.f32.mrb[235].mxu1 }
 0x361   :  { %v2902_v30 = vadd.f32 %v2901_v38, %v7842_v44  ;;  %v3418_v61 = vadd.f32 %v3417_v47, %v3163_v50  ;;  %v6203_v44 = vpack.c.bf16 %v8501_v22, %v8496_v57 }
 0x363   :  { %v2903_v12 = vadd.f32 %v2902_v30, %v7844_v49  ;;  %v3419_v2 = vadd.f32 %v3418_v61, %v3164_v17  ;;  %6351 = vst [vmem:[%s8816_s2 + $0x3d0] sm:$0xff] %v6203_v44   ;;  %v3168_v49 = vmul.f32 %v7881_v23, %v7881_v23  ;;  %v8965_v17 = vld [vmem:[#allocation5_spill] sm:$0xff]  ;;  %v8967_v44 = vld [vmem:[#allocation7_spill] sm:$0xff] }
 0x364   :  { %v8517_v60 = vpop.f32.mrb[236].mxu1  ;;  %v3173_v30 = vmul.f32 %v8965_v17, %v8965_v17 }
 0x365   :  { %v2904_v53 = vadd.f32 %v2903_v12, %v7863_v35  ;;  %v3420_v25 = vadd.f32 %v3419_v2, %v3165_v51  ;;  %v2698_v46 = vpop.f32.mrb[237].mxu1  ;;  %v8966_v2 = vld [vmem:[#allocation6_spill] sm:$0xff] }
 0x366   :  { %v8522_v63 = vpop.f32.mrb[238].mxu1  ;;  %v3174_v33 = vmul.f32 %v8966_v2, %v8966_v2 }
 0x367   :  { %v2905_v21 = vadd.f32 %v2904_v53, %v7865_v41  ;;  %v3421_v54 = vadd.f32 %v3420_v25, %v3166_v52  ;;  %v2701_v24 = vpop.f32.mrb[239].mxu1 }
 0x369   :  { %v2906_v56 = vadd.f32 %v2905_v21, %v7881_v23  ;;  %v3422_v35 = vadd.f32 %v3421_v54, %v3167_v62  ;;  %v6208_v23 = vpack.c.bf16 %v8522_v63, %v8517_v60  ;;  %v3175_v62 = vmul.f32 %v8967_v44, %v8967_v44 }
 0x36b   :  { %v2907_v8 = vadd.f32 %v2906_v56, %v7883_v29  ;;  %v3423_v41 = vadd.f32 %v3422_v35, %v3168_v49  ;;  %6352 = vst [vmem:[%s8816_s2 + $0x3d8] sm:$0xff] %v6208_v23   ;;  %v8964_v29 = vld [vmem:[#allocation4_spill] sm:$0xff]  ;;  %v8970_v23 = vld [vmem:[#allocation10_spill] sm:$0xff] }
 0x36c   :  { %v3172_v34 = vmul.f32 %v8964_v29, %v8964_v29  ;;  %v8538_v38 = vpop.f32.mrb[240].mxu1  ;;  %v8968_v49 = vld [vmem:[#allocation8_spill] sm:$0xff] }
 0x36d   :  { %v2908_v15 = vadd.f32 %v2907_v8, %v8962_v36  ;;  %v3424_v13 = vadd.f32 %v3423_v41, %v3169_v0  ;;  %v2706_v47 = vpop.f32.mrb[241].mxu1  ;;  %v3176_v56 = vmul.f32 %v8968_v49, %v8968_v49  ;;  %v8969_v41 = vld [vmem:[#allocation9_spill] sm:$0xff] }
 0x36e   :  { %v8543_v51 = vpop.f32.mrb[242].mxu1  ;;  %v3177_v24 = vmul.f32 %v8969_v41, %v8969_v41  ;;  %v8972_v47 = vld [vmem:[#allocation12_spill] sm:$0xff] }
 0x36f   :  { %v2909_v19 = vadd.f32 %v2908_v15, %v8963_v39  ;;  %v3425_v16 = vadd.f32 %v3424_v13, %v3170_v4  ;;  %v2709_v12 = vpop.f32.mrb[243].mxu1  ;;  %v6213_v25 = vpack.c.bf16 %v8543_v51, %v8538_v38  ;;  %v3178_v39 = vmul.f32 %v8970_v23, %v8970_v23 }
 0x371   :  { %v2910_v9 = vadd.f32 %v2909_v19, %v8964_v29  ;;  %v3426_v50 = vadd.f32 %v3425_v16, %v3171_v59  ;;  %6353 = vst [vmem:[%s8816_s2 + $0x3e0] sm:$0xff] %v6213_v25   ;;  %v8971_v29 = vld [vmem:[#allocation11_spill] sm:$0xff] }
 0x373   :  { %v3427_v61 = vadd.f32 %v3426_v50, %v3172_v34  ;;  %v2911_v55 = vadd.f32 %v2910_v9, %v8965_v17  ;;  %v3179_v34 = vmul.f32 %v8971_v29, %v8971_v29  ;;  %v3180_v17 = vmul.f32 %v8972_v47, %v8972_v47 }
 0x374   :  { %v8559_v0 = vpop.f32.mrb[244].mxu1 }
 0x375   :  { %v2912_v52 = vadd.f32 %v2911_v55, %v8966_v2  ;;  %v3428_v53 = vadd.f32 %v3427_v61, %v3173_v30  ;;  %v2714_v8 = vpop.f32.mrb[245].mxu1  ;;  %v8973_v2 = vld [vmem:[#allocation13_spill] sm:$0xff] }
 0x376   :  { %v8564_v15 = vpop.f32.mrb[246].mxu1 }
 0x377   :  { %v2913_v21 = vadd.f32 %v2912_v52, %v8967_v44  ;;  %v3429_v54 = vadd.f32 %v3428_v53, %v3174_v33  ;;  %v2717_v13 = vpop.f32.mrb[247].mxu1  ;;  %v6218_v16 = vpack.c.bf16 %v8564_v15, %v8559_v0  ;;  %v3181_v33 = vmul.f32 %v8973_v2, %v8973_v2 }
 0x379   :  { %v2914_v35 = vadd.f32 %v2913_v21, %v8968_v49  ;;  %v3430_v46 = vadd.f32 %v3429_v54, %v3175_v62  ;;  %6354 = vst [vmem:[%s8816_s2 + $0x3e8] sm:$0xff] %v6218_v16   ;;  %v8974_v62 = vld [vmem:[#allocation14_spill] sm:$0xff] }
 0x37a   :  { %v3182_v21 = vmul.f32 %v8974_v62, %v8974_v62 }
 0x37b   :  { %v2915_v36 = vadd.f32 %v2914_v35, %v8969_v41  ;;  %v3431_v4 = vadd.f32 %v3430_v46, %v3176_v56  ;;  %v8975_v35 = vld [vmem:[#allocation15_spill] sm:$0xff] }
 0x37c   :  { %v8580_v55 = vpop.f32.mrb[248].mxu1  ;;  %v3183_v46 = vmul.f32 %v8975_v35, %v8975_v35 }
 0x37d   :  { %v2916_v59 = vadd.f32 %v2915_v36, %v8970_v23  ;;  %v3432_v19 = vadd.f32 %v3431_v4, %v3177_v24  ;;  %v2722_v12 = vpop.f32.mrb[249].mxu1  ;;  %v8976_v24 = vld [vmem:[#allocation16_spill] sm:$0xff] }
 0x37e   :  { %v8585_v25 = vpop.f32.mrb[250].mxu1  ;;  %v3184_v36 = vmul.f32 %v8976_v24, %v8976_v24  ;;  %v8979_v12 = vld [vmem:[#allocation19_spill] sm:$0xff] }
 0x37f   :  { %v2917_v9 = vadd.f32 %v2916_v59, %v8971_v29  ;;  %v3433_v50 = vadd.f32 %v3432_v19, %v3178_v39  ;;  %v2725_v44 = vpop.f32.mrb[251].mxu1  ;;  %v6223_v56 = vpack.c.bf16 %v8585_v25, %v8580_v55  ;;  %v8977_v59 = vld [vmem:[#allocation17_spill] sm:$0xff] }
 0x380   :  { %v3185_v19 = vmul.f32 %v8977_v59, %v8977_v59 }
 0x381   :  { %v2918_v30 = vadd.f32 %v2917_v9, %v8972_v47  ;;  %v3434_v61 = vadd.f32 %v3433_v50, %v3179_v34  ;;  %6355 = vst [vmem:[%s8816_s2 + $0x3f0] sm:$0xff] %v6223_v56   ;;  %v8978_v50 = vld [vmem:[#allocation18_spill] sm:$0xff] }
 0x382   :  { %v3186_v47 = vmul.f32 %v8978_v50, %v8978_v50 }
 0x383   :  { %v2919_v52 = vadd.f32 %v2918_v30, %v8973_v2  ;;  %v3435_v53 = vadd.f32 %v3434_v61, %v3180_v17  ;;  %v3187_v2 = vmul.f32 %v8979_v12, %v8979_v12 }
 0x384   :  { %v8601_v23 = vpop.f32.mrb[252].mxu1 }
 0x385   :  { %v2920_v54 = vadd.f32 %v2919_v52, %v8974_v62  ;;  %v3436_v49 = vadd.f32 %v3435_v53, %v3181_v33  ;;  %v2730_v39 = vpop.f32.mrb[253].mxu1  ;;  %v8980_v53 = vld [vmem:[#allocation20_spill] sm:$0xff] }
 0x386   :  { %v8606_v34 = vpop.f32.mrb[254].mxu1  ;;  %v3188_v62 = vmul.f32 %v8980_v53, %v8980_v53 }
 0x387   :  { %v2921_v8 = vadd.f32 %v2920_v54, %v8975_v35  ;;  %v3437_v41 = vadd.f32 %v3436_v49, %v3182_v21  ;;  %v2733_v9 = vpop.f32.mrb[255].mxu1  ;;  %v6228_v61 = vpack.c.bf16 %v8606_v34, %v8601_v23  ;;  %v8981_v49 = vld [vmem:[#allocation21_spill] sm:$0xff] }
 0x388   :  { %v3189_v35 = vmul.f32 %v8981_v49, %v8981_v49 }
 0x389   :  { %v2922_v4 = vadd.f32 %v2921_v8, %v8976_v24  ;;  %v3438_v13 = vadd.f32 %v3437_v41, %v3183_v46  ;;  %6356 = vst [vmem:[%s8816_s2 + $0x3f8] sm:$0xff] %v6228_v61   ;;  %v8982_v8 = vld [vmem:[#allocation22_spill] sm:$0xff] }
 0x38a   :  { %v3190_v24 = vmul.f32 %v8982_v8, %v8982_v8  ;;  %v8986_v61 = vld [vmem:[#allocation26_spill] sm:$0xff] }
 0x38b   :  { %v2923_v16 = vadd.f32 %v2922_v4, %v8977_v59  ;;  %v3439_v29 = vadd.f32 %v3438_v13, %v3184_v36  ;;  %v8983_v4 = vld [vmem:[#allocation23_spill] sm:$0xff] }
 0x38c   :  { %v3191_v39 = vmul.f32 %v8983_v4, %v8983_v4 }
 0x38d   :  { %v2924_v17 = vadd.f32 %v2923_v16, %v8978_v50  ;;  %v3440_v30 = vadd.f32 %v3439_v29, %v3185_v19  ;;  %v8984_v19 = vld [vmem:[#allocation24_spill] sm:$0xff]  ;;  %v8985_v50 = vld [vmem:[#allocation25_spill] sm:$0xff] }
 0x38e   :  { %v3192_v29 = vmul.f32 %v8984_v19, %v8984_v19 }
 0x38f   :  { %v2925_v33 = vadd.f32 %v2924_v17, %v8979_v12  ;;  %v3441_v52 = vadd.f32 %v3440_v30, %v3186_v47  ;;  %v3193_v17 = vmul.f32 %v8985_v50, %v8985_v50 }
 0x391   :  { %v2926_v44 = vadd.f32 %v2925_v33, %v8980_v53  ;;  %v3442_v21 = vadd.f32 %v3441_v52, %v3187_v2  ;;  %v3194_v2 = vmul.f32 %v8986_v61, %v8986_v61  ;;  %v8987_v52 = vld [vmem:[#allocation27_spill] sm:$0xff] }
 0x393   :  { %v3443_v54 = vadd.f32 %v3442_v21, %v3188_v62  ;;  %v2927_v56 = vadd.f32 %v2926_v44, %v8981_v49  ;;  %v3195_v44 = vmul.f32 %v8987_v52, %v8987_v52  ;;  %v8988_v21 = vld [vmem:[#allocation28_spill] sm:$0xff] }
 0x394   :  { %v3196_v49 = vmul.f32 %v8988_v21, %v8988_v21 }
 0x395   :  { %v3444_v46 = vadd.f32 %v3443_v54, %v3189_v35  ;;  %v2928_v41 = vadd.f32 %v2927_v56, %v8982_v8  ;;  %v8989_v35 = vld [vmem:[#allocation29_spill] sm:$0xff] }
 0x396   :  { %v3197_v8 = vmul.f32 %v8989_v35, %v8989_v35 }
 0x397   :  { %v3445_v36 = vadd.f32 %v3444_v46, %v3190_v24  ;;  %v2929_v13 = vadd.f32 %v2928_v41, %v8983_v4  ;;  %v8990_v24 = vld [vmem:[#allocation30_spill] sm:$0xff] }
 0x398   :  { %v3198_v4 = vmul.f32 %v8990_v24, %v8990_v24 }
 0x399   :  { %v3446_v59 = vadd.f32 %v3445_v36, %v3191_v39  ;;  %v2930_v16 = vadd.f32 %v2929_v13, %v8984_v19  ;;  %v8991_v39 = vld [vmem:[#allocation31_spill] sm:$0xff] }
 0x39a   :  { %v3199_v19 = vmul.f32 %v8991_v39, %v8991_v39 }
 0x39b   :  { %v3447_v9 = vadd.f32 %v3446_v59, %v3192_v29  ;;  %v2931_v47 = vadd.f32 %v2930_v16, %v8985_v50  ;;  %v8992_v29 = vld [vmem:[#allocation32_spill] sm:$0xff] }
 0x39c   :  { %v3200_v50 = vmul.f32 %v8992_v29, %v8992_v29 }
 0x39d   :  { %v3448_v30 = vadd.f32 %v3447_v9, %v3193_v17  ;;  %v2932_v12 = vadd.f32 %v2931_v47, %v8986_v61  ;;  %v8993_v17 = vld [vmem:[#allocation33_spill] sm:$0xff] }
 0x39e   :  { %v3201_v61 = vmul.f32 %v8993_v17, %v8993_v17 }
 0x39f   :  { %v3449_v33 = vadd.f32 %v3448_v30, %v3194_v2  ;;  %v2933_v53 = vadd.f32 %v2932_v12, %v8987_v52  ;;  %v8994_v2 = vld [vmem:[#allocation34_spill] sm:$0xff] }
 0x3a0   :  { %v3202_v52 = vmul.f32 %v8994_v2, %v8994_v2 }
 0x3a1   :  { %v3450_v62 = vadd.f32 %v3449_v33, %v3195_v44  ;;  %v2934_v54 = vadd.f32 %v2933_v53, %v8988_v21  ;;  %v8995_v44 = vld [vmem:[#allocation35_spill] sm:$0xff] }
 0x3a2   :  { %v3203_v21 = vmul.f32 %v8995_v44, %v8995_v44 }
 0x3a3   :  { %v3451_v56 = vadd.f32 %v3450_v62, %v3196_v49  ;;  %v2935_v46 = vadd.f32 %v2934_v54, %v8989_v35  ;;  %v8996_v49 = vld [vmem:[#allocation36_spill] sm:$0xff] }
 0x3a4   :  { %v3204_v35 = vmul.f32 %v8996_v49, %v8996_v49 }
 0x3a5   :  { %v3452_v41 = vadd.f32 %v3451_v56, %v3197_v8  ;;  %v2936_v36 = vadd.f32 %v2935_v46, %v8990_v24  ;;  %v8997_v8 = vld [vmem:[#allocation37_spill] sm:$0xff] }
 0x3a6   :  { %v3205_v24 = vmul.f32 %v8997_v8, %v8997_v8 }
 0x3a7   :  { %v3453_v13 = vadd.f32 %v3452_v41, %v3198_v4  ;;  %v2937_v59 = vadd.f32 %v2936_v36, %v8991_v39  ;;  %v8998_v4 = vld [vmem:[#allocation38_spill] sm:$0xff] }
 0x3a8   :  { %v3206_v39 = vmul.f32 %v8998_v4, %v8998_v4 }
 0x3a9   :  { %v3454_v16 = vadd.f32 %v3453_v13, %v3199_v19  ;;  %v2938_v9 = vadd.f32 %v2937_v59, %v8992_v29  ;;  %v8999_v19 = vld [vmem:[#allocation39_spill] sm:$0xff] }
 0x3aa   :  { %v3207_v29 = vmul.f32 %v8999_v19, %v8999_v19 }
 0x3ab   :  { %v3455_v47 = vadd.f32 %v3454_v16, %v3200_v50  ;;  %v2939_v30 = vadd.f32 %v2938_v9, %v8993_v17  ;;  %v9000_v50 = vld [vmem:[#allocation40_spill] sm:$0xff] }
 0x3ac   :  { %v3208_v17 = vmul.f32 %v9000_v50, %v9000_v50 }
 0x3ad   :  { %v3456_v12 = vadd.f32 %v3455_v47, %v3201_v61  ;;  %v2940_v33 = vadd.f32 %v2939_v30, %v8994_v2  ;;  %v9001_v61 = vld [vmem:[#allocation41_spill] sm:$0xff] }
 0x3ae   :  { %v3209_v2 = vmul.f32 %v9001_v61, %v9001_v61 }
 0x3af   :  { %v3457_v53 = vadd.f32 %v3456_v12, %v3202_v52  ;;  %v2941_v62 = vadd.f32 %v2940_v33, %v8995_v44  ;;  %v9002_v52 = vld [vmem:[#allocation42_spill] sm:$0xff] }
 0x3b0   :  { %v3210_v44 = vmul.f32 %v9002_v52, %v9002_v52 }
 0x3b1   :  { %v3458_v54 = vadd.f32 %v3457_v53, %v3203_v21  ;;  %v2942_v56 = vadd.f32 %v2941_v62, %v8996_v49  ;;  %v9003_v21 = vld [vmem:[#allocation43_spill] sm:$0xff] }
 0x3b2   :  { %v3211_v49 = vmul.f32 %v9003_v21, %v9003_v21 }
 0x3b3   :  { %v3459_v46 = vadd.f32 %v3458_v54, %v3204_v35  ;;  %v2943_v41 = vadd.f32 %v2942_v56, %v8997_v8  ;;  %v9004_v35 = vld [vmem:[#allocation44_spill] sm:$0xff] }
 0x3b4   :  { %v3212_v8 = vmul.f32 %v9004_v35, %v9004_v35 }
 0x3b5   :  { %v3460_v36 = vadd.f32 %v3459_v46, %v3205_v24  ;;  %v2944_v13 = vadd.f32 %v2943_v41, %v8998_v4  ;;  %v9005_v24 = vld [vmem:[#allocation45_spill] sm:$0xff] }
 0x3b6   :  { %v3213_v4 = vmul.f32 %v9005_v24, %v9005_v24 }
 0x3b7   :  { %v3461_v59 = vadd.f32 %v3460_v36, %v3206_v39  ;;  %v2945_v16 = vadd.f32 %v2944_v13, %v8999_v19  ;;  %v9006_v39 = vld [vmem:[#allocation46_spill] sm:$0xff] }
 0x3b8   :  { %v3214_v19 = vmul.f32 %v9006_v39, %v9006_v39 }
 0x3b9   :  { %v3462_v9 = vadd.f32 %v3461_v59, %v3207_v29  ;;  %v2946_v47 = vadd.f32 %v2945_v16, %v9000_v50  ;;  %v9007_v29 = vld [vmem:[#allocation47_spill] sm:$0xff] }
 0x3ba   :  { %v3215_v50 = vmul.f32 %v9007_v29, %v9007_v29 }
 0x3bb   :  { %v3463_v30 = vadd.f32 %v3462_v9, %v3208_v17  ;;  %v2947_v12 = vadd.f32 %v2946_v47, %v9001_v61  ;;  %v9008_v17 = vld [vmem:[#allocation48_spill] sm:$0xff] }
 0x3bc   :  { %v3216_v61 = vmul.f32 %v9008_v17, %v9008_v17 }
 0x3bd   :  { %v3464_v33 = vadd.f32 %v3463_v30, %v3209_v2  ;;  %v2948_v53 = vadd.f32 %v2947_v12, %v9002_v52  ;;  %v9009_v2 = vld [vmem:[#allocation49_spill] sm:$0xff] }
 0x3be   :  { %v3217_v52 = vmul.f32 %v9009_v2, %v9009_v2 }
 0x3bf   :  { %v3465_v62 = vadd.f32 %v3464_v33, %v3210_v44  ;;  %v2949_v54 = vadd.f32 %v2948_v53, %v9003_v21 }
 0x3c1   :  { %v3466_v56 = vadd.f32 %v3465_v62, %v3211_v49  ;;  %v2950_v46 = vadd.f32 %v2949_v54, %v9004_v35  ;;  %v3218_v62 = vmul.f32 %v8271_v7, %v8271_v7  ;;  %v3219_v49 = vmul.f32 %v8273_v1, %v8273_v1 }
 0x3c3   :  { %v3467_v41 = vadd.f32 %v3466_v56, %v3212_v8  ;;  %v2951_v36 = vadd.f32 %v2950_v46, %v9005_v24  ;;  %v3220_v46 = vmul.f32 %v8286_v28, %v8286_v28  ;;  %v3221_v24 = vmul.f32 %v8291_v58, %v8291_v58 }
 0x3c5   :  { %v3468_v13 = vadd.f32 %v3467_v41, %v3213_v4  ;;  %v2952_v59 = vadd.f32 %v2951_v36, %v9006_v39  ;;  %v3222_v4 = vmul.f32 %v8307_v37, %v8307_v37  ;;  %v3223_v39 = vmul.f32 %v8312_v31, %v8312_v31 }
 0x3c7   :  { %v3469_v16 = vadd.f32 %v3468_v13, %v3214_v19  ;;  %v2953_v9 = vadd.f32 %v2952_v59, %v9007_v29  ;;  %v3224_v19 = vmul.f32 %v8328_v6, %v8328_v6  ;;  %v3225_v29 = vmul.f32 %v8333_v5, %v8333_v5 }
 0x3c9   :  { %v3470_v47 = vadd.f32 %v3469_v16, %v3215_v50  ;;  %v2954_v30 = vadd.f32 %v2953_v9, %v9008_v17  ;;  %v3226_v50 = vmul.f32 %v8349_v43, %v8349_v43  ;;  %v3227_v17 = vmul.f32 %v8354_v3, %v8354_v3 }
 0x3cb   :  { %v3471_v12 = vadd.f32 %v3470_v47, %v3216_v61  ;;  %v2955_v33 = vadd.f32 %v2954_v30, %v9009_v2  ;;  %v3228_v61 = vmul.f32 %v8370_v45, %v8370_v45  ;;  %v3229_v2 = vmul.f32 %v8375_v42, %v8375_v42 }
 0x3cd   :  { %v3472_v53 = vadd.f32 %v3471_v12, %v3217_v52  ;;  %v2956_v44 = vadd.f32 %v2955_v33, %v8271_v7  ;;  %v3230_v52 = vmul.f32 %v8391_v14, %v8391_v14 }
 0x3cf   :  { %v3473_v21 = vadd.f32 %v3472_v53, %v3218_v62  ;;  %v2957_v54 = vadd.f32 %v2956_v44, %v8273_v1  ;;  %v3231_v44 = vmul.f32 %v8396_v10, %v8396_v10 }
 0x3d1   :  { %v3474_v56 = vadd.f32 %v3473_v21, %v3219_v49  ;;  %v2958_v35 = vadd.f32 %v2957_v54, %v8286_v28  ;;  %v3232_v21 = vmul.f32 %v8412_v40, %v8412_v40  ;;  %v3233_v49 = vmul.f32 %v8417_v27, %v8417_v27 }
 0x3d3   :  { %v3475_v8 = vadd.f32 %v3474_v56, %v3220_v46  ;;  %v2959_v41 = vadd.f32 %v2958_v35, %v8291_v58  ;;  %v3234_v35 = vmul.f32 %v8433_v32, %v8433_v32 }
 0x3d5   :  { %v3476_v36 = vadd.f32 %v3475_v8, %v3221_v24  ;;  %v2960_v7 = vadd.f32 %v2959_v41, %v8307_v37  ;;  %v3235_v8 = vmul.f32 %v8438_v11, %v8438_v11  ;;  %v3236_v24 = vmul.f32 %v8454_v18, %v8454_v18 }
 0x3d7   :  { %v3477_v13 = vadd.f32 %v3476_v36, %v3222_v4  ;;  %v2961_v1 = vadd.f32 %v2960_v7, %v8312_v31  ;;  %v3237_v7 = vmul.f32 %v8459_v20, %v8459_v20 }
 0x3d9   :  { %v3478_v59 = vadd.f32 %v3477_v13, %v3223_v39  ;;  %v2962_v28 = vadd.f32 %v2961_v1, %v8328_v6  ;;  %v3238_v13 = vmul.f32 %v8475_v48, %v8475_v48  ;;  %v3239_v39 = vmul.f32 %v8480_v26, %v8480_v26 }
 0x3db   :  { %v3479_v16 = vadd.f32 %v3478_v59, %v3224_v19  ;;  %v2963_v58 = vadd.f32 %v2962_v28, %v8333_v5  ;;  %v3240_v28 = vmul.f32 %v8496_v57, %v8496_v57 }
 0x3dd   :  { %v3480_v9 = vadd.f32 %v3479_v16, %v3225_v29  ;;  %v2964_v37 = vadd.f32 %v2963_v58, %v8349_v43  ;;  %v3241_v16 = vmul.f32 %v8501_v22, %v8501_v22  ;;  %v3242_v29 = vmul.f32 %v8517_v60, %v8517_v60 }
 0x3df   :  { %v3481_v47 = vadd.f32 %v3480_v9, %v3226_v50  ;;  %v2965_v31 = vadd.f32 %v2964_v37, %v8354_v3  ;;  %v3243_v37 = vmul.f32 %v8522_v63, %v8522_v63 }
 0x3e1   :  { %v3482_v30 = vadd.f32 %v3481_v47, %v3227_v17  ;;  %v2966_v6 = vadd.f32 %v2965_v31, %v8370_v45  ;;  %v3244_v47 = vmul.f32 %v8538_v38, %v8538_v38  ;;  %v3245_v17 = vmul.f32 %v8543_v51, %v8543_v51 }
 0x3e3   :  { %v3483_v12 = vadd.f32 %v3482_v30, %v3228_v61  ;;  %v2967_v5 = vadd.f32 %v2966_v6, %v8375_v42  ;;  %v3246_v6 = vmul.f32 %v8559_v0, %v8559_v0 }
 0x3e5   :  { %v3484_v33 = vadd.f32 %v3483_v12, %v3229_v2  ;;  %v2968_v43 = vadd.f32 %v2967_v5, %v8391_v14  ;;  %v3247_v12 = vmul.f32 %v8564_v15, %v8564_v15  ;;  %v3248_v2 = vmul.f32 %v8580_v55, %v8580_v55 }
 0x3e7   :  { %v3485_v53 = vadd.f32 %v3484_v33, %v3230_v52  ;;  %v2969_v3 = vadd.f32 %v2968_v43, %v8396_v10  ;;  %v3249_v43 = vmul.f32 %v8585_v25, %v8585_v25 }
 0x3e9   :  { %v3486_v62 = vadd.f32 %v3485_v53, %v3231_v44  ;;  %v2970_v45 = vadd.f32 %v2969_v3, %v8412_v40  ;;  %v3251_v44 = vmul.f32 %v8606_v34, %v8606_v34 }
 0x3eb   :  { %v3487_v54 = vadd.f32 %v3486_v62, %v3232_v21  ;;  %v2971_v42 = vadd.f32 %v2970_v45, %v8417_v27 }
 0x3ed   :  { %v3488_v56 = vadd.f32 %v3487_v54, %v3233_v49  ;;  %v2972_v14 = vadd.f32 %v2971_v42, %v8433_v32 }
 0x3ef   :  { %v3489_v46 = vadd.f32 %v3488_v56, %v3234_v35  ;;  %v2973_v10 = vadd.f32 %v2972_v14, %v8438_v11 }
 0x3f1   :  { %v3490_v41 = vadd.f32 %v3489_v46, %v3235_v8  ;;  %v2974_v40 = vadd.f32 %v2973_v10, %v8454_v18 }
 0x3f3   :  { %v3491_v36 = vadd.f32 %v3490_v41, %v3236_v24  ;;  %v2975_v27 = vadd.f32 %v2974_v40, %v8459_v20 }
 0x3f5   :  { %v3492_v4 = vadd.f32 %v3491_v36, %v3237_v7  ;;  %v2976_v32 = vadd.f32 %v2975_v27, %v8475_v48 }
 0x3f7   :  { %v3493_v1 = vadd.f32 %v3492_v4, %v3238_v13  ;;  %v2977_v11 = vadd.f32 %v2976_v32, %v8480_v26 }
 0x3f9   :  { %v3494_v59 = vadd.f32 %v3493_v1, %v3239_v39  ;;  %v2978_v18 = vadd.f32 %v2977_v11, %v8496_v57 }
 0x3fb   :  { %v3495_v19 = vadd.f32 %v3494_v59, %v3240_v28  ;;  %v2979_v20 = vadd.f32 %v2978_v18, %v8501_v22 }
 0x3fd   :  { %v3496_v58 = vadd.f32 %v3495_v19, %v3241_v16  ;;  %v2980_v48 = vadd.f32 %v2979_v20, %v8517_v60 }
 0x3ff   :  { %v3497_v9 = vadd.f32 %v3496_v58, %v3242_v29  ;;  %v2981_v26 = vadd.f32 %v2980_v48, %v8522_v63 }
 0x401   :  { %v3498_v50 = vadd.f32 %v3497_v9, %v3243_v37  ;;  %v2982_v57 = vadd.f32 %v2981_v26, %v8538_v38 }
 0x403   :  { %v3499_v31 = vadd.f32 %v3498_v50, %v3244_v47  ;;  %v2983_v22 = vadd.f32 %v2982_v57, %v8543_v51 }
 0x405   :  { %v3500_v30 = vadd.f32 %v3499_v31, %v3245_v17  ;;  %v2984_v60 = vadd.f32 %v2983_v22, %v8559_v0  ;;  %v3250_v0 = vmul.f32 %v8601_v23, %v8601_v23 }
 0x407   :  { %v3501_v61 = vadd.f32 %v3500_v30, %v3246_v6  ;;  %v2985_v63 = vadd.f32 %v2984_v60, %v8564_v15 }
 0x409   :  { %v3502_v5 = vadd.f32 %v3501_v61, %v3247_v12  ;;  %v2986_v38 = vadd.f32 %v2985_v63, %v8580_v55 }
 0x40b   :  { %v3503_v33 = vadd.f32 %v3502_v5, %v3248_v2  ;;  %v2987_v51 = vadd.f32 %v2986_v38, %v8585_v25 }
 0x40d   :  { %v3504_v52 = vadd.f32 %v3503_v33, %v3249_v43  ;;  %v2988_v53 = vadd.f32 %v2987_v51, %v8601_v23 }
 0x40f   :  { %v3505_v3 = vadd.f32 %v3504_v52, %v3250_v0  ;;  %v2989_v15 = vadd.f32 %v2988_v53, %v8606_v34 }
 0x411   :  { %v2990_v62 = vrot.slane %v2989_v15, 4  ;;  %v3506_v55 = vadd.f32 %v3505_v3, %v3251_v44 }
 0x413   :  { %v2991_v45 = vadd.f32 %v2990_v62, %v2989_v15  ;;  %v3507_v21 = vrot.slane %v3506_v55, 4 }
 0x415   :  { %v2992_v54 = vrot.slane %v2991_v45, 2  ;;  %v3508_v42 = vadd.f32 %v3507_v21, %v3506_v55 }
 0x417   :  { %v2993_v49 = vadd.f32 %v2992_v54, %v2991_v45  ;;  %v3509_v25 = vrot.slane %v3508_v42, 2 }
 0x419   :  { %v2994_v56 = vrot.slane %v2993_v49, 1  ;;  %v3510_v14 = vadd.f32 %v3509_v25, %v3508_v42 }
 0x41b   :  { %v3511_v35 = vrot.slane %v3510_v14, 1  ;;  %v2995_v46 = vadd.f32 %v2994_v56, %v2993_v49 }
 0x41d   :  { %v3512_v23 = vadd.f32 %v3511_v35, %v3510_v14 }
 0x41f   :  { %v3514_v10 = vsel %vm3513_vm0, %v2995_v46, %v3512_v23 }
 0x420   :  { %v3516_v8 = vsel %vm3515_vm1, %v3514_v10, 0.0 }
 0x421   :  { %3517 = vst [vmem:[%s8817_s3] sm:$0xff] %v3516_v8 }

// kernel: _lambda_.16
= control target key start
LH: loop header
LB: loop body
LE: loop exit
PB: predicated region body
PF: predicated region fallthrough
CT: control target
= control target key end

     0   :  { %v33_v0 = vlaneseq  ;;  %v4547_v2 = vmov 1966171168   ;;  %s6338_s0 = inlined_call_operand.vmem [shape: bf16[2048,128], index: 0, kind: input, shape index: {}]   ;;  %s6339_s1 = inlined_call_operand.vmem [shape: f32[1,8,128], index: 1, kind: input, shape index: {}]   ;;  %s6340_s2 = inlined_call_operand.vmem [shape: f32[1,128], index: 2, kind: input, shape index: {}]   ;;  %s6341_s3 = inlined_call_operand.vmem [shape: f32[1,128], index: 3, kind: input, shape index: {}]   ;;  %s6342_s4 = inlined_call_operand.vmem [shape: bf16[2048,128], index: 4, kind: output, shape index: {}]  }
   0x1   :  { %v17_v1 = vld [vmem:[%s6339_s1] sm:$0xff]  ;;  %v31_v3 = vunpack.c.l.s4 %v4547_v2  ;;  %v4588_v7 = vld [vmem:[%s6338_s0 + $0x8] sm:$0xff]   ;;  %v4593_v8 = vld [vmem:[%s6338_s0 + $0x10] sm:$0xff]  }
   0x2   :  { %v4576_v4 = vmul.f32 0.00048828125, %v17_v1  ;;  %v4578_v5 = vshrl.u32 %v33_v0, 7  ;;  %v4583_v6 = vld [vmem:[%s6338_s0] sm:$0xff]   ;;  %v4601_v13 = vld [vmem:[%s6338_s0 + $0x18] sm:$0xff]   ;;  %v4611_v15 = vld [vmem:[%s6338_s0 + $0x28] sm:$0xff]  }
   0x3   :  { %v32_v9 = vunpack.c.0.s8 %v31_v3  ;;  %v4606_v14 = vld [vmem:[%s6338_s0 + $0x20] sm:$0xff]   ;;  %v4621_v20 = vld [vmem:[%s6338_s0 + $0x30] sm:$0xff]   ;;  %v4626_v21 = vld [vmem:[%s6338_s0 + $0x38] sm:$0xff]  }
   0x4   :  { %v20_v16 = vmul.f32 %v4576_v4, %v4576_v4  ;;  %v4637_v26 = vld [vmem:[%s6338_s0 + $0x40] sm:$0xff]   ;;  %v4645_v31 = vld [vmem:[%s6338_s0 + $0x48] sm:$0xff]   ;;  %v4650_v32 = vld [vmem:[%s6338_s0 + $0x50] sm:$0xff]   ;;  %v6397_v17 = vsub.s32 0, %v4578_v5 }
   0x5   :  { %v4629_v22 = vsub.s32 %v32_v9, %v4578_v5  ;;  %v4659_v37 = vld [vmem:[%s6338_s0 + $0x58] sm:$0xff]   ;;  %v4664_v38 = vld [vmem:[%s6338_s0 + $0x60] sm:$0xff]   ;;  %v4673_v43 = vld [vmem:[%s6338_s0 + $0x68] sm:$0xff]  }
   0x6   :  { %v22_v27 = vrot.slane %v20_v16, 7  ;;  %v4678_v44 = vld [vmem:[%s6338_s0 + $0x70] sm:$0xff]   ;;  %v4687_v49 = vld [vmem:[%s6338_s0 + $0x78] sm:$0xff]   ;;  %v4695_v54 = vld [vmem:[%s6338_s0 + $0x80] sm:$0xff]  }
   0x7   :  { %v4700_v55 = vld [vmem:[%s6338_s0 + $0x88] sm:$0xff]   ;;  %v4709_v60 = vld [vmem:[%s6338_s0 + $0x90] sm:$0xff]   ;;  %v4714_v61 = vld [vmem:[%s6338_s0 + $0x98] sm:$0xff]  }
   0x8   :  { %v24_v39 = vsub.f32 %v4576_v4, %v22_v27  ;;  %v4722_v2 = vld [vmem:[%s6338_s0 + $0xa0] sm:$0xff]   ;;  %v4727_v3 = vld [vmem:[%s6338_s0 + $0xa8] sm:$0xff]   ;;  %v4741_v1 = vld [vmem:[%s6338_s0 + $0xb8] sm:$0xff]  }
   0x9   :  { %v4754_v27 = vld [vmem:[%s6338_s0 + $0xc8] sm:$0xff]   ;;  %v4763_v16 = vld [vmem:[%s6338_s0 + $0xd0] sm:$0xff]   ;;  %v4768_v59 = vld [vmem:[%s6338_s0 + $0xd8] sm:$0xff]  }
   0xa   :  { %v25_v50 = vmax.f32 %v24_v39, 0.0  ;;  %v4749_v39 = vld [vmem:[%s6338_s0 + $0xc0] sm:$0xff]   ;;  %v4782_v57 = vld [vmem:[%s6338_s0 + $0xe8] sm:$0xff]   ;;  %v4791_v0 = vld [vmem:[%s6338_s0 + $0xf0] sm:$0xff]  }
   0xb   :  { %v4777_v9 = vld [vmem:[%s6338_s0 + $0xe0] sm:$0xff]   ;;  %v4796_v53 = vld [vmem:[%s6338_s0 + $0xf8] sm:$0xff]   ;;  %v4810_v51 = vld [vmem:[%s6338_s0 + $0x108] sm:$0xff]  }
   0xc   :  { %v27_v62 = vadd.f32 1e-05, %v25_v50  ;;  %v4736_v50 = vld [vmem:[%s6338_s0 + $0xb0] sm:$0xff]   ;;  %v4824_v47 = vld [vmem:[%s6338_s0 + $0x118] sm:$0xff]   ;;  %v4833_v58 = vld [vmem:[%s6338_s0 + $0x120] sm:$0xff]  }
   0xd   :  { %v4819_v63 = vld [vmem:[%s6338_s0 + $0x110] sm:$0xff]   ;;  %v4838_v45 = vld [vmem:[%s6338_s0 + $0x128] sm:$0xff]   ;;  %v4852_v41 = vld [vmem:[%s6338_s0 + $0x138] sm:$0xff]  }
   0xe   :  { %4545 = vrsqrt.f32 %v27_v62  ;;  %v4805_v62 = vld [vmem:[%s6338_s0 + $0x100] sm:$0xff]   ;;  %v4847_v56 = vld [vmem:[%s6338_s0 + $0x130] sm:$0xff]   ;;  %6379 = vst [vmem:[#allocation2_spill] sm:$0xff] %v4852_v41  ;;  %v4870_v42 = vld [vmem:[%s6338_s0 + $0x148] sm:$0xff]  }
   0xf   :  { %v4861_v52 = vld [vmem:[%s6338_s0 + $0x140] sm:$0xff]   ;;  %6381 = vst [vmem:[#allocation4_spill] sm:$0xff] %v4870_v42  ;;  %v4875_v48 = vld [vmem:[%s6338_s0 + $0x150] sm:$0xff]   ;;  %v4884_v33 = vld [vmem:[%s6338_s0 + $0x158] sm:$0xff]  }
  0x10   :  { %6380 = vst [vmem:[#allocation3_spill] sm:$0xff] %v4861_v52  ;;  %6382 = vst [vmem:[#allocation5_spill] sm:$0xff] %v4875_v48  ;;  %v4889_v30 = vld [vmem:[%s6338_s0 + $0x160] sm:$0xff]   ;;  %v4898_v34 = vld [vmem:[%s6338_s0 + $0x168] sm:$0xff]  }
  0x11   :  { %6383 = vst [vmem:[#allocation6_spill] sm:$0xff] %v4884_v33  ;;  %6384 = vst [vmem:[#allocation7_spill] sm:$0xff] %v4889_v30  ;;  %v4903_v28 = vld [vmem:[%s6338_s0 + $0x170] sm:$0xff]   ;;  %v4912_v35 = vld [vmem:[%s6338_s0 + $0x178] sm:$0xff]  }
  0x12   :  { %6385 = vst [vmem:[#allocation8_spill] sm:$0xff] %v4898_v34  ;;  %6386 = vst [vmem:[#allocation9_spill] sm:$0xff] %v4903_v28  ;;  %v4925_v36 = vld [vmem:[%s6338_s0 + $0x188] sm:$0xff]   ;;  %v4937_v25 = vld [vmem:[%s6338_s0 + $0x190] sm:$0xff]   ;;  %v6402_v34 = vunpack.c.l.bf16 %v4593_v8  ;;  %v6405_v28 = vsub.s32 0, %v4578_v5  ;;  %v6410_v5 = vunpack.c.h.bf16 %v4611_v15 }
  0x13   :  { %6387 = vst [vmem:[#allocation10_spill] sm:$0xff] %v4912_v35  ;;  %6389 = vst [vmem:[#allocation12_spill] sm:$0xff] %v4925_v36  ;;  %v4942_v12 = vld [vmem:[%s6338_s0 + $0x198] sm:$0xff]   ;;  %v4951_v40 = vld [vmem:[%s6338_s0 + $0x1a0] sm:$0xff]  }
  0x14   :  { %6390 = vst [vmem:[#allocation13_spill] sm:$0xff] %v4937_v25  ;;  %6391 = vst [vmem:[#allocation14_spill] sm:$0xff] %v4942_v12  ;;  %v4956_v10 = vld [vmem:[%s6338_s0 + $0x1a8] sm:$0xff]   ;;  %v4965_v18 = vld [vmem:[%s6338_s0 + $0x1b0] sm:$0xff]  }
  0x15   :  { %6392 = vst [vmem:[#allocation15_spill] sm:$0xff] %v4951_v40  ;;  %6393 = vst [vmem:[#allocation16_spill] sm:$0xff] %v4956_v10  ;;  %v4978_v19 = vld [vmem:[%s6338_s0 + $0x1c0] sm:$0xff]  }
  0x16   :  { %6394 = vst [vmem:[#allocation17_spill] sm:$0xff] %v4965_v18  ;;  %6396 = vst [vmem:[#allocation19_spill] sm:$0xff] %v4978_v19 }
  0x18   :  { %v4546_v46 = vpop.eup %4545 }
  0x19   :  { %v36_v29 = vrot.slane %v4546_v46, %v4629_v22  ;;  %v4920_v46 = vld [vmem:[%s6338_s0 + $0x180] sm:$0xff]  }
  0x1a   :  { %6388 = vst [vmem:[#allocation11_spill] sm:$0xff] %v4920_v46  ;;  %v6400_v46 = vunpack.c.l.bf16 %v4588_v7 }
  0x1b   :  { %v37_v24 = vcombine.high %v36_v29, %v36_v29  ;;  %v26_v29 = vld [vmem:[%s6340_s2] sm:$0x1] }
  0x1d   :  { %v44_v11 = vrot.slane %v37_v24, %v4629_v22  ;;  %v4973_v22 = vld [vmem:[%s6338_s0 + $0x1b8] sm:$0xff]  }
  0x1e   :  { %6395 = vst [vmem:[#allocation18_spill] sm:$0xff] %v4973_v22  ;;  %v6409_v22 = vunpack.c.l.bf16 %v4611_v15 }
  0x1f   :  { %v46_v23 = vmul.f32 %v44_v11, %v26_v29  ;;  %v47_v11 = vld [vmem:[%s6341_s3] sm:$0x1]  ;;  %v6401_v29 = vunpack.c.h.bf16 %v4588_v7  ;;  %v6406_v7 = vunpack.c.h.bf16 %v4601_v13 }
  0x21   :  { %v48_v24 = vmul.f32 %v46_v23, %v4576_v4  ;;  %v4990_v25 = vrot.slane %v46_v23, %v6397_v17  ;;  %v6398_v4 = vunpack.c.l.bf16 %v4583_v6  ;;  %v6399_v17 = vunpack.c.h.bf16 %v4583_v6 }
  0x22   :  { %v6404_v6 = vunpack.c.l.bf16 %v4601_v13  ;;  %v6411_v13 = vunpack.c.l.bf16 %v4621_v20 }
  0x23   :  { %v49_v40 = vsub.f32 %v47_v11, %v48_v24  ;;  %v568_v35 = vmul.f32 %v6398_v4, %v4990_v25  ;;  %v569_v23 = vmul.f32 %v6399_v17, %v4990_v25  ;;  %v570_v36 = vmul.f32 %v6400_v46, %v4990_v25 }
  0x24   :  { %v571_v30 = vmul.f32 %v6401_v29, %v4990_v25  ;;  %v572_v24 = vmul.f32 %v6402_v34, %v4990_v25  ;;  %v6403_v11 = vunpack.c.h.bf16 %v4593_v8  ;;  %v574_v17 = vmul.f32 %v6404_v6, %v4990_v25 }
  0x25   :  { %v5021_v19 = vrot.slane %v49_v40, %v6405_v28  ;;  %v575_v46 = vmul.f32 %v6406_v7, %v4990_v25  ;;  %v6407_v29 = vunpack.c.l.bf16 %v4606_v14  ;;  %v6408_v8 = vunpack.c.h.bf16 %v4606_v14 }
  0x26   :  { %v573_v4 = vmul.f32 %v6403_v11, %v4990_v25  ;;  %v578_v6 = vmul.f32 %v6409_v22, %v4990_v25  ;;  %v579_v28 = vmul.f32 %v6410_v5, %v4990_v25  ;;  %v580_v40 = vmul.f32 %v6411_v13, %v4990_v25 }
  0x27   :  { %v576_v34 = vmul.f32 %v6407_v29, %v4990_v25  ;;  %v577_v11 = vmul.f32 %v6408_v8, %v4990_v25  ;;  %v6412_v7 = vunpack.c.h.bf16 %v4621_v20  ;;  %v830_v18 = vadd.f32 %v5021_v19, %v568_v35 }
  0x28   :  { %v831_v14 = vadd.f32 %v5021_v19, %v569_v23  ;;  %v832_v8 = vadd.f32 %v5021_v19, %v570_v36  ;;  %v833_v22 = vadd.f32 %v5021_v19, %v571_v30  ;;  %v834_v10 = vadd.f32 %v5021_v19, %v572_v24 }
  0x29   :  { %v581_v29 = vmul.f32 %v6412_v7, %v4990_v25  ;;  %v835_v15 = vadd.f32 %v5021_v19, %v573_v4  ;;  %v836_v5 = vadd.f32 %v5021_v19, %v574_v17  ;;  %v837_v13 = vadd.f32 %v5021_v19, %v575_v46 }
  0x2a   :  { %v1086_v12 = vmax.f32 %v830_v18, 0.0  ;;  %v1087_v33 = vmax.f32 %v831_v14, 0.0  ;;  %v1088_v20 = vmax.f32 %v832_v8, 0.0  ;;  %v1089_v7 = vmax.f32 %v833_v22, 0.0 }
  0x2b   :  { %v1090_v48 = vmax.f32 %v834_v10, 0.0  ;;  %v1091_v35 = vmax.f32 %v835_v15, 0.0  ;;  %v1092_v42 = vmax.f32 %v836_v5, 0.0  ;;  %v1093_v23 = vmax.f32 %v837_v13, 0.0 }
  0x2c   :  { %v3653_v52 = vpack.c.bf16 %v1087_v33, %v1086_v12  ;;  %v3658_v36 = vpack.c.bf16 %v1089_v7, %v1088_v20  ;;  %v838_v30 = vadd.f32 %v5021_v19, %v576_v34  ;;  %v839_v24 = vadd.f32 %v5021_v19, %v577_v11 }
  0x2d   :  { %v3663_v41 = vpack.c.bf16 %v1091_v35, %v1090_v48  ;;  %v3668_v4 = vpack.c.bf16 %v1093_v23, %v1092_v42  ;;  %v840_v17 = vadd.f32 %v5021_v19, %v578_v6  ;;  %v841_v46 = vadd.f32 %v5021_v19, %v579_v28 }
  0x2e   :  { %3654 = vst [vmem:[%s6342_s4] sm:$0xff] %v3653_v52   ;;  %4417 = vst [vmem:[%s6342_s4 + $0x8] sm:$0xff] %v3658_v36   ;;  %v1094_v10 = vmax.f32 %v838_v30, 0.0  ;;  %v1095_v12 = vmax.f32 %v839_v24, 0.0  ;;  %v842_v18 = vadd.f32 %v5021_v19, %v580_v40  ;;  %v843_v33 = vadd.f32 %v5021_v19, %v581_v29 }
  0x2f   :  { %4418 = vst [vmem:[%s6342_s4 + $0x10] sm:$0xff] %v3663_v41   ;;  %4419 = vst [vmem:[%s6342_s4 + $0x18] sm:$0xff] %v3668_v4   ;;  %v1096_v42 = vmax.f32 %v840_v17, 0.0  ;;  %v1097_v48 = vmax.f32 %v841_v46, 0.0  ;;  %v6413_v52 = vunpack.c.l.bf16 %v4626_v21  ;;  %v6414_v11 = vunpack.c.h.bf16 %v4626_v21 }
  0x30   :  { %v3673_v28 = vpack.c.bf16 %v1095_v12, %v1094_v10  ;;  %v1098_v40 = vmax.f32 %v842_v18, 0.0  ;;  %v1099_v29 = vmax.f32 %v843_v33, 0.0  ;;  %v6415_v41 = vunpack.c.l.bf16 %v4637_v26 }
  0x31   :  { %v582_v34 = vmul.f32 %v6413_v52, %v4990_v25  ;;  %v583_v6 = vmul.f32 %v6414_v11, %v4990_v25  ;;  %v3678_v8 = vpack.c.bf16 %v1097_v48, %v1096_v42  ;;  %v6416_v5 = vunpack.c.h.bf16 %v4637_v26 }
  0x32   :  { %v584_v14 = vmul.f32 %v6415_v41, %v4990_v25  ;;  %4420 = vst [vmem:[%s6342_s4 + $0x20] sm:$0xff] %v3673_v28   ;;  %v3683_v21 = vpack.c.bf16 %v1099_v29, %v1098_v40  ;;  %v6417_v7 = vunpack.c.l.bf16 %v4645_v31  ;;  %v6418_v23 = vunpack.c.h.bf16 %v4645_v31 }
  0x33   :  { %v844_v22 = vadd.f32 %v5021_v19, %v582_v34  ;;  %v845_v15 = vadd.f32 %v5021_v19, %v583_v6  ;;  %v585_v13 = vmul.f32 %v6416_v5, %v4990_v25  ;;  %4421 = vst [vmem:[%s6342_s4 + $0x28] sm:$0xff] %v3678_v8   ;;  %v6419_v4 = vunpack.c.l.bf16 %v4650_v32 }
  0x34   :  { %v846_v20 = vadd.f32 %v5021_v19, %v584_v14  ;;  %v586_v35 = vmul.f32 %v6417_v7, %v4990_v25  ;;  %v587_v36 = vmul.f32 %v6418_v23, %v4990_v25  ;;  %4422 = vst [vmem:[%s6342_s4 + $0x30] sm:$0xff] %v3683_v21   ;;  %v6420_v12 = vunpack.c.h.bf16 %v4650_v32 }
  0x35   :  { %v1100_v26 = vmax.f32 %v844_v22, 0.0  ;;  %v1101_v30 = vmax.f32 %v845_v15, 0.0  ;;  %v847_v24 = vadd.f32 %v5021_v19, %v585_v13  ;;  %v588_v17 = vmul.f32 %v6419_v4, %v4990_v25 }
  0x36   :  { %v1102_v46 = vmax.f32 %v846_v20, 0.0  ;;  %v848_v31 = vadd.f32 %v5021_v19, %v586_v35  ;;  %v849_v10 = vadd.f32 %v5021_v19, %v587_v36  ;;  %v589_v18 = vmul.f32 %v6420_v12, %v4990_v25 }
  0x37   :  { %v3688_v33 = vpack.c.bf16 %v1101_v30, %v1100_v26  ;;  %v1103_v42 = vmax.f32 %v847_v24, 0.0  ;;  %v850_v48 = vadd.f32 %v5021_v19, %v588_v17  ;;  %v6421_v52 = vunpack.c.l.bf16 %v4659_v37 }
  0x38   :  { %v1104_v11 = vmax.f32 %v848_v31, 0.0  ;;  %v1105_v6 = vmax.f32 %v849_v10, 0.0  ;;  %v851_v28 = vadd.f32 %v5021_v19, %v589_v18  ;;  %v6422_v40 = vunpack.c.h.bf16 %v4659_v37 }
  0x39   :  { %v590_v34 = vmul.f32 %v6421_v52, %v4990_v25  ;;  %4423 = vst [vmem:[%s6342_s4 + $0x38] sm:$0xff] %v3688_v33   ;;  %v3693_v32 = vpack.c.bf16 %v1103_v42, %v1102_v46  ;;  %v1106_v41 = vmax.f32 %v850_v48, 0.0  ;;  %v6423_v8 = vunpack.c.l.bf16 %v4664_v38 }
  0x3a   :  { %v591_v29 = vmul.f32 %v6422_v40, %v4990_v25  ;;  %v3698_v15 = vpack.c.bf16 %v1105_v6, %v1104_v11  ;;  %v1107_v5 = vmax.f32 %v851_v28, 0.0  ;;  %v6424_v37 = vunpack.c.h.bf16 %v4664_v38 }
  0x3b   :  { %v852_v14 = vadd.f32 %v5021_v19, %v590_v34  ;;  %v592_v22 = vmul.f32 %v6423_v8, %v4990_v25  ;;  %4424 = vst [vmem:[%s6342_s4 + $0x40] sm:$0xff] %v3693_v32   ;;  %v6425_v35 = vunpack.c.l.bf16 %v4673_v43  ;;  %v6426_v36 = vunpack.c.h.bf16 %v4673_v43 }
  0x3c   :  { %v853_v13 = vadd.f32 %v5021_v19, %v591_v29  ;;  %v593_v21 = vmul.f32 %v6424_v37, %v4990_v25  ;;  %4425 = vst [vmem:[%s6342_s4 + $0x48] sm:$0xff] %v3698_v15   ;;  %v3703_v38 = vpack.c.bf16 %v1107_v5, %v1106_v41  ;;  %v6427_v4 = vunpack.c.l.bf16 %v4678_v44 }
  0x3d   :  { %v1108_v20 = vmax.f32 %v852_v14, 0.0  ;;  %v854_v7 = vadd.f32 %v5021_v19, %v592_v22  ;;  %v594_v23 = vmul.f32 %v6425_v35, %v4990_v25  ;;  %v595_v26 = vmul.f32 %v6426_v36, %v4990_v25 }
  0x3e   :  { %v1109_v30 = vmax.f32 %v853_v13, 0.0  ;;  %v855_v24 = vadd.f32 %v5021_v19, %v593_v21  ;;  %v596_v17 = vmul.f32 %v6427_v4, %v4990_v25  ;;  %v6428_v43 = vunpack.c.h.bf16 %v4678_v44  ;;  %4426 = vst [vmem:[%s6342_s4 + $0x50] sm:$0xff] %v3703_v38  }
  0x3f   :  { %v1110_v46 = vmax.f32 %v854_v7, 0.0  ;;  %v856_v31 = vadd.f32 %v5021_v19, %v594_v23  ;;  %v857_v10 = vadd.f32 %v5021_v19, %v595_v26  ;;  %v6429_v48 = vunpack.c.l.bf16 %v4687_v49 }
  0x40   :  { %v597_v12 = vmul.f32 %v6428_v43, %v4990_v25  ;;  %v3708_v18 = vpack.c.bf16 %v1109_v30, %v1108_v20  ;;  %v1111_v33 = vmax.f32 %v855_v24, 0.0  ;;  %v858_v42 = vadd.f32 %v5021_v19, %v596_v17 }
  0x41   :  { %v598_v52 = vmul.f32 %v6429_v48, %v4990_v25  ;;  %v1112_v34 = vmax.f32 %v856_v31, 0.0  ;;  %v1113_v11 = vmax.f32 %v857_v10, 0.0  ;;  %v6430_v44 = vunpack.c.h.bf16 %v4687_v49 }
  0x42   :  { %v859_v6 = vadd.f32 %v5021_v19, %v597_v12  ;;  %4427 = vst [vmem:[%s6342_s4 + $0x58] sm:$0xff] %v3708_v18   ;;  %v3713_v40 = vpack.c.bf16 %v1111_v33, %v1110_v46  ;;  %v1114_v29 = vmax.f32 %v858_v42, 0.0  ;;  %v6431_v41 = vunpack.c.l.bf16 %v4695_v54 }
  0x43   :  { %v599_v28 = vmul.f32 %v6430_v44, %v4990_v25  ;;  %v860_v32 = vadd.f32 %v5021_v19, %v598_v52  ;;  %v3718_v8 = vpack.c.bf16 %v1113_v11, %v1112_v34  ;;  %v6432_v49 = vunpack.c.h.bf16 %v4695_v54 }
  0x44   :  { %v600_v14 = vmul.f32 %v6431_v41, %v4990_v25  ;;  %v1115_v22 = vmax.f32 %v859_v6, 0.0  ;;  %4428 = vst [vmem:[%s6342_s4 + $0x60] sm:$0xff] %v3713_v40   ;;  %v6433_v21 = vunpack.c.l.bf16 %v4700_v55  ;;  %v6434_v7 = vunpack.c.h.bf16 %v4700_v55 }
  0x45   :  { %v861_v15 = vadd.f32 %v5021_v19, %v599_v28  ;;  %v601_v5 = vmul.f32 %v6432_v49, %v4990_v25  ;;  %v1116_v13 = vmax.f32 %v860_v32, 0.0  ;;  %4429 = vst [vmem:[%s6342_s4 + $0x68] sm:$0xff] %v3718_v8   ;;  %v6435_v26 = vunpack.c.l.bf16 %v4709_v60 }
  0x46   :  { %v862_v37 = vadd.f32 %v5021_v19, %v600_v14  ;;  %v602_v20 = vmul.f32 %v6433_v21, %v4990_v25  ;;  %v603_v35 = vmul.f32 %v6434_v7, %v4990_v25  ;;  %v3723_v54 = vpack.c.bf16 %v1115_v22, %v1114_v29 }
  0x47   :  { %v1117_v23 = vmax.f32 %v861_v15, 0.0  ;;  %v863_v36 = vadd.f32 %v5021_v19, %v601_v5  ;;  %v604_v38 = vmul.f32 %v6435_v26, %v4990_v25  ;;  %v6436_v55 = vunpack.c.h.bf16 %v4709_v60 }
  0x48   :  { %v1118_v30 = vmax.f32 %v862_v37, 0.0  ;;  %v864_v24 = vadd.f32 %v5021_v19, %v602_v20  ;;  %v865_v4 = vadd.f32 %v5021_v19, %v603_v35  ;;  %4430 = vst [vmem:[%s6342_s4 + $0x70] sm:$0xff] %v3723_v54   ;;  %v6437_v43 = vunpack.c.l.bf16 %v4714_v61 }
  0x49   :  { %v605_v17 = vmul.f32 %v6436_v55, %v4990_v25  ;;  %v3728_v46 = vpack.c.bf16 %v1117_v23, %v1116_v13  ;;  %v1119_v31 = vmax.f32 %v863_v36, 0.0  ;;  %v866_v10 = vadd.f32 %v5021_v19, %v604_v38 }
  0x4a   :  { %v606_v12 = vmul.f32 %v6437_v43, %v4990_v25  ;;  %v1120_v18 = vmax.f32 %v864_v24, 0.0  ;;  %v1121_v33 = vmax.f32 %v865_v4, 0.0  ;;  %v6438_v60 = vunpack.c.h.bf16 %v4714_v61 }
  0x4b   :  { %v867_v42 = vadd.f32 %v5021_v19, %v605_v17  ;;  %4431 = vst [vmem:[%s6342_s4 + $0x78] sm:$0xff] %v3728_v46   ;;  %v3733_v52 = vpack.c.bf16 %v1119_v31, %v1118_v30  ;;  %v1122_v34 = vmax.f32 %v866_v10, 0.0  ;;  %v6439_v6 = vunpack.c.l.bf16 %v4722_v2 }
  0x4c   :  { %v607_v48 = vmul.f32 %v6438_v60, %v4990_v25  ;;  %v868_v11 = vadd.f32 %v5021_v19, %v606_v12  ;;  %v3738_v28 = vpack.c.bf16 %v1121_v33, %v1120_v18  ;;  %v6440_v61 = vunpack.c.h.bf16 %v4722_v2 }
  0x4d   :  { %v608_v44 = vmul.f32 %v6439_v6, %v4990_v25  ;;  %v1123_v40 = vmax.f32 %v867_v42, 0.0  ;;  %4432 = vst [vmem:[%s6342_s4 + $0x80] sm:$0xff] %v3733_v52   ;;  %v6441_v8 = vunpack.c.l.bf16 %v4727_v3  ;;  %v6442_v15 = vunpack.c.h.bf16 %v4727_v3 }
  0x4e   :  { %v869_v29 = vadd.f32 %v5021_v19, %v607_v48  ;;  %v609_v32 = vmul.f32 %v6440_v61, %v4990_v25  ;;  %v1124_v41 = vmax.f32 %v868_v11, 0.0  ;;  %4433 = vst [vmem:[%s6342_s4 + $0x88] sm:$0xff] %v3738_v28   ;;  %v6443_v37 = vunpack.c.l.bf16 %v4736_v50 }
  0x4f   :  { %v870_v14 = vadd.f32 %v5021_v19, %v608_v44  ;;  %v610_v22 = vmul.f32 %v6441_v8, %v4990_v25  ;;  %v611_v49 = vmul.f32 %v6442_v15, %v4990_v25  ;;  %v3743_v2 = vpack.c.bf16 %v1123_v40, %v1122_v34 }
  0x50   :  { %v1125_v5 = vmax.f32 %v869_v29, 0.0  ;;  %v871_v13 = vadd.f32 %v5021_v19, %v609_v32  ;;  %v612_v21 = vmul.f32 %v6443_v37, %v4990_v25  ;;  %v6444_v3 = vunpack.c.h.bf16 %v4736_v50 }
  0x51   :  { %v1126_v20 = vmax.f32 %v870_v14, 0.0  ;;  %v872_v7 = vadd.f32 %v5021_v19, %v610_v22  ;;  %v873_v35 = vadd.f32 %v5021_v19, %v611_v49  ;;  %4434 = vst [vmem:[%s6342_s4 + $0x90] sm:$0xff] %v3743_v2   ;;  %v6445_v38 = vunpack.c.l.bf16 %v4741_v1 }
  0x52   :  { %v613_v54 = vmul.f32 %v6444_v3, %v4990_v25  ;;  %v3748_v23 = vpack.c.bf16 %v1125_v5, %v1124_v41  ;;  %v1127_v36 = vmax.f32 %v871_v13, 0.0  ;;  %v874_v26 = vadd.f32 %v5021_v19, %v612_v21 }
  0x53   :  { %v614_v30 = vmul.f32 %v6445_v38, %v4990_v25  ;;  %v1128_v24 = vmax.f32 %v872_v7, 0.0  ;;  %v1129_v4 = vmax.f32 %v873_v35, 0.0  ;;  %v6446_v50 = vunpack.c.h.bf16 %v4741_v1 }
  0x54   :  { %v875_v55 = vadd.f32 %v5021_v19, %v613_v54  ;;  %4435 = vst [vmem:[%s6342_s4 + $0x98] sm:$0xff] %v3748_v23   ;;  %v3753_v46 = vpack.c.bf16 %v1127_v36, %v1126_v20  ;;  %v1130_v31 = vmax.f32 %v874_v26, 0.0  ;;  %v6447_v43 = vunpack.c.l.bf16 %v4749_v39 }
  0x55   :  { %v615_v17 = vmul.f32 %v6446_v50, %v4990_v25  ;;  %v876_v10 = vadd.f32 %v5021_v19, %v614_v30  ;;  %v3758_v18 = vpack.c.bf16 %v1129_v4, %v1128_v24  ;;  %v6448_v1 = vunpack.c.h.bf16 %v4749_v39 }
  0x56   :  { %v616_v12 = vmul.f32 %v6447_v43, %v4990_v25  ;;  %v1131_v33 = vmax.f32 %v875_v55, 0.0  ;;  %4436 = vst [vmem:[%s6342_s4 + $0xa0] sm:$0xff] %v3753_v46   ;;  %v6449_v34 = vunpack.c.l.bf16 %v4754_v27  ;;  %v6450_v6 = vunpack.c.h.bf16 %v4754_v27 }
  0x57   :  { %v877_v42 = vadd.f32 %v5021_v19, %v615_v17  ;;  %v617_v60 = vmul.f32 %v6448_v1, %v4990_v25  ;;  %v1132_v48 = vmax.f32 %v876_v10, 0.0  ;;  %4437 = vst [vmem:[%s6342_s4 + $0xa8] sm:$0xff] %v3758_v18   ;;  %v6451_v29 = vunpack.c.l.bf16 %v4763_v16 }
  0x58   :  { %v878_v52 = vadd.f32 %v5021_v19, %v616_v12  ;;  %v618_v11 = vmul.f32 %v6449_v34, %v4990_v25  ;;  %v619_v44 = vmul.f32 %v6450_v6, %v4990_v25  ;;  %v3763_v39 = vpack.c.bf16 %v1131_v33, %v1130_v31 }
  0x59   :  { %v1133_v28 = vmax.f32 %v877_v42, 0.0  ;;  %v879_v40 = vadd.f32 %v5021_v19, %v617_v60  ;;  %v620_v61 = vmul.f32 %v6451_v29, %v4990_v25  ;;  %v6452_v27 = vunpack.c.h.bf16 %v4763_v16 }
  0x5a   :  { %v1134_v32 = vmax.f32 %v878_v52, 0.0  ;;  %v880_v41 = vadd.f32 %v5021_v19, %v618_v11  ;;  %v881_v14 = vadd.f32 %v5021_v19, %v619_v44  ;;  %4438 = vst [vmem:[%s6342_s4 + $0xb0] sm:$0xff] %v3763_v39   ;;  %v6453_v2 = vunpack.c.l.bf16 %v4768_v59 }
  0x5b   :  { %v621_v8 = vmul.f32 %v6452_v27, %v4990_v25  ;;  %v3768_v22 = vpack.c.bf16 %v1133_v28, %v1132_v48  ;;  %v1135_v15 = vmax.f32 %v879_v40, 0.0  ;;  %v882_v49 = vadd.f32 %v5021_v19, %v620_v61 }
  0x5c   :  { %v622_v5 = vmul.f32 %v6453_v2, %v4990_v25  ;;  %v1136_v13 = vmax.f32 %v880_v41, 0.0  ;;  %v1137_v37 = vmax.f32 %v881_v14, 0.0  ;;  %v6454_v16 = vunpack.c.h.bf16 %v4768_v59 }
  0x5d   :  { %v883_v21 = vadd.f32 %v5021_v19, %v621_v8  ;;  %4439 = vst [vmem:[%s6342_s4 + $0xb8] sm:$0xff] %v3768_v22   ;;  %v3773_v7 = vpack.c.bf16 %v1135_v15, %v1134_v32  ;;  %v1138_v35 = vmax.f32 %v882_v49, 0.0  ;;  %v6455_v54 = vunpack.c.l.bf16 %v4777_v9 }
  0x5e   :  { %v623_v20 = vmul.f32 %v6454_v16, %v4990_v25  ;;  %v884_v3 = vadd.f32 %v5021_v19, %v622_v5  ;;  %v3778_v36 = vpack.c.bf16 %v1137_v37, %v1136_v13  ;;  %v6456_v59 = vunpack.c.h.bf16 %v4777_v9 }
  0x5f   :  { %v624_v23 = vmul.f32 %v6455_v54, %v4990_v25  ;;  %v1139_v26 = vmax.f32 %v883_v21, 0.0  ;;  %4440 = vst [vmem:[%s6342_s4 + $0xc0] sm:$0xff] %v3773_v7   ;;  %v6457_v55 = vunpack.c.l.bf16 %v4782_v57  ;;  %v6458_v17 = vunpack.c.h.bf16 %v4782_v57 }
  0x60   :  { %v885_v38 = vadd.f32 %v5021_v19, %v623_v20  ;;  %v625_v30 = vmul.f32 %v6456_v59, %v4990_v25  ;;  %v1140_v24 = vmax.f32 %v884_v3, 0.0  ;;  %4441 = vst [vmem:[%s6342_s4 + $0xc8] sm:$0xff] %v3778_v36   ;;  %v6459_v43 = vunpack.c.l.bf16 %v4791_v0 }
  0x61   :  { %v886_v4 = vadd.f32 %v5021_v19, %v624_v23  ;;  %v626_v50 = vmul.f32 %v6457_v55, %v4990_v25  ;;  %v627_v46 = vmul.f32 %v6458_v17, %v4990_v25  ;;  %v3783_v9 = vpack.c.bf16 %v1139_v26, %v1138_v35 }
  0x62   :  { %v1141_v31 = vmax.f32 %v885_v38, 0.0  ;;  %v887_v10 = vadd.f32 %v5021_v19, %v625_v30  ;;  %v628_v12 = vmul.f32 %v6459_v43, %v4990_v25  ;;  %v6460_v57 = vunpack.c.h.bf16 %v4791_v0 }
  0x63   :  { %v1142_v18 = vmax.f32 %v886_v4, 0.0  ;;  %v888_v33 = vadd.f32 %v5021_v19, %v626_v50  ;;  %v889_v42 = vadd.f32 %v5021_v19, %v627_v46  ;;  %4442 = vst [vmem:[%s6342_s4 + $0xd0] sm:$0xff] %v3783_v9   ;;  %v6461_v34 = vunpack.c.l.bf16 %v4796_v53 }
  0x64   :  { %v629_v1 = vmul.f32 %v6460_v57, %v4990_v25  ;;  %v3788_v60 = vpack.c.bf16 %v1141_v31, %v1140_v24  ;;  %v1143_v48 = vmax.f32 %v887_v10, 0.0  ;;  %v890_v52 = vadd.f32 %v5021_v19, %v628_v12 }
  0x65   :  { %v630_v11 = vmul.f32 %v6461_v34, %v4990_v25  ;;  %v1144_v6 = vmax.f32 %v888_v33, 0.0  ;;  %v1145_v44 = vmax.f32 %v889_v42, 0.0  ;;  %v6462_v0 = vunpack.c.h.bf16 %v4796_v53 }
  0x66   :  { %v891_v39 = vadd.f32 %v5021_v19, %v629_v1  ;;  %4443 = vst [vmem:[%s6342_s4 + $0xd8] sm:$0xff] %v3788_v60   ;;  %v3793_v40 = vpack.c.bf16 %v1143_v48, %v1142_v18  ;;  %v1146_v29 = vmax.f32 %v890_v52, 0.0  ;;  %v6463_v32 = vunpack.c.l.bf16 %v4805_v62 }
  0x67   :  { %v631_v28 = vmul.f32 %v6462_v0, %v4990_v25  ;;  %v892_v61 = vadd.f32 %v5021_v19, %v630_v11  ;;  %v3798_v14 = vpack.c.bf16 %v1145_v44, %v1144_v6  ;;  %v6464_v53 = vunpack.c.h.bf16 %v4805_v62 }
  0x68   :  { %v632_v41 = vmul.f32 %v6463_v32, %v4990_v25  ;;  %v1147_v27 = vmax.f32 %v891_v39, 0.0  ;;  %4444 = vst [vmem:[%s6342_s4 + $0xe0] sm:$0xff] %v3793_v40   ;;  %v6465_v2 = vunpack.c.l.bf16 %v4810_v51  ;;  %v6466_v13 = vunpack.c.h.bf16 %v4810_v51 }
  0x69   :  { %v893_v8 = vadd.f32 %v5021_v19, %v631_v28  ;;  %v633_v22 = vmul.f32 %v6464_v53, %v4990_v25  ;;  %v1148_v15 = vmax.f32 %v892_v61, 0.0  ;;  %4445 = vst [vmem:[%s6342_s4 + $0xe8] sm:$0xff] %v3798_v14   ;;  %v6467_v20 = vunpack.c.l.bf16 %v4819_v63 }
  0x6a   :  { %v894_v49 = vadd.f32 %v5021_v19, %v632_v41  ;;  %v634_v5 = vmul.f32 %v6465_v2, %v4990_v25  ;;  %v635_v37 = vmul.f32 %v6466_v13, %v4990_v25  ;;  %v3803_v62 = vpack.c.bf16 %v1147_v27, %v1146_v29  ;;  %v6477_v41 = vld [vmem:[#allocation2_spill] sm:$0xff]  ;;  %v6480_v13 = vld [vmem:[#allocation3_spill] sm:$0xff] }
  0x6b   :  { %v1149_v21 = vmax.f32 %v893_v8, 0.0  ;;  %v895_v16 = vadd.f32 %v5021_v19, %v633_v22  ;;  %v636_v7 = vmul.f32 %v6467_v20, %v4990_v25  ;;  %v6468_v51 = vunpack.c.h.bf16 %v4819_v63 }
  0x6c   :  { %v1150_v35 = vmax.f32 %v894_v49, 0.0  ;;  %v896_v3 = vadd.f32 %v5021_v19, %v634_v5  ;;  %v897_v54 = vadd.f32 %v5021_v19, %v635_v37  ;;  %4446 = vst [vmem:[%s6342_s4 + $0xf0] sm:$0xff] %v3803_v62   ;;  %v6469_v59 = vunpack.c.l.bf16 %v4824_v47 }
  0x6d   :  { %v637_v23 = vmul.f32 %v6468_v51, %v4990_v25  ;;  %v3808_v36 = vpack.c.bf16 %v1149_v21, %v1148_v15  ;;  %v1151_v26 = vmax.f32 %v895_v16, 0.0  ;;  %v898_v38 = vadd.f32 %v5021_v19, %v636_v7  ;;  %v6483_v51 = vld [vmem:[#allocation4_spill] sm:$0xff] }
  0x6e   :  { %v638_v30 = vmul.f32 %v6469_v59, %v4990_v25  ;;  %v1152_v24 = vmax.f32 %v896_v3, 0.0  ;;  %v1153_v4 = vmax.f32 %v897_v54, 0.0  ;;  %v6470_v63 = vunpack.c.h.bf16 %v4824_v47 }
  0x6f   :  { %v899_v55 = vadd.f32 %v5021_v19, %v637_v23  ;;  %4447 = vst [vmem:[%s6342_s4 + $0xf8] sm:$0xff] %v3808_v36   ;;  %v3813_v17 = vpack.c.bf16 %v1151_v26, %v1150_v35  ;;  %v1154_v46 = vmax.f32 %v898_v38, 0.0  ;;  %v6471_v31 = vunpack.c.l.bf16 %v4833_v58 }
  0x70   :  { %v639_v50 = vmul.f32 %v6470_v63, %v4990_v25  ;;  %v900_v9 = vadd.f32 %v5021_v19, %v638_v30  ;;  %v3818_v43 = vpack.c.bf16 %v1153_v4, %v1152_v24  ;;  %v6472_v47 = vunpack.c.h.bf16 %v4833_v58  ;;  %v6486_v4 = vld [vmem:[#allocation5_spill] sm:$0xff] }
  0x71   :  { %v640_v10 = vmul.f32 %v6471_v31, %v4990_v25  ;;  %v1155_v12 = vmax.f32 %v899_v55, 0.0  ;;  %4448 = vst [vmem:[%s6342_s4 + $0x100] sm:$0xff] %v3813_v17   ;;  %v6473_v1 = vunpack.c.l.bf16 %v4838_v45  ;;  %v6474_v48 = vunpack.c.h.bf16 %v4838_v45 }
  0x72   :  { %v901_v18 = vadd.f32 %v5021_v19, %v639_v50  ;;  %v641_v33 = vmul.f32 %v6472_v47, %v4990_v25  ;;  %v1156_v42 = vmax.f32 %v900_v9, 0.0  ;;  %4449 = vst [vmem:[%s6342_s4 + $0x108] sm:$0xff] %v3818_v43   ;;  %v6475_v6 = vunpack.c.l.bf16 %v4847_v56 }
  0x73   :  { %v902_v57 = vadd.f32 %v5021_v19, %v640_v10  ;;  %v642_v60 = vmul.f32 %v6473_v1, %v4990_v25  ;;  %v643_v52 = vmul.f32 %v6474_v48, %v4990_v25  ;;  %v3823_v58 = vpack.c.bf16 %v1155_v12, %v1154_v46 }
  0x74   :  { %v1157_v34 = vmax.f32 %v901_v18, 0.0  ;;  %v903_v11 = vadd.f32 %v5021_v19, %v641_v33  ;;  %v644_v44 = vmul.f32 %v6475_v6, %v4990_v25  ;;  %v6476_v45 = vunpack.c.h.bf16 %v4847_v56  ;;  %v6489_v18 = vld [vmem:[#allocation6_spill] sm:$0xff] }
  0x75   :  { %v1158_v39 = vmax.f32 %v902_v57, 0.0  ;;  %v904_v0 = vadd.f32 %v5021_v19, %v642_v60  ;;  %v905_v28 = vadd.f32 %v5021_v19, %v643_v52  ;;  %4450 = vst [vmem:[%s6342_s4 + $0x110] sm:$0xff] %v3823_v58   ;;  %v6478_v14 = vunpack.c.l.bf16 %v6477_v41 }
  0x76   :  { %v645_v40 = vmul.f32 %v6476_v45, %v4990_v25  ;;  %v3828_v29 = vpack.c.bf16 %v1157_v34, %v1156_v42  ;;  %v1159_v61 = vmax.f32 %v903_v11, 0.0  ;;  %v906_v32 = vadd.f32 %v5021_v19, %v644_v44  ;;  %v6492_v11 = vld [vmem:[#allocation7_spill] sm:$0xff] }
  0x77   :  { %v646_v27 = vmul.f32 %v6478_v14, %v4990_v25  ;;  %v1160_v8 = vmax.f32 %v904_v0, 0.0  ;;  %v1161_v53 = vmax.f32 %v905_v28, 0.0  ;;  %v6479_v56 = vunpack.c.h.bf16 %v6477_v41 }
  0x78   :  { %v907_v22 = vadd.f32 %v5021_v19, %v645_v40  ;;  %4451 = vst [vmem:[%s6342_s4 + $0x118] sm:$0xff] %v3828_v29   ;;  %v3833_v49 = vpack.c.bf16 %v1159_v61, %v1158_v39  ;;  %v1162_v2 = vmax.f32 %v906_v32, 0.0  ;;  %v6481_v37 = vunpack.c.l.bf16 %v6480_v13  ;;  %v6495_v32 = vld [vmem:[#allocation8_spill] sm:$0xff] }
  0x79   :  { %v647_v15 = vmul.f32 %v6479_v56, %v4990_v25  ;;  %v908_v5 = vadd.f32 %v5021_v19, %v646_v27  ;;  %v3838_v21 = vpack.c.bf16 %v1161_v53, %v1160_v8  ;;  %v6482_v7 = vunpack.c.h.bf16 %v6480_v13 }
  0x7a   :  { %v648_v62 = vmul.f32 %v6481_v37, %v4990_v25  ;;  %v1163_v16 = vmax.f32 %v907_v22, 0.0  ;;  %4452 = vst [vmem:[%s6342_s4 + $0x120] sm:$0xff] %v3833_v49   ;;  %v6484_v23 = vunpack.c.l.bf16 %v6483_v51  ;;  %v6485_v26 = vunpack.c.h.bf16 %v6483_v51 }
  0x7b   :  { %v909_v20 = vadd.f32 %v5021_v19, %v647_v15  ;;  %v649_v35 = vmul.f32 %v6482_v7, %v4990_v25  ;;  %v1164_v3 = vmax.f32 %v908_v5, 0.0  ;;  %4453 = vst [vmem:[%s6342_s4 + $0x128] sm:$0xff] %v3838_v21   ;;  %v6487_v55 = vunpack.c.l.bf16 %v6486_v4  ;;  %v6498_v15 = vld [vmem:[#allocation9_spill] sm:$0xff] }
  0x7c   :  { %v910_v54 = vadd.f32 %v5021_v19, %v648_v62  ;;  %v650_v36 = vmul.f32 %v6484_v23, %v4990_v25  ;;  %v651_v38 = vmul.f32 %v6485_v26, %v4990_v25  ;;  %v3843_v59 = vpack.c.bf16 %v1163_v16, %v1162_v2 }
  0x7d   :  { %v1165_v30 = vmax.f32 %v909_v20, 0.0  ;;  %v911_v24 = vadd.f32 %v5021_v19, %v649_v35  ;;  %v652_v63 = vmul.f32 %v6487_v55, %v4990_v25  ;;  %v6488_v9 = vunpack.c.h.bf16 %v6486_v4  ;;  %v6501_v35 = vld [vmem:[#allocation10_spill] sm:$0xff]  ;;  %v6504_v4 = vld [vmem:[#allocation11_spill] sm:$0xff] }
  0x7e   :  { %v1166_v50 = vmax.f32 %v910_v54, 0.0  ;;  %v912_v17 = vadd.f32 %v5021_v19, %v650_v36  ;;  %v913_v46 = vadd.f32 %v5021_v19, %v651_v38  ;;  %4454 = vst [vmem:[%s6342_s4 + $0x130] sm:$0xff] %v3843_v59   ;;  %v6490_v47 = vunpack.c.l.bf16 %v6489_v18 }
  0x7f   :  { %v653_v31 = vmul.f32 %v6488_v9, %v4990_v25  ;;  %v3848_v10 = vpack.c.bf16 %v1165_v30, %v1164_v3  ;;  %v1167_v43 = vmax.f32 %v911_v24, 0.0  ;;  %v914_v12 = vadd.f32 %v5021_v19, %v652_v63 }
  0x80   :  { %v654_v33 = vmul.f32 %v6490_v47, %v4990_v25  ;;  %v1168_v42 = vmax.f32 %v912_v17, 0.0  ;;  %v1169_v57 = vmax.f32 %v913_v46, 0.0  ;;  %v6491_v60 = vunpack.c.h.bf16 %v6489_v18 }
  0x81   :  { %v915_v1 = vadd.f32 %v5021_v19, %v653_v31  ;;  %4455 = vst [vmem:[%s6342_s4 + $0x138] sm:$0xff] %v3848_v10   ;;  %v3853_v52 = vpack.c.bf16 %v1167_v43, %v1166_v50  ;;  %v1170_v58 = vmax.f32 %v914_v12, 0.0  ;;  %v6493_v6 = vunpack.c.l.bf16 %v6492_v11  ;;  %v6507_v12 = vld [vmem:[#allocation12_spill] sm:$0xff] }
  0x82   :  { %v655_v48 = vmul.f32 %v6491_v60, %v4990_v25  ;;  %v916_v34 = vadd.f32 %v5021_v19, %v654_v33  ;;  %v3858_v39 = vpack.c.bf16 %v1169_v57, %v1168_v42  ;;  %v6494_v45 = vunpack.c.h.bf16 %v6492_v11 }
  0x83   :  { %v656_v44 = vmul.f32 %v6493_v6, %v4990_v25  ;;  %v1171_v0 = vmax.f32 %v915_v1, 0.0  ;;  %4456 = vst [vmem:[%s6342_s4 + $0x140] sm:$0xff] %v3853_v52   ;;  %v6496_v41 = vunpack.c.l.bf16 %v6495_v32  ;;  %v6497_v27 = vunpack.c.h.bf16 %v6495_v32 }
  0x84   :  { %v917_v28 = vadd.f32 %v5021_v19, %v655_v48  ;;  %v657_v40 = vmul.f32 %v6494_v45, %v4990_v25  ;;  %v1172_v29 = vmax.f32 %v916_v34, 0.0  ;;  %4457 = vst [vmem:[%s6342_s4 + $0x148] sm:$0xff] %v3858_v39   ;;  %v6499_v49 = vunpack.c.l.bf16 %v6498_v15  ;;  %v6510_v48 = vld [vmem:[#allocation13_spill] sm:$0xff] }
  0x85   :  { %v918_v61 = vadd.f32 %v5021_v19, %v656_v44  ;;  %v658_v14 = vmul.f32 %v6496_v41, %v4990_v25  ;;  %v659_v8 = vmul.f32 %v6497_v27, %v4990_v25  ;;  %v3863_v53 = vpack.c.bf16 %v1171_v0, %v1170_v58 }
  0x86   :  { %v1173_v22 = vmax.f32 %v917_v28, 0.0  ;;  %v919_v56 = vadd.f32 %v5021_v19, %v657_v40  ;;  %v660_v2 = vmul.f32 %v6499_v49, %v4990_v25  ;;  %v6500_v62 = vunpack.c.h.bf16 %v6498_v15  ;;  %v6513_v40 = vld [vmem:[#allocation14_spill] sm:$0xff]  ;;  %v6516_v15 = vld [vmem:[#allocation15_spill] sm:$0xff] }
  0x87   :  { %v1174_v5 = vmax.f32 %v918_v61, 0.0  ;;  %v920_v13 = vadd.f32 %v5021_v19, %v658_v14  ;;  %v921_v37 = vadd.f32 %v5021_v19, %v659_v8  ;;  %4458 = vst [vmem:[%s6342_s4 + $0x150] sm:$0xff] %v3863_v53   ;;  %v6502_v3 = vunpack.c.l.bf16 %v6501_v35 }
  0x88   :  { %v661_v21 = vmul.f32 %v6500_v62, %v4990_v25  ;;  %v3868_v16 = vpack.c.bf16 %v1173_v22, %v1172_v29  ;;  %v1175_v20 = vmax.f32 %v919_v56, 0.0  ;;  %v922_v7 = vadd.f32 %v5021_v19, %v660_v2 }
  0x89   :  { %v662_v54 = vmul.f32 %v6502_v3, %v4990_v25  ;;  %v1176_v51 = vmax.f32 %v920_v13, 0.0  ;;  %v1177_v23 = vmax.f32 %v921_v37, 0.0  ;;  %v6503_v26 = vunpack.c.h.bf16 %v6501_v35 }
  0x8a   :  { %v923_v36 = vadd.f32 %v5021_v19, %v661_v21  ;;  %4459 = vst [vmem:[%s6342_s4 + $0x158] sm:$0xff] %v3868_v16   ;;  %v3873_v59 = vpack.c.bf16 %v1175_v20, %v1174_v5  ;;  %v1178_v30 = vmax.f32 %v922_v7, 0.0  ;;  %v6505_v55 = vunpack.c.l.bf16 %v6504_v4  ;;  %v6519_v7 = vld [vmem:[#allocation16_spill] sm:$0xff] }
  0x8b   :  { %v663_v38 = vmul.f32 %v6503_v26, %v4990_v25  ;;  %v924_v24 = vadd.f32 %v5021_v19, %v662_v54  ;;  %v3878_v50 = vpack.c.bf16 %v1177_v23, %v1176_v51  ;;  %v6506_v9 = vunpack.c.h.bf16 %v6504_v4 }
  0x8c   :  { %v664_v63 = vmul.f32 %v6505_v55, %v4990_v25  ;;  %v1179_v17 = vmax.f32 %v923_v36, 0.0  ;;  %4460 = vst [vmem:[%s6342_s4 + $0x160] sm:$0xff] %v3873_v59   ;;  %v6508_v18 = vunpack.c.l.bf16 %v6507_v12  ;;  %v6509_v33 = vunpack.c.h.bf16 %v6507_v12 }
  0x8d   :  { %v925_v46 = vadd.f32 %v5021_v19, %v663_v38  ;;  %v665_v31 = vmul.f32 %v6506_v9, %v4990_v25  ;;  %v1180_v10 = vmax.f32 %v924_v24, 0.0  ;;  %4461 = vst [vmem:[%s6342_s4 + $0x168] sm:$0xff] %v3878_v50   ;;  %v6511_v52 = vunpack.c.l.bf16 %v6510_v48  ;;  %v6522_v38 = vld [vmem:[#allocation17_spill] sm:$0xff] }
  0x8e   :  { %v926_v43 = vadd.f32 %v5021_v19, %v664_v63  ;;  %v666_v47 = vmul.f32 %v6508_v18, %v4990_v25  ;;  %v667_v42 = vmul.f32 %v6509_v33, %v4990_v25  ;;  %v3883_v57 = vpack.c.bf16 %v1179_v17, %v1178_v30 }
  0x8f   :  { %v1181_v1 = vmax.f32 %v925_v46, 0.0  ;;  %v927_v60 = vadd.f32 %v5021_v19, %v665_v31  ;;  %v668_v58 = vmul.f32 %v6511_v52, %v4990_v25  ;;  %v6512_v44 = vunpack.c.h.bf16 %v6510_v48  ;;  %v6525_v31 = vld [vmem:[#allocation18_spill] sm:$0xff]  ;;  %v6528_v52 = vld [vmem:[#allocation19_spill] sm:$0xff] }
  0x90   :  { %v1182_v34 = vmax.f32 %v926_v43, 0.0  ;;  %v928_v11 = vadd.f32 %v5021_v19, %v666_v47  ;;  %v929_v6 = vadd.f32 %v5021_v19, %v667_v42  ;;  %4462 = vst [vmem:[%s6342_s4 + $0x170] sm:$0xff] %v3883_v57   ;;  %v6514_v29 = vunpack.c.l.bf16 %v6513_v40  ;;  %v4346_v57 = vld [vmem:[%s6338_s0 + $0x1c8] sm:$0xff]  }
  0x91   :  { %v669_v39 = vmul.f32 %v6512_v44, %v4990_v25  ;;  %v3888_v0 = vpack.c.bf16 %v1181_v1, %v1180_v10  ;;  %v1183_v28 = vmax.f32 %v927_v60, 0.0  ;;  %v930_v45 = vadd.f32 %v5021_v19, %v668_v58 }
  0x92   :  { %v670_v61 = vmul.f32 %v6514_v29, %v4990_v25  ;;  %v1184_v32 = vmax.f32 %v928_v11, 0.0  ;;  %v1185_v41 = vmax.f32 %v929_v6, 0.0  ;;  %v6515_v27 = vunpack.c.h.bf16 %v6513_v40 }
  0x93   :  { %v931_v14 = vadd.f32 %v5021_v19, %v669_v39  ;;  %4463 = vst [vmem:[%s6342_s4 + $0x178] sm:$0xff] %v3888_v0   ;;  %v3893_v53 = vpack.c.bf16 %v1183_v28, %v1182_v34  ;;  %v1186_v22 = vmax.f32 %v930_v45, 0.0  ;;  %v6517_v49 = vunpack.c.l.bf16 %v6516_v15  ;;  %v4347_v34 = vld [vmem:[%s6338_s0 + $0x1d0] sm:$0xff]  }
  0x94   :  { %v671_v8 = vmul.f32 %v6515_v27, %v4990_v25  ;;  %v932_v56 = vadd.f32 %v5021_v19, %v670_v61  ;;  %v3898_v5 = vpack.c.bf16 %v1185_v41, %v1184_v32  ;;  %v6518_v62 = vunpack.c.h.bf16 %v6516_v15  ;;  %v4348_v61 = vld [vmem:[%s6338_s0 + $0x1d8] sm:$0xff]   ;;  %v4349_v15 = vld [vmem:[%s6338_s0 + $0x1e0] sm:$0xff]  }
  0x95   :  { %v672_v2 = vmul.f32 %v6517_v49, %v4990_v25  ;;  %v1187_v13 = vmax.f32 %v931_v14, 0.0  ;;  %4464 = vst [vmem:[%s6342_s4 + $0x180] sm:$0xff] %v3893_v53   ;;  %v6520_v35 = vunpack.c.l.bf16 %v6519_v7  ;;  %v6521_v54 = vunpack.c.h.bf16 %v6519_v7 }
  0x96   :  { %v933_v37 = vadd.f32 %v5021_v19, %v671_v8  ;;  %v673_v21 = vmul.f32 %v6518_v62, %v4990_v25  ;;  %v1188_v16 = vmax.f32 %v932_v56, 0.0  ;;  %4465 = vst [vmem:[%s6342_s4 + $0x188] sm:$0xff] %v3898_v5   ;;  %v6523_v59 = vunpack.c.l.bf16 %v6522_v38 }
  0x97   :  { %v934_v20 = vadd.f32 %v5021_v19, %v672_v2  ;;  %v674_v3 = vmul.f32 %v6520_v35, %v4990_v25  ;;  %v675_v51 = vmul.f32 %v6521_v54, %v4990_v25  ;;  %v3903_v23 = vpack.c.bf16 %v1187_v13, %v1186_v22  ;;  %v4350_v54 = vld [vmem:[%s6338_s0 + $0x1e8] sm:$0xff]  }
  0x98   :  { %v1189_v36 = vmax.f32 %v933_v37, 0.0  ;;  %v935_v26 = vadd.f32 %v5021_v19, %v673_v21  ;;  %v676_v30 = vmul.f32 %v6523_v59, %v4990_v25  ;;  %v6524_v63 = vunpack.c.h.bf16 %v6522_v38 }
  0x99   :  { %v1190_v24 = vmax.f32 %v934_v20, 0.0  ;;  %v936_v4 = vadd.f32 %v5021_v19, %v674_v3  ;;  %v937_v55 = vadd.f32 %v5021_v19, %v675_v51  ;;  %4466 = vst [vmem:[%s6342_s4 + $0x190] sm:$0xff] %v3903_v23   ;;  %v6526_v10 = vunpack.c.l.bf16 %v6525_v31 }
  0x9a   :  { %v677_v50 = vmul.f32 %v6524_v63, %v4990_v25  ;;  %v3908_v17 = vpack.c.bf16 %v1189_v36, %v1188_v16  ;;  %v1191_v46 = vmax.f32 %v935_v26, 0.0  ;;  %v938_v9 = vadd.f32 %v5021_v19, %v676_v30 }
  0x9b   :  { %v678_v43 = vmul.f32 %v6526_v10, %v4990_v25  ;;  %v1192_v12 = vmax.f32 %v936_v4, 0.0  ;;  %v1193_v18 = vmax.f32 %v937_v55, 0.0  ;;  %v6527_v33 = vunpack.c.h.bf16 %v6525_v31  ;;  %v4351_v4 = vld [vmem:[%s6338_s0 + $0x1f0] sm:$0xff]  }
  0x9c   :  { %v939_v47 = vadd.f32 %v5021_v19, %v677_v50  ;;  %4467 = vst [vmem:[%s6342_s4 + $0x198] sm:$0xff] %v3908_v17   ;;  %v3913_v1 = vpack.c.bf16 %v1191_v46, %v1190_v24  ;;  %v1194_v60 = vmax.f32 %v938_v9, 0.0  ;;  %v3365_v58 = vunpack.c.h.bf16 %v6528_v52 }
  0x9d   :  { %v679_v42 = vmul.f32 %v6527_v33, %v4990_v25  ;;  %v940_v48 = vadd.f32 %v5021_v19, %v678_v43  ;;  %v3918_v11 = vpack.c.bf16 %v1193_v18, %v1192_v12  ;;  %v6529_v39 = vunpack.c.l.bf16 %v6528_v52  ;;  %v4352_v43 = vld [vmem:[%s6338_s0 + $0x1f8] sm:$0xff]  }
  0x9e   :  { %v1195_v6 = vmax.f32 %v939_v47, 0.0  ;;  %4468 = vst [vmem:[%s6342_s4 + $0x1a0] sm:$0xff] %v3913_v1   ;;  %v681_v45 = vmul.f32 %v3365_v58, %v4990_v25  ;;  %v3368_v40 = vunpack.c.l.bf16 %v4346_v57  ;;  %v3369_v29 = vunpack.c.h.bf16 %v4346_v57 }
  0x9f   :  { %v941_v44 = vadd.f32 %v5021_v19, %v679_v42  ;;  %v680_v0 = vmul.f32 %v6529_v39, %v4990_v25  ;;  %v1196_v28 = vmax.f32 %v940_v48, 0.0  ;;  %4469 = vst [vmem:[%s6342_s4 + $0x1a8] sm:$0xff] %v3918_v11   ;;  %v3372_v27 = vunpack.c.l.bf16 %v4347_v34  ;;  %v4353_v11 = vld [vmem:[%s6338_s0 + $0x200] sm:$0xff]  }
  0xa0   :  { %v3923_v32 = vpack.c.bf16 %v1195_v6, %v1194_v60  ;;  %v943_v8 = vadd.f32 %v5021_v19, %v681_v45  ;;  %v682_v53 = vmul.f32 %v3368_v40, %v4990_v25  ;;  %v683_v22 = vmul.f32 %v3369_v29, %v4990_v25 }
  0xa1   :  { %v1197_v41 = vmax.f32 %v941_v44, 0.0  ;;  %v942_v14 = vadd.f32 %v5021_v19, %v680_v0  ;;  %v3373_v56 = vunpack.c.h.bf16 %v4347_v34  ;;  %v684_v5 = vmul.f32 %v3372_v27, %v4990_v25 }
  0xa2   :  { %4470 = vst [vmem:[%s6342_s4 + $0x1b0] sm:$0xff] %v3923_v32   ;;  %v3376_v13 = vunpack.c.l.bf16 %v4348_v61  ;;  %v1199_v37 = vmax.f32 %v943_v8, 0.0  ;;  %v944_v62 = vadd.f32 %v5021_v19, %v682_v53  ;;  %v945_v21 = vadd.f32 %v5021_v19, %v683_v22 }
  0xa3   :  { %v3928_v49 = vpack.c.bf16 %v1197_v41, %v1196_v28  ;;  %v1198_v2 = vmax.f32 %v942_v14, 0.0  ;;  %v685_v16 = vmul.f32 %v3373_v56, %v4990_v25  ;;  %v946_v20 = vadd.f32 %v5021_v19, %v684_v5 }
  0xa4   :  { %v3377_v7 = vunpack.c.h.bf16 %v4348_v61  ;;  %v686_v35 = vmul.f32 %v3376_v13, %v4990_v25  ;;  %v3380_v3 = vunpack.c.l.bf16 %v4349_v15  ;;  %v1200_v23 = vmax.f32 %v944_v62, 0.0  ;;  %v4354_v61 = vld [vmem:[%s6338_s0 + $0x208] sm:$0xff]  }
  0xa5   :  { %4471 = vst [vmem:[%s6342_s4 + $0x1b8] sm:$0xff] %v3928_v49   ;;  %v3933_v51 = vpack.c.bf16 %v1199_v37, %v1198_v2  ;;  %v1201_v36 = vmax.f32 %v945_v21, 0.0  ;;  %v947_v26 = vadd.f32 %v5021_v19, %v685_v16  ;;  %v1202_v38 = vmax.f32 %v946_v20, 0.0  ;;  %v4356_v20 = vld [vmem:[%s6338_s0 + $0x218] sm:$0xff]  }
  0xa6   :  { %v687_v59 = vmul.f32 %v3377_v7, %v4990_v25  ;;  %v948_v30 = vadd.f32 %v5021_v19, %v686_v35  ;;  %v3381_v24 = vunpack.c.h.bf16 %v4349_v15  ;;  %v688_v50 = vmul.f32 %v3380_v3, %v4990_v25  ;;  %v4355_v15 = vld [vmem:[%s6338_s0 + $0x210] sm:$0xff]  }
  0xa7   :  { %4472 = vst [vmem:[%s6342_s4 + $0x1c0] sm:$0xff] %v3933_v51   ;;  %v3938_v55 = vpack.c.bf16 %v1201_v36, %v1200_v23  ;;  %v1203_v63 = vmax.f32 %v947_v26, 0.0  ;;  %v3384_v17 = vunpack.c.l.bf16 %v4350_v54  ;;  %v3385_v10 = vunpack.c.h.bf16 %v4350_v54 }
  0xa8   :  { %v949_v46 = vadd.f32 %v5021_v19, %v687_v59  ;;  %v1204_v9 = vmax.f32 %v948_v30, 0.0  ;;  %v689_v31 = vmul.f32 %v3381_v24, %v4990_v25  ;;  %v950_v18 = vadd.f32 %v5021_v19, %v688_v50 }
  0xa9   :  { %4473 = vst [vmem:[%s6342_s4 + $0x1c8] sm:$0xff] %v3938_v55   ;;  %v3943_v12 = vpack.c.bf16 %v1203_v63, %v1202_v38  ;;  %v690_v47 = vmul.f32 %v3384_v17, %v4990_v25  ;;  %v3388_v33 = vunpack.c.l.bf16 %v4351_v4  ;;  %v691_v1 = vmul.f32 %v3385_v10, %v4990_v25 }
  0xaa   :  { %v1205_v42 = vmax.f32 %v949_v46, 0.0  ;;  %v951_v57 = vadd.f32 %v5021_v19, %v689_v31  ;;  %v3389_v60 = vunpack.c.h.bf16 %v4351_v4  ;;  %v1206_v48 = vmax.f32 %v950_v18, 0.0  ;;  %v4357_v4 = vld [vmem:[%s6338_s0 + $0x220] sm:$0xff]  }
  0xab   :  { %4474 = vst [vmem:[%s6342_s4 + $0x1d0] sm:$0xff] %v3943_v12   ;;  %v952_v52 = vadd.f32 %v5021_v19, %v690_v47  ;;  %v692_v58 = vmul.f32 %v3388_v33, %v4990_v25  ;;  %v3392_v34 = vunpack.c.l.bf16 %v4352_v43  ;;  %v953_v39 = vadd.f32 %v5021_v19, %v691_v1 }
  0xac   :  { %v3948_v6 = vpack.c.bf16 %v1205_v42, %v1204_v9  ;;  %v1207_v44 = vmax.f32 %v951_v57, 0.0  ;;  %v693_v0 = vmul.f32 %v3389_v60, %v4990_v25  ;;  %v3393_v40 = vunpack.c.h.bf16 %v4352_v43  ;;  %v4358_v43 = vld [vmem:[%s6338_s0 + $0x228] sm:$0xff]  }
  0xad   :  { %v1208_v28 = vmax.f32 %v952_v52, 0.0  ;;  %v954_v45 = vadd.f32 %v5021_v19, %v692_v58  ;;  %v694_v29 = vmul.f32 %v3392_v34, %v4990_v25  ;;  %v1209_v41 = vmax.f32 %v953_v39, 0.0 }
  0xae   :  { %4475 = vst [vmem:[%s6342_s4 + $0x1d8] sm:$0xff] %v3948_v6   ;;  %v3953_v32 = vpack.c.bf16 %v1207_v44, %v1206_v48  ;;  %v955_v14 = vadd.f32 %v5021_v19, %v693_v0  ;;  %v3396_v27 = vunpack.c.l.bf16 %v4353_v11  ;;  %v695_v53 = vmul.f32 %v3393_v40, %v4990_v25  ;;  %v4359_v48 = vld [vmem:[%s6338_s0 + $0x230] sm:$0xff]  }
  0xaf   :  { %v1210_v8 = vmax.f32 %v954_v45, 0.0  ;;  %v956_v22 = vadd.f32 %v5021_v19, %v694_v29  ;;  %v3397_v56 = vunpack.c.h.bf16 %v4353_v11  ;;  %v3958_v49 = vpack.c.bf16 %v1209_v41, %v1208_v28  ;;  %v4360_v28 = vld [vmem:[%s6338_s0 + $0x238] sm:$0xff]  }
  0xb0   :  { %4476 = vst [vmem:[%s6342_s4 + $0x1e0] sm:$0xff] %v3953_v32   ;;  %v1211_v2 = vmax.f32 %v955_v14, 0.0  ;;  %v696_v5 = vmul.f32 %v3396_v27, %v4990_v25  ;;  %v3400_v13 = vunpack.c.l.bf16 %v4354_v61  ;;  %v957_v37 = vadd.f32 %v5021_v19, %v695_v53 }
  0xb1   :  { %v1212_v62 = vmax.f32 %v956_v22, 0.0  ;;  %v697_v21 = vmul.f32 %v3397_v56, %v4990_v25  ;;  %v3401_v16 = vunpack.c.h.bf16 %v4354_v61  ;;  %4477 = vst [vmem:[%s6342_s4 + $0x1e8] sm:$0xff] %v3958_v49   ;;  %v3404_v54 = vunpack.c.l.bf16 %v4355_v15 }
  0xb2   :  { %v3963_v7 = vpack.c.bf16 %v1211_v2, %v1210_v8  ;;  %v958_v35 = vadd.f32 %v5021_v19, %v696_v5  ;;  %v698_v3 = vmul.f32 %v3400_v13, %v4990_v25  ;;  %v1213_v51 = vmax.f32 %v957_v37, 0.0 }
  0xb3   :  { %v959_v23 = vadd.f32 %v5021_v19, %v697_v21  ;;  %v699_v36 = vmul.f32 %v3401_v16, %v4990_v25  ;;  %v3405_v26 = vunpack.c.h.bf16 %v4355_v15  ;;  %v700_v30 = vmul.f32 %v3404_v54, %v4990_v25  ;;  %v4361_v15 = vld [vmem:[%s6338_s0 + $0x240] sm:$0xff]  }
  0xb4   :  { %4478 = vst [vmem:[%s6342_s4 + $0x1f0] sm:$0xff] %v3963_v7   ;;  %v1214_v38 = vmax.f32 %v958_v35, 0.0  ;;  %v960_v59 = vadd.f32 %v5021_v19, %v698_v3  ;;  %v3408_v24 = vunpack.c.l.bf16 %v4356_v20  ;;  %v3968_v55 = vpack.c.bf16 %v1213_v51, %v1212_v62 }
  0xb5   :  { %v1215_v63 = vmax.f32 %v959_v23, 0.0  ;;  %v961_v50 = vadd.f32 %v5021_v19, %v699_v36  ;;  %v701_v17 = vmul.f32 %v3405_v26, %v4990_v25  ;;  %v962_v9 = vadd.f32 %v5021_v19, %v700_v30 }
  0xb6   :  { %v1216_v46 = vmax.f32 %v960_v59, 0.0  ;;  %v3409_v31 = vunpack.c.h.bf16 %v4356_v20  ;;  %v702_v10 = vmul.f32 %v3408_v24, %v4990_v25  ;;  %4479 = vst [vmem:[%s6342_s4 + $0x1f8] sm:$0xff] %v3968_v55   ;;  %v3412_v33 = vunpack.c.l.bf16 %v4357_v4  ;;  %v4362_v20 = vld [vmem:[%s6338_s0 + $0x248] sm:$0xff]  }
  0xb7   :  { %v3973_v12 = vpack.c.bf16 %v1215_v63, %v1214_v38  ;;  %v1217_v18 = vmax.f32 %v961_v50, 0.0  ;;  %v963_v47 = vadd.f32 %v5021_v19, %v701_v17  ;;  %v1218_v42 = vmax.f32 %v962_v9, 0.0  ;;  %v4363_v38 = vld [vmem:[%s6338_s0 + $0x250] sm:$0xff]  }
  0xb8   :  { %v703_v57 = vmul.f32 %v3409_v31, %v4990_v25  ;;  %v964_v1 = vadd.f32 %v5021_v19, %v702_v10  ;;  %v3413_v60 = vunpack.c.h.bf16 %v4357_v4  ;;  %v704_v34 = vmul.f32 %v3412_v33, %v4990_v25 }
  0xb9   :  { %4480 = vst [vmem:[%s6342_s4 + $0x200] sm:$0xff] %v3973_v12   ;;  %v3978_v52 = vpack.c.bf16 %v1217_v18, %v1216_v46  ;;  %v1219_v58 = vmax.f32 %v963_v47, 0.0  ;;  %v3416_v11 = vunpack.c.l.bf16 %v4358_v43  ;;  %v3417_v0 = vunpack.c.h.bf16 %v4358_v43  ;;  %v4364_v46 = vld [vmem:[%s6338_s0 + $0x258] sm:$0xff]  }
  0xba   :  { %v965_v6 = vadd.f32 %v5021_v19, %v703_v57  ;;  %v1220_v44 = vmax.f32 %v964_v1, 0.0  ;;  %v705_v39 = vmul.f32 %v3413_v60, %v4990_v25  ;;  %v966_v40 = vadd.f32 %v5021_v19, %v704_v34 }
  0xbb   :  { %4481 = vst [vmem:[%s6342_s4 + $0x208] sm:$0xff] %v3978_v52   ;;  %v3983_v45 = vpack.c.bf16 %v1219_v58, %v1218_v42  ;;  %v706_v29 = vmul.f32 %v3416_v11, %v4990_v25  ;;  %v3420_v61 = vunpack.c.l.bf16 %v4359_v48  ;;  %v707_v14 = vmul.f32 %v3417_v0, %v4990_v25 }
  0xbc   :  { %v1221_v32 = vmax.f32 %v965_v6, 0.0  ;;  %v967_v41 = vadd.f32 %v5021_v19, %v705_v39  ;;  %v3421_v27 = vunpack.c.h.bf16 %v4359_v48  ;;  %v1222_v8 = vmax.f32 %v966_v40, 0.0  ;;  %v4365_v48 = vld [vmem:[%s6338_s0 + $0x260] sm:$0xff]  }
  0xbd   :  { %4482 = vst [vmem:[%s6342_s4 + $0x210] sm:$0xff] %v3983_v45   ;;  %v968_v53 = vadd.f32 %v5021_v19, %v706_v29  ;;  %v708_v22 = vmul.f32 %v3420_v61, %v4990_v25  ;;  %v3424_v56 = vunpack.c.l.bf16 %v4360_v28  ;;  %v969_v5 = vadd.f32 %v5021_v19, %v707_v14 }
  0xbe   :  { %v3988_v49 = vpack.c.bf16 %v1221_v32, %v1220_v44  ;;  %v1223_v2 = vmax.f32 %v967_v41, 0.0  ;;  %v709_v13 = vmul.f32 %v3421_v27, %v4990_v25  ;;  %v3425_v21 = vunpack.c.h.bf16 %v4360_v28  ;;  %v4366_v28 = vld [vmem:[%s6338_s0 + $0x268] sm:$0xff]  }
  0xbf   :  { %v1224_v37 = vmax.f32 %v968_v53, 0.0  ;;  %v970_v62 = vadd.f32 %v5021_v19, %v708_v22  ;;  %v710_v16 = vmul.f32 %v3424_v56, %v4990_v25  ;;  %v1225_v35 = vmax.f32 %v969_v5, 0.0 }
  0xc0   :  { %4483 = vst [vmem:[%s6342_s4 + $0x218] sm:$0xff] %v3988_v49   ;;  %v3993_v7 = vpack.c.bf16 %v1223_v2, %v1222_v8  ;;  %v971_v3 = vadd.f32 %v5021_v19, %v709_v13  ;;  %v3428_v54 = vunpack.c.l.bf16 %v4361_v15  ;;  %v711_v23 = vmul.f32 %v3425_v21, %v4990_v25  ;;  %v4367_v8 = vld [vmem:[%s6338_s0 + $0x270] sm:$0xff]  }
  0xc1   :  { %v1226_v51 = vmax.f32 %v970_v62, 0.0  ;;  %v972_v36 = vadd.f32 %v5021_v19, %v710_v16  ;;  %v3429_v26 = vunpack.c.h.bf16 %v4361_v15  ;;  %v3998_v59 = vpack.c.bf16 %v1225_v35, %v1224_v37  ;;  %v4368_v37 = vld [vmem:[%s6338_s0 + $0x278] sm:$0xff]  }
  0xc2   :  { %4484 = vst [vmem:[%s6342_s4 + $0x220] sm:$0xff] %v3993_v7   ;;  %v1227_v30 = vmax.f32 %v971_v3, 0.0  ;;  %v712_v24 = vmul.f32 %v3428_v54, %v4990_v25  ;;  %v3432_v4 = vunpack.c.l.bf16 %v4362_v20  ;;  %v973_v55 = vadd.f32 %v5021_v19, %v711_v23 }
  0xc3   :  { %v1228_v63 = vmax.f32 %v972_v36, 0.0  ;;  %v713_v50 = vmul.f32 %v3429_v26, %v4990_v25  ;;  %v3433_v17 = vunpack.c.h.bf16 %v4362_v20  ;;  %4485 = vst [vmem:[%s6342_s4 + $0x228] sm:$0xff] %v3998_v59   ;;  %v3436_v43 = vunpack.c.l.bf16 %v4363_v38 }
  0xc4   :  { %v4003_v9 = vpack.c.bf16 %v1227_v30, %v1226_v51  ;;  %v974_v31 = vadd.f32 %v5021_v19, %v712_v24  ;;  %v714_v10 = vmul.f32 %v3432_v4, %v4990_v25  ;;  %v1229_v12 = vmax.f32 %v973_v55, 0.0 }
  0xc5   :  { %v975_v18 = vadd.f32 %v5021_v19, %v713_v50  ;;  %v715_v47 = vmul.f32 %v3433_v17, %v4990_v25  ;;  %v3437_v33 = vunpack.c.h.bf16 %v4363_v38  ;;  %v716_v1 = vmul.f32 %v3436_v43, %v4990_v25  ;;  %v4369_v38 = vld [vmem:[%s6338_s0 + $0x280] sm:$0xff]  }
  0xc6   :  { %4486 = vst [vmem:[%s6342_s4 + $0x230] sm:$0xff] %v4003_v9   ;;  %v1230_v42 = vmax.f32 %v974_v31, 0.0  ;;  %v976_v57 = vadd.f32 %v5021_v19, %v714_v10  ;;  %v3440_v60 = vunpack.c.l.bf16 %v4364_v46  ;;  %v4008_v52 = vpack.c.bf16 %v1229_v12, %v1228_v63 }
  0xc7   :  { %v1231_v58 = vmax.f32 %v975_v18, 0.0  ;;  %v977_v34 = vadd.f32 %v5021_v19, %v715_v47  ;;  %v717_v11 = vmul.f32 %v3437_v33, %v4990_v25  ;;  %v978_v44 = vadd.f32 %v5021_v19, %v716_v1 }
  0xc8   :  { %v1232_v6 = vmax.f32 %v976_v57, 0.0  ;;  %v3441_v39 = vunpack.c.h.bf16 %v4364_v46  ;;  %v718_v0 = vmul.f32 %v3440_v60, %v4990_v25  ;;  %4487 = vst [vmem:[%s6342_s4 + $0x238] sm:$0xff] %v4008_v52   ;;  %v3444_v61 = vunpack.c.l.bf16 %v4365_v48  ;;  %v4370_v46 = vld [vmem:[%s6338_s0 + $0x288] sm:$0xff]  }
  0xc9   :  { %v4013_v45 = vpack.c.bf16 %v1231_v58, %v1230_v42  ;;  %v1233_v40 = vmax.f32 %v977_v34, 0.0  ;;  %v979_v29 = vadd.f32 %v5021_v19, %v717_v11  ;;  %v1234_v32 = vmax.f32 %v978_v44, 0.0  ;;  %v4371_v42 = vld [vmem:[%s6338_s0 + $0x290] sm:$0xff]  }
  0xca   :  { %v719_v41 = vmul.f32 %v3441_v39, %v4990_v25  ;;  %v980_v14 = vadd.f32 %v5021_v19, %v718_v0  ;;  %v3445_v27 = vunpack.c.h.bf16 %v4365_v48  ;;  %v720_v56 = vmul.f32 %v3444_v61, %v4990_v25 }
  0xcb   :  { %4488 = vst [vmem:[%s6342_s4 + $0x240] sm:$0xff] %v4013_v45   ;;  %v4018_v53 = vpack.c.bf16 %v1233_v40, %v1232_v6  ;;  %v1235_v22 = vmax.f32 %v979_v29, 0.0  ;;  %v3448_v15 = vunpack.c.l.bf16 %v4366_v28  ;;  %v3449_v13 = vunpack.c.h.bf16 %v4366_v28  ;;  %v4372_v6 = vld [vmem:[%s6338_s0 + $0x298] sm:$0xff]  }
  0xcc   :  { %v981_v49 = vadd.f32 %v5021_v19, %v719_v41  ;;  %v1236_v2 = vmax.f32 %v980_v14, 0.0  ;;  %v721_v5 = vmul.f32 %v3445_v27, %v4990_v25  ;;  %v982_v21 = vadd.f32 %v5021_v19, %v720_v56 }
  0xcd   :  { %4489 = vst [vmem:[%s6342_s4 + $0x248] sm:$0xff] %v4018_v53   ;;  %v4023_v62 = vpack.c.bf16 %v1235_v22, %v1234_v32  ;;  %v722_v16 = vmul.f32 %v3448_v15, %v4990_v25  ;;  %v3452_v20 = vunpack.c.l.bf16 %v4367_v8  ;;  %v723_v3 = vmul.f32 %v3449_v13, %v4990_v25 }
  0xce   :  { %v1237_v7 = vmax.f32 %v981_v49, 0.0  ;;  %v983_v35 = vadd.f32 %v5021_v19, %v721_v5  ;;  %v3453_v54 = vunpack.c.h.bf16 %v4367_v8  ;;  %v1238_v51 = vmax.f32 %v982_v21, 0.0  ;;  %v4373_v8 = vld [vmem:[%s6338_s0 + $0x2a0] sm:$0xff]  }
  0xcf   :  { %4490 = vst [vmem:[%s6342_s4 + $0x250] sm:$0xff] %v4023_v62   ;;  %v984_v23 = vadd.f32 %v5021_v19, %v722_v16  ;;  %v724_v36 = vmul.f32 %v3452_v20, %v4990_v25  ;;  %v3456_v26 = vunpack.c.l.bf16 %v4368_v37  ;;  %v985_v24 = vadd.f32 %v5021_v19, %v723_v3 }
  0xd0   :  { %v4028_v59 = vpack.c.bf16 %v1237_v7, %v1236_v2  ;;  %v1239_v30 = vmax.f32 %v983_v35, 0.0  ;;  %v725_v4 = vmul.f32 %v3453_v54, %v4990_v25  ;;  %v3457_v50 = vunpack.c.h.bf16 %v4368_v37  ;;  %v4374_v37 = vld [vmem:[%s6338_s0 + $0x2a8] sm:$0xff]  }
  0xd1   :  { %v1240_v55 = vmax.f32 %v984_v23, 0.0  ;;  %v986_v63 = vadd.f32 %v5021_v19, %v724_v36  ;;  %v726_v17 = vmul.f32 %v3456_v26, %v4990_v25  ;;  %v1241_v31 = vmax.f32 %v985_v24, 0.0 }
  0xd2   :  { %4491 = vst [vmem:[%s6342_s4 + $0x258] sm:$0xff] %v4028_v59   ;;  %v4033_v9 = vpack.c.bf16 %v1239_v30, %v1238_v51  ;;  %v987_v10 = vadd.f32 %v5021_v19, %v725_v4  ;;  %v3460_v43 = vunpack.c.l.bf16 %v4369_v38  ;;  %v727_v18 = vmul.f32 %v3457_v50, %v4990_v25  ;;  %v4375_v51 = vld [vmem:[%s6338_s0 + $0x2b0] sm:$0xff]  }
  0xd3   :  { %v1242_v12 = vmax.f32 %v986_v63, 0.0  ;;  %v988_v47 = vadd.f32 %v5021_v19, %v726_v17  ;;  %v3461_v33 = vunpack.c.h.bf16 %v4369_v38  ;;  %v4038_v57 = vpack.c.bf16 %v1241_v31, %v1240_v55  ;;  %v4376_v55 = vld [vmem:[%s6338_s0 + $0x2b8] sm:$0xff]  }
  0xd4   :  { %4492 = vst [vmem:[%s6342_s4 + $0x260] sm:$0xff] %v4033_v9   ;;  %v1243_v1 = vmax.f32 %v987_v10, 0.0  ;;  %v728_v60 = vmul.f32 %v3460_v43, %v4990_v25  ;;  %v3464_v48 = vunpack.c.l.bf16 %v4370_v46  ;;  %v989_v52 = vadd.f32 %v5021_v19, %v727_v18 }
  0xd5   :  { %v1244_v58 = vmax.f32 %v988_v47, 0.0  ;;  %v729_v34 = vmul.f32 %v3461_v33, %v4990_v25  ;;  %v3465_v11 = vunpack.c.h.bf16 %v4370_v46  ;;  %4493 = vst [vmem:[%s6342_s4 + $0x268] sm:$0xff] %v4038_v57   ;;  %v3468_v28 = vunpack.c.l.bf16 %v4371_v42 }
  0xd6   :  { %v4043_v44 = vpack.c.bf16 %v1243_v1, %v1242_v12  ;;  %v990_v39 = vadd.f32 %v5021_v19, %v728_v60  ;;  %v730_v0 = vmul.f32 %v3464_v48, %v4990_v25  ;;  %v1245_v45 = vmax.f32 %v989_v52, 0.0 }
  0xd7   :  { %v991_v40 = vadd.f32 %v5021_v19, %v729_v34  ;;  %v731_v29 = vmul.f32 %v3465_v11, %v4990_v25  ;;  %v3469_v61 = vunpack.c.h.bf16 %v4371_v42  ;;  %v732_v14 = vmul.f32 %v3468_v28, %v4990_v25  ;;  %v4377_v42 = vld [vmem:[%s6338_s0 + $0x2c0] sm:$0xff]  }
  0xd8   :  { %4494 = vst [vmem:[%s6342_s4 + $0x270] sm:$0xff] %v4043_v44   ;;  %v1246_v32 = vmax.f32 %v990_v39, 0.0  ;;  %v992_v41 = vadd.f32 %v5021_v19, %v730_v0  ;;  %v3472_v27 = vunpack.c.l.bf16 %v4372_v6  ;;  %v4048_v53 = vpack.c.bf16 %v1245_v45, %v1244_v58 }
  0xd9   :  { %v1247_v22 = vmax.f32 %v991_v40, 0.0  ;;  %v993_v56 = vadd.f32 %v5021_v19, %v731_v29  ;;  %v733_v15 = vmul.f32 %v3469_v61, %v4990_v25  ;;  %v994_v2 = vadd.f32 %v5021_v19, %v732_v14 }
  0xda   :  { %v1248_v49 = vmax.f32 %v992_v41, 0.0  ;;  %v3473_v5 = vunpack.c.h.bf16 %v4372_v6  ;;  %v734_v13 = vmul.f32 %v3472_v27, %v4990_v25  ;;  %4495 = vst [vmem:[%s6342_s4 + $0x278] sm:$0xff] %v4048_v53   ;;  %v3476_v20 = vunpack.c.l.bf16 %v4373_v8  ;;  %v4378_v6 = vld [vmem:[%s6338_s0 + $0x2c8] sm:$0xff]  }
  0xdb   :  { %v4053_v62 = vpack.c.bf16 %v1247_v22, %v1246_v32  ;;  %v1249_v21 = vmax.f32 %v993_v56, 0.0  ;;  %v995_v16 = vadd.f32 %v5021_v19, %v733_v15  ;;  %v1250_v7 = vmax.f32 %v994_v2, 0.0  ;;  %v4379_v32 = vld [vmem:[%s6338_s0 + $0x2d0] sm:$0xff]  }
  0xdc   :  { %v735_v35 = vmul.f32 %v3473_v5, %v4990_v25  ;;  %v996_v3 = vadd.f32 %v5021_v19, %v734_v13  ;;  %v3477_v54 = vunpack.c.h.bf16 %v4373_v8  ;;  %v736_v26 = vmul.f32 %v3476_v20, %v4990_v25 }
  0xdd   :  { %4496 = vst [vmem:[%s6342_s4 + $0x280] sm:$0xff] %v4053_v62   ;;  %v4058_v23 = vpack.c.bf16 %v1249_v21, %v1248_v49  ;;  %v1251_v36 = vmax.f32 %v995_v16, 0.0  ;;  %v3480_v38 = vunpack.c.l.bf16 %v4374_v37  ;;  %v3481_v4 = vunpack.c.h.bf16 %v4374_v37  ;;  %v4380_v49 = vld [vmem:[%s6338_s0 + $0x2d8] sm:$0xff]  }
  0xde   :  { %v997_v59 = vadd.f32 %v5021_v19, %v735_v35  ;;  %v1252_v30 = vmax.f32 %v996_v3, 0.0  ;;  %v737_v24 = vmul.f32 %v3477_v54, %v4990_v25  ;;  %v998_v50 = vadd.f32 %v5021_v19, %v736_v26 }
  0xdf   :  { %4497 = vst [vmem:[%s6342_s4 + $0x288] sm:$0xff] %v4058_v23   ;;  %v4063_v63 = vpack.c.bf16 %v1251_v36, %v1250_v7  ;;  %v738_v17 = vmul.f32 %v3480_v38, %v4990_v25  ;;  %v3484_v46 = vunpack.c.l.bf16 %v4375_v51  ;;  %v739_v10 = vmul.f32 %v3481_v4, %v4990_v25 }
  0xe0   :  { %v1253_v9 = vmax.f32 %v997_v59, 0.0  ;;  %v999_v31 = vadd.f32 %v5021_v19, %v737_v24  ;;  %v3485_v43 = vunpack.c.h.bf16 %v4375_v51  ;;  %v1254_v12 = vmax.f32 %v998_v50, 0.0  ;;  %v4381_v51 = vld [vmem:[%s6338_s0 + $0x2e0] sm:$0xff]  }
  0xe1   :  { %4498 = vst [vmem:[%s6342_s4 + $0x290] sm:$0xff] %v4063_v63   ;;  %v1000_v18 = vadd.f32 %v5021_v19, %v738_v17  ;;  %v740_v47 = vmul.f32 %v3484_v46, %v4990_v25  ;;  %v3488_v33 = vunpack.c.l.bf16 %v4376_v55  ;;  %v1001_v60 = vadd.f32 %v5021_v19, %v739_v10 }
  0xe2   :  { %v4068_v57 = vpack.c.bf16 %v1253_v9, %v1252_v30  ;;  %v1255_v1 = vmax.f32 %v999_v31, 0.0  ;;  %v741_v48 = vmul.f32 %v3485_v43, %v4990_v25  ;;  %v3489_v34 = vunpack.c.h.bf16 %v4376_v55  ;;  %v4382_v55 = vld [vmem:[%s6338_s0 + $0x2e8] sm:$0xff]  }
  0xe3   :  { %v1256_v52 = vmax.f32 %v1000_v18, 0.0  ;;  %v1002_v58 = vadd.f32 %v5021_v19, %v740_v47  ;;  %v742_v11 = vmul.f32 %v3488_v33, %v4990_v25  ;;  %v1257_v39 = vmax.f32 %v1001_v60, 0.0 }
  0xe4   :  { %4499 = vst [vmem:[%s6342_s4 + $0x298] sm:$0xff] %v4068_v57   ;;  %v4073_v44 = vpack.c.bf16 %v1255_v1, %v1254_v12  ;;  %v1003_v0 = vadd.f32 %v5021_v19, %v741_v48  ;;  %v3492_v28 = vunpack.c.l.bf16 %v4377_v42  ;;  %v743_v40 = vmul.f32 %v3489_v34, %v4990_v25  ;;  %v4383_v12 = vld [vmem:[%s6338_s0 + $0x2f0] sm:$0xff]  }
  0xe5   :  { %v1258_v45 = vmax.f32 %v1002_v58, 0.0  ;;  %v1004_v29 = vadd.f32 %v5021_v19, %v742_v11  ;;  %v3493_v61 = vunpack.c.h.bf16 %v4377_v42  ;;  %v4078_v41 = vpack.c.bf16 %v1257_v39, %v1256_v52  ;;  %v4384_v52 = vld [vmem:[%s6338_s0 + $0x2f8] sm:$0xff]  }
  0xe6   :  { %4500 = vst [vmem:[%s6342_s4 + $0x2a0] sm:$0xff] %v4073_v44   ;;  %v1259_v14 = vmax.f32 %v1003_v0, 0.0  ;;  %v744_v27 = vmul.f32 %v3492_v28, %v4990_v25  ;;  %v3496_v8 = vunpack.c.l.bf16 %v4378_v6  ;;  %v1005_v53 = vadd.f32 %v5021_v19, %v743_v40 }
  0xe7   :  { %v1260_v22 = vmax.f32 %v1004_v29, 0.0  ;;  %v745_v56 = vmul.f32 %v3493_v61, %v4990_v25  ;;  %v3497_v15 = vunpack.c.h.bf16 %v4378_v6  ;;  %4501 = vst [vmem:[%s6342_s4 + $0x2a8] sm:$0xff] %v4078_v41   ;;  %v3500_v37 = vunpack.c.l.bf16 %v4379_v32 }
  0xe8   :  { %v4083_v2 = vpack.c.bf16 %v1259_v14, %v1258_v45  ;;  %v1006_v5 = vadd.f32 %v5021_v19, %v744_v27  ;;  %v746_v13 = vmul.f32 %v3496_v8, %v4990_v25  ;;  %v1261_v62 = vmax.f32 %v1005_v53, 0.0 }
  0xe9   :  { %v1007_v21 = vadd.f32 %v5021_v19, %v745_v56  ;;  %v747_v16 = vmul.f32 %v3497_v15, %v4990_v25  ;;  %v3501_v20 = vunpack.c.h.bf16 %v4379_v32  ;;  %v748_v3 = vmul.f32 %v3500_v37, %v4990_v25  ;;  %v4385_v32 = vld [vmem:[%s6338_s0 + $0x300] sm:$0xff]  }
  0xea   :  { %4502 = vst [vmem:[%s6342_s4 + $0x2b0] sm:$0xff] %v4083_v2   ;;  %v1262_v7 = vmax.f32 %v1006_v5, 0.0  ;;  %v1008_v35 = vadd.f32 %v5021_v19, %v746_v13  ;;  %v3504_v54 = vunpack.c.l.bf16 %v4380_v49  ;;  %v4088_v23 = vpack.c.bf16 %v1261_v62, %v1260_v22 }
  0xeb   :  { %v1263_v36 = vmax.f32 %v1007_v21, 0.0  ;;  %v1009_v26 = vadd.f32 %v5021_v19, %v747_v16  ;;  %v749_v38 = vmul.f32 %v3501_v20, %v4990_v25  ;;  %v1010_v30 = vadd.f32 %v5021_v19, %v748_v3 }
  0xec   :  { %v1264_v59 = vmax.f32 %v1008_v35, 0.0  ;;  %v3505_v24 = vunpack.c.h.bf16 %v4380_v49  ;;  %v750_v4 = vmul.f32 %v3504_v54, %v4990_v25  ;;  %4503 = vst [vmem:[%s6342_s4 + $0x2b8] sm:$0xff] %v4088_v23   ;;  %v3508_v46 = vunpack.c.l.bf16 %v4381_v51  ;;  %v4386_v49 = vld [vmem:[%s6338_s0 + $0x308] sm:$0xff]  }
  0xed   :  { %v4093_v63 = vpack.c.bf16 %v1263_v36, %v1262_v7  ;;  %v1265_v50 = vmax.f32 %v1009_v26, 0.0  ;;  %v1011_v17 = vadd.f32 %v5021_v19, %v749_v38  ;;  %v1266_v9 = vmax.f32 %v1010_v30, 0.0  ;;  %v4387_v7 = vld [vmem:[%s6338_s0 + $0x310] sm:$0xff]  }
  0xee   :  { %v751_v31 = vmul.f32 %v3505_v24, %v4990_v25  ;;  %v1012_v10 = vadd.f32 %v5021_v19, %v750_v4  ;;  %v3509_v43 = vunpack.c.h.bf16 %v4381_v51  ;;  %v752_v33 = vmul.f32 %v3508_v46, %v4990_v25 }
  0xef   :  { %4504 = vst [vmem:[%s6342_s4 + $0x2c0] sm:$0xff] %v4093_v63   ;;  %v4098_v18 = vpack.c.bf16 %v1265_v50, %v1264_v59  ;;  %v1267_v47 = vmax.f32 %v1011_v17, 0.0  ;;  %v3512_v42 = vunpack.c.l.bf16 %v4382_v55  ;;  %v3513_v48 = vunpack.c.h.bf16 %v4382_v55  ;;  %v4388_v59 = vld [vmem:[%s6338_s0 + $0x318] sm:$0xff]  }
  0xf0   :  { %v1013_v57 = vadd.f32 %v5021_v19, %v751_v31  ;;  %v1268_v1 = vmax.f32 %v1012_v10, 0.0  ;;  %v753_v60 = vmul.f32 %v3509_v43, %v4990_v25  ;;  %v1014_v34 = vadd.f32 %v5021_v19, %v752_v33 }
  0xf1   :  { %4505 = vst [vmem:[%s6342_s4 + $0x2c8] sm:$0xff] %v4098_v18   ;;  %v4103_v58 = vpack.c.bf16 %v1267_v47, %v1266_v9  ;;  %v754_v11 = vmul.f32 %v3512_v42, %v4990_v25  ;;  %v3516_v6 = vunpack.c.l.bf16 %v4383_v12  ;;  %v755_v0 = vmul.f32 %v3513_v48, %v4990_v25 }
  0xf2   :  { %v1269_v44 = vmax.f32 %v1013_v57, 0.0  ;;  %v1015_v39 = vadd.f32 %v5021_v19, %v753_v60  ;;  %v3517_v28 = vunpack.c.h.bf16 %v4383_v12  ;;  %v1270_v45 = vmax.f32 %v1014_v34, 0.0  ;;  %v4389_v12 = vld [vmem:[%s6338_s0 + $0x320] sm:$0xff]  }
  0xf3   :  { %4506 = vst [vmem:[%s6342_s4 + $0x2d0] sm:$0xff] %v4103_v58   ;;  %v1016_v40 = vadd.f32 %v5021_v19, %v754_v11  ;;  %v756_v29 = vmul.f32 %v3516_v6, %v4990_v25  ;;  %v3520_v61 = vunpack.c.l.bf16 %v4384_v52  ;;  %v1017_v27 = vadd.f32 %v5021_v19, %v755_v0 }
  0xf4   :  { %v4108_v41 = vpack.c.bf16 %v1269_v44, %v1268_v1  ;;  %v1271_v14 = vmax.f32 %v1015_v39, 0.0  ;;  %v757_v8 = vmul.f32 %v3517_v28, %v4990_v25  ;;  %v3521_v56 = vunpack.c.h.bf16 %v4384_v52  ;;  %v4390_v52 = vld [vmem:[%s6338_s0 + $0x328] sm:$0xff]  }
  0xf5   :  { %v1272_v53 = vmax.f32 %v1016_v40, 0.0  ;;  %v1018_v22 = vadd.f32 %v5021_v19, %v756_v29  ;;  %v758_v15 = vmul.f32 %v3520_v61, %v4990_v25  ;;  %v1273_v5 = vmax.f32 %v1017_v27, 0.0 }
  0xf6   :  { %4507 = vst [vmem:[%s6342_s4 + $0x2d8] sm:$0xff] %v4108_v41   ;;  %v4113_v2 = vpack.c.bf16 %v1271_v14, %v1270_v45  ;;  %v1019_v13 = vadd.f32 %v5021_v19, %v757_v8  ;;  %v3524_v37 = vunpack.c.l.bf16 %v4385_v32  ;;  %v759_v21 = vmul.f32 %v3521_v56, %v4990_v25  ;;  %v4391_v45 = vld [vmem:[%s6338_s0 + $0x330] sm:$0xff]  }
  0xf7   :  { %v1274_v62 = vmax.f32 %v1018_v22, 0.0  ;;  %v1020_v16 = vadd.f32 %v5021_v19, %v758_v15  ;;  %v3525_v20 = vunpack.c.h.bf16 %v4385_v32  ;;  %v4118_v35 = vpack.c.bf16 %v1273_v5, %v1272_v53  ;;  %v4392_v53 = vld [vmem:[%s6338_s0 + $0x338] sm:$0xff]  }
  0xf8   :  { %4508 = vst [vmem:[%s6342_s4 + $0x2e0] sm:$0xff] %v4113_v2   ;;  %v1275_v3 = vmax.f32 %v1019_v13, 0.0  ;;  %v760_v54 = vmul.f32 %v3524_v37, %v4990_v25  ;;  %v3528_v51 = vunpack.c.l.bf16 %v4386_v49  ;;  %v1021_v23 = vadd.f32 %v5021_v19, %v759_v21 }
  0xf9   :  { %v1276_v36 = vmax.f32 %v1020_v16, 0.0  ;;  %v761_v26 = vmul.f32 %v3525_v20, %v4990_v25  ;;  %v3529_v38 = vunpack.c.h.bf16 %v4386_v49  ;;  %4509 = vst [vmem:[%s6342_s4 + $0x2e8] sm:$0xff] %v4118_v35   ;;  %v3532_v55 = vunpack.c.l.bf16 %v4387_v7 }
  0xfa   :  { %v4123_v30 = vpack.c.bf16 %v1275_v3, %v1274_v62  ;;  %v1022_v24 = vadd.f32 %v5021_v19, %v760_v54  ;;  %v762_v4 = vmul.f32 %v3528_v51, %v4990_v25  ;;  %v1277_v63 = vmax.f32 %v1021_v23, 0.0 }
  0xfb   :  { %v1023_v50 = vadd.f32 %v5021_v19, %v761_v26  ;;  %v763_v17 = vmul.f32 %v3529_v38, %v4990_v25  ;;  %v3533_v46 = vunpack.c.h.bf16 %v4387_v7  ;;  %v764_v10 = vmul.f32 %v3532_v55, %v4990_v25  ;;  %v4393_v7 = vld [vmem:[%s6338_s0 + $0x340] sm:$0xff]  }
  0xfc   :  { %4510 = vst [vmem:[%s6342_s4 + $0x2f0] sm:$0xff] %v4123_v30   ;;  %v1278_v9 = vmax.f32 %v1022_v24, 0.0  ;;  %v1024_v31 = vadd.f32 %v5021_v19, %v762_v4  ;;  %v3536_v43 = vunpack.c.l.bf16 %v4388_v59  ;;  %v4128_v18 = vpack.c.bf16 %v1277_v63, %v1276_v36 }
  0xfd   :  { %v1279_v47 = vmax.f32 %v1023_v50, 0.0  ;;  %v1025_v33 = vadd.f32 %v5021_v19, %v763_v17  ;;  %v765_v42 = vmul.f32 %v3533_v46, %v4990_v25  ;;  %v1026_v1 = vadd.f32 %v5021_v19, %v764_v10 }
  0xfe   :  { %v1280_v57 = vmax.f32 %v1024_v31, 0.0  ;;  %v3537_v60 = vunpack.c.h.bf16 %v4388_v59  ;;  %v766_v48 = vmul.f32 %v3536_v43, %v4990_v25  ;;  %4511 = vst [vmem:[%s6342_s4 + $0x2f8] sm:$0xff] %v4128_v18   ;;  %v3540_v6 = vunpack.c.l.bf16 %v4389_v12  ;;  %v4394_v59 = vld [vmem:[%s6338_s0 + $0x348] sm:$0xff]  }
  0xff   :  { %v4133_v58 = vpack.c.bf16 %v1279_v47, %v1278_v9  ;;  %v1281_v34 = vmax.f32 %v1025_v33, 0.0  ;;  %v1027_v11 = vadd.f32 %v5021_v19, %v765_v42  ;;  %v1282_v44 = vmax.f32 %v1026_v1, 0.0  ;;  %v4395_v9 = vld [vmem:[%s6338_s0 + $0x350] sm:$0xff]  }
 0x100   :  { %v767_v39 = vmul.f32 %v3537_v60, %v4990_v25  ;;  %v1028_v0 = vadd.f32 %v5021_v19, %v766_v48  ;;  %v3541_v28 = vunpack.c.h.bf16 %v4389_v12  ;;  %v768_v61 = vmul.f32 %v3540_v6, %v4990_v25 }
 0x101   :  { %4512 = vst [vmem:[%s6342_s4 + $0x300] sm:$0xff] %v4133_v58   ;;  %v4138_v40 = vpack.c.bf16 %v1281_v34, %v1280_v57  ;;  %v1283_v29 = vmax.f32 %v1027_v11, 0.0  ;;  %v3544_v32 = vunpack.c.l.bf16 %v4390_v52  ;;  %v3545_v8 = vunpack.c.h.bf16 %v4390_v52  ;;  %v4396_v57 = vld [vmem:[%s6338_s0 + $0x358] sm:$0xff]  }
 0x102   :  { %v1029_v41 = vadd.f32 %v5021_v19, %v767_v39  ;;  %v1284_v14 = vmax.f32 %v1028_v0, 0.0  ;;  %v769_v27 = vmul.f32 %v3541_v28, %v4990_v25  ;;  %v1030_v56 = vadd.f32 %v5021_v19, %v768_v61 }
 0x103   :  { %4513 = vst [vmem:[%s6342_s4 + $0x308] sm:$0xff] %v4138_v40   ;;  %v4143_v22 = vpack.c.bf16 %v1283_v29, %v1282_v44  ;;  %v770_v15 = vmul.f32 %v3544_v32, %v4990_v25  ;;  %v3548_v49 = vunpack.c.l.bf16 %v4391_v45  ;;  %v771_v13 = vmul.f32 %v3545_v8, %v4990_v25 }
 0x104   :  { %v1285_v2 = vmax.f32 %v1029_v41, 0.0  ;;  %v1031_v5 = vadd.f32 %v5021_v19, %v769_v27  ;;  %v3549_v37 = vunpack.c.h.bf16 %v4391_v45  ;;  %v1286_v62 = vmax.f32 %v1030_v56, 0.0  ;;  %v4397_v45 = vld [vmem:[%s6338_s0 + $0x360] sm:$0xff]  }
 0x105   :  { %4514 = vst [vmem:[%s6342_s4 + $0x310] sm:$0xff] %v4143_v22   ;;  %v1032_v21 = vadd.f32 %v5021_v19, %v770_v15  ;;  %v772_v16 = vmul.f32 %v3548_v49, %v4990_v25  ;;  %v3552_v20 = vunpack.c.l.bf16 %v4392_v53  ;;  %v1033_v54 = vadd.f32 %v5021_v19, %v771_v13 }
 0x106   :  { %v4148_v35 = vpack.c.bf16 %v1285_v2, %v1284_v14  ;;  %v1287_v3 = vmax.f32 %v1031_v5, 0.0  ;;  %v773_v51 = vmul.f32 %v3549_v37, %v4990_v25  ;;  %v3553_v26 = vunpack.c.h.bf16 %v4392_v53  ;;  %v4398_v53 = vld [vmem:[%s6338_s0 + $0x368] sm:$0xff]  }
 0x107   :  { %v1288_v23 = vmax.f32 %v1032_v21, 0.0  ;;  %v1034_v36 = vadd.f32 %v5021_v19, %v772_v16  ;;  %v774_v38 = vmul.f32 %v3552_v20, %v4990_v25  ;;  %v1289_v24 = vmax.f32 %v1033_v54, 0.0 }
 0x108   :  { %4515 = vst [vmem:[%s6342_s4 + $0x318] sm:$0xff] %v4148_v35   ;;  %v4153_v30 = vpack.c.bf16 %v1287_v3, %v1286_v62  ;;  %v1035_v4 = vadd.f32 %v5021_v19, %v773_v51  ;;  %v3556_v55 = vunpack.c.l.bf16 %v4393_v7  ;;  %v775_v50 = vmul.f32 %v3553_v26, %v4990_v25  ;;  %v4399_v62 = vld [vmem:[%s6338_s0 + $0x370] sm:$0xff]  }
 0x109   :  { %v1290_v63 = vmax.f32 %v1034_v36, 0.0  ;;  %v1036_v17 = vadd.f32 %v5021_v19, %v774_v38  ;;  %v3557_v46 = vunpack.c.h.bf16 %v4393_v7  ;;  %v4158_v31 = vpack.c.bf16 %v1289_v24, %v1288_v23  ;;  %v4400_v23 = vld [vmem:[%s6338_s0 + $0x378] sm:$0xff]  }
 0x10a   :  { %4516 = vst [vmem:[%s6342_s4 + $0x320] sm:$0xff] %v4153_v30   ;;  %v1291_v10 = vmax.f32 %v1035_v4, 0.0  ;;  %v776_v43 = vmul.f32 %v3556_v55, %v4990_v25  ;;  %v3560_v12 = vunpack.c.l.bf16 %v4394_v59  ;;  %v1037_v18 = vadd.f32 %v5021_v19, %v775_v50 }
 0x10b   :  { %v1292_v47 = vmax.f32 %v1036_v17, 0.0  ;;  %v777_v33 = vmul.f32 %v3557_v46, %v4990_v25  ;;  %v3561_v42 = vunpack.c.h.bf16 %v4394_v59  ;;  %4517 = vst [vmem:[%s6342_s4 + $0x328] sm:$0xff] %v4158_v31   ;;  %v3564_v52 = vunpack.c.l.bf16 %v4395_v9 }
 0x10c   :  { %v4163_v1 = vpack.c.bf16 %v1291_v10, %v1290_v63  ;;  %v1038_v60 = vadd.f32 %v5021_v19, %v776_v43  ;;  %v778_v48 = vmul.f32 %v3560_v12, %v4990_v25  ;;  %v1293_v58 = vmax.f32 %v1037_v18, 0.0 }
 0x10d   :  { %v1039_v34 = vadd.f32 %v5021_v19, %v777_v33  ;;  %v779_v11 = vmul.f32 %v3561_v42, %v4990_v25  ;;  %v3565_v6 = vunpack.c.h.bf16 %v4395_v9  ;;  %v780_v0 = vmul.f32 %v3564_v52, %v4990_v25  ;;  %v4401_v9 = vld [vmem:[%s6338_s0 + $0x380] sm:$0xff]  }
 0x10e   :  { %4518 = vst [vmem:[%s6342_s4 + $0x330] sm:$0xff] %v4163_v1   ;;  %v1294_v44 = vmax.f32 %v1038_v60, 0.0  ;;  %v1040_v39 = vadd.f32 %v5021_v19, %v778_v48  ;;  %v3568_v28 = vunpack.c.l.bf16 %v4396_v57  ;;  %v4168_v40 = vpack.c.bf16 %v1293_v58, %v1292_v47 }
 0x10f   :  { %v1295_v29 = vmax.f32 %v1039_v34, 0.0  ;;  %v1041_v61 = vadd.f32 %v5021_v19, %v779_v11  ;;  %v781_v32 = vmul.f32 %v3565_v6, %v4990_v25  ;;  %v1042_v14 = vadd.f32 %v5021_v19, %v780_v0 }
 0x110   :  { %v1296_v41 = vmax.f32 %v1040_v39, 0.0  ;;  %v3569_v27 = vunpack.c.h.bf16 %v4396_v57  ;;  %v782_v8 = vmul.f32 %v3568_v28, %v4990_v25  ;;  %4519 = vst [vmem:[%s6342_s4 + $0x338] sm:$0xff] %v4168_v40   ;;  %v3572_v49 = vunpack.c.l.bf16 %v4397_v45  ;;  %v4402_v57 = vld [vmem:[%s6338_s0 + $0x388] sm:$0xff]  }
 0x111   :  { %v4173_v22 = vpack.c.bf16 %v1295_v29, %v1294_v44  ;;  %v1297_v56 = vmax.f32 %v1041_v61, 0.0  ;;  %v1043_v15 = vadd.f32 %v5021_v19, %v781_v32  ;;  %v1298_v2 = vmax.f32 %v1042_v14, 0.0  ;;  %v4403_v44 = vld [vmem:[%s6338_s0 + $0x390] sm:$0xff]  }
 0x112   :  { %v783_v5 = vmul.f32 %v3569_v27, %v4990_v25  ;;  %v1044_v13 = vadd.f32 %v5021_v19, %v782_v8  ;;  %v3573_v37 = vunpack.c.h.bf16 %v4397_v45  ;;  %v784_v20 = vmul.f32 %v3572_v49, %v4990_v25 }
 0x113   :  { %4520 = vst [vmem:[%s6342_s4 + $0x340] sm:$0xff] %v4173_v22   ;;  %v4178_v21 = vpack.c.bf16 %v1297_v56, %v1296_v41  ;;  %v1299_v16 = vmax.f32 %v1043_v15, 0.0  ;;  %v3576_v7 = vunpack.c.l.bf16 %v4398_v53  ;;  %v3577_v51 = vunpack.c.h.bf16 %v4398_v53  ;;  %v4404_v41 = vld [vmem:[%s6338_s0 + $0x398] sm:$0xff]  }
 0x114   :  { %v1045_v35 = vadd.f32 %v5021_v19, %v783_v5  ;;  %v1300_v3 = vmax.f32 %v1044_v13, 0.0  ;;  %v785_v54 = vmul.f32 %v3573_v37, %v4990_v25  ;;  %v1046_v26 = vadd.f32 %v5021_v19, %v784_v20 }
 0x115   :  { %4521 = vst [vmem:[%s6342_s4 + $0x348] sm:$0xff] %v4178_v21   ;;  %v4183_v36 = vpack.c.bf16 %v1299_v16, %v1298_v2  ;;  %v786_v38 = vmul.f32 %v3576_v7, %v4990_v25  ;;  %v3580_v59 = vunpack.c.l.bf16 %v4399_v62  ;;  %v787_v4 = vmul.f32 %v3577_v51, %v4990_v25 }
 0x116   :  { %v1301_v30 = vmax.f32 %v1045_v35, 0.0  ;;  %v1047_v24 = vadd.f32 %v5021_v19, %v785_v54  ;;  %v3581_v55 = vunpack.c.h.bf16 %v4399_v62  ;;  %v1302_v63 = vmax.f32 %v1046_v26, 0.0  ;;  %v4405_v62 = vld [vmem:[%s6338_s0 + $0x3a0] sm:$0xff]  }
 0x117   :  { %4522 = vst [vmem:[%s6342_s4 + $0x350] sm:$0xff] %v4183_v36   ;;  %v1048_v50 = vadd.f32 %v5021_v19, %v786_v38  ;;  %v788_v17 = vmul.f32 %v3580_v59, %v4990_v25  ;;  %v3584_v46 = vunpack.c.l.bf16 %v4400_v23  ;;  %v1049_v43 = vadd.f32 %v5021_v19, %v787_v4 }
 0x118   :  { %v4188_v31 = vpack.c.bf16 %v1301_v30, %v1300_v3  ;;  %v1303_v10 = vmax.f32 %v1047_v24, 0.0  ;;  %v789_v12 = vmul.f32 %v3581_v55, %v4990_v25  ;;  %v3585_v33 = vunpack.c.h.bf16 %v4400_v23  ;;  %v4406_v23 = vld [vmem:[%s6338_s0 + $0x3a8] sm:$0xff]  }
 0x119   :  { %v1304_v18 = vmax.f32 %v1048_v50, 0.0  ;;  %v1050_v47 = vadd.f32 %v5021_v19, %v788_v17  ;;  %v790_v42 = vmul.f32 %v3584_v46, %v4990_v25  ;;  %v1305_v60 = vmax.f32 %v1049_v43, 0.0 }
 0x11a   :  { %4523 = vst [vmem:[%s6342_s4 + $0x358] sm:$0xff] %v4188_v31   ;;  %v4193_v1 = vpack.c.bf16 %v1303_v10, %v1302_v63  ;;  %v1051_v48 = vadd.f32 %v5021_v19, %v789_v12  ;;  %v3588_v52 = vunpack.c.l.bf16 %v4401_v9  ;;  %v791_v34 = vmul.f32 %v3585_v33, %v4990_v25  ;;  %v4407_v63 = vld [vmem:[%s6338_s0 + $0x3b0] sm:$0xff]  }
 0x11b   :  { %v1306_v58 = vmax.f32 %v1050_v47, 0.0  ;;  %v1052_v11 = vadd.f32 %v5021_v19, %v790_v42  ;;  %v3589_v6 = vunpack.c.h.bf16 %v4401_v9  ;;  %v4198_v39 = vpack.c.bf16 %v1305_v60, %v1304_v18  ;;  %v4408_v18 = vld [vmem:[%s6338_s0 + $0x3b8] sm:$0xff]  }
 0x11c   :  { %4524 = vst [vmem:[%s6342_s4 + $0x360] sm:$0xff] %v4193_v1   ;;  %v1307_v0 = vmax.f32 %v1051_v48, 0.0  ;;  %v792_v28 = vmul.f32 %v3588_v52, %v4990_v25  ;;  %v3592_v45 = vunpack.c.l.bf16 %v4402_v57  ;;  %v1053_v40 = vadd.f32 %v5021_v19, %v791_v34 }
 0x11d   :  { %v1308_v29 = vmax.f32 %v1052_v11, 0.0  ;;  %v793_v61 = vmul.f32 %v3589_v6, %v4990_v25  ;;  %v3593_v32 = vunpack.c.h.bf16 %v4402_v57  ;;  %4525 = vst [vmem:[%s6342_s4 + $0x368] sm:$0xff] %v4198_v39   ;;  %v3596_v53 = vunpack.c.l.bf16 %v4403_v44 }
 0x11e   :  { %v4203_v14 = vpack.c.bf16 %v1307_v0, %v1306_v58  ;;  %v1054_v27 = vadd.f32 %v5021_v19, %v792_v28  ;;  %v794_v8 = vmul.f32 %v3592_v45, %v4990_v25  ;;  %v1309_v22 = vmax.f32 %v1053_v40, 0.0 }
 0x11f   :  { %v1055_v56 = vadd.f32 %v5021_v19, %v793_v61  ;;  %v795_v15 = vmul.f32 %v3593_v32, %v4990_v25  ;;  %v3597_v49 = vunpack.c.h.bf16 %v4403_v44  ;;  %v796_v13 = vmul.f32 %v3596_v53, %v4990_v25  ;;  %v4409_v44 = vld [vmem:[%s6338_s0 + $0x3c0] sm:$0xff]  }
 0x120   :  { %4526 = vst [vmem:[%s6342_s4 + $0x370] sm:$0xff] %v4203_v14   ;;  %v1310_v2 = vmax.f32 %v1054_v27, 0.0  ;;  %v1056_v5 = vadd.f32 %v5021_v19, %v794_v8  ;;  %v3600_v37 = vunpack.c.l.bf16 %v4404_v41  ;;  %v4208_v21 = vpack.c.bf16 %v1309_v22, %v1308_v29 }
 0x121   :  { %v1311_v16 = vmax.f32 %v1055_v56, 0.0  ;;  %v1057_v20 = vadd.f32 %v5021_v19, %v795_v15  ;;  %v797_v7 = vmul.f32 %v3597_v49, %v4990_v25  ;;  %v1058_v3 = vadd.f32 %v5021_v19, %v796_v13 }
 0x122   :  { %v1312_v35 = vmax.f32 %v1056_v5, 0.0  ;;  %v3601_v54 = vunpack.c.h.bf16 %v4404_v41  ;;  %v798_v51 = vmul.f32 %v3600_v37, %v4990_v25  ;;  %4527 = vst [vmem:[%s6342_s4 + $0x378] sm:$0xff] %v4208_v21   ;;  %v3604_v59 = vunpack.c.l.bf16 %v4405_v62  ;;  %v4410_v41 = vld [vmem:[%s6338_s0 + $0x3c8] sm:$0xff]  }
 0x123   :  { %v4213_v36 = vpack.c.bf16 %v1311_v16, %v1310_v2  ;;  %v1313_v26 = vmax.f32 %v1057_v20, 0.0  ;;  %v1059_v38 = vadd.f32 %v5021_v19, %v797_v7  ;;  %v1314_v30 = vmax.f32 %v1058_v3, 0.0  ;;  %v4411_v2 = vld [vmem:[%s6338_s0 + $0x3d0] sm:$0xff]  }
 0x124   :  { %v799_v24 = vmul.f32 %v3601_v54, %v4990_v25  ;;  %v1060_v4 = vadd.f32 %v5021_v19, %v798_v51  ;;  %v3605_v55 = vunpack.c.h.bf16 %v4405_v62  ;;  %v800_v46 = vmul.f32 %v3604_v59, %v4990_v25 }
 0x125   :  { %4528 = vst [vmem:[%s6342_s4 + $0x380] sm:$0xff] %v4213_v36   ;;  %v4218_v50 = vpack.c.bf16 %v1313_v26, %v1312_v35  ;;  %v1315_v17 = vmax.f32 %v1059_v38, 0.0  ;;  %v3608_v9 = vunpack.c.l.bf16 %v4406_v23  ;;  %v3609_v12 = vunpack.c.h.bf16 %v4406_v23  ;;  %v4412_v35 = vld [vmem:[%s6338_s0 + $0x3d8] sm:$0xff]  }
 0x126   :  { %v1061_v31 = vadd.f32 %v5021_v19, %v799_v24  ;;  %v1316_v10 = vmax.f32 %v1060_v4, 0.0  ;;  %v801_v43 = vmul.f32 %v3605_v55, %v4990_v25  ;;  %v1062_v33 = vadd.f32 %v5021_v19, %v800_v46 }
 0x127   :  { %4529 = vst [vmem:[%s6342_s4 + $0x388] sm:$0xff] %v4218_v50   ;;  %v4223_v47 = vpack.c.bf16 %v1315_v17, %v1314_v30  ;;  %v802_v42 = vmul.f32 %v3608_v9, %v4990_v25  ;;  %v3612_v57 = vunpack.c.l.bf16 %v4407_v63  ;;  %v803_v48 = vmul.f32 %v3609_v12, %v4990_v25 }
 0x128   :  { %v1317_v1 = vmax.f32 %v1061_v31, 0.0  ;;  %v1063_v60 = vadd.f32 %v5021_v19, %v801_v43  ;;  %v3613_v52 = vunpack.c.h.bf16 %v4407_v63  ;;  %v1318_v58 = vmax.f32 %v1062_v33, 0.0  ;;  %v4413_v63 = vld [vmem:[%s6338_s0 + $0x3e0] sm:$0xff]  }
 0x129   :  { %4530 = vst [vmem:[%s6342_s4 + $0x390] sm:$0xff] %v4223_v47   ;;  %v1064_v34 = vadd.f32 %v5021_v19, %v802_v42  ;;  %v804_v11 = vmul.f32 %v3612_v57, %v4990_v25  ;;  %v3616_v6 = vunpack.c.l.bf16 %v4408_v18  ;;  %v1065_v28 = vadd.f32 %v5021_v19, %v803_v48 }
 0x12a   :  { %v4228_v39 = vpack.c.bf16 %v1317_v1, %v1316_v10  ;;  %v1319_v0 = vmax.f32 %v1063_v60, 0.0  ;;  %v805_v45 = vmul.f32 %v3613_v52, %v4990_v25  ;;  %v3617_v61 = vunpack.c.h.bf16 %v4408_v18  ;;  %v4414_v18 = vld [vmem:[%s6338_s0 + $0x3e8] sm:$0xff]  }
 0x12b   :  { %v1320_v40 = vmax.f32 %v1064_v34, 0.0  ;;  %v1066_v29 = vadd.f32 %v5021_v19, %v804_v11  ;;  %v806_v32 = vmul.f32 %v3616_v6, %v4990_v25  ;;  %v1321_v27 = vmax.f32 %v1065_v28, 0.0 }
 0x12c   :  { %4531 = vst [vmem:[%s6342_s4 + $0x398] sm:$0xff] %v4228_v39   ;;  %v4233_v14 = vpack.c.bf16 %v1319_v0, %v1318_v58  ;;  %v1067_v8 = vadd.f32 %v5021_v19, %v805_v45  ;;  %v3620_v53 = vunpack.c.l.bf16 %v4409_v44  ;;  %v807_v56 = vmul.f32 %v3617_v61, %v4990_v25  ;;  %v4415_v58 = vld [vmem:[%s6338_s0 + $0x3f0] sm:$0xff]  }
 0x12d   :  { %v1322_v22 = vmax.f32 %v1066_v29, 0.0  ;;  %v1068_v15 = vadd.f32 %v5021_v19, %v806_v32  ;;  %v3621_v49 = vunpack.c.h.bf16 %v4409_v44  ;;  %v4238_v5 = vpack.c.bf16 %v1321_v27, %v1320_v40  ;;  %v4416_v40 = vld [vmem:[%s6338_s0 + $0x3f8] sm:$0xff]  }
 0x12e   :  { %4532 = vst [vmem:[%s6342_s4 + $0x3a0] sm:$0xff] %v4233_v14   ;;  %v1323_v13 = vmax.f32 %v1067_v8, 0.0  ;;  %v808_v37 = vmul.f32 %v3620_v53, %v4990_v25  ;;  %v3624_v62 = vunpack.c.l.bf16 %v4410_v41  ;;  %v1069_v21 = vadd.f32 %v5021_v19, %v807_v56 }
 0x12f   :  { %v1324_v16 = vmax.f32 %v1068_v15, 0.0  ;;  %v809_v20 = vmul.f32 %v3621_v49, %v4990_v25  ;;  %v3625_v7 = vunpack.c.h.bf16 %v4410_v41  ;;  %4533 = vst [vmem:[%s6342_s4 + $0x3a8] sm:$0xff] %v4238_v5   ;;  %v3628_v23 = vunpack.c.l.bf16 %v4411_v2 }
 0x130   :  { %v4243_v3 = vpack.c.bf16 %v1323_v13, %v1322_v22  ;;  %v1070_v54 = vadd.f32 %v5021_v19, %v808_v37  ;;  %v810_v51 = vmul.f32 %v3624_v62, %v4990_v25  ;;  %v1325_v36 = vmax.f32 %v1069_v21, 0.0 }
 0x131   :  { %v1071_v26 = vadd.f32 %v5021_v19, %v809_v20  ;;  %v811_v38 = vmul.f32 %v3625_v7, %v4990_v25  ;;  %v3629_v59 = vunpack.c.h.bf16 %v4411_v2  ;;  %v812_v4 = vmul.f32 %v3628_v23, %v4990_v25 }
 0x132   :  { %4534 = vst [vmem:[%s6342_s4 + $0x3b0] sm:$0xff] %v4243_v3   ;;  %v1326_v30 = vmax.f32 %v1070_v54, 0.0  ;;  %v1072_v24 = vadd.f32 %v5021_v19, %v810_v51  ;;  %v3632_v55 = vunpack.c.l.bf16 %v4412_v35  ;;  %v4248_v50 = vpack.c.bf16 %v1325_v36, %v1324_v16 }
 0x133   :  { %v1327_v17 = vmax.f32 %v1071_v26, 0.0  ;;  %v1073_v46 = vadd.f32 %v5021_v19, %v811_v38  ;;  %v813_v9 = vmul.f32 %v3629_v59, %v4990_v25  ;;  %v1074_v10 = vadd.f32 %v5021_v19, %v812_v4 }
 0x134   :  { %v1328_v31 = vmax.f32 %v1072_v24, 0.0  ;;  %v3633_v43 = vunpack.c.h.bf16 %v4412_v35  ;;  %v814_v12 = vmul.f32 %v3632_v55, %v4990_v25  ;;  %4535 = vst [vmem:[%s6342_s4 + $0x3b8] sm:$0xff] %v4248_v50   ;;  %v3636_v57 = vunpack.c.l.bf16 %v4413_v63 }
 0x135   :  { %v4253_v47 = vpack.c.bf16 %v1327_v17, %v1326_v30  ;;  %v1329_v33 = vmax.f32 %v1073_v46, 0.0  ;;  %v1075_v42 = vadd.f32 %v5021_v19, %v813_v9  ;;  %v1330_v1 = vmax.f32 %v1074_v10, 0.0 }
 0x136   :  { %v815_v60 = vmul.f32 %v3633_v43, %v4990_v25  ;;  %v1076_v48 = vadd.f32 %v5021_v19, %v814_v12  ;;  %v3637_v52 = vunpack.c.h.bf16 %v4413_v63  ;;  %v816_v6 = vmul.f32 %v3636_v57, %v4990_v25 }
 0x137   :  { %4536 = vst [vmem:[%s6342_s4 + $0x3c0] sm:$0xff] %v4253_v47   ;;  %v4258_v34 = vpack.c.bf16 %v1329_v33, %v1328_v31  ;;  %v1331_v11 = vmax.f32 %v1075_v42, 0.0  ;;  %v3640_v44 = vunpack.c.l.bf16 %v4414_v18  ;;  %v3641_v45 = vunpack.c.h.bf16 %v4414_v18 }
 0x138   :  { %v1077_v39 = vadd.f32 %v5021_v19, %v815_v60  ;;  %v1332_v0 = vmax.f32 %v1076_v48, 0.0  ;;  %v817_v28 = vmul.f32 %v3637_v52, %v4990_v25  ;;  %v1078_v61 = vadd.f32 %v5021_v19, %v816_v6 }
 0x139   :  { %4537 = vst [vmem:[%s6342_s4 + $0x3c8] sm:$0xff] %v4258_v34   ;;  %v4263_v29 = vpack.c.bf16 %v1331_v11, %v1330_v1  ;;  %v818_v32 = vmul.f32 %v3640_v44, %v4990_v25  ;;  %v3644_v41 = vunpack.c.l.bf16 %v4415_v58  ;;  %v819_v8 = vmul.f32 %v3641_v45, %v4990_v25 }
 0x13a   :  { %v1333_v14 = vmax.f32 %v1077_v39, 0.0  ;;  %v1079_v27 = vadd.f32 %v5021_v19, %v817_v28  ;;  %v3645_v53 = vunpack.c.h.bf16 %v4415_v58  ;;  %v1334_v22 = vmax.f32 %v1078_v61, 0.0 }
 0x13b   :  { %4538 = vst [vmem:[%s6342_s4 + $0x3d0] sm:$0xff] %v4263_v29   ;;  %v1080_v56 = vadd.f32 %v5021_v19, %v818_v32  ;;  %v820_v15 = vmul.f32 %v3644_v41, %v4990_v25  ;;  %v3648_v49 = vunpack.c.l.bf16 %v4416_v40  ;;  %v1081_v13 = vadd.f32 %v5021_v19, %v819_v8 }
 0x13c   :  { %v4268_v2 = vpack.c.bf16 %v1333_v14, %v1332_v0  ;;  %v1335_v5 = vmax.f32 %v1079_v27, 0.0  ;;  %v821_v37 = vmul.f32 %v3645_v53, %v4990_v25  ;;  %v3649_v16 = vunpack.c.h.bf16 %v4416_v40 }
 0x13d   :  { %v1336_v62 = vmax.f32 %v1080_v56, 0.0  ;;  %v1082_v21 = vadd.f32 %v5021_v19, %v820_v15  ;;  %v822_v20 = vmul.f32 %v3648_v49, %v4990_v25  ;;  %v1337_v35 = vmax.f32 %v1081_v13, 0.0 }
 0x13e   :  { %4539 = vst [vmem:[%s6342_s4 + $0x3d8] sm:$0xff] %v4268_v2   ;;  %v4273_v7 = vpack.c.bf16 %v1335_v5, %v1334_v22  ;;  %v1083_v3 = vadd.f32 %v5021_v19, %v821_v37  ;;  %v823_v51 = vmul.f32 %v3649_v16, %v4990_v25 }
 0x13f   :  { %v1338_v54 = vmax.f32 %v1082_v21, 0.0  ;;  %v1084_v23 = vadd.f32 %v5021_v19, %v822_v20  ;;  %v4278_v36 = vpack.c.bf16 %v1337_v35, %v1336_v62 }
 0x140   :  { %4540 = vst [vmem:[%s6342_s4 + $0x3e0] sm:$0xff] %v4273_v7   ;;  %v1339_v26 = vmax.f32 %v1083_v3, 0.0  ;;  %v1085_v38 = vadd.f32 %v5021_v19, %v823_v51 }
 0x141   :  { %v1340_v59 = vmax.f32 %v1084_v23, 0.0  ;;  %4541 = vst [vmem:[%s6342_s4 + $0x3e8] sm:$0xff] %v4278_v36  }
 0x142   :  { %v4283_v30 = vpack.c.bf16 %v1339_v26, %v1338_v54  ;;  %v1341_v24 = vmax.f32 %v1085_v38, 0.0 }
 0x144   :  { %4542 = vst [vmem:[%s6342_s4 + $0x3f0] sm:$0xff] %v4283_v30   ;;  %v4288_v25 = vpack.c.bf16 %v1341_v24, %v1340_v59 }
 0x146   :  { %4543 = vst [vmem:[%s6342_s4 + $0x3f8] sm:$0xff] %v4288_v25  }

// kernel: _lambda_.17
= control target key start
LH: loop header
LB: loop body
LE: loop exit
PB: predicated region body
PF: predicated region fallthrough
CT: control target
= control target key end

     0   :  { %s4111_s9 = smov 0   ;;  %s4544_s0 = inlined_call_operand.vmem [shape: bf16[8192,128], index: 0, kind: input, shape index: {}]   ;;  %s4545_s1 = inlined_call_operand.vmem [shape: bf16[128,128], index: 1, kind: input, shape index: {}]   ;;  %s4546_s2 = inlined_call_operand.vmem [shape: f32[8192,128], index: 2, kind: output, shape index: {}]  }
   0x1 LB: > { %s2861_s10 = sadd.s32 4294967295, %s4094_s9   ;;  %p2865_p0 = scmp.ge.s32.totalorder %s4094_s9, 1  ;;  %s4094_s9 = sphi %s4111_s9, %s12_s9  }
   0x2   : > { %p113_p1 = scmp.lt.s32.totalorder %s4094_s9, 5 }
   0x4   : > { %p114_p2 = pnand %p2865_p0, %p113_p1 }
   0x5   : > { %v3440_v0 = vld [vmem:[%s4545_s1] sm:$0xff] (!%p114_p2)   ;;  %s2866_s13 = sshll.u32 (!%p114_p2), %s2861_s10, 8  ;;  %v3441_v1 = vld [vmem:[%s4545_s1 + $0x8] sm:$0xff] (!%p114_p2)   ;;  %v3442_v2 = vld [vmem:[%s4545_s1 + $0x10] sm:$0xff] (!%p114_p2)  }
   0x6   : > { %117 = sbr.rel (%p114_p2) target bundleno = 520 (0x208), region = 28  ;;  %p136_p3 = scmp.lt.s32.totalorder (!%p114_p2), %s2866_s13, 1023  ;;  %3144 = vmatprep.subr.bf16.mxu0 (!%p114_p2), %v3440_v0  ;;  %3416 = vmatprep.subr.bf16.mxu1 (!%p114_p2), %v3440_v0  ;;  %v3443_v3 = vld [vmem:[%s4545_s1 + $0x18] sm:$0xff] (!%p114_p2)   ;;  %v3444_v6 = vld [vmem:[%s4545_s1 + $0x20] sm:$0xff] (!%p114_p2)   ;;  %v3445_v7 = vld [vmem:[%s4545_s1 + $0x28] sm:$0xff] (!%p114_p2)  }
   0x7   : > { %3145 = vmatpush3.bf16.msra.mxu0 (!%p114_p2), %v3440_v0  ;;  %3424 = vmatpush3.bf16.msra.mxu1 (!%p114_p2), %v3440_v0  ;;  %v3446_v8 = vld [vmem:[%s4545_s1 + $0x30] sm:$0xff] (!%p114_p2)   ;;  %v3447_v9 = vld [vmem:[%s4545_s1 + $0x38] sm:$0xff] (!%p114_p2)  }
   0x8   : > { %3146 = vmatprep.subr.bf16.mxu0 (!%p114_p2), %v3441_v1  ;;  %3417 = vmatprep.subr.bf16.mxu1 (!%p114_p2), %v3441_v1 }
   0xb   : > { %3147 = vmatpush3.bf16.msra.mxu0 (!%p114_p2), %v3441_v1  ;;  %3425 = vmatpush3.bf16.msra.mxu1 (!%p114_p2), %v3441_v1 }
   0xc   : > { %3148 = vmatprep.subr.bf16.mxu0 (!%p114_p2), %v3442_v2  ;;  %3418 = vmatprep.subr.bf16.mxu1 (!%p114_p2), %v3442_v2 }
   0xd   : > { %s4548_s13 = smov (!%p136_p3, %s2866_s13), 1023 }
   0xe   : > { %s2867_s18 = sshll.u32 %s4548_s13, 2  ;;  %s2869_s4 = sshll.u32 %s4548_s13, 3 }
   0xf   : > { %s4134_s21 = scalar_lea.vmem %s4544_s0, %s2867_s18  ;;  %3149 = vmatpush3.bf16.msra.mxu0 %v3442_v2  ;;  %3426 = vmatpush3.bf16.msra.mxu1 %v3442_v2  ;;  %s4269_s7 = scalar_lea.vmem %s4546_s2, %s2869_s4 }
  0x10   : > { %v3448_v4 = vld [vmem:[%s4134_s21] sm:$0xff]   ;;  %3150 = vmatprep.subr.bf16.mxu0 %v3443_v3  ;;  %3419 = vmatprep.subr.bf16.mxu1 %v3443_v3  ;;  %v3450_v10 = vld [vmem:[%s4134_s21 + $0x8] sm:$0xff]   ;;  %v3452_v12 = vld [vmem:[%s4134_s21 + $0x10] sm:$0xff]  }
  0x11   : > { %v3449_v5 = vld [vmem:[%s4134_s21 + $0x200] sm:$0xff]   ;;  %3160 = vmatprep.mubr.bf16.mxu0 %v3448_v4  ;;  %v3451_v11 = vld [vmem:[%s4134_s21 + $0x208] sm:$0xff]   ;;  %v3453_v13 = vld [vmem:[%s4134_s21 + $0x210] sm:$0xff]  }
  0x12   : > { %3288 = vmatprep.mubr.bf16.mxu1 %v3449_v5  ;;  %v3454_v14 = vld [vmem:[%s4134_s21 + $0x18] sm:$0xff]   ;;  %v3456_v16 = vld [vmem:[%s4134_s21 + $0x20] sm:$0xff]   ;;  %v3458_v18 = vld [vmem:[%s4134_s21 + $0x28] sm:$0xff]  }
  0x13   : > { %3151 = vmatpush3.bf16.msra.mxu0 %v3443_v3  ;;  %3427 = vmatpush3.bf16.msra.mxu1 %v3443_v3  ;;  %v3455_v15 = vld [vmem:[%s4134_s21 + $0x218] sm:$0xff]   ;;  %v3457_v17 = vld [vmem:[%s4134_s21 + $0x220] sm:$0xff]   ;;  %v3459_v19 = vld [vmem:[%s4134_s21 + $0x228] sm:$0xff]  }
  0x14   : > { %3152 = vmatprep.subr.bf16.mxu0 %v3444_v6  ;;  %3420 = vmatprep.subr.bf16.mxu1 %v3444_v6  ;;  %v3460_v20 = vld [vmem:[%s4134_s21 + $0x30] sm:$0xff]   ;;  %v3462_v22 = vld [vmem:[%s4134_s21 + $0x38] sm:$0xff]   ;;  %v3464_v24 = vld [vmem:[%s4134_s21 + $0x40] sm:$0xff]  }
  0x15   : > { %v3461_v21 = vld [vmem:[%s4134_s21 + $0x230] sm:$0xff]   ;;  %v3463_v23 = vld [vmem:[%s4134_s21 + $0x238] sm:$0xff]   ;;  %v3465_v25 = vld [vmem:[%s4134_s21 + $0x240] sm:$0xff]  }
  0x16   : > { %v3466_v26 = vld [vmem:[%s4134_s21 + $0x48] sm:$0xff]   ;;  %v3468_v28 = vld [vmem:[%s4134_s21 + $0x50] sm:$0xff]   ;;  %v3470_v30 = vld [vmem:[%s4134_s21 + $0x58] sm:$0xff]  }
  0x17   : > { %3153 = vmatpush3.bf16.msra.mxu0 %v3444_v6  ;;  %3428 = vmatpush3.bf16.msra.mxu1 %v3444_v6  ;;  %v3467_v27 = vld [vmem:[%s4134_s21 + $0x248] sm:$0xff]   ;;  %v3469_v29 = vld [vmem:[%s4134_s21 + $0x250] sm:$0xff]   ;;  %v3471_v31 = vld [vmem:[%s4134_s21 + $0x258] sm:$0xff]  }
  0x18   : > { %3154 = vmatprep.subr.bf16.mxu0 %v3445_v7  ;;  %3421 = vmatprep.subr.bf16.mxu1 %v3445_v7  ;;  %v3472_v32 = vld [vmem:[%s4134_s21 + $0x60] sm:$0xff]   ;;  %v3474_v34 = vld [vmem:[%s4134_s21 + $0x68] sm:$0xff]   ;;  %v3476_v36 = vld [vmem:[%s4134_s21 + $0x70] sm:$0xff]  }
  0x19   : > { %v3473_v33 = vld [vmem:[%s4134_s21 + $0x260] sm:$0xff]   ;;  %v3475_v35 = vld [vmem:[%s4134_s21 + $0x268] sm:$0xff]   ;;  %v3477_v37 = vld [vmem:[%s4134_s21 + $0x270] sm:$0xff]  }
  0x1a   : > { %v3478_v38 = vld [vmem:[%s4134_s21 + $0x78] sm:$0xff]   ;;  %v3480_v40 = vld [vmem:[%s4134_s21 + $0x80] sm:$0xff]   ;;  %v3482_v42 = vld [vmem:[%s4134_s21 + $0x88] sm:$0xff]  }
  0x1b   : > { %3155 = vmatpush3.bf16.msra.mxu0 %v3445_v7  ;;  %3429 = vmatpush3.bf16.msra.mxu1 %v3445_v7  ;;  %v3479_v39 = vld [vmem:[%s4134_s21 + $0x278] sm:$0xff]   ;;  %v3481_v41 = vld [vmem:[%s4134_s21 + $0x280] sm:$0xff]   ;;  %v3483_v43 = vld [vmem:[%s4134_s21 + $0x288] sm:$0xff]  }
  0x1c   : > { %3156 = vmatprep.subr.bf16.mxu0 %v3446_v8  ;;  %3422 = vmatprep.subr.bf16.mxu1 %v3446_v8  ;;  %v3484_v44 = vld [vmem:[%s4134_s21 + $0x90] sm:$0xff]   ;;  %v3486_v46 = vld [vmem:[%s4134_s21 + $0x98] sm:$0xff]   ;;  %v3488_v48 = vld [vmem:[%s4134_s21 + $0xa0] sm:$0xff]  }
  0x1d   : > { %v3485_v45 = vld [vmem:[%s4134_s21 + $0x290] sm:$0xff]   ;;  %v3487_v47 = vld [vmem:[%s4134_s21 + $0x298] sm:$0xff]   ;;  %v3489_v49 = vld [vmem:[%s4134_s21 + $0x2a0] sm:$0xff]  }
  0x1e   : > { %v3490_v50 = vld [vmem:[%s4134_s21 + $0xa8] sm:$0xff]   ;;  %v3492_v52 = vld [vmem:[%s4134_s21 + $0xb0] sm:$0xff]   ;;  %v3494_v54 = vld [vmem:[%s4134_s21 + $0xb8] sm:$0xff]  }
  0x1f   : > { %3157 = vmatpush3.bf16.msra.mxu0 %v3446_v8  ;;  %3430 = vmatpush3.bf16.msra.mxu1 %v3446_v8  ;;  %v3491_v51 = vld [vmem:[%s4134_s21 + $0x2a8] sm:$0xff]   ;;  %v3493_v53 = vld [vmem:[%s4134_s21 + $0x2b0] sm:$0xff]   ;;  %v3495_v55 = vld [vmem:[%s4134_s21 + $0x2b8] sm:$0xff]  }
  0x20   : > { %3158 = vmatprep.subr.bf16.mxu0 %v3447_v9  ;;  %3423 = vmatprep.subr.bf16.mxu1 %v3447_v9  ;;  %v3496_v56 = vld [vmem:[%s4134_s21 + $0xc0] sm:$0xff]   ;;  %v3498_v58 = vld [vmem:[%s4134_s21 + $0xc8] sm:$0xff]   ;;  %v3500_v60 = vld [vmem:[%s4134_s21 + $0xd0] sm:$0xff]  }
  0x21   : > { %v3497_v57 = vld [vmem:[%s4134_s21 + $0x2c0] sm:$0xff]   ;;  %v3499_v59 = vld [vmem:[%s4134_s21 + $0x2c8] sm:$0xff]   ;;  %v3501_v61 = vld [vmem:[%s4134_s21 + $0x2d0] sm:$0xff]  }
  0x22   : > { %v3502_v62 = vld [vmem:[%s4134_s21 + $0xd8] sm:$0xff]   ;;  %v3504_v0 = vld [vmem:[%s4134_s21 + $0xe0] sm:$0xff]   ;;  %v3506_v2 = vld [vmem:[%s4134_s21 + $0xe8] sm:$0xff]  }
  0x23   : > { %3159 = vmatpush3.bf16.msra.mxu0 %v3447_v9  ;;  %3431 = vmatpush3.bf16.msra.mxu1 %v3447_v9  ;;  %v3503_v63 = vld [vmem:[%s4134_s21 + $0x2d8] sm:$0xff]   ;;  %v3505_v1 = vld [vmem:[%s4134_s21 + $0x2e0] sm:$0xff]   ;;  %v3507_v3 = vld [vmem:[%s4134_s21 + $0x2e8] sm:$0xff]  }
  0x24   : > { %v3508_v4 = vld [vmem:[%s4134_s21 + $0xf0] sm:$0xff]   ;;  %v3510_v6 = vld [vmem:[%s4134_s21 + $0xf8] sm:$0xff]   ;;  %v3512_v8 = vld [vmem:[%s4134_s21 + $0x100] sm:$0xff]  }
  0x25   : > { %v3509_v5 = vld [vmem:[%s4134_s21 + $0x2f0] sm:$0xff]   ;;  %v3511_v7 = vld [vmem:[%s4134_s21 + $0x2f8] sm:$0xff]   ;;  %v3513_v9 = vld [vmem:[%s4134_s21 + $0x300] sm:$0xff]  }
  0x26   : > { %3161 = vmatmul.mubr.bf16.vlgmr.msra.gmra.mrb[0].mxu0 %v3450_v10  ;;  %3289 = vmatmul.mubr.bf16.vlgmr.msra.gmra.mrb[0].mxu1 %v3451_v11  ;;  %v3514_v10 = vld [vmem:[%s4134_s21 + $0x108] sm:$0xff]  }
  0x27   : > { %3164 = vmatprep.mubr.bf16.mxu0 %v3452_v12  ;;  %3292 = vmatprep.mubr.bf16.mxu1 %v3453_v13  ;;  %v3515_v11 = vld [vmem:[%s4134_s21 + $0x308] sm:$0xff]   ;;  %v3516_v12 = vld [vmem:[%s4134_s21 + $0x110] sm:$0xff]  }
  0x28   : > { %v3517_v13 = vld [vmem:[%s4134_s21 + $0x310] sm:$0xff]  }
  0x2e   : > { %3165 = vmatmul.mubr.bf16.gmra.mrb[4].mxu0 %v3454_v14  ;;  %3293 = vmatmul.mubr.bf16.gmra.mrb[4].mxu1 %v3455_v15  ;;  %v3518_v14 = vld [vmem:[%s4134_s21 + $0x118] sm:$0xff]  }
  0x2f   : > { %3168 = vmatprep.mubr.bf16.mxu0 %v3456_v16  ;;  %3296 = vmatprep.mubr.bf16.mxu1 %v3457_v17  ;;  %v3519_v15 = vld [vmem:[%s4134_s21 + $0x318] sm:$0xff]   ;;  %v3520_v16 = vld [vmem:[%s4134_s21 + $0x120] sm:$0xff]  }
  0x30   : > { %v3521_v17 = vld [vmem:[%s4134_s21 + $0x320] sm:$0xff]  }
  0x36   : > { %3169 = vmatmul.mubr.bf16.gmra.mrb[8].mxu0 %v3458_v18  ;;  %3297 = vmatmul.mubr.bf16.gmra.mrb[8].mxu1 %v3459_v19  ;;  %v3522_v18 = vld [vmem:[%s4134_s21 + $0x128] sm:$0xff]  }
  0x37   : > { %3172 = vmatprep.mubr.bf16.mxu0 %v3460_v20  ;;  %3300 = vmatprep.mubr.bf16.mxu1 %v3461_v21  ;;  %v3523_v19 = vld [vmem:[%s4134_s21 + $0x328] sm:$0xff]   ;;  %v3524_v20 = vld [vmem:[%s4134_s21 + $0x130] sm:$0xff]  }
  0x38   : > { %v3525_v21 = vld [vmem:[%s4134_s21 + $0x330] sm:$0xff]  }
  0x3e   : > { %3173 = vmatmul.mubr.bf16.gmra.mrb[12].mxu0 %v3462_v22  ;;  %3301 = vmatmul.mubr.bf16.gmra.mrb[12].mxu1 %v3463_v23  ;;  %v3526_v22 = vld [vmem:[%s4134_s21 + $0x138] sm:$0xff]  }
  0x3f   : > { %3176 = vmatprep.mubr.bf16.mxu0 %v3464_v24  ;;  %3304 = vmatprep.mubr.bf16.mxu1 %v3465_v25  ;;  %v3527_v23 = vld [vmem:[%s4134_s21 + $0x338] sm:$0xff]   ;;  %v3528_v24 = vld [vmem:[%s4134_s21 + $0x140] sm:$0xff]  }
  0x40   : > { %v3529_v25 = vld [vmem:[%s4134_s21 + $0x340] sm:$0xff]  }
  0x46   : > { %3177 = vmatmul.mubr.bf16.gmra.mrb[16].mxu0 %v3466_v26  ;;  %3305 = vmatmul.mubr.bf16.gmra.mrb[16].mxu1 %v3467_v27  ;;  %v3530_v26 = vld [vmem:[%s4134_s21 + $0x148] sm:$0xff]  }
  0x47   : > { %3180 = vmatprep.mubr.bf16.mxu0 %v3468_v28  ;;  %3308 = vmatprep.mubr.bf16.mxu1 %v3469_v29  ;;  %v3531_v27 = vld [vmem:[%s4134_s21 + $0x348] sm:$0xff]   ;;  %v3532_v28 = vld [vmem:[%s4134_s21 + $0x150] sm:$0xff]  }
  0x48   : > { %v3533_v29 = vld [vmem:[%s4134_s21 + $0x350] sm:$0xff]  }
  0x4e   : > { %3181 = vmatmul.mubr.bf16.gmra.mrb[20].mxu0 %v3470_v30  ;;  %3309 = vmatmul.mubr.bf16.gmra.mrb[20].mxu1 %v3471_v31  ;;  %v3534_v30 = vld [vmem:[%s4134_s21 + $0x158] sm:$0xff]  }
  0x4f   : > { %3184 = vmatprep.mubr.bf16.mxu0 %v3472_v32  ;;  %3312 = vmatprep.mubr.bf16.mxu1 %v3473_v33  ;;  %v3535_v31 = vld [vmem:[%s4134_s21 + $0x358] sm:$0xff]   ;;  %v3536_v32 = vld [vmem:[%s4134_s21 + $0x160] sm:$0xff]  }
  0x50   : > { %v3537_v33 = vld [vmem:[%s4134_s21 + $0x360] sm:$0xff]  }
  0x56   : > { %3185 = vmatmul.mubr.bf16.gmra.mrb[24].mxu0 %v3474_v34  ;;  %3313 = vmatmul.mubr.bf16.gmra.mrb[24].mxu1 %v3475_v35  ;;  %v3538_v34 = vld [vmem:[%s4134_s21 + $0x168] sm:$0xff]  }
  0x57   : > { %3188 = vmatprep.mubr.bf16.mxu0 %v3476_v36  ;;  %3316 = vmatprep.mubr.bf16.mxu1 %v3477_v37  ;;  %v3539_v35 = vld [vmem:[%s4134_s21 + $0x368] sm:$0xff]   ;;  %v3540_v36 = vld [vmem:[%s4134_s21 + $0x170] sm:$0xff]  }
  0x58   : > { %v3541_v37 = vld [vmem:[%s4134_s21 + $0x370] sm:$0xff]  }
  0x5e   : > { %3189 = vmatmul.mubr.bf16.gmra.mrb[28].mxu0 %v3478_v38  ;;  %3317 = vmatmul.mubr.bf16.gmra.mrb[28].mxu1 %v3479_v39  ;;  %v3542_v38 = vld [vmem:[%s4134_s21 + $0x178] sm:$0xff]  }
  0x5f   : > { %3192 = vmatprep.mubr.bf16.mxu0 %v3480_v40  ;;  %3320 = vmatprep.mubr.bf16.mxu1 %v3481_v41  ;;  %v3543_v39 = vld [vmem:[%s4134_s21 + $0x378] sm:$0xff]   ;;  %v3544_v40 = vld [vmem:[%s4134_s21 + $0x180] sm:$0xff]  }
  0x60   : > { %v3545_v41 = vld [vmem:[%s4134_s21 + $0x380] sm:$0xff]  }
  0x66   : > { %3193 = vmatmul.mubr.bf16.gmra.mrb[32].mxu0 %v3482_v42  ;;  %3321 = vmatmul.mubr.bf16.gmra.mrb[32].mxu1 %v3483_v43  ;;  %v3546_v42 = vld [vmem:[%s4134_s21 + $0x188] sm:$0xff]  }
  0x67   : > { %3196 = vmatprep.mubr.bf16.mxu0 %v3484_v44  ;;  %3324 = vmatprep.mubr.bf16.mxu1 %v3485_v45  ;;  %v3547_v43 = vld [vmem:[%s4134_s21 + $0x388] sm:$0xff]   ;;  %v3548_v44 = vld [vmem:[%s4134_s21 + $0x190] sm:$0xff]  }
  0x68   : > { %v3549_v45 = vld [vmem:[%s4134_s21 + $0x390] sm:$0xff]  }
  0x6e   : > { %3197 = vmatmul.mubr.bf16.gmra.mrb[36].mxu0 %v3486_v46  ;;  %3325 = vmatmul.mubr.bf16.gmra.mrb[36].mxu1 %v3487_v47  ;;  %v3550_v46 = vld [vmem:[%s4134_s21 + $0x198] sm:$0xff]  }
  0x6f   : > { %3200 = vmatprep.mubr.bf16.mxu0 %v3488_v48  ;;  %3328 = vmatprep.mubr.bf16.mxu1 %v3489_v49  ;;  %v3551_v47 = vld [vmem:[%s4134_s21 + $0x398] sm:$0xff]   ;;  %v3552_v48 = vld [vmem:[%s4134_s21 + $0x1a0] sm:$0xff]  }
  0x70   : > { %v3553_v49 = vld [vmem:[%s4134_s21 + $0x3a0] sm:$0xff]  }
  0x76   : > { %3201 = vmatmul.mubr.bf16.gmra.mrb[40].mxu0 %v3490_v50  ;;  %3329 = vmatmul.mubr.bf16.gmra.mrb[40].mxu1 %v3491_v51  ;;  %v3554_v50 = vld [vmem:[%s4134_s21 + $0x1a8] sm:$0xff]  }
  0x77   : > { %3204 = vmatprep.mubr.bf16.mxu0 %v3492_v52  ;;  %3332 = vmatprep.mubr.bf16.mxu1 %v3493_v53  ;;  %v3555_v51 = vld [vmem:[%s4134_s21 + $0x3a8] sm:$0xff]   ;;  %v3556_v52 = vld [vmem:[%s4134_s21 + $0x1b0] sm:$0xff]  }
  0x78   : > { %v3557_v53 = vld [vmem:[%s4134_s21 + $0x3b0] sm:$0xff]  }
  0x7e   : > { %3205 = vmatmul.mubr.bf16.gmra.mrb[44].mxu0 %v3494_v54  ;;  %3333 = vmatmul.mubr.bf16.gmra.mrb[44].mxu1 %v3495_v55 }
  0x7f   : > { %3208 = vmatprep.mubr.bf16.mxu0 %v3496_v56  ;;  %3336 = vmatprep.mubr.bf16.mxu1 %v3497_v57 }
  0x86   : > { %3209 = vmatmul.mubr.bf16.gmra.mrb[48].mxu0 %v3498_v58  ;;  %3337 = vmatmul.mubr.bf16.gmra.mrb[48].mxu1 %v3499_v59  ;;  %v3558_v58 = vld [vmem:[%s4134_s21 + $0x1b8] sm:$0xff]  }
  0x87   : > { %3212 = vmatprep.mubr.bf16.mxu0 %v3500_v60  ;;  %3340 = vmatprep.mubr.bf16.mxu1 %v3501_v61  ;;  %v3559_v59 = vld [vmem:[%s4134_s21 + $0x3b8] sm:$0xff]  }
  0x8e   : > { %3213 = vmatmul.mubr.bf16.gmra.mrb[52].mxu0 %v3502_v62  ;;  %3341 = vmatmul.mubr.bf16.gmra.mrb[52].mxu1 %v3503_v63  ;;  %v3560_v62 = vld [vmem:[%s4134_s21 + $0x1c0] sm:$0xff]  }
  0x8f   : > { %3216 = vmatprep.mubr.bf16.mxu0 %v3504_v0  ;;  %3344 = vmatprep.mubr.bf16.mxu1 %v3505_v1  ;;  %v3561_v63 = vld [vmem:[%s4134_s21 + $0x3c0] sm:$0xff]  }
  0x96   : > { %3217 = vmatmul.mubr.bf16.gmra.mrb[56].mxu0 %v3506_v2  ;;  %3345 = vmatmul.mubr.bf16.gmra.mrb[56].mxu1 %v3507_v3 }
  0x97   : > { %3220 = vmatprep.mubr.bf16.mxu0 %v3508_v4  ;;  %3348 = vmatprep.mubr.bf16.mxu1 %v3509_v5 }
  0x9e   : > { %3221 = vmatmul.mubr.bf16.gmra.mrb[60].mxu0 %v3510_v6  ;;  %3349 = vmatmul.mubr.bf16.gmra.mrb[60].mxu1 %v3511_v7  ;;  %v3562_v6 = vld [vmem:[%s4134_s21 + $0x1c8] sm:$0xff]  }
  0x9f   : > { %3224 = vmatprep.mubr.bf16.mxu0 %v3512_v8  ;;  %3352 = vmatprep.mubr.bf16.mxu1 %v3513_v9  ;;  %v3563_v7 = vld [vmem:[%s4134_s21 + $0x3c8] sm:$0xff]  }
  0xa6   : > { %3225 = vmatmul.mubr.bf16.gmra.mrb[64].mxu0 %v3514_v10  ;;  %3353 = vmatmul.mubr.bf16.gmra.mrb[64].mxu1 %v3515_v11  ;;  %v3564_v10 = vld [vmem:[%s4134_s21 + $0x1d0] sm:$0xff]  }
  0xa7   : > { %3228 = vmatprep.mubr.bf16.mxu0 %v3516_v12  ;;  %3356 = vmatprep.mubr.bf16.mxu1 %v3517_v13  ;;  %v3565_v11 = vld [vmem:[%s4134_s21 + $0x3d0] sm:$0xff]  }
  0xae   : > { %3229 = vmatmul.mubr.bf16.gmra.mrb[68].mxu0 %v3518_v14  ;;  %3357 = vmatmul.mubr.bf16.gmra.mrb[68].mxu1 %v3519_v15 }
  0xaf   : > { %3232 = vmatprep.mubr.bf16.mxu0 %v3520_v16  ;;  %3360 = vmatprep.mubr.bf16.mxu1 %v3521_v17 }
  0xb6   : > { %3233 = vmatmul.mubr.bf16.gmra.mrb[72].mxu0 %v3522_v18  ;;  %3361 = vmatmul.mubr.bf16.gmra.mrb[72].mxu1 %v3523_v19 }
  0xb7   : > { %3236 = vmatprep.mubr.bf16.mxu0 %v3524_v20  ;;  %3364 = vmatprep.mubr.bf16.mxu1 %v3525_v21 }
  0xbe   : > { %3237 = vmatmul.mubr.bf16.gmra.mrb[76].mxu0 %v3526_v22  ;;  %3365 = vmatmul.mubr.bf16.gmra.mrb[76].mxu1 %v3527_v23 }
  0xbf   : > { %3240 = vmatprep.mubr.bf16.mxu0 %v3528_v24  ;;  %3368 = vmatprep.mubr.bf16.mxu1 %v3529_v25  ;;  %v3566_v25 = vld [vmem:[%s4134_s21 + $0x1d8] sm:$0xff]  }
  0xc6   : > { %3241 = vmatmul.mubr.bf16.gmra.mrb[80].mxu0 %v3530_v26  ;;  %3369 = vmatmul.mubr.bf16.gmra.mrb[80].mxu1 %v3531_v27  ;;  %v3567_v26 = vld [vmem:[%s4134_s21 + $0x3d8] sm:$0xff]  }
  0xc7   : > { %3244 = vmatprep.mubr.bf16.mxu0 %v3532_v28  ;;  %3372 = vmatprep.mubr.bf16.mxu1 %v3533_v29 }
  0xce   : > { %3245 = vmatmul.mubr.bf16.gmra.mrb[84].mxu0 %v3534_v30  ;;  %3373 = vmatmul.mubr.bf16.gmra.mrb[84].mxu1 %v3535_v31  ;;  %v3568_v30 = vld [vmem:[%s4134_s21 + $0x1e0] sm:$0xff]  }
  0xcf   : > { %3248 = vmatprep.mubr.bf16.mxu0 %v3536_v32  ;;  %3376 = vmatprep.mubr.bf16.mxu1 %v3537_v33  ;;  %v3569_v31 = vld [vmem:[%s4134_s21 + $0x3e0] sm:$0xff]  }
  0xd6   : > { %3249 = vmatmul.mubr.bf16.gmra.mrb[88].mxu0 %v3538_v34  ;;  %3377 = vmatmul.mubr.bf16.gmra.mrb[88].mxu1 %v3539_v35 }
  0xd7   : > { %3252 = vmatprep.mubr.bf16.mxu0 %v3540_v36  ;;  %3380 = vmatprep.mubr.bf16.mxu1 %v3541_v37 }
  0xde   : > { %3253 = vmatmul.mubr.bf16.gmra.mrb[92].mxu0 %v3542_v38  ;;  %3381 = vmatmul.mubr.bf16.gmra.mrb[92].mxu1 %v3543_v39 }
  0xdf   : > { %3256 = vmatprep.mubr.bf16.mxu0 %v3544_v40  ;;  %3384 = vmatprep.mubr.bf16.mxu1 %v3545_v41 }
  0xe6   : > { %3257 = vmatmul.mubr.bf16.gmra.mrb[96].mxu0 %v3546_v42  ;;  %3385 = vmatmul.mubr.bf16.gmra.mrb[96].mxu1 %v3547_v43 }
  0xe7   : > { %3260 = vmatprep.mubr.bf16.mxu0 %v3548_v44  ;;  %3388 = vmatprep.mubr.bf16.mxu1 %v3549_v45  ;;  %v3570_v45 = vld [vmem:[%s4134_s21 + $0x1e8] sm:$0xff]  }
  0xee   : > { %3261 = vmatmul.mubr.bf16.gmra.mrb[100].mxu0 %v3550_v46  ;;  %3389 = vmatmul.mubr.bf16.gmra.mrb[100].mxu1 %v3551_v47  ;;  %v3571_v46 = vld [vmem:[%s4134_s21 + $0x3e8] sm:$0xff]  }
  0xef   : > { %3264 = vmatprep.mubr.bf16.mxu0 %v3552_v48  ;;  %3392 = vmatprep.mubr.bf16.mxu1 %v3553_v49 }
  0xf6   : > { %3265 = vmatmul.mubr.bf16.gmra.mrb[104].mxu0 %v3554_v50  ;;  %3393 = vmatmul.mubr.bf16.gmra.mrb[104].mxu1 %v3555_v51  ;;  %v3572_v50 = vld [vmem:[%s4134_s21 + $0x1f0] sm:$0xff]  }
  0xf7   : > { %3268 = vmatprep.mubr.bf16.mxu0 %v3556_v52  ;;  %3396 = vmatprep.mubr.bf16.mxu1 %v3557_v53  ;;  %v3573_v51 = vld [vmem:[%s4134_s21 + $0x3f0] sm:$0xff]  }
  0xf9   : > { %v3162_v54 = vpop.f32.mrb[0].mxu0  ;;  %v3290_v55 = vpop.f32.mrb[0].mxu1 }
  0xfa   : > { %3576 = vtanh.f32 %v3162_v54  ;;  %v1270_v56 = vpop.f32.mrb[1].mxu0  ;;  %v1782_v57 = vpop.f32.mrb[1].mxu1 }
  0xfb   : > { %3578 = vtanh.f32 %v3290_v55  ;;  %v3163_v60 = vpop.f32.mrb[2].mxu0  ;;  %v3291_v61 = vpop.f32.mrb[2].mxu1 }
  0xfc   : > { %3580 = vtanh.f32 %v1270_v56  ;;  %v1273_v0 = vpop.f32.mrb[3].mxu0  ;;  %v1785_v1 = vpop.f32.mrb[3].mxu1 }
  0xfd   : > { %3582 = vtanh.f32 %v1782_v57 }
  0xfe   : > { %3584 = vtanh.f32 %v3163_v60  ;;  %3269 = vmatmul.mubr.bf16.gmra.mrb[108].mxu0 %v3558_v58  ;;  %3397 = vmatmul.mubr.bf16.gmra.mrb[108].mxu1 %v3559_v59 }
  0xff   : > { %3586 = vtanh.f32 %v3291_v61  ;;  %3272 = vmatprep.mubr.bf16.mxu0 %v3560_v62  ;;  %3400 = vmatprep.mubr.bf16.mxu1 %v3561_v63 }
 0x100   : > { %3588 = vtanh.f32 %v1273_v0 }
 0x101   : > { %3590 = vtanh.f32 %v1785_v1  ;;  %v3166_v2 = vpop.f32.mrb[4].mxu0  ;;  %v3294_v3 = vpop.f32.mrb[4].mxu1  ;;  %v3574_v1 = vld [vmem:[%s4134_s21 + $0x1f8] sm:$0xff]  }
 0x102   : > { %3592 = vtanh.f32 %v3166_v2  ;;  %v1286_v4 = vpop.f32.mrb[5].mxu0  ;;  %v1798_v5 = vpop.f32.mrb[5].mxu1  ;;  %v3575_v2 = vld [vmem:[%s4134_s21 + $0x3f8] sm:$0xff]  }
 0x103   : > { %3594 = vtanh.f32 %v3294_v3  ;;  %v3167_v8 = vpop.f32.mrb[6].mxu0  ;;  %v3295_v9 = vpop.f32.mrb[6].mxu1 }
 0x104   : > { %v3577_v12 = vpop.eup %3576  ;;  %3596 = vtanh.f32 %v1286_v4  ;;  %v1289_v13 = vpop.f32.mrb[7].mxu0 }
 0x105   : > { %v1801_v14 = vpop.f32.mrb[7].mxu1  ;;  %v3579_v15 = vpop.eup %3578  ;;  %2551 = vst [vmem:[%s4269_s7 + $0x10] sm:$0xff] %v3577_v12  ;;  %3598 = vtanh.f32 %v1798_v5 }
 0x106   : > { %v3581_v16 = vpop.eup %3580  ;;  %2679 = vst [vmem:[%s4269_s7 + $0x410] sm:$0xff] %v3579_v15  ;;  %3600 = vtanh.f32 %v3167_v8  ;;  %3273 = vmatmul.mubr.bf16.gmra.mrb[112].mxu0 %v3562_v6  ;;  %3401 = vmatmul.mubr.bf16.gmra.mrb[112].mxu1 %v3563_v7 }
 0x107   : > { %v3583_v17 = vpop.eup %3582  ;;  %2549 = vst [vmem:[%s4269_s7] sm:$0xff] %v3581_v16  ;;  %3602 = vtanh.f32 %v3295_v9  ;;  %3276 = vmatprep.mubr.bf16.mxu0 %v3564_v10  ;;  %3404 = vmatprep.mubr.bf16.mxu1 %v3565_v11 }
 0x108   : > { %v3585_v18 = vpop.eup %3584  ;;  %2677 = vst [vmem:[%s4269_s7 + $0x400] sm:$0xff] %v3583_v17  ;;  %3604 = vtanh.f32 %v1289_v13 }
 0x109   : > { %v3587_v19 = vpop.eup %3586  ;;  %2552 = vst [vmem:[%s4269_s7 + $0x18] sm:$0xff] %v3585_v18  ;;  %3606 = vtanh.f32 %v1801_v14  ;;  %v3170_v20 = vpop.f32.mrb[8].mxu0 }
 0x10a   : > { %v3298_v21 = vpop.f32.mrb[8].mxu1  ;;  %v3589_v22 = vpop.eup %3588  ;;  %2680 = vst [vmem:[%s4269_s7 + $0x418] sm:$0xff] %v3587_v19  ;;  %3608 = vtanh.f32 %v3170_v20 }
 0x10b   : > { %v1302_v23 = vpop.f32.mrb[9].mxu0  ;;  %v1814_v24 = vpop.f32.mrb[9].mxu1  ;;  %2550 = vst [vmem:[%s4269_s7 + $0x8] sm:$0xff] %v3589_v22  ;;  %3610 = vtanh.f32 %v3298_v21 }
 0x10c   : > { %v3591_v27 = vpop.eup %3590  ;;  %v3171_v28 = vpop.f32.mrb[10].mxu0  ;;  %3612 = vtanh.f32 %v1302_v23 }
 0x10d   : > { %v3299_v29 = vpop.f32.mrb[10].mxu1  ;;  %v3593_v32 = vpop.eup %3592  ;;  %2678 = vst [vmem:[%s4269_s7 + $0x408] sm:$0xff] %v3591_v27  ;;  %3614 = vtanh.f32 %v1814_v24 }
 0x10e   : > { %v1305_v33 = vpop.f32.mrb[11].mxu0  ;;  %v1817_v34 = vpop.f32.mrb[11].mxu1  ;;  %2555 = vst [vmem:[%s4269_s7 + $0x30] sm:$0xff] %v3593_v32  ;;  %3616 = vtanh.f32 %v3171_v28  ;;  %3277 = vmatmul.mubr.bf16.gmra.mrb[116].mxu0 %v3566_v25  ;;  %3405 = vmatmul.mubr.bf16.gmra.mrb[116].mxu1 %v3567_v26 }
 0x10f   : > { %v3595_v35 = vpop.eup %3594  ;;  %3618 = vtanh.f32 %v3299_v29  ;;  %3280 = vmatprep.mubr.bf16.mxu0 %v3568_v30  ;;  %3408 = vmatprep.mubr.bf16.mxu1 %v3569_v31 }
 0x110   : > { %v3597_v36 = vpop.eup %3596  ;;  %2683 = vst [vmem:[%s4269_s7 + $0x430] sm:$0xff] %v3595_v35  ;;  %3620 = vtanh.f32 %v1305_v33 }
 0x111   : > { %v3599_v37 = vpop.eup %3598  ;;  %2553 = vst [vmem:[%s4269_s7 + $0x20] sm:$0xff] %v3597_v36  ;;  %3622 = vtanh.f32 %v1817_v34  ;;  %v3174_v40 = vpop.f32.mrb[12].mxu0 }
 0x112   : > { %v3601_v38 = vpop.eup %3600  ;;  %2681 = vst [vmem:[%s4269_s7 + $0x420] sm:$0xff] %v3599_v37  ;;  %v3302_v41 = vpop.f32.mrb[12].mxu1  ;;  %3624 = vtanh.f32 %v3174_v40 }
 0x113   : > { %v3603_v39 = vpop.eup %3602  ;;  %2556 = vst [vmem:[%s4269_s7 + $0x38] sm:$0xff] %v3601_v38  ;;  %v1318_v43 = vpop.f32.mrb[13].mxu0  ;;  %3626 = vtanh.f32 %v3302_v41 }
 0x114   : > { %v3605_v42 = vpop.eup %3604  ;;  %2684 = vst [vmem:[%s4269_s7 + $0x438] sm:$0xff] %v3603_v39  ;;  %v1830_v44 = vpop.f32.mrb[13].mxu1  ;;  %3628 = vtanh.f32 %v1318_v43 }
 0x115   : > { %v3607_v47 = vpop.eup %3606  ;;  %2554 = vst [vmem:[%s4269_s7 + $0x28] sm:$0xff] %v3605_v42  ;;  %v3175_v48 = vpop.f32.mrb[14].mxu0  ;;  %3630 = vtanh.f32 %v1830_v44 }
 0x116   : > { %v3303_v49 = vpop.f32.mrb[14].mxu1  ;;  %v3609_v52 = vpop.eup %3608  ;;  %2682 = vst [vmem:[%s4269_s7 + $0x428] sm:$0xff] %v3607_v47  ;;  %3632 = vtanh.f32 %v3175_v48  ;;  %3281 = vmatmul.mubr.bf16.gmra.mrb[120].mxu0 %v3570_v45  ;;  %3409 = vmatmul.mubr.bf16.gmra.mrb[120].mxu1 %v3571_v46 }
 0x117   : > { %v1321_v53 = vpop.f32.mrb[15].mxu0  ;;  %v1833_v54 = vpop.f32.mrb[15].mxu1  ;;  %2559 = vst [vmem:[%s4269_s7 + $0x50] sm:$0xff] %v3609_v52  ;;  %3634 = vtanh.f32 %v3303_v49  ;;  %3284 = vmatprep.mubr.bf16.mxu0 %v3572_v50  ;;  %3412 = vmatprep.mubr.bf16.mxu1 %v3573_v51 }
 0x118   : > { %v3611_v55 = vpop.eup %3610  ;;  %3636 = vtanh.f32 %v1321_v53 }
 0x119   : > { %v3613_v56 = vpop.eup %3612  ;;  %2687 = vst [vmem:[%s4269_s7 + $0x450] sm:$0xff] %v3611_v55  ;;  %3638 = vtanh.f32 %v1833_v54  ;;  %v3178_v60 = vpop.f32.mrb[16].mxu0 }
 0x11a   : > { %v3615_v57 = vpop.eup %3614  ;;  %2557 = vst [vmem:[%s4269_s7 + $0x40] sm:$0xff] %v3613_v56  ;;  %v3306_v61 = vpop.f32.mrb[16].mxu1  ;;  %3640 = vtanh.f32 %v3178_v60 }
 0x11b   : > { %v3617_v58 = vpop.eup %3616  ;;  %2685 = vst [vmem:[%s4269_s7 + $0x440] sm:$0xff] %v3615_v57  ;;  %v1334_v63 = vpop.f32.mrb[17].mxu0  ;;  %3642 = vtanh.f32 %v3306_v61 }
 0x11c   : > { %v3619_v59 = vpop.eup %3618  ;;  %2560 = vst [vmem:[%s4269_s7 + $0x58] sm:$0xff] %v3617_v58  ;;  %v1846_v0 = vpop.f32.mrb[17].mxu1  ;;  %3644 = vtanh.f32 %v1334_v63 }
 0x11d   : > { %v3621_v62 = vpop.eup %3620  ;;  %2688 = vst [vmem:[%s4269_s7 + $0x458] sm:$0xff] %v3619_v59  ;;  %v3179_v4 = vpop.f32.mrb[18].mxu0  ;;  %3646 = vtanh.f32 %v1846_v0 }
 0x11e   : > { %v3623_v3 = vpop.eup %3622  ;;  %2558 = vst [vmem:[%s4269_s7 + $0x48] sm:$0xff] %v3621_v62  ;;  %v3307_v5 = vpop.f32.mrb[18].mxu1  ;;  %3648 = vtanh.f32 %v3179_v4  ;;  %3285 = vmatmul.mubr.bf16.gmra.mrb[124].mxu0 %v3574_v1  ;;  %3413 = vmatmul.mubr.bf16.gmra.mrb[124].mxu1 %v3575_v2 }
 0x11f   : > { %v3625_v6 = vpop.eup %3624  ;;  %2686 = vst [vmem:[%s4269_s7 + $0x448] sm:$0xff] %v3623_v3  ;;  %v1337_v7 = vpop.f32.mrb[19].mxu0  ;;  %3650 = vtanh.f32 %v3307_v5 }
 0x120   : > { %v1849_v8 = vpop.f32.mrb[19].mxu1  ;;  %v3627_v9 = vpop.eup %3626  ;;  %2563 = vst [vmem:[%s4269_s7 + $0x70] sm:$0xff] %v3625_v6  ;;  %3652 = vtanh.f32 %v1337_v7 }
 0x121   : > { %v3629_v10 = vpop.eup %3628  ;;  %2691 = vst [vmem:[%s4269_s7 + $0x470] sm:$0xff] %v3627_v9  ;;  %3654 = vtanh.f32 %v1849_v8  ;;  %v3182_v14 = vpop.f32.mrb[20].mxu0 }
 0x122   : > { %v3631_v11 = vpop.eup %3630  ;;  %2561 = vst [vmem:[%s4269_s7 + $0x60] sm:$0xff] %v3629_v10  ;;  %v3310_v15 = vpop.f32.mrb[20].mxu1  ;;  %3656 = vtanh.f32 %v3182_v14 }
 0x123   : > { %v3633_v12 = vpop.eup %3632  ;;  %2689 = vst [vmem:[%s4269_s7 + $0x460] sm:$0xff] %v3631_v11  ;;  %v1350_v17 = vpop.f32.mrb[21].mxu0  ;;  %3658 = vtanh.f32 %v3310_v15 }
 0x124   : > { %v3635_v13 = vpop.eup %3634  ;;  %2564 = vst [vmem:[%s4269_s7 + $0x78] sm:$0xff] %v3633_v12  ;;  %v1862_v18 = vpop.f32.mrb[21].mxu1  ;;  %3660 = vtanh.f32 %v1350_v17 }
 0x125   : > { %v3637_v16 = vpop.eup %3636  ;;  %2692 = vst [vmem:[%s4269_s7 + $0x478] sm:$0xff] %v3635_v13  ;;  %v3183_v20 = vpop.f32.mrb[22].mxu0  ;;  %3662 = vtanh.f32 %v1862_v18 }
 0x126   : > { %v3639_v19 = vpop.eup %3638  ;;  %2562 = vst [vmem:[%s4269_s7 + $0x68] sm:$0xff] %v3637_v16  ;;  %v3311_v21 = vpop.f32.mrb[22].mxu1  ;;  %3664 = vtanh.f32 %v3183_v20 }
 0x127   : > { %v3641_v22 = vpop.eup %3640  ;;  %2690 = vst [vmem:[%s4269_s7 + $0x468] sm:$0xff] %v3639_v19  ;;  %v1353_v23 = vpop.f32.mrb[23].mxu0  ;;  %3666 = vtanh.f32 %v3311_v21 }
 0x128   : > { %v1865_v24 = vpop.f32.mrb[23].mxu1  ;;  %v3643_v25 = vpop.eup %3642  ;;  %2567 = vst [vmem:[%s4269_s7 + $0x90] sm:$0xff] %v3641_v22  ;;  %3668 = vtanh.f32 %v1353_v23 }
 0x129   : > { %v3645_v26 = vpop.eup %3644  ;;  %2695 = vst [vmem:[%s4269_s7 + $0x490] sm:$0xff] %v3643_v25  ;;  %3670 = vtanh.f32 %v1865_v24  ;;  %v3186_v30 = vpop.f32.mrb[24].mxu0 }
 0x12a   : > { %v3647_v27 = vpop.eup %3646  ;;  %2565 = vst [vmem:[%s4269_s7 + $0x80] sm:$0xff] %v3645_v26  ;;  %v3314_v31 = vpop.f32.mrb[24].mxu1  ;;  %3672 = vtanh.f32 %v3186_v30 }
 0x12b   : > { %v3649_v28 = vpop.eup %3648  ;;  %2693 = vst [vmem:[%s4269_s7 + $0x480] sm:$0xff] %v3647_v27  ;;  %v1366_v33 = vpop.f32.mrb[25].mxu0  ;;  %3674 = vtanh.f32 %v3314_v31 }
 0x12c   : > { %v3651_v29 = vpop.eup %3650  ;;  %2568 = vst [vmem:[%s4269_s7 + $0x98] sm:$0xff] %v3649_v28  ;;  %v1878_v34 = vpop.f32.mrb[25].mxu1  ;;  %3676 = vtanh.f32 %v1366_v33 }
 0x12d   : > { %v3653_v32 = vpop.eup %3652  ;;  %2696 = vst [vmem:[%s4269_s7 + $0x498] sm:$0xff] %v3651_v29  ;;  %v3187_v36 = vpop.f32.mrb[26].mxu0  ;;  %3678 = vtanh.f32 %v1878_v34 }
 0x12e   : > { %v3655_v35 = vpop.eup %3654  ;;  %2566 = vst [vmem:[%s4269_s7 + $0x88] sm:$0xff] %v3653_v32  ;;  %v3315_v37 = vpop.f32.mrb[26].mxu1  ;;  %3680 = vtanh.f32 %v3187_v36 }
 0x12f   : > { %v3657_v38 = vpop.eup %3656  ;;  %2694 = vst [vmem:[%s4269_s7 + $0x488] sm:$0xff] %v3655_v35  ;;  %v1369_v39 = vpop.f32.mrb[27].mxu0  ;;  %3682 = vtanh.f32 %v3315_v37 }
 0x130   : > { %v1881_v40 = vpop.f32.mrb[27].mxu1  ;;  %v3659_v41 = vpop.eup %3658  ;;  %2571 = vst [vmem:[%s4269_s7 + $0xb0] sm:$0xff] %v3657_v38  ;;  %3684 = vtanh.f32 %v1369_v39 }
 0x131   : > { %v3661_v42 = vpop.eup %3660  ;;  %2699 = vst [vmem:[%s4269_s7 + $0x4b0] sm:$0xff] %v3659_v41  ;;  %3686 = vtanh.f32 %v1881_v40  ;;  %v3190_v46 = vpop.f32.mrb[28].mxu0 }
 0x132   : > { %v3663_v43 = vpop.eup %3662  ;;  %2569 = vst [vmem:[%s4269_s7 + $0xa0] sm:$0xff] %v3661_v42  ;;  %v3318_v47 = vpop.f32.mrb[28].mxu1  ;;  %3688 = vtanh.f32 %v3190_v46 }
 0x133   : > { %v3665_v44 = vpop.eup %3664  ;;  %2697 = vst [vmem:[%s4269_s7 + $0x4a0] sm:$0xff] %v3663_v43  ;;  %v1382_v49 = vpop.f32.mrb[29].mxu0  ;;  %3690 = vtanh.f32 %v3318_v47 }
 0x134   : > { %v3667_v45 = vpop.eup %3666  ;;  %2572 = vst [vmem:[%s4269_s7 + $0xb8] sm:$0xff] %v3665_v44  ;;  %v1894_v50 = vpop.f32.mrb[29].mxu1  ;;  %3692 = vtanh.f32 %v1382_v49 }
 0x135   : > { %v3669_v48 = vpop.eup %3668  ;;  %2700 = vst [vmem:[%s4269_s7 + $0x4b8] sm:$0xff] %v3667_v45  ;;  %v3191_v52 = vpop.f32.mrb[30].mxu0  ;;  %3694 = vtanh.f32 %v1894_v50 }
 0x136   : > { %v3671_v51 = vpop.eup %3670  ;;  %2570 = vst [vmem:[%s4269_s7 + $0xa8] sm:$0xff] %v3669_v48  ;;  %v3319_v53 = vpop.f32.mrb[30].mxu1  ;;  %3696 = vtanh.f32 %v3191_v52 }
 0x137   : > { %v3673_v54 = vpop.eup %3672  ;;  %2698 = vst [vmem:[%s4269_s7 + $0x4a8] sm:$0xff] %v3671_v51  ;;  %v1385_v55 = vpop.f32.mrb[31].mxu0  ;;  %3698 = vtanh.f32 %v3319_v53 }
 0x138   : > { %v1897_v56 = vpop.f32.mrb[31].mxu1  ;;  %v3675_v57 = vpop.eup %3674  ;;  %2575 = vst [vmem:[%s4269_s7 + $0xd0] sm:$0xff] %v3673_v54  ;;  %3700 = vtanh.f32 %v1385_v55 }
 0x139   : > { %v3677_v58 = vpop.eup %3676  ;;  %2703 = vst [vmem:[%s4269_s7 + $0x4d0] sm:$0xff] %v3675_v57  ;;  %3702 = vtanh.f32 %v1897_v56  ;;  %v3194_v62 = vpop.f32.mrb[32].mxu0 }
 0x13a   : > { %v3679_v59 = vpop.eup %3678  ;;  %2573 = vst [vmem:[%s4269_s7 + $0xc0] sm:$0xff] %v3677_v58  ;;  %v3322_v63 = vpop.f32.mrb[32].mxu1  ;;  %3704 = vtanh.f32 %v3194_v62 }
 0x13b   : > { %v3681_v60 = vpop.eup %3680  ;;  %2701 = vst [vmem:[%s4269_s7 + $0x4c0] sm:$0xff] %v3679_v59  ;;  %v1398_v1 = vpop.f32.mrb[33].mxu0  ;;  %3706 = vtanh.f32 %v3322_v63 }
 0x13c   : > { %v3683_v61 = vpop.eup %3682  ;;  %2576 = vst [vmem:[%s4269_s7 + $0xd8] sm:$0xff] %v3681_v60  ;;  %v1910_v2 = vpop.f32.mrb[33].mxu1  ;;  %3708 = vtanh.f32 %v1398_v1 }
 0x13d   : > { %v3685_v0 = vpop.eup %3684  ;;  %2704 = vst [vmem:[%s4269_s7 + $0x4d8] sm:$0xff] %v3683_v61  ;;  %v3195_v4 = vpop.f32.mrb[34].mxu0  ;;  %3710 = vtanh.f32 %v1910_v2 }
 0x13e   : > { %v3687_v3 = vpop.eup %3686  ;;  %2574 = vst [vmem:[%s4269_s7 + $0xc8] sm:$0xff] %v3685_v0  ;;  %v3323_v5 = vpop.f32.mrb[34].mxu1  ;;  %3712 = vtanh.f32 %v3195_v4 }
 0x13f   : > { %v3689_v6 = vpop.eup %3688  ;;  %2702 = vst [vmem:[%s4269_s7 + $0x4c8] sm:$0xff] %v3687_v3  ;;  %v1401_v7 = vpop.f32.mrb[35].mxu0  ;;  %3714 = vtanh.f32 %v3323_v5 }
 0x140   : > { %v1913_v8 = vpop.f32.mrb[35].mxu1  ;;  %v3691_v9 = vpop.eup %3690  ;;  %2579 = vst [vmem:[%s4269_s7 + $0xf0] sm:$0xff] %v3689_v6  ;;  %3716 = vtanh.f32 %v1401_v7 }
 0x141   : > { %v3693_v10 = vpop.eup %3692  ;;  %2707 = vst [vmem:[%s4269_s7 + $0x4f0] sm:$0xff] %v3691_v9  ;;  %3718 = vtanh.f32 %v1913_v8  ;;  %v3198_v14 = vpop.f32.mrb[36].mxu0 }
 0x142   : > { %v3695_v11 = vpop.eup %3694  ;;  %2577 = vst [vmem:[%s4269_s7 + $0xe0] sm:$0xff] %v3693_v10  ;;  %v3326_v15 = vpop.f32.mrb[36].mxu1  ;;  %3720 = vtanh.f32 %v3198_v14 }
 0x143   : > { %v3697_v12 = vpop.eup %3696  ;;  %2705 = vst [vmem:[%s4269_s7 + $0x4e0] sm:$0xff] %v3695_v11  ;;  %v1414_v17 = vpop.f32.mrb[37].mxu0  ;;  %3722 = vtanh.f32 %v3326_v15 }
 0x144   : > { %v3699_v13 = vpop.eup %3698  ;;  %2580 = vst [vmem:[%s4269_s7 + $0xf8] sm:$0xff] %v3697_v12  ;;  %v1926_v18 = vpop.f32.mrb[37].mxu1  ;;  %3724 = vtanh.f32 %v1414_v17 }
 0x145   : > { %v3701_v16 = vpop.eup %3700  ;;  %2708 = vst [vmem:[%s4269_s7 + $0x4f8] sm:$0xff] %v3699_v13  ;;  %v3199_v20 = vpop.f32.mrb[38].mxu0  ;;  %3726 = vtanh.f32 %v1926_v18 }
 0x146   : > { %v3703_v19 = vpop.eup %3702  ;;  %2578 = vst [vmem:[%s4269_s7 + $0xe8] sm:$0xff] %v3701_v16  ;;  %v3327_v21 = vpop.f32.mrb[38].mxu1  ;;  %3728 = vtanh.f32 %v3199_v20 }
 0x147   : > { %v3705_v22 = vpop.eup %3704  ;;  %2706 = vst [vmem:[%s4269_s7 + $0x4e8] sm:$0xff] %v3703_v19  ;;  %v1417_v23 = vpop.f32.mrb[39].mxu0  ;;  %3730 = vtanh.f32 %v3327_v21 }
 0x148   : > { %v1929_v24 = vpop.f32.mrb[39].mxu1  ;;  %v3707_v25 = vpop.eup %3706  ;;  %2583 = vst [vmem:[%s4269_s7 + $0x110] sm:$0xff] %v3705_v22  ;;  %3732 = vtanh.f32 %v1417_v23 }
 0x149   : > { %v3709_v26 = vpop.eup %3708  ;;  %2711 = vst [vmem:[%s4269_s7 + $0x510] sm:$0xff] %v3707_v25  ;;  %3734 = vtanh.f32 %v1929_v24  ;;  %v3202_v30 = vpop.f32.mrb[40].mxu0 }
 0x14a   : > { %v3711_v27 = vpop.eup %3710  ;;  %2581 = vst [vmem:[%s4269_s7 + $0x100] sm:$0xff] %v3709_v26  ;;  %v3330_v31 = vpop.f32.mrb[40].mxu1  ;;  %3736 = vtanh.f32 %v3202_v30 }
 0x14b   : > { %v3713_v28 = vpop.eup %3712  ;;  %2709 = vst [vmem:[%s4269_s7 + $0x500] sm:$0xff] %v3711_v27  ;;  %v1430_v33 = vpop.f32.mrb[41].mxu0  ;;  %3738 = vtanh.f32 %v3330_v31 }
 0x14c   : > { %v3715_v29 = vpop.eup %3714  ;;  %2584 = vst [vmem:[%s4269_s7 + $0x118] sm:$0xff] %v3713_v28  ;;  %v1942_v34 = vpop.f32.mrb[41].mxu1  ;;  %3740 = vtanh.f32 %v1430_v33 }
 0x14d   : > { %v3717_v32 = vpop.eup %3716  ;;  %2712 = vst [vmem:[%s4269_s7 + $0x518] sm:$0xff] %v3715_v29  ;;  %v3203_v36 = vpop.f32.mrb[42].mxu0  ;;  %3742 = vtanh.f32 %v1942_v34 }
 0x14e   : > { %v3719_v35 = vpop.eup %3718  ;;  %2582 = vst [vmem:[%s4269_s7 + $0x108] sm:$0xff] %v3717_v32  ;;  %v3331_v37 = vpop.f32.mrb[42].mxu1  ;;  %3744 = vtanh.f32 %v3203_v36 }
 0x14f   : > { %v3721_v38 = vpop.eup %3720  ;;  %2710 = vst [vmem:[%s4269_s7 + $0x508] sm:$0xff] %v3719_v35  ;;  %v1433_v39 = vpop.f32.mrb[43].mxu0  ;;  %3746 = vtanh.f32 %v3331_v37 }
 0x150   : > { %v1945_v40 = vpop.f32.mrb[43].mxu1  ;;  %v3723_v41 = vpop.eup %3722  ;;  %2587 = vst [vmem:[%s4269_s7 + $0x130] sm:$0xff] %v3721_v38  ;;  %3748 = vtanh.f32 %v1433_v39 }
 0x151   : > { %v3725_v42 = vpop.eup %3724  ;;  %2715 = vst [vmem:[%s4269_s7 + $0x530] sm:$0xff] %v3723_v41  ;;  %3750 = vtanh.f32 %v1945_v40  ;;  %v3206_v46 = vpop.f32.mrb[44].mxu0 }
 0x152   : > { %v3727_v43 = vpop.eup %3726  ;;  %2585 = vst [vmem:[%s4269_s7 + $0x120] sm:$0xff] %v3725_v42  ;;  %v3334_v47 = vpop.f32.mrb[44].mxu1  ;;  %3752 = vtanh.f32 %v3206_v46 }
 0x153   : > { %v3729_v44 = vpop.eup %3728  ;;  %2713 = vst [vmem:[%s4269_s7 + $0x520] sm:$0xff] %v3727_v43  ;;  %v1446_v49 = vpop.f32.mrb[45].mxu0  ;;  %3754 = vtanh.f32 %v3334_v47 }
 0x154   : > { %v3731_v45 = vpop.eup %3730  ;;  %2588 = vst [vmem:[%s4269_s7 + $0x138] sm:$0xff] %v3729_v44  ;;  %v1958_v50 = vpop.f32.mrb[45].mxu1  ;;  %3756 = vtanh.f32 %v1446_v49 }
 0x155   : > { %v3733_v48 = vpop.eup %3732  ;;  %2716 = vst [vmem:[%s4269_s7 + $0x538] sm:$0xff] %v3731_v45  ;;  %v3207_v52 = vpop.f32.mrb[46].mxu0  ;;  %3758 = vtanh.f32 %v1958_v50 }
 0x156   : > { %v3735_v51 = vpop.eup %3734  ;;  %2586 = vst [vmem:[%s4269_s7 + $0x128] sm:$0xff] %v3733_v48  ;;  %v3335_v53 = vpop.f32.mrb[46].mxu1  ;;  %3760 = vtanh.f32 %v3207_v52 }
 0x157   : > { %v3737_v54 = vpop.eup %3736  ;;  %2714 = vst [vmem:[%s4269_s7 + $0x528] sm:$0xff] %v3735_v51  ;;  %v1449_v55 = vpop.f32.mrb[47].mxu0  ;;  %3762 = vtanh.f32 %v3335_v53 }
 0x158   : > { %v1961_v56 = vpop.f32.mrb[47].mxu1  ;;  %v3739_v57 = vpop.eup %3738  ;;  %2591 = vst [vmem:[%s4269_s7 + $0x150] sm:$0xff] %v3737_v54  ;;  %3764 = vtanh.f32 %v1449_v55 }
 0x159   : > { %v3741_v58 = vpop.eup %3740  ;;  %2719 = vst [vmem:[%s4269_s7 + $0x550] sm:$0xff] %v3739_v57  ;;  %3766 = vtanh.f32 %v1961_v56  ;;  %v3210_v62 = vpop.f32.mrb[48].mxu0 }
 0x15a   : > { %v3743_v59 = vpop.eup %3742  ;;  %2589 = vst [vmem:[%s4269_s7 + $0x140] sm:$0xff] %v3741_v58  ;;  %v3338_v63 = vpop.f32.mrb[48].mxu1  ;;  %3768 = vtanh.f32 %v3210_v62 }
 0x15b   : > { %v3745_v60 = vpop.eup %3744  ;;  %2717 = vst [vmem:[%s4269_s7 + $0x540] sm:$0xff] %v3743_v59  ;;  %v1462_v1 = vpop.f32.mrb[49].mxu0  ;;  %3770 = vtanh.f32 %v3338_v63 }
 0x15c   : > { %v3747_v61 = vpop.eup %3746  ;;  %2592 = vst [vmem:[%s4269_s7 + $0x158] sm:$0xff] %v3745_v60  ;;  %v1974_v2 = vpop.f32.mrb[49].mxu1  ;;  %3772 = vtanh.f32 %v1462_v1 }
 0x15d   : > { %v3749_v0 = vpop.eup %3748  ;;  %2720 = vst [vmem:[%s4269_s7 + $0x558] sm:$0xff] %v3747_v61  ;;  %v3211_v4 = vpop.f32.mrb[50].mxu0  ;;  %3774 = vtanh.f32 %v1974_v2 }
 0x15e   : > { %v3751_v3 = vpop.eup %3750  ;;  %2590 = vst [vmem:[%s4269_s7 + $0x148] sm:$0xff] %v3749_v0  ;;  %v3339_v5 = vpop.f32.mrb[50].mxu1  ;;  %3776 = vtanh.f32 %v3211_v4 }
 0x15f   : > { %v3753_v6 = vpop.eup %3752  ;;  %2718 = vst [vmem:[%s4269_s7 + $0x548] sm:$0xff] %v3751_v3  ;;  %v1465_v7 = vpop.f32.mrb[51].mxu0  ;;  %3778 = vtanh.f32 %v3339_v5 }
 0x160   : > { %v1977_v8 = vpop.f32.mrb[51].mxu1  ;;  %v3755_v9 = vpop.eup %3754  ;;  %2595 = vst [vmem:[%s4269_s7 + $0x170] sm:$0xff] %v3753_v6  ;;  %3780 = vtanh.f32 %v1465_v7 }
 0x161   : > { %v3757_v10 = vpop.eup %3756  ;;  %2723 = vst [vmem:[%s4269_s7 + $0x570] sm:$0xff] %v3755_v9  ;;  %3782 = vtanh.f32 %v1977_v8  ;;  %v3214_v14 = vpop.f32.mrb[52].mxu0 }
 0x162   : > { %v3759_v11 = vpop.eup %3758  ;;  %2593 = vst [vmem:[%s4269_s7 + $0x160] sm:$0xff] %v3757_v10  ;;  %v3342_v15 = vpop.f32.mrb[52].mxu1  ;;  %3784 = vtanh.f32 %v3214_v14 }
 0x163   : > { %v3761_v12 = vpop.eup %3760  ;;  %2721 = vst [vmem:[%s4269_s7 + $0x560] sm:$0xff] %v3759_v11  ;;  %v1478_v17 = vpop.f32.mrb[53].mxu0  ;;  %3786 = vtanh.f32 %v3342_v15 }
 0x164   : > { %v3763_v13 = vpop.eup %3762  ;;  %2596 = vst [vmem:[%s4269_s7 + $0x178] sm:$0xff] %v3761_v12  ;;  %v1990_v18 = vpop.f32.mrb[53].mxu1  ;;  %3788 = vtanh.f32 %v1478_v17 }
 0x165   : > { %v3765_v16 = vpop.eup %3764  ;;  %2724 = vst [vmem:[%s4269_s7 + $0x578] sm:$0xff] %v3763_v13  ;;  %v3215_v20 = vpop.f32.mrb[54].mxu0  ;;  %3790 = vtanh.f32 %v1990_v18 }
 0x166   : > { %v3767_v19 = vpop.eup %3766  ;;  %2594 = vst [vmem:[%s4269_s7 + $0x168] sm:$0xff] %v3765_v16  ;;  %v3343_v21 = vpop.f32.mrb[54].mxu1  ;;  %3792 = vtanh.f32 %v3215_v20 }
 0x167   : > { %v3769_v22 = vpop.eup %3768  ;;  %2722 = vst [vmem:[%s4269_s7 + $0x568] sm:$0xff] %v3767_v19  ;;  %v1481_v23 = vpop.f32.mrb[55].mxu0  ;;  %3794 = vtanh.f32 %v3343_v21 }
 0x168   : > { %v1993_v24 = vpop.f32.mrb[55].mxu1  ;;  %v3771_v25 = vpop.eup %3770  ;;  %2599 = vst [vmem:[%s4269_s7 + $0x190] sm:$0xff] %v3769_v22  ;;  %3796 = vtanh.f32 %v1481_v23 }
 0x169   : > { %v3773_v26 = vpop.eup %3772  ;;  %2727 = vst [vmem:[%s4269_s7 + $0x590] sm:$0xff] %v3771_v25  ;;  %3798 = vtanh.f32 %v1993_v24  ;;  %v3218_v30 = vpop.f32.mrb[56].mxu0 }
 0x16a   : > { %v3775_v27 = vpop.eup %3774  ;;  %2597 = vst [vmem:[%s4269_s7 + $0x180] sm:$0xff] %v3773_v26  ;;  %v3346_v31 = vpop.f32.mrb[56].mxu1  ;;  %3800 = vtanh.f32 %v3218_v30 }
 0x16b   : > { %v3777_v28 = vpop.eup %3776  ;;  %2725 = vst [vmem:[%s4269_s7 + $0x580] sm:$0xff] %v3775_v27  ;;  %v1494_v33 = vpop.f32.mrb[57].mxu0  ;;  %3802 = vtanh.f32 %v3346_v31 }
 0x16c   : > { %v3779_v29 = vpop.eup %3778  ;;  %2600 = vst [vmem:[%s4269_s7 + $0x198] sm:$0xff] %v3777_v28  ;;  %v2006_v34 = vpop.f32.mrb[57].mxu1  ;;  %3804 = vtanh.f32 %v1494_v33 }
 0x16d   : > { %v3781_v32 = vpop.eup %3780  ;;  %2728 = vst [vmem:[%s4269_s7 + $0x598] sm:$0xff] %v3779_v29  ;;  %v3219_v36 = vpop.f32.mrb[58].mxu0  ;;  %3806 = vtanh.f32 %v2006_v34 }
 0x16e   : > { %v3783_v35 = vpop.eup %3782  ;;  %2598 = vst [vmem:[%s4269_s7 + $0x188] sm:$0xff] %v3781_v32  ;;  %v3347_v37 = vpop.f32.mrb[58].mxu1  ;;  %3808 = vtanh.f32 %v3219_v36 }
 0x16f   : > { %v3785_v38 = vpop.eup %3784  ;;  %2726 = vst [vmem:[%s4269_s7 + $0x588] sm:$0xff] %v3783_v35  ;;  %v1497_v39 = vpop.f32.mrb[59].mxu0  ;;  %3810 = vtanh.f32 %v3347_v37 }
 0x170   : > { %v2009_v40 = vpop.f32.mrb[59].mxu1  ;;  %v3787_v41 = vpop.eup %3786  ;;  %2603 = vst [vmem:[%s4269_s7 + $0x1b0] sm:$0xff] %v3785_v38  ;;  %3812 = vtanh.f32 %v1497_v39 }
 0x171   : > { %v3789_v42 = vpop.eup %3788  ;;  %2731 = vst [vmem:[%s4269_s7 + $0x5b0] sm:$0xff] %v3787_v41  ;;  %3814 = vtanh.f32 %v2009_v40  ;;  %v3222_v46 = vpop.f32.mrb[60].mxu0 }
 0x172   : > { %v3791_v43 = vpop.eup %3790  ;;  %2601 = vst [vmem:[%s4269_s7 + $0x1a0] sm:$0xff] %v3789_v42  ;;  %v3350_v47 = vpop.f32.mrb[60].mxu1  ;;  %3816 = vtanh.f32 %v3222_v46 }
 0x173   : > { %v3793_v44 = vpop.eup %3792  ;;  %2729 = vst [vmem:[%s4269_s7 + $0x5a0] sm:$0xff] %v3791_v43  ;;  %v1510_v49 = vpop.f32.mrb[61].mxu0  ;;  %3818 = vtanh.f32 %v3350_v47 }
 0x174   : > { %v3795_v45 = vpop.eup %3794  ;;  %2604 = vst [vmem:[%s4269_s7 + $0x1b8] sm:$0xff] %v3793_v44  ;;  %v2022_v50 = vpop.f32.mrb[61].mxu1  ;;  %3820 = vtanh.f32 %v1510_v49 }
 0x175   : > { %v3797_v48 = vpop.eup %3796  ;;  %2732 = vst [vmem:[%s4269_s7 + $0x5b8] sm:$0xff] %v3795_v45  ;;  %v3223_v52 = vpop.f32.mrb[62].mxu0  ;;  %3822 = vtanh.f32 %v2022_v50 }
 0x176   : > { %v3799_v51 = vpop.eup %3798  ;;  %2602 = vst [vmem:[%s4269_s7 + $0x1a8] sm:$0xff] %v3797_v48  ;;  %v3351_v53 = vpop.f32.mrb[62].mxu1  ;;  %3824 = vtanh.f32 %v3223_v52 }
 0x177   : > { %v3801_v54 = vpop.eup %3800  ;;  %2730 = vst [vmem:[%s4269_s7 + $0x5a8] sm:$0xff] %v3799_v51  ;;  %v1513_v55 = vpop.f32.mrb[63].mxu0  ;;  %3826 = vtanh.f32 %v3351_v53 }
 0x178   : > { %v2025_v56 = vpop.f32.mrb[63].mxu1  ;;  %v3803_v57 = vpop.eup %3802  ;;  %2607 = vst [vmem:[%s4269_s7 + $0x1d0] sm:$0xff] %v3801_v54  ;;  %3828 = vtanh.f32 %v1513_v55 }
 0x179   : > { %v3805_v58 = vpop.eup %3804  ;;  %2735 = vst [vmem:[%s4269_s7 + $0x5d0] sm:$0xff] %v3803_v57  ;;  %3830 = vtanh.f32 %v2025_v56  ;;  %v3226_v62 = vpop.f32.mrb[64].mxu0 }
 0x17a   : > { %v3807_v59 = vpop.eup %3806  ;;  %2605 = vst [vmem:[%s4269_s7 + $0x1c0] sm:$0xff] %v3805_v58  ;;  %v3354_v63 = vpop.f32.mrb[64].mxu1  ;;  %3832 = vtanh.f32 %v3226_v62 }
 0x17b   : > { %v3809_v60 = vpop.eup %3808  ;;  %2733 = vst [vmem:[%s4269_s7 + $0x5c0] sm:$0xff] %v3807_v59  ;;  %v1526_v1 = vpop.f32.mrb[65].mxu0  ;;  %3834 = vtanh.f32 %v3354_v63 }
 0x17c   : > { %v3811_v61 = vpop.eup %3810  ;;  %2608 = vst [vmem:[%s4269_s7 + $0x1d8] sm:$0xff] %v3809_v60  ;;  %v2038_v2 = vpop.f32.mrb[65].mxu1  ;;  %3836 = vtanh.f32 %v1526_v1 }
 0x17d   : > { %v3813_v0 = vpop.eup %3812  ;;  %2736 = vst [vmem:[%s4269_s7 + $0x5d8] sm:$0xff] %v3811_v61  ;;  %v3227_v4 = vpop.f32.mrb[66].mxu0  ;;  %3838 = vtanh.f32 %v2038_v2 }
 0x17e   : > { %v3815_v3 = vpop.eup %3814  ;;  %2606 = vst [vmem:[%s4269_s7 + $0x1c8] sm:$0xff] %v3813_v0  ;;  %v3355_v5 = vpop.f32.mrb[66].mxu1  ;;  %3840 = vtanh.f32 %v3227_v4 }
 0x17f   : > { %v3817_v6 = vpop.eup %3816  ;;  %2734 = vst [vmem:[%s4269_s7 + $0x5c8] sm:$0xff] %v3815_v3  ;;  %v1529_v7 = vpop.f32.mrb[67].mxu0  ;;  %3842 = vtanh.f32 %v3355_v5 }
 0x180   : > { %v2041_v8 = vpop.f32.mrb[67].mxu1  ;;  %v3819_v9 = vpop.eup %3818  ;;  %2611 = vst [vmem:[%s4269_s7 + $0x1f0] sm:$0xff] %v3817_v6  ;;  %3844 = vtanh.f32 %v1529_v7 }
 0x181   : > { %v3821_v10 = vpop.eup %3820  ;;  %2739 = vst [vmem:[%s4269_s7 + $0x5f0] sm:$0xff] %v3819_v9  ;;  %3846 = vtanh.f32 %v2041_v8  ;;  %v3230_v14 = vpop.f32.mrb[68].mxu0 }
 0x182   : > { %v3823_v11 = vpop.eup %3822  ;;  %2609 = vst [vmem:[%s4269_s7 + $0x1e0] sm:$0xff] %v3821_v10  ;;  %v3358_v15 = vpop.f32.mrb[68].mxu1  ;;  %3848 = vtanh.f32 %v3230_v14 }
 0x183   : > { %v3825_v12 = vpop.eup %3824  ;;  %2737 = vst [vmem:[%s4269_s7 + $0x5e0] sm:$0xff] %v3823_v11  ;;  %v1542_v17 = vpop.f32.mrb[69].mxu0  ;;  %3850 = vtanh.f32 %v3358_v15 }
 0x184   : > { %v3827_v13 = vpop.eup %3826  ;;  %2612 = vst [vmem:[%s4269_s7 + $0x1f8] sm:$0xff] %v3825_v12  ;;  %v2054_v18 = vpop.f32.mrb[69].mxu1  ;;  %3852 = vtanh.f32 %v1542_v17 }
 0x185   : > { %v3829_v16 = vpop.eup %3828  ;;  %2740 = vst [vmem:[%s4269_s7 + $0x5f8] sm:$0xff] %v3827_v13  ;;  %v3231_v20 = vpop.f32.mrb[70].mxu0  ;;  %3854 = vtanh.f32 %v2054_v18 }
 0x186   : > { %v3831_v19 = vpop.eup %3830  ;;  %2610 = vst [vmem:[%s4269_s7 + $0x1e8] sm:$0xff] %v3829_v16  ;;  %v3359_v21 = vpop.f32.mrb[70].mxu1  ;;  %3856 = vtanh.f32 %v3231_v20 }
 0x187   : > { %v3833_v22 = vpop.eup %3832  ;;  %2738 = vst [vmem:[%s4269_s7 + $0x5e8] sm:$0xff] %v3831_v19  ;;  %v1545_v23 = vpop.f32.mrb[71].mxu0  ;;  %3858 = vtanh.f32 %v3359_v21 }
 0x188   : > { %v2057_v24 = vpop.f32.mrb[71].mxu1  ;;  %v3835_v25 = vpop.eup %3834  ;;  %2615 = vst [vmem:[%s4269_s7 + $0x210] sm:$0xff] %v3833_v22  ;;  %3860 = vtanh.f32 %v1545_v23 }
 0x189   : > { %v3837_v26 = vpop.eup %3836  ;;  %2743 = vst [vmem:[%s4269_s7 + $0x610] sm:$0xff] %v3835_v25  ;;  %3862 = vtanh.f32 %v2057_v24  ;;  %v3234_v30 = vpop.f32.mrb[72].mxu0 }
 0x18a   : > { %v3839_v27 = vpop.eup %3838  ;;  %2613 = vst [vmem:[%s4269_s7 + $0x200] sm:$0xff] %v3837_v26  ;;  %v3362_v31 = vpop.f32.mrb[72].mxu1  ;;  %3864 = vtanh.f32 %v3234_v30 }
 0x18b   : > { %v3841_v28 = vpop.eup %3840  ;;  %2741 = vst [vmem:[%s4269_s7 + $0x600] sm:$0xff] %v3839_v27  ;;  %v1558_v33 = vpop.f32.mrb[73].mxu0  ;;  %3866 = vtanh.f32 %v3362_v31 }
 0x18c   : > { %v3843_v29 = vpop.eup %3842  ;;  %2616 = vst [vmem:[%s4269_s7 + $0x218] sm:$0xff] %v3841_v28  ;;  %v2070_v34 = vpop.f32.mrb[73].mxu1  ;;  %3868 = vtanh.f32 %v1558_v33 }
 0x18d   : > { %v3845_v32 = vpop.eup %3844  ;;  %2744 = vst [vmem:[%s4269_s7 + $0x618] sm:$0xff] %v3843_v29  ;;  %v3235_v36 = vpop.f32.mrb[74].mxu0  ;;  %3870 = vtanh.f32 %v2070_v34 }
 0x18e   : > { %v3847_v35 = vpop.eup %3846  ;;  %2614 = vst [vmem:[%s4269_s7 + $0x208] sm:$0xff] %v3845_v32  ;;  %v3363_v37 = vpop.f32.mrb[74].mxu1  ;;  %3872 = vtanh.f32 %v3235_v36 }
 0x18f   : > { %v3849_v38 = vpop.eup %3848  ;;  %2742 = vst [vmem:[%s4269_s7 + $0x608] sm:$0xff] %v3847_v35  ;;  %v1561_v39 = vpop.f32.mrb[75].mxu0  ;;  %3874 = vtanh.f32 %v3363_v37 }
 0x190   : > { %v2073_v40 = vpop.f32.mrb[75].mxu1  ;;  %v3851_v41 = vpop.eup %3850  ;;  %2619 = vst [vmem:[%s4269_s7 + $0x230] sm:$0xff] %v3849_v38  ;;  %3876 = vtanh.f32 %v1561_v39 }
 0x191   : > { %v3853_v42 = vpop.eup %3852  ;;  %2747 = vst [vmem:[%s4269_s7 + $0x630] sm:$0xff] %v3851_v41  ;;  %3878 = vtanh.f32 %v2073_v40  ;;  %v3238_v46 = vpop.f32.mrb[76].mxu0 }
 0x192   : > { %v3855_v43 = vpop.eup %3854  ;;  %2617 = vst [vmem:[%s4269_s7 + $0x220] sm:$0xff] %v3853_v42  ;;  %v3366_v47 = vpop.f32.mrb[76].mxu1  ;;  %3880 = vtanh.f32 %v3238_v46 }
 0x193   : > { %v3857_v44 = vpop.eup %3856  ;;  %2745 = vst [vmem:[%s4269_s7 + $0x620] sm:$0xff] %v3855_v43  ;;  %v1574_v49 = vpop.f32.mrb[77].mxu0  ;;  %3882 = vtanh.f32 %v3366_v47 }
 0x194   : > { %v3859_v45 = vpop.eup %3858  ;;  %2620 = vst [vmem:[%s4269_s7 + $0x238] sm:$0xff] %v3857_v44  ;;  %v2086_v50 = vpop.f32.mrb[77].mxu1  ;;  %3884 = vtanh.f32 %v1574_v49 }
 0x195   : > { %v3861_v48 = vpop.eup %3860  ;;  %2748 = vst [vmem:[%s4269_s7 + $0x638] sm:$0xff] %v3859_v45  ;;  %v3239_v52 = vpop.f32.mrb[78].mxu0  ;;  %3886 = vtanh.f32 %v2086_v50 }
 0x196   : > { %v3863_v51 = vpop.eup %3862  ;;  %2618 = vst [vmem:[%s4269_s7 + $0x228] sm:$0xff] %v3861_v48  ;;  %v3367_v53 = vpop.f32.mrb[78].mxu1  ;;  %3888 = vtanh.f32 %v3239_v52 }
 0x197   : > { %v3865_v54 = vpop.eup %3864  ;;  %2746 = vst [vmem:[%s4269_s7 + $0x628] sm:$0xff] %v3863_v51  ;;  %v1577_v55 = vpop.f32.mrb[79].mxu0  ;;  %3890 = vtanh.f32 %v3367_v53 }
 0x198   : > { %v2089_v56 = vpop.f32.mrb[79].mxu1  ;;  %v3867_v57 = vpop.eup %3866  ;;  %2623 = vst [vmem:[%s4269_s7 + $0x250] sm:$0xff] %v3865_v54  ;;  %3892 = vtanh.f32 %v1577_v55 }
 0x199   : > { %v3869_v58 = vpop.eup %3868  ;;  %2751 = vst [vmem:[%s4269_s7 + $0x650] sm:$0xff] %v3867_v57  ;;  %3894 = vtanh.f32 %v2089_v56  ;;  %v3242_v62 = vpop.f32.mrb[80].mxu0 }
 0x19a   : > { %v3871_v59 = vpop.eup %3870  ;;  %2621 = vst [vmem:[%s4269_s7 + $0x240] sm:$0xff] %v3869_v58  ;;  %v3370_v63 = vpop.f32.mrb[80].mxu1  ;;  %3896 = vtanh.f32 %v3242_v62 }
 0x19b   : > { %v3873_v60 = vpop.eup %3872  ;;  %2749 = vst [vmem:[%s4269_s7 + $0x640] sm:$0xff] %v3871_v59  ;;  %v1590_v1 = vpop.f32.mrb[81].mxu0  ;;  %3898 = vtanh.f32 %v3370_v63 }
 0x19c   : > { %v3875_v61 = vpop.eup %3874  ;;  %2624 = vst [vmem:[%s4269_s7 + $0x258] sm:$0xff] %v3873_v60  ;;  %v2102_v2 = vpop.f32.mrb[81].mxu1  ;;  %3900 = vtanh.f32 %v1590_v1 }
 0x19d   : > { %v3877_v0 = vpop.eup %3876  ;;  %2752 = vst [vmem:[%s4269_s7 + $0x658] sm:$0xff] %v3875_v61  ;;  %v3243_v4 = vpop.f32.mrb[82].mxu0  ;;  %3902 = vtanh.f32 %v2102_v2 }
 0x19e   : > { %v3879_v3 = vpop.eup %3878  ;;  %2622 = vst [vmem:[%s4269_s7 + $0x248] sm:$0xff] %v3877_v0  ;;  %v3371_v5 = vpop.f32.mrb[82].mxu1  ;;  %3904 = vtanh.f32 %v3243_v4 }
 0x19f   : > { %v3881_v6 = vpop.eup %3880  ;;  %2750 = vst [vmem:[%s4269_s7 + $0x648] sm:$0xff] %v3879_v3  ;;  %v1593_v7 = vpop.f32.mrb[83].mxu0  ;;  %3906 = vtanh.f32 %v3371_v5 }
 0x1a0   : > { %v2105_v8 = vpop.f32.mrb[83].mxu1  ;;  %v3883_v9 = vpop.eup %3882  ;;  %2627 = vst [vmem:[%s4269_s7 + $0x270] sm:$0xff] %v3881_v6  ;;  %3908 = vtanh.f32 %v1593_v7 }
 0x1a1   : > { %v3885_v10 = vpop.eup %3884  ;;  %2755 = vst [vmem:[%s4269_s7 + $0x670] sm:$0xff] %v3883_v9  ;;  %3910 = vtanh.f32 %v2105_v8  ;;  %v3246_v14 = vpop.f32.mrb[84].mxu0 }
 0x1a2   : > { %v3887_v11 = vpop.eup %3886  ;;  %2625 = vst [vmem:[%s4269_s7 + $0x260] sm:$0xff] %v3885_v10  ;;  %v3374_v15 = vpop.f32.mrb[84].mxu1  ;;  %3912 = vtanh.f32 %v3246_v14 }
 0x1a3   : > { %v3889_v12 = vpop.eup %3888  ;;  %2753 = vst [vmem:[%s4269_s7 + $0x660] sm:$0xff] %v3887_v11  ;;  %v1606_v17 = vpop.f32.mrb[85].mxu0  ;;  %3914 = vtanh.f32 %v3374_v15 }
 0x1a4   : > { %v3891_v13 = vpop.eup %3890  ;;  %2628 = vst [vmem:[%s4269_s7 + $0x278] sm:$0xff] %v3889_v12  ;;  %v2118_v18 = vpop.f32.mrb[85].mxu1  ;;  %3916 = vtanh.f32 %v1606_v17 }
 0x1a5   : > { %v3893_v16 = vpop.eup %3892  ;;  %2756 = vst [vmem:[%s4269_s7 + $0x678] sm:$0xff] %v3891_v13  ;;  %v3247_v20 = vpop.f32.mrb[86].mxu0  ;;  %3918 = vtanh.f32 %v2118_v18 }
 0x1a6   : > { %v3895_v19 = vpop.eup %3894  ;;  %2626 = vst [vmem:[%s4269_s7 + $0x268] sm:$0xff] %v3893_v16  ;;  %v3375_v21 = vpop.f32.mrb[86].mxu1  ;;  %3920 = vtanh.f32 %v3247_v20 }
 0x1a7   : > { %v3897_v22 = vpop.eup %3896  ;;  %2754 = vst [vmem:[%s4269_s7 + $0x668] sm:$0xff] %v3895_v19  ;;  %v1609_v23 = vpop.f32.mrb[87].mxu0  ;;  %3922 = vtanh.f32 %v3375_v21 }
 0x1a8   : > { %v2121_v24 = vpop.f32.mrb[87].mxu1  ;;  %v3899_v25 = vpop.eup %3898  ;;  %2631 = vst [vmem:[%s4269_s7 + $0x290] sm:$0xff] %v3897_v22  ;;  %3924 = vtanh.f32 %v1609_v23 }
 0x1a9   : > { %v3901_v26 = vpop.eup %3900  ;;  %2759 = vst [vmem:[%s4269_s7 + $0x690] sm:$0xff] %v3899_v25  ;;  %3926 = vtanh.f32 %v2121_v24  ;;  %v3250_v30 = vpop.f32.mrb[88].mxu0 }
 0x1aa   : > { %v3903_v27 = vpop.eup %3902  ;;  %2629 = vst [vmem:[%s4269_s7 + $0x280] sm:$0xff] %v3901_v26  ;;  %v3378_v31 = vpop.f32.mrb[88].mxu1  ;;  %3928 = vtanh.f32 %v3250_v30 }
 0x1ab   : > { %v3905_v28 = vpop.eup %3904  ;;  %2757 = vst [vmem:[%s4269_s7 + $0x680] sm:$0xff] %v3903_v27  ;;  %v1622_v33 = vpop.f32.mrb[89].mxu0  ;;  %3930 = vtanh.f32 %v3378_v31 }
 0x1ac   : > { %v3907_v29 = vpop.eup %3906  ;;  %2632 = vst [vmem:[%s4269_s7 + $0x298] sm:$0xff] %v3905_v28  ;;  %v2134_v34 = vpop.f32.mrb[89].mxu1  ;;  %3932 = vtanh.f32 %v1622_v33 }
 0x1ad   : > { %v3909_v32 = vpop.eup %3908  ;;  %2760 = vst [vmem:[%s4269_s7 + $0x698] sm:$0xff] %v3907_v29  ;;  %v3251_v36 = vpop.f32.mrb[90].mxu0  ;;  %3934 = vtanh.f32 %v2134_v34 }
 0x1ae   : > { %v3911_v35 = vpop.eup %3910  ;;  %2630 = vst [vmem:[%s4269_s7 + $0x288] sm:$0xff] %v3909_v32  ;;  %v3379_v37 = vpop.f32.mrb[90].mxu1  ;;  %3936 = vtanh.f32 %v3251_v36 }
 0x1af   : > { %v3913_v38 = vpop.eup %3912  ;;  %2758 = vst [vmem:[%s4269_s7 + $0x688] sm:$0xff] %v3911_v35  ;;  %v1625_v39 = vpop.f32.mrb[91].mxu0  ;;  %3938 = vtanh.f32 %v3379_v37 }
 0x1b0   : > { %v2137_v40 = vpop.f32.mrb[91].mxu1  ;;  %v3915_v41 = vpop.eup %3914  ;;  %2635 = vst [vmem:[%s4269_s7 + $0x2b0] sm:$0xff] %v3913_v38  ;;  %3940 = vtanh.f32 %v1625_v39 }
 0x1b1   : > { %v3917_v42 = vpop.eup %3916  ;;  %2763 = vst [vmem:[%s4269_s7 + $0x6b0] sm:$0xff] %v3915_v41  ;;  %3942 = vtanh.f32 %v2137_v40  ;;  %v3254_v46 = vpop.f32.mrb[92].mxu0 }
 0x1b2   : > { %v3919_v43 = vpop.eup %3918  ;;  %2633 = vst [vmem:[%s4269_s7 + $0x2a0] sm:$0xff] %v3917_v42  ;;  %v3382_v47 = vpop.f32.mrb[92].mxu1  ;;  %3944 = vtanh.f32 %v3254_v46 }
 0x1b3   : > { %v3921_v44 = vpop.eup %3920  ;;  %2761 = vst [vmem:[%s4269_s7 + $0x6a0] sm:$0xff] %v3919_v43  ;;  %v1638_v49 = vpop.f32.mrb[93].mxu0  ;;  %3946 = vtanh.f32 %v3382_v47 }
 0x1b4   : > { %v3923_v45 = vpop.eup %3922  ;;  %2636 = vst [vmem:[%s4269_s7 + $0x2b8] sm:$0xff] %v3921_v44  ;;  %v2150_v50 = vpop.f32.mrb[93].mxu1  ;;  %3948 = vtanh.f32 %v1638_v49 }
 0x1b5   : > { %v3925_v48 = vpop.eup %3924  ;;  %2764 = vst [vmem:[%s4269_s7 + $0x6b8] sm:$0xff] %v3923_v45  ;;  %v3255_v52 = vpop.f32.mrb[94].mxu0  ;;  %3950 = vtanh.f32 %v2150_v50 }
 0x1b6   : > { %v3927_v51 = vpop.eup %3926  ;;  %2634 = vst [vmem:[%s4269_s7 + $0x2a8] sm:$0xff] %v3925_v48  ;;  %v3383_v53 = vpop.f32.mrb[94].mxu1  ;;  %3952 = vtanh.f32 %v3255_v52 }
 0x1b7   : > { %v3929_v54 = vpop.eup %3928  ;;  %2762 = vst [vmem:[%s4269_s7 + $0x6a8] sm:$0xff] %v3927_v51  ;;  %v1641_v55 = vpop.f32.mrb[95].mxu0  ;;  %3954 = vtanh.f32 %v3383_v53 }
 0x1b8   : > { %v2153_v56 = vpop.f32.mrb[95].mxu1  ;;  %v3931_v57 = vpop.eup %3930  ;;  %2639 = vst [vmem:[%s4269_s7 + $0x2d0] sm:$0xff] %v3929_v54  ;;  %3956 = vtanh.f32 %v1641_v55 }
 0x1b9   : > { %v3933_v58 = vpop.eup %3932  ;;  %2767 = vst [vmem:[%s4269_s7 + $0x6d0] sm:$0xff] %v3931_v57  ;;  %3958 = vtanh.f32 %v2153_v56  ;;  %v3258_v62 = vpop.f32.mrb[96].mxu0 }
 0x1ba   : > { %v3935_v59 = vpop.eup %3934  ;;  %2637 = vst [vmem:[%s4269_s7 + $0x2c0] sm:$0xff] %v3933_v58  ;;  %v3386_v63 = vpop.f32.mrb[96].mxu1  ;;  %3960 = vtanh.f32 %v3258_v62 }
 0x1bb   : > { %v3937_v60 = vpop.eup %3936  ;;  %2765 = vst [vmem:[%s4269_s7 + $0x6c0] sm:$0xff] %v3935_v59  ;;  %v1654_v1 = vpop.f32.mrb[97].mxu0  ;;  %3962 = vtanh.f32 %v3386_v63 }
 0x1bc   : > { %v3939_v61 = vpop.eup %3938  ;;  %2640 = vst [vmem:[%s4269_s7 + $0x2d8] sm:$0xff] %v3937_v60  ;;  %v2166_v2 = vpop.f32.mrb[97].mxu1  ;;  %3964 = vtanh.f32 %v1654_v1 }
 0x1bd   : > { %v3941_v0 = vpop.eup %3940  ;;  %2768 = vst [vmem:[%s4269_s7 + $0x6d8] sm:$0xff] %v3939_v61  ;;  %v3259_v4 = vpop.f32.mrb[98].mxu0  ;;  %3966 = vtanh.f32 %v2166_v2 }
 0x1be   : > { %v3943_v3 = vpop.eup %3942  ;;  %2638 = vst [vmem:[%s4269_s7 + $0x2c8] sm:$0xff] %v3941_v0  ;;  %v3387_v5 = vpop.f32.mrb[98].mxu1  ;;  %3968 = vtanh.f32 %v3259_v4 }
 0x1bf   : > { %v3945_v6 = vpop.eup %3944  ;;  %2766 = vst [vmem:[%s4269_s7 + $0x6c8] sm:$0xff] %v3943_v3  ;;  %v1657_v7 = vpop.f32.mrb[99].mxu0  ;;  %3970 = vtanh.f32 %v3387_v5 }
 0x1c0   : > { %v2169_v8 = vpop.f32.mrb[99].mxu1  ;;  %v3947_v9 = vpop.eup %3946  ;;  %2643 = vst [vmem:[%s4269_s7 + $0x2f0] sm:$0xff] %v3945_v6  ;;  %3972 = vtanh.f32 %v1657_v7 }
 0x1c1   : > { %v3949_v10 = vpop.eup %3948  ;;  %2771 = vst [vmem:[%s4269_s7 + $0x6f0] sm:$0xff] %v3947_v9  ;;  %3974 = vtanh.f32 %v2169_v8  ;;  %v3262_v14 = vpop.f32.mrb[100].mxu0 }
 0x1c2   : > { %v3951_v11 = vpop.eup %3950  ;;  %2641 = vst [vmem:[%s4269_s7 + $0x2e0] sm:$0xff] %v3949_v10  ;;  %v3390_v15 = vpop.f32.mrb[100].mxu1  ;;  %3976 = vtanh.f32 %v3262_v14 }
 0x1c3   : > { %v3953_v12 = vpop.eup %3952  ;;  %2769 = vst [vmem:[%s4269_s7 + $0x6e0] sm:$0xff] %v3951_v11  ;;  %v1670_v17 = vpop.f32.mrb[101].mxu0  ;;  %3978 = vtanh.f32 %v3390_v15 }
 0x1c4   : > { %v3955_v13 = vpop.eup %3954  ;;  %2644 = vst [vmem:[%s4269_s7 + $0x2f8] sm:$0xff] %v3953_v12  ;;  %v2182_v18 = vpop.f32.mrb[101].mxu1  ;;  %3980 = vtanh.f32 %v1670_v17 }
 0x1c5   : > { %v3957_v16 = vpop.eup %3956  ;;  %2772 = vst [vmem:[%s4269_s7 + $0x6f8] sm:$0xff] %v3955_v13  ;;  %v3263_v20 = vpop.f32.mrb[102].mxu0  ;;  %3982 = vtanh.f32 %v2182_v18 }
 0x1c6   : > { %v3959_v19 = vpop.eup %3958  ;;  %2642 = vst [vmem:[%s4269_s7 + $0x2e8] sm:$0xff] %v3957_v16  ;;  %v3391_v21 = vpop.f32.mrb[102].mxu1  ;;  %3984 = vtanh.f32 %v3263_v20 }
 0x1c7   : > { %v3961_v22 = vpop.eup %3960  ;;  %2770 = vst [vmem:[%s4269_s7 + $0x6e8] sm:$0xff] %v3959_v19  ;;  %v1673_v23 = vpop.f32.mrb[103].mxu0  ;;  %3986 = vtanh.f32 %v3391_v21 }
 0x1c8   : > { %v2185_v24 = vpop.f32.mrb[103].mxu1  ;;  %v3963_v25 = vpop.eup %3962  ;;  %2647 = vst [vmem:[%s4269_s7 + $0x310] sm:$0xff] %v3961_v22  ;;  %3988 = vtanh.f32 %v1673_v23 }
 0x1c9   : > { %v3965_v26 = vpop.eup %3964  ;;  %2775 = vst [vmem:[%s4269_s7 + $0x710] sm:$0xff] %v3963_v25  ;;  %3990 = vtanh.f32 %v2185_v24  ;;  %v3266_v30 = vpop.f32.mrb[104].mxu0 }
 0x1ca   : > { %v3967_v27 = vpop.eup %3966  ;;  %2645 = vst [vmem:[%s4269_s7 + $0x300] sm:$0xff] %v3965_v26  ;;  %v3394_v31 = vpop.f32.mrb[104].mxu1  ;;  %3992 = vtanh.f32 %v3266_v30 }
 0x1cb   : > { %v3969_v28 = vpop.eup %3968  ;;  %2773 = vst [vmem:[%s4269_s7 + $0x700] sm:$0xff] %v3967_v27  ;;  %v1686_v33 = vpop.f32.mrb[105].mxu0  ;;  %3994 = vtanh.f32 %v3394_v31 }
 0x1cc   : > { %v3971_v29 = vpop.eup %3970  ;;  %2648 = vst [vmem:[%s4269_s7 + $0x318] sm:$0xff] %v3969_v28  ;;  %v2198_v34 = vpop.f32.mrb[105].mxu1  ;;  %3996 = vtanh.f32 %v1686_v33 }
 0x1cd   : > { %v3973_v32 = vpop.eup %3972  ;;  %2776 = vst [vmem:[%s4269_s7 + $0x718] sm:$0xff] %v3971_v29  ;;  %v3267_v36 = vpop.f32.mrb[106].mxu0  ;;  %3998 = vtanh.f32 %v2198_v34 }
 0x1ce   : > { %v3975_v35 = vpop.eup %3974  ;;  %2646 = vst [vmem:[%s4269_s7 + $0x308] sm:$0xff] %v3973_v32  ;;  %v3395_v37 = vpop.f32.mrb[106].mxu1  ;;  %4000 = vtanh.f32 %v3267_v36 }
 0x1cf   : > { %v3977_v38 = vpop.eup %3976  ;;  %2774 = vst [vmem:[%s4269_s7 + $0x708] sm:$0xff] %v3975_v35  ;;  %v1689_v39 = vpop.f32.mrb[107].mxu0  ;;  %4002 = vtanh.f32 %v3395_v37 }
 0x1d0   : > { %v2201_v40 = vpop.f32.mrb[107].mxu1  ;;  %v3979_v41 = vpop.eup %3978  ;;  %2651 = vst [vmem:[%s4269_s7 + $0x330] sm:$0xff] %v3977_v38  ;;  %4004 = vtanh.f32 %v1689_v39 }
 0x1d1   : > { %v3981_v42 = vpop.eup %3980  ;;  %2779 = vst [vmem:[%s4269_s7 + $0x730] sm:$0xff] %v3979_v41  ;;  %4006 = vtanh.f32 %v2201_v40  ;;  %v3270_v46 = vpop.f32.mrb[108].mxu0 }
 0x1d2   : > { %v3983_v43 = vpop.eup %3982  ;;  %2649 = vst [vmem:[%s4269_s7 + $0x320] sm:$0xff] %v3981_v42  ;;  %v3398_v47 = vpop.f32.mrb[108].mxu1  ;;  %4008 = vtanh.f32 %v3270_v46 }
 0x1d3   : > { %v3985_v44 = vpop.eup %3984  ;;  %2777 = vst [vmem:[%s4269_s7 + $0x720] sm:$0xff] %v3983_v43  ;;  %v1702_v49 = vpop.f32.mrb[109].mxu0  ;;  %4010 = vtanh.f32 %v3398_v47 }
 0x1d4   : > { %v3987_v45 = vpop.eup %3986  ;;  %2652 = vst [vmem:[%s4269_s7 + $0x338] sm:$0xff] %v3985_v44  ;;  %v2214_v50 = vpop.f32.mrb[109].mxu1  ;;  %4012 = vtanh.f32 %v1702_v49 }
 0x1d5   : > { %v3989_v48 = vpop.eup %3988  ;;  %2780 = vst [vmem:[%s4269_s7 + $0x738] sm:$0xff] %v3987_v45  ;;  %v3271_v52 = vpop.f32.mrb[110].mxu0  ;;  %4014 = vtanh.f32 %v2214_v50 }
 0x1d6   : > { %v3991_v51 = vpop.eup %3990  ;;  %2650 = vst [vmem:[%s4269_s7 + $0x328] sm:$0xff] %v3989_v48  ;;  %v3399_v53 = vpop.f32.mrb[110].mxu1  ;;  %4016 = vtanh.f32 %v3271_v52 }
 0x1d7   : > { %v3993_v54 = vpop.eup %3992  ;;  %2778 = vst [vmem:[%s4269_s7 + $0x728] sm:$0xff] %v3991_v51  ;;  %v1705_v55 = vpop.f32.mrb[111].mxu0  ;;  %4018 = vtanh.f32 %v3399_v53 }
 0x1d8   : > { %v2217_v56 = vpop.f32.mrb[111].mxu1  ;;  %v3995_v57 = vpop.eup %3994  ;;  %2655 = vst [vmem:[%s4269_s7 + $0x350] sm:$0xff] %v3993_v54  ;;  %4020 = vtanh.f32 %v1705_v55 }
 0x1d9   : > { %v3997_v58 = vpop.eup %3996  ;;  %2783 = vst [vmem:[%s4269_s7 + $0x750] sm:$0xff] %v3995_v57  ;;  %4022 = vtanh.f32 %v2217_v56  ;;  %v3274_v62 = vpop.f32.mrb[112].mxu0 }
 0x1da   : > { %v3999_v59 = vpop.eup %3998  ;;  %2653 = vst [vmem:[%s4269_s7 + $0x340] sm:$0xff] %v3997_v58  ;;  %v3402_v63 = vpop.f32.mrb[112].mxu1  ;;  %4024 = vtanh.f32 %v3274_v62 }
 0x1db   : > { %v4001_v60 = vpop.eup %4000  ;;  %2781 = vst [vmem:[%s4269_s7 + $0x740] sm:$0xff] %v3999_v59  ;;  %v1718_v1 = vpop.f32.mrb[113].mxu0  ;;  %4026 = vtanh.f32 %v3402_v63 }
 0x1dc   : > { %v4003_v61 = vpop.eup %4002  ;;  %2656 = vst [vmem:[%s4269_s7 + $0x358] sm:$0xff] %v4001_v60  ;;  %v2230_v2 = vpop.f32.mrb[113].mxu1  ;;  %4028 = vtanh.f32 %v1718_v1 }
 0x1dd   : > { %v4005_v0 = vpop.eup %4004  ;;  %2784 = vst [vmem:[%s4269_s7 + $0x758] sm:$0xff] %v4003_v61  ;;  %v3275_v4 = vpop.f32.mrb[114].mxu0  ;;  %4030 = vtanh.f32 %v2230_v2 }
 0x1de   : > { %v4007_v3 = vpop.eup %4006  ;;  %2654 = vst [vmem:[%s4269_s7 + $0x348] sm:$0xff] %v4005_v0  ;;  %v3403_v5 = vpop.f32.mrb[114].mxu1  ;;  %4032 = vtanh.f32 %v3275_v4 }
 0x1df   : > { %v4009_v6 = vpop.eup %4008  ;;  %2782 = vst [vmem:[%s4269_s7 + $0x748] sm:$0xff] %v4007_v3  ;;  %v1721_v7 = vpop.f32.mrb[115].mxu0  ;;  %4034 = vtanh.f32 %v3403_v5 }
 0x1e0   : > { %v2233_v8 = vpop.f32.mrb[115].mxu1  ;;  %v4011_v9 = vpop.eup %4010  ;;  %2659 = vst [vmem:[%s4269_s7 + $0x370] sm:$0xff] %v4009_v6  ;;  %4036 = vtanh.f32 %v1721_v7 }
 0x1e1   : > { %v4013_v10 = vpop.eup %4012  ;;  %2787 = vst [vmem:[%s4269_s7 + $0x770] sm:$0xff] %v4011_v9  ;;  %4038 = vtanh.f32 %v2233_v8  ;;  %v3278_v14 = vpop.f32.mrb[116].mxu0 }
 0x1e2   : > { %v4015_v11 = vpop.eup %4014  ;;  %2657 = vst [vmem:[%s4269_s7 + $0x360] sm:$0xff] %v4013_v10  ;;  %v3406_v15 = vpop.f32.mrb[116].mxu1  ;;  %4040 = vtanh.f32 %v3278_v14 }
 0x1e3   : > { %v4017_v12 = vpop.eup %4016  ;;  %2785 = vst [vmem:[%s4269_s7 + $0x760] sm:$0xff] %v4015_v11  ;;  %v1734_v17 = vpop.f32.mrb[117].mxu0  ;;  %4042 = vtanh.f32 %v3406_v15 }
 0x1e4   : > { %v4019_v13 = vpop.eup %4018  ;;  %2660 = vst [vmem:[%s4269_s7 + $0x378] sm:$0xff] %v4017_v12  ;;  %v2246_v18 = vpop.f32.mrb[117].mxu1  ;;  %4044 = vtanh.f32 %v1734_v17 }
 0x1e5   : > { %v4021_v16 = vpop.eup %4020  ;;  %2788 = vst [vmem:[%s4269_s7 + $0x778] sm:$0xff] %v4019_v13  ;;  %v3279_v20 = vpop.f32.mrb[118].mxu0  ;;  %4046 = vtanh.f32 %v2246_v18 }
 0x1e6   : > { %v4023_v19 = vpop.eup %4022  ;;  %2658 = vst [vmem:[%s4269_s7 + $0x368] sm:$0xff] %v4021_v16  ;;  %v3407_v21 = vpop.f32.mrb[118].mxu1  ;;  %4048 = vtanh.f32 %v3279_v20 }
 0x1e7   : > { %v4025_v22 = vpop.eup %4024  ;;  %2786 = vst [vmem:[%s4269_s7 + $0x768] sm:$0xff] %v4023_v19  ;;  %v1737_v23 = vpop.f32.mrb[119].mxu0  ;;  %4050 = vtanh.f32 %v3407_v21 }
 0x1e8   : > { %v2249_v24 = vpop.f32.mrb[119].mxu1  ;;  %v4027_v25 = vpop.eup %4026  ;;  %2663 = vst [vmem:[%s4269_s7 + $0x390] sm:$0xff] %v4025_v22  ;;  %4052 = vtanh.f32 %v1737_v23 }
 0x1e9   : > { %v4029_v26 = vpop.eup %4028  ;;  %2791 = vst [vmem:[%s4269_s7 + $0x790] sm:$0xff] %v4027_v25  ;;  %4054 = vtanh.f32 %v2249_v24  ;;  %v3282_v30 = vpop.f32.mrb[120].mxu0 }
 0x1ea   : > { %v4031_v27 = vpop.eup %4030  ;;  %2661 = vst [vmem:[%s4269_s7 + $0x380] sm:$0xff] %v4029_v26  ;;  %v3410_v31 = vpop.f32.mrb[120].mxu1  ;;  %4056 = vtanh.f32 %v3282_v30 }
 0x1eb   : > { %v4033_v28 = vpop.eup %4032  ;;  %2789 = vst [vmem:[%s4269_s7 + $0x780] sm:$0xff] %v4031_v27  ;;  %v1750_v33 = vpop.f32.mrb[121].mxu0  ;;  %4058 = vtanh.f32 %v3410_v31 }
 0x1ec   : > { %v4035_v29 = vpop.eup %4034  ;;  %2664 = vst [vmem:[%s4269_s7 + $0x398] sm:$0xff] %v4033_v28  ;;  %v2262_v34 = vpop.f32.mrb[121].mxu1  ;;  %4060 = vtanh.f32 %v1750_v33 }
 0x1ed   : > { %v4037_v32 = vpop.eup %4036  ;;  %2792 = vst [vmem:[%s4269_s7 + $0x798] sm:$0xff] %v4035_v29  ;;  %v3283_v36 = vpop.f32.mrb[122].mxu0  ;;  %4062 = vtanh.f32 %v2262_v34 }
 0x1ee   : > { %v4039_v35 = vpop.eup %4038  ;;  %2662 = vst [vmem:[%s4269_s7 + $0x388] sm:$0xff] %v4037_v32  ;;  %v3411_v37 = vpop.f32.mrb[122].mxu1  ;;  %4064 = vtanh.f32 %v3283_v36 }
 0x1ef   : > { %v4041_v38 = vpop.eup %4040  ;;  %2790 = vst [vmem:[%s4269_s7 + $0x788] sm:$0xff] %v4039_v35  ;;  %v1753_v39 = vpop.f32.mrb[123].mxu0  ;;  %4066 = vtanh.f32 %v3411_v37 }
 0x1f0   : > { %v2265_v40 = vpop.f32.mrb[123].mxu1  ;;  %v4043_v41 = vpop.eup %4042  ;;  %2667 = vst [vmem:[%s4269_s7 + $0x3b0] sm:$0xff] %v4041_v38  ;;  %4068 = vtanh.f32 %v1753_v39 }
 0x1f1   : > { %v4045_v42 = vpop.eup %4044  ;;  %2795 = vst [vmem:[%s4269_s7 + $0x7b0] sm:$0xff] %v4043_v41  ;;  %4070 = vtanh.f32 %v2265_v40  ;;  %v3286_v46 = vpop.f32.mrb[124].mxu0 }
 0x1f2   : > { %v4047_v43 = vpop.eup %4046  ;;  %2665 = vst [vmem:[%s4269_s7 + $0x3a0] sm:$0xff] %v4045_v42  ;;  %v3414_v47 = vpop.f32.mrb[124].mxu1  ;;  %4072 = vtanh.f32 %v3286_v46 }
 0x1f3   : > { %v4049_v44 = vpop.eup %4048  ;;  %2793 = vst [vmem:[%s4269_s7 + $0x7a0] sm:$0xff] %v4047_v43  ;;  %v1766_v49 = vpop.f32.mrb[125].mxu0  ;;  %4074 = vtanh.f32 %v3414_v47 }
 0x1f4   : > { %v4051_v45 = vpop.eup %4050  ;;  %2668 = vst [vmem:[%s4269_s7 + $0x3b8] sm:$0xff] %v4049_v44  ;;  %v2278_v50 = vpop.f32.mrb[125].mxu1  ;;  %4076 = vtanh.f32 %v1766_v49 }
 0x1f5   : > { %v4053_v48 = vpop.eup %4052  ;;  %2796 = vst [vmem:[%s4269_s7 + $0x7b8] sm:$0xff] %v4051_v45  ;;  %v3287_v52 = vpop.f32.mrb[126].mxu0  ;;  %4078 = vtanh.f32 %v2278_v50 }
 0x1f6   : > { %v4055_v51 = vpop.eup %4054  ;;  %2666 = vst [vmem:[%s4269_s7 + $0x3a8] sm:$0xff] %v4053_v48  ;;  %v3415_v53 = vpop.f32.mrb[126].mxu1  ;;  %4080 = vtanh.f32 %v3287_v52 }
 0x1f7   : > { %v4057_v54 = vpop.eup %4056  ;;  %2794 = vst [vmem:[%s4269_s7 + $0x7a8] sm:$0xff] %v4055_v51  ;;  %v1769_v55 = vpop.f32.mrb[127].mxu0  ;;  %4082 = vtanh.f32 %v3415_v53 }
 0x1f8   : > { %v2281_v56 = vpop.f32.mrb[127].mxu1  ;;  %v4059_v57 = vpop.eup %4058  ;;  %2671 = vst [vmem:[%s4269_s7 + $0x3d0] sm:$0xff] %v4057_v54  ;;  %4084 = vtanh.f32 %v1769_v55 }
 0x1f9   : > { %v4061_v58 = vpop.eup %4060  ;;  %2799 = vst [vmem:[%s4269_s7 + $0x7d0] sm:$0xff] %v4059_v57  ;;  %4086 = vtanh.f32 %v2281_v56 }
 0x1fa   : > { %v4063_v59 = vpop.eup %4062  ;;  %2669 = vst [vmem:[%s4269_s7 + $0x3c0] sm:$0xff] %v4061_v58 }
 0x1fb   : > { %v4065_v60 = vpop.eup %4064  ;;  %2797 = vst [vmem:[%s4269_s7 + $0x7c0] sm:$0xff] %v4063_v59 }
 0x1fc   : > { %v4067_v61 = vpop.eup %4066  ;;  %2672 = vst [vmem:[%s4269_s7 + $0x3d8] sm:$0xff] %v4065_v60 }
 0x1fd   : > { %v4069_v62 = vpop.eup %4068  ;;  %2800 = vst [vmem:[%s4269_s7 + $0x7d8] sm:$0xff] %v4067_v61 }
 0x1fe   : > { %v4071_v63 = vpop.eup %4070  ;;  %2670 = vst [vmem:[%s4269_s7 + $0x3c8] sm:$0xff] %v4069_v62 }
 0x1ff   : > { %v4073_v0 = vpop.eup %4072  ;;  %2798 = vst [vmem:[%s4269_s7 + $0x7c8] sm:$0xff] %v4071_v63 }
 0x200   : > { %v4075_v1 = vpop.eup %4074  ;;  %2675 = vst [vmem:[%s4269_s7 + $0x3f0] sm:$0xff] %v4073_v0 }
 0x201   : > { %v4077_v2 = vpop.eup %4076  ;;  %2803 = vst [vmem:[%s4269_s7 + $0x7f0] sm:$0xff] %v4075_v1 }
 0x202   : > { %v4079_v3 = vpop.eup %4078  ;;  %2673 = vst [vmem:[%s4269_s7 + $0x3e0] sm:$0xff] %v4077_v2 }
 0x203   : > { %v4081_v4 = vpop.eup %4080  ;;  %2801 = vst [vmem:[%s4269_s7 + $0x7e0] sm:$0xff] %v4079_v3 }
 0x204   : > { %v4083_v5 = vpop.eup %4082  ;;  %2676 = vst [vmem:[%s4269_s7 + $0x3f8] sm:$0xff] %v4081_v4 }
 0x205   : > { %v4085_v6 = vpop.eup %4084  ;;  %2804 = vst [vmem:[%s4269_s7 + $0x7f8] sm:$0xff] %v4083_v5 }
 0x206   : > { %v4087_v7 = vpop.eup %4086  ;;  %2674 = vst [vmem:[%s4269_s7 + $0x3e8] sm:$0xff] %v4085_v6 }
 0x207   : > { %2802 = vst [vmem:[%s4269_s7 + $0x7e8] sm:$0xff] %v4087_v7 }
 0x208 PF: > { %s12_s9 = sadd.s32 1, %s4094_s9  }
 0x209   : > { %p9_p4 = scmp.ge.s32.totalorder %s12_s9, 6  }
 0x20b   :  { %11 = sbr.rel (!%p9_p4) target bundleno = 1 (0x1), region = 58 }

</bundles_post_ra>
